<compile_context>
chip_gen: v7x
topology: tpu7x:2x2x1
jax: 0.10.0
libtpu: 0.0.40
codegen_flags: <defaults>
</compile_context>

<pallas_src>
import functools

import jax
import jax.numpy as jnp
from jax import lax
from jax.experimental import pallas as pl
from jax.experimental.pallas import tpu as pltpu

_VMEM_LIMIT = 32 * 1024 * 1024    # scoped-VMEM cap, safe on v5e/v6e/v7x
_VMEM_BUDGET = 20 * 1024 * 1024   # target working set (headroom under the cap)


def _round_up(x: int, m: int) -> int:
    return ((x + m - 1) // m) * m


def _apply_act(x, act):
    if act == "leaky":
        return jnp.where(x > 0, x, 0.2 * x)
    if act == "sigmoid":
        return jax.nn.sigmoid(x)
    return x


# ----------------------------- Pallas kernels --------------------------------

def _mm_single_kernel(a_ref, w_ref, b_ref, o_ref, *, act):
    """Single K-step fast path: o = act(a @ w + b), written once (no RMW)."""
    acc = jnp.dot(a_ref[...], w_ref[...], preferred_element_type=jnp.float32)
    o_ref[...] = _apply_act(acc + b_ref[...], act).astype(o_ref.dtype)


def _mm_multi_kernel(a_ref, w_ref, b_ref, o_ref, acc_ref, *, act):
    """Multi K-step fallback: f32 scratch accumulator, bias+act in epilogue."""
    k = pl.program_id(2)

    @pl.when(k == 0)
    def _():
        acc_ref[...] = jnp.zeros_like(acc_ref)

    acc_ref[...] += jnp.dot(a_ref[...], w_ref[...],
                            preferred_element_type=jnp.float32)

    @pl.when(k == pl.num_programs(2) - 1)
    def _():
        o_ref[...] = _apply_act(acc_ref[...] + b_ref[...], act).astype(o_ref.dtype)


def _matvec_sigmoid_kernel(a_ref, w_ref, b_ref, o_ref):
    """Final Conv(512->1): VPU multiply + cross-lane reduce; true N=1, no MXU."""
    prod = a_ref[...].astype(jnp.float32) * w_ref[...].astype(jnp.float32)
    o_ref[...] = jax.nn.sigmoid(jnp.sum(prod, axis=-1, keepdims=True) + b_ref[...])


# ----------------------------- kernel wrappers --------------------------------

def _pick_tiles(M, Kp, Np, out_itemsize):
    if M <= 512:
        TM = max(16, _round_up(M, 16))     # bf16 sublane tile
        Mp = TM
    else:
        TM = 512
        Mp = _round_up(M, TM)
    TN = 256 if Np % 256 == 0 else 128
    TN = min(TN, Np)

    def working_set(tk, multi):
        ws = 2 * (TM * tk + tk * TN) * 2       # bf16 A + W, double-buffered
        ws += 2 * TN * 4                       # bias
        ws += 2 * TM * TN * out_itemsize       # output block
        if multi:
            ws += TM * TN * 4                  # f32 scratch accumulator
        return ws

    if working_set(Kp, False) <= _VMEM_BUDGET:
        TK = Kp                                # single K step -> no reduction axis
    else:
        TK = 128
        for cand in range(Kp - 128, 127, -128):
            if Kp % cand == 0 and working_set(cand, True) <= _VMEM_BUDGET:
                TK = cand
                break
    return TM, Mp, TK, TN


def matmul_bias_act(a, w_pad, b_pad, n_out, act, out_dtype):
    """o = act(a @ w + b).  a:(M,Kp) bf16, w_pad:(Kp,Np) bf16 (pre-padded once),
    b_pad:(1,Np) f32.  Returns (M, n_out) in out_dtype."""
    M, K = a.shape
    Kp, Np = w_pad.shape
    assert K == Kp, (K, Kp)
    out_itemsize = jnp.dtype(out_dtype).itemsize
    TM, Mp, TK, TN = _pick_tiles(M, Kp, Np, out_itemsize)

    a_p = a if Mp == M else jnp.pad(a, ((0, Mp - M), (0, 0)))

    if TK == Kp:
        out = pl.pallas_call(
            functools.partial(_mm_single_kernel, act=act),
            out_shape=jax.ShapeDtypeStruct((Mp, Np), out_dtype),
            grid_spec=pltpu.PrefetchScalarGridSpec(
                num_scalar_prefetch=0,
                grid=(Mp // TM, Np // TN),
                in_specs=[
                    pl.BlockSpec((TM, Kp), lambda i, j: (i, 0)),
                    pl.BlockSpec((Kp, TN), lambda i, j: (0, j)),
                    pl.BlockSpec((1, TN), lambda i, j: (0, j)),
                ],
                out_specs=pl.BlockSpec((TM, TN), lambda i, j: (i, j)),
            ),
            compiler_params=pltpu.CompilerParams(
                dimension_semantics=("parallel", "parallel"),
                vmem_limit_bytes=_VMEM_LIMIT),
        )(a_p, w_pad, b_pad)
    else:
        out = pl.pallas_call(
            functools.partial(_mm_multi_kernel, act=act),
            out_shape=jax.ShapeDtypeStruct((Mp, Np), out_dtype),
            grid_spec=pltpu.PrefetchScalarGridSpec(
                num_scalar_prefetch=0,
                grid=(Mp // TM, Np // TN, Kp // TK),
                in_specs=[
                    pl.BlockSpec((TM, TK), lambda i, j, k: (i, k)),
                    pl.BlockSpec((TK, TN), lambda i, j, k: (k, j)),
                    pl.BlockSpec((1, TN), lambda i, j, k: (0, j)),
                ],
                out_specs=pl.BlockSpec((TM, TN), lambda i, j, k: (i, j)),
                scratch_shapes=[pltpu.VMEM((TM, TN), jnp.float32)],
            ),
            compiler_params=pltpu.CompilerParams(
                dimension_semantics=("parallel", "parallel", "arbitrary"),
                vmem_limit_bytes=_VMEM_LIMIT),
        )(a_p, w_pad, b_pad)
    return out[:M, :n_out]


def matvec_bias_sigmoid(a, w_row, b_arr):
    """Final layer: sigmoid(a @ w_row.T + b) with true N=1 (no 128-col padding).
    a:(M,K) bf16, w_row:(1,K) bf16, b_arr:(1,1) f32 -> (M,1) f32."""
    M, K = a.shape
    assert w_row.shape == (1, K)
    Mp = max(8, _round_up(M, 8))
    a_p = a if Mp == M else jnp.pad(a, ((0, Mp - M), (0, 0)))
    out = pl.pallas_call(
        _matvec_sigmoid_kernel,
        out_shape=jax.ShapeDtypeStruct((Mp, 1), jnp.float32),
        compiler_params=pltpu.CompilerParams(vmem_limit_bytes=_VMEM_LIMIT),
    )(a_p, w_row, b_arr)
    return out[:M]


# ----------------------------- conv glue (im2col) -----------------------------

def _im2col(x, kh, kw, stride, pad):
    """x: (N, H, W, C) NHWC; pad = (top, bottom, left, right). Keeps x's dtype."""
    x = jnp.pad(x, ((0, 0), (pad[0], pad[1]), (pad[2], pad[3]), (0, 0)))
    n, H, W, c = x.shape
    oh = (H - kh) // stride + 1
    ow = (W - kw) // stride + 1
    cols = []
    for i in range(kh):
        for j in range(kw):
            cols.append(x[:, i:i + stride * (oh - 1) + 1:stride,
                          j:j + stride * (ow - 1) + 1:stride, :])
    cols = jnp.stack(cols, axis=3)                 # (n, oh, ow, kh*kw, c)
    return cols.reshape(n * oh * ow, kh * kw * c), oh, ow


def conv_layer(x, w_arr, b_arr, cout, stride, pad, act, out_dtype):
    """x: NHWC bf16.  w_arr is pre-padded: (Kp,Np) bf16 matrix for hidden layers,
    or a (1,K) bf16 row for the final 1-output conv."""
    kh = kw = 4
    n = x.shape[0]
    final = (act == "sigmoid")
    K = w_arr.shape[1] if final else w_arr.shape[0]
    cin_pad = K // (kh * kw)
    if x.shape[-1] != cin_pad:                      # only layer 1 (3 -> 8 channels)
        x = jnp.pad(x, ((0, 0), (0, 0), (0, 0), (0, cin_pad - x.shape[-1])))
    # TODO(synk): at real CycleGAN resolutions (128-256 px), replace the HBM
    # im2col round trip with a direct conv (16 accumulating taps folded into the
    # matmul grid) and/or fuse all five layers into one VMEM-resident kernel.
    a, oh, ow = _im2col(x, kh, kw, stride, pad)
    if final:
        y = matvec_bias_sigmoid(a, w_arr, b_arr)
    else:
        y = matmul_bias_act(a, w_arr, b_arr, cout, act, out_dtype)
    return y.reshape(n, oh, ow, cout)


# ----------------------------- Discriminator ---------------------------------

def init_discriminator_params(key, channels):
    dims = [(channels, 64), (64, 128), (128, 256), (256, 512), (512, 1)]
    params = []
    for cin, cout in dims:
        key, k1, k2 = jax.random.split(key, 3)
        fan_in = 4 * 4 * cin
        w = jax.random.normal(k1, (4, 4, cin, cout), jnp.float32) * (2.0 / fan_in) ** 0.5
        b = jax.random.normal(k2, (cout,), jnp.float32) * 0.01
        params.append((w, b))
    return params


def prepare_params(params):
    """Pad/cast weights & biases to lane-dense bf16/f32 ONCE (not per forward)."""
    prepared = []
    last = len(params) - 1
    for idx, (w, b) in enumerate(params):
        kh, kw, cin, cout = w.shape
        cin_p = _round_up(cin, 8)                 # so K = 16*cin_p is a multiple of 128
        w_p = jnp.pad(w, ((0, 0), (0, 0), (0, cin_p - cin), (0, 0)))
        w_mat = w_p.reshape(kh * kw * cin_p, cout)
        if idx == last:                           # Conv(512->1): keep true N = 1
            prepared.append((w_mat[:, 0].reshape(1, -1).astype(jnp.bfloat16),
                             b.reshape(1, 1).astype(jnp.float32)))
        else:
            Np = _round_up(cout, 128)
            prepared.append((
                jnp.pad(w_mat, ((0, 0), (0, Np - cout))).astype(jnp.bfloat16),
                jnp.pad(b, (0, Np - cout)).reshape(1, Np).astype(jnp.float32)))
    return prepared


@jax.jit
def discriminator_forward(img_nchw, prepared_params):
    x = jnp.transpose(img_nchw, (0, 2, 3, 1)).astype(jnp.bfloat16)   # NCHW -> NHWC bf16
    couts   = (64, 128, 256, 512, 1)
    strides = (2, 2, 2, 2, 1)
    # last layer: ZeroPad2d((1,0,1,0)) + Conv pad 1 -> per-side (top2,bot1,left2,right1)
    pads    = ((1, 1, 1, 1),) * 4 + ((2, 1, 2, 1),)
    acts    = ("leaky",) * 4 + ("sigmoid",)
    out_dts = (jnp.bfloat16,) * 4 + (jnp.float32,)
    for (w_arr, b_arr), cout, s, p, act, od in zip(
            prepared_params, couts, strides, pads, acts, out_dts):
        x = conv_layer(x, w_arr, b_arr, cout, s, p, act, od)
    return jnp.transpose(x, (0, 3, 1, 2))          # NHWC -> NCHW, f32


# ----------------------------- pure-JAX reference -----------------------------

def reference_forward(img_nchw, params):
    x = img_nchw
    strides = [(2, 2)] * 4 + [(1, 1)]
    pads = [((1, 1), (1, 1))] * 4 + [((2, 1), (2, 1))]
    for i, (w, b) in enumerate(params):
        x = lax.conv_general_dilated(
            x, w, strides[i], pads[i],
            dimension_numbers=("NCHW", "HWIO", "NCHW"),
            precision=lax.Precision.HIGHEST)
        x = x + b.reshape(1, -1, 1, 1)
        x = jnp.where(x > 0, x, 0.2 * x) if i < 4 else jax.nn.sigmoid(x)
    return x


# ----------------------------------- main -------------------------------------

if __name__ == "__main__":
    key = jax.random.PRNGKey(0)
    k_img, k_params = jax.random.split(key)

    # input_shape = (channels=3, height=32, width=32), batch=2  (NCHW like PyTorch)
    batch, channels, height, width = 2, 3, 32, 32
    img = jax.random.normal(k_img, (batch, channels, height, width), jnp.float32)
    params = init_discriminator_params(k_params, channels)
    prepared = prepare_params(params)              # pad/cast weights once

    out = jax.block_until_ready(discriminator_forward(img, prepared))

    # PyTorch output_shape = (1, H // 16, W // 16)
    expected_shape = (batch, 1, height // 16, width // 16)
    assert out.shape == expected_shape, (out.shape, expected_shape)
    assert bool(jnp.all(jnp.isfinite(out)))

    ref = jax.block_until_ready(reference_forward(img, params))
    # bf16 operands/activations with f32 accumulation vs. f32 reference.
    assert jnp.allclose(out, ref, rtol=3e-2, atol=3e-2), \
        f"max abs diff {jnp.max(jnp.abs(out - ref))}"

    print("KERNEL_OK")
</pallas_src>

<mosaic_0001>
module attributes {stable_mosaic.version = 11 : i64} {
  func.func @_mm_single_kernel(%arg0: i32, %arg1: i32, %arg2: memref<512x128xbf16, #tpu.memory_space<vmem>>, %arg3: memref<128x128xbf16, #tpu.memory_space<vmem>>, %arg4: memref<1x128xf32, #tpu.memory_space<vmem>>, %arg5: memref<512x128xbf16, #tpu.memory_space<vmem>>) attributes {dimension_semantics = [#tpu.dimension_semantics<parallel>, #tpu.dimension_semantics<parallel>], iteration_bounds = array<i64: 1, 1>, scalar_prefetch = 0 : i64, scratch_operands = 0 : i64, tpu.core_type = #tpu.core_type<tc>, window_params = [{transform_indices = @transform_0, window_bounds = array<i64: 512, 128>}, {transform_indices = @transform_1, window_bounds = array<i64: 128, 128>}, {transform_indices = @transform_2, window_bounds = array<i64: 1, 128>}, {transform_indices = @transform_3, window_bounds = array<i64: 512, 128>}]} {
    %c0 = arith.constant 0 : index
    %c0_0 = arith.constant 0 : index
    %0 = vector.load %arg2[%c0, %c0_0] : memref<512x128xbf16, #tpu.memory_space<vmem>>, vector<512x128xbf16>
    %c0_1 = arith.constant 0 : index
    %c0_2 = arith.constant 0 : index
    %1 = vector.load %arg3[%c0_1, %c0_2] : memref<128x128xbf16, #tpu.memory_space<vmem>>, vector<128x128xbf16>
    %cst = arith.constant dense<0.000000e+00> : vector<512x128xf32>
    %2 = tpu.matmul %0, %1, %cst {dimension_numbers = #tpu.dot_dimension_numbers<[1], [0], [0], [1], [0, 0, 1, 1], [], []>} : vector<512x128xbf16>, vector<128x128xbf16>, vector<512x128xf32> -> vector<512x128xf32>
    %c0_3 = arith.constant 0 : index
    %c0_4 = arith.constant 0 : index
    %3 = vector.load %arg4[%c0_3, %c0_4] : memref<1x128xf32, #tpu.memory_space<vmem>>, vector<1x128xf32>
    %4 = vector.broadcast %3 : vector<1x128xf32> to vector<512x128xf32>
    %5 = arith.addf %2, %4 : vector<512x128xf32>
    %cst_5 = arith.constant 0.000000e+00 : f32
    %6 = vector.broadcast %cst_5 : f32 to vector<512x128xf32>
    %7 = arith.cmpf ogt, %5, %6 : vector<512x128xf32>
    %cst_6 = arith.constant 2.000000e-01 : f32
    %8 = vector.broadcast %cst_6 : f32 to vector<512x128xf32>
    %9 = arith.mulf %8, %5 : vector<512x128xf32>
    %10 = arith.select %7, %5, %9 : vector<512x128xi1>, vector<512x128xf32>
    %11 = arith.truncf %10 : vector<512x128xf32> to vector<512x128xbf16>
    %c0_7 = arith.constant 0 : index
    %c0_8 = arith.constant 0 : index
    %12 = vector.load %arg5[%c0_7, %c0_8] : memref<512x128xbf16, #tpu.memory_space<vmem>>, vector<512x128xbf16>
    tpu.vector_store %arg5[%c0_7, %c0_8], %11 {strides = array<i32>} : memref<512x128xbf16, #tpu.memory_space<vmem>>, vector<512x128xbf16>,
    return
  }
  func.func @transform_0(%arg0: i32, %arg1: i32) -> (i32, i32) {
    %c0_i32 = arith.constant 0 : i32
    %c0_i32_0 = arith.constant 0 : i32
    return %arg0, %c0_i32 : i32, i32
  }
  func.func @transform_1(%arg0: i32, %arg1: i32) -> (i32, i32) {
    %c0_i32 = arith.constant 0 : i32
    %c0_i32_0 = arith.constant 0 : i32
    return %c0_i32, %arg1 : i32, i32
  }
  func.func @transform_2(%arg0: i32, %arg1: i32) -> (i32, i32) {
    %c0_i32 = arith.constant 0 : i32
    %c0_i32_0 = arith.constant 0 : i32
    return %c0_i32, %arg1 : i32, i32
  }
  func.func @transform_3(%arg0: i32, %arg1: i32) -> (i32, i32) {
    %c0_i32 = arith.constant 0 : i32
    return %arg0, %arg1 : i32, i32
  }
}

module attributes {stable_mosaic.version = 11 : i64} {
  func.func @_mm_single_kernel(%arg0: i32, %arg1: i32, %arg2: memref<128x1024xbf16, #tpu.memory_space<vmem>>, %arg3: memref<1024x128xbf16, #tpu.memory_space<vmem>>, %arg4: memref<1x128xf32, #tpu.memory_space<vmem>>, %arg5: memref<128x128xbf16, #tpu.memory_space<vmem>>) attributes {dimension_semantics = [#tpu.dimension_semantics<parallel>, #tpu.dimension_semantics<parallel>], iteration_bounds = array<i64: 1, 1>, scalar_prefetch = 0 : i64, scratch_operands = 0 : i64, tpu.core_type = #tpu.core_type<tc>, window_params = [{transform_indices = @transform_0, window_bounds = array<i64: 128, 1024>}, {transform_indices = @transform_1, window_bounds = array<i64: 1024, 128>}, {transform_indices = @transform_2, window_bounds = array<i64: 1, 128>}, {transform_indices = @transform_3, window_bounds = array<i64: 128, 128>}]} {
    %c0 = arith.constant 0 : index
    %c0_0 = arith.constant 0 : index
    %0 = vector.load %arg2[%c0, %c0_0] : memref<128x1024xbf16, #tpu.memory_space<vmem>>, vector<128x1024xbf16>
    %c0_1 = arith.constant 0 : index
    %c0_2 = arith.constant 0 : index
    %1 = vector.load %arg3[%c0_1, %c0_2] : memref<1024x128xbf16, #tpu.memory_space<vmem>>, vector<1024x128xbf16>
    %cst = arith.constant dense<0.000000e+00> : vector<128x128xf32>
    %2 = tpu.matmul %0, %1, %cst {dimension_numbers = #tpu.dot_dimension_numbers<[1], [0], [0], [1], [0, 0, 1, 1], [], []>} : vector<128x1024xbf16>, vector<1024x128xbf16>, vector<128x128xf32> -> vector<128x128xf32>
    %c0_3 = arith.constant 0 : index
    %c0_4 = arith.constant 0 : index
    %3 = vector.load %arg4[%c0_3, %c0_4] : memref<1x128xf32, #tpu.memory_space<vmem>>, vector<1x128xf32>
    %4 = vector.broadcast %3 : vector<1x128xf32> to vector<128x128xf32>
    %5 = arith.addf %2, %4 : vector<128x128xf32>
    %cst_5 = arith.constant 0.000000e+00 : f32
    %6 = vector.broadcast %cst_5 : f32 to vector<128x128xf32>
    %7 = arith.cmpf ogt, %5, %6 : vector<128x128xf32>
    %cst_6 = arith.constant 2.000000e-01 : f32
    %8 = vector.broadcast %cst_6 : f32 to vector<128x128xf32>
    %9 = arith.mulf %8, %5 : vector<128x128xf32>
    %10 = arith.select %7, %5, %9 : vector<128x128xi1>, vector<128x128xf32>
    %11 = arith.truncf %10 : vector<128x128xf32> to vector<128x128xbf16>
    %c0_7 = arith.constant 0 : index
    %c0_8 = arith.constant 0 : index
    %12 = vector.load %arg5[%c0_7, %c0_8] : memref<128x128xbf16, #tpu.memory_space<vmem>>, vector<128x128xbf16>
    tpu.vector_store %arg5[%c0_7, %c0_8], %11 {strides = array<i32>} : memref<128x128xbf16, #tpu.memory_space<vmem>>, vector<128x128xbf16>,
    return
  }
  func.func @transform_0(%arg0: i32, %arg1: i32) -> (i32, i32) {
    %c0_i32 = arith.constant 0 : i32
    %c0_i32_0 = arith.constant 0 : i32
    return %arg0, %c0_i32 : i32, i32
  }
  func.func @transform_1(%arg0: i32, %arg1: i32) -> (i32, i32) {
    %c0_i32 = arith.constant 0 : i32
    %c0_i32_0 = arith.constant 0 : i32
    return %c0_i32, %arg1 : i32, i32
  }
  func.func @transform_2(%arg0: i32, %arg1: i32) -> (i32, i32) {
    %c0_i32 = arith.constant 0 : i32
    %c0_i32_0 = arith.constant 0 : i32
    return %c0_i32, %arg1 : i32, i32
  }
  func.func @transform_3(%arg0: i32, %arg1: i32) -> (i32, i32) {
    %c0_i32 = arith.constant 0 : i32
    return %arg0, %arg1 : i32, i32
  }
}

module attributes {stable_mosaic.version = 11 : i64} {
  func.func @_mm_single_kernel(%arg0: i32, %arg1: i32, %arg2: memref<32x2048xbf16, #tpu.memory_space<vmem>>, %arg3: memref<2048x256xbf16, #tpu.memory_space<vmem>>, %arg4: memref<1x256xf32, #tpu.memory_space<vmem>>, %arg5: memref<32x256xbf16, #tpu.memory_space<vmem>>) attributes {dimension_semantics = [#tpu.dimension_semantics<parallel>, #tpu.dimension_semantics<parallel>], iteration_bounds = array<i64: 1, 1>, scalar_prefetch = 0 : i64, scratch_operands = 0 : i64, tpu.core_type = #tpu.core_type<tc>, window_params = [{transform_indices = @transform_0, window_bounds = array<i64: 32, 2048>}, {transform_indices = @transform_1, window_bounds = array<i64: 2048, 256>}, {transform_indices = @transform_2, window_bounds = array<i64: 1, 256>}, {transform_indices = @transform_3, window_bounds = array<i64: 32, 256>}]} {
    %c0 = arith.constant 0 : index
    %c0_0 = arith.constant 0 : index
    %0 = vector.load %arg2[%c0, %c0_0] : memref<32x2048xbf16, #tpu.memory_space<vmem>>, vector<32x2048xbf16>
    %c0_1 = arith.constant 0 : index
    %c0_2 = arith.constant 0 : index
    %1 = vector.load %arg3[%c0_1, %c0_2] : memref<2048x256xbf16, #tpu.memory_space<vmem>>, vector<2048x256xbf16>
    %cst = arith.constant dense<0.000000e+00> : vector<32x256xf32>
    %2 = tpu.matmul %0, %1, %cst {dimension_numbers = #tpu.dot_dimension_numbers<[1], [0], [0], [1], [0, 0, 1, 1], [], []>} : vector<32x2048xbf16>, vector<2048x256xbf16>, vector<32x256xf32> -> vector<32x256xf32>
    %c0_3 = arith.constant 0 : index
    %c0_4 = arith.constant 0 : index
    %3 = vector.load %arg4[%c0_3, %c0_4] : memref<1x256xf32, #tpu.memory_space<vmem>>, vector<1x256xf32>
    %4 = vector.broadcast %3 : vector<1x256xf32> to vector<32x256xf32>
    %5 = arith.addf %2, %4 : vector<32x256xf32>
    %cst_5 = arith.constant 0.000000e+00 : f32
    %6 = vector.broadcast %cst_5 : f32 to vector<32x256xf32>
    %7 = arith.cmpf ogt, %5, %6 : vector<32x256xf32>
    %cst_6 = arith.constant 2.000000e-01 : f32
    %8 = vector.broadcast %cst_6 : f32 to vector<32x256xf32>
    %9 = arith.mulf %8, %5 : vector<32x256xf32>
    %10 = arith.select %7, %5, %9 : vector<32x256xi1>, vector<32x256xf32>
    %11 = arith.truncf %10 : vector<32x256xf32> to vector<32x256xbf16>
    %c0_7 = arith.constant 0 : index
    %c0_8 = arith.constant 0 : index
    %12 = vector.load %arg5[%c0_7, %c0_8] : memref<32x256xbf16, #tpu.memory_space<vmem>>, vector<32x256xbf16>
    tpu.vector_store %arg5[%c0_7, %c0_8], %11 {strides = array<i32>} : memref<32x256xbf16, #tpu.memory_space<vmem>>, vector<32x256xbf16>,
    return
  }
  func.func @transform_0(%arg0: i32, %arg1: i32) -> (i32, i32) {
    %c0_i32 = arith.constant 0 : i32
    %c0_i32_0 = arith.constant 0 : i32
    return %arg0, %c0_i32 : i32, i32
  }
  func.func @transform_1(%arg0: i32, %arg1: i32) -> (i32, i32) {
    %c0_i32 = arith.constant 0 : i32
    %c0_i32_0 = arith.constant 0 : i32
    return %c0_i32, %arg1 : i32, i32
  }
  func.func @transform_2(%arg0: i32, %arg1: i32) -> (i32, i32) {
    %c0_i32 = arith.constant 0 : i32
    %c0_i32_0 = arith.constant 0 : i32
    return %c0_i32, %arg1 : i32, i32
  }
  func.func @transform_3(%arg0: i32, %arg1: i32) -> (i32, i32) {
    %c0_i32 = arith.constant 0 : i32
    return %arg0, %arg1 : i32, i32
  }
}

module attributes {stable_mosaic.version = 11 : i64} {
  func.func @_mm_single_kernel(%arg0: i32, %arg1: i32, %arg2: memref<16x4096xbf16, #tpu.memory_space<vmem>>, %arg3: memref<4096x256xbf16, #tpu.memory_space<vmem>>, %arg4: memref<1x256xf32, #tpu.memory_space<vmem>>, %arg5: memref<16x256xbf16, #tpu.memory_space<vmem>>) attributes {dimension_semantics = [#tpu.dimension_semantics<parallel>, #tpu.dimension_semantics<parallel>], iteration_bounds = array<i64: 1, 2>, scalar_prefetch = 0 : i64, scratch_operands = 0 : i64, tpu.core_type = #tpu.core_type<tc>, window_params = [{transform_indices = @transform_0, window_bounds = array<i64: 16, 4096>}, {transform_indices = @transform_1, window_bounds = array<i64: 4096, 256>}, {transform_indices = @transform_2, window_bounds = array<i64: 1, 256>}, {transform_indices = @transform_3, window_bounds = array<i64: 16, 256>}]} {
    %c0 = arith.constant 0 : index
    %c0_0 = arith.constant 0 : index
    %0 = vector.load %arg2[%c0, %c0_0] : memref<16x4096xbf16, #tpu.memory_space<vmem>>, vector<16x4096xbf16>
    %c0_1 = arith.constant 0 : index
    %c0_2 = arith.constant 0 : index
    %1 = vector.load %arg3[%c0_1, %c0_2] : memref<4096x256xbf16, #tpu.memory_space<vmem>>, vector<4096x256xbf16>
    %cst = arith.constant dense<0.000000e+00> : vector<16x256xf32>
    %2 = tpu.matmul %0, %1, %cst {dimension_numbers = #tpu.dot_dimension_numbers<[1], [0], [0], [1], [0, 0, 1, 1], [], []>} : vector<16x4096xbf16>, vector<4096x256xbf16>, vector<16x256xf32> -> vector<16x256xf32>
    %c0_3 = arith.constant 0 : index
    %c0_4 = arith.constant 0 : index
    %3 = vector.load %arg4[%c0_3, %c0_4] : memref<1x256xf32, #tpu.memory_space<vmem>>, vector<1x256xf32>
    %4 = vector.broadcast %3 : vector<1x256xf32> to vector<16x256xf32>
    %5 = arith.addf %2, %4 : vector<16x256xf32>
    %cst_5 = arith.constant 0.000000e+00 : f32
    %6 = vector.broadcast %cst_5 : f32 to vector<16x256xf32>
    %7 = arith.cmpf ogt, %5, %6 : vector<16x256xf32>
    %cst_6 = arith.constant 2.000000e-01 : f32
    %8 = vector.broadcast %cst_6 : f32 to vector<16x256xf32>
    %9 = arith.mulf %8, %5 : vector<16x256xf32>
    %10 = arith.select %7, %5, %9 : vector<16x256xi1>, vector<16x256xf32>
    %11 = arith.truncf %10 : vector<16x256xf32> to vector<16x256xbf16>
    %c0_7 = arith.constant 0 : index
    %c0_8 = arith.constant 0 : index
    %12 = vector.load %arg5[%c0_7, %c0_8] : memref<16x256xbf16, #tpu.memory_space<vmem>>, vector<16x256xbf16>
    tpu.vector_store %arg5[%c0_7, %c0_8], %11 {strides = array<i32>} : memref<16x256xbf16, #tpu.memory_space<vmem>>, vector<16x256xbf16>,
    return
  }
  func.func @transform_0(%arg0: i32, %arg1: i32) -> (i32, i32) {
    %c0_i32 = arith.constant 0 : i32
    %c0_i32_0 = arith.constant 0 : i32
    return %arg0, %c0_i32 : i32, i32
  }
  func.func @transform_1(%arg0: i32, %arg1: i32) -> (i32, i32) {
    %c0_i32 = arith.constant 0 : i32
    %c0_i32_0 = arith.constant 0 : i32
    return %c0_i32, %arg1 : i32, i32
  }
  func.func @transform_2(%arg0: i32, %arg1: i32) -> (i32, i32) {
    %c0_i32 = arith.constant 0 : i32
    %c0_i32_0 = arith.constant 0 : i32
    return %c0_i32, %arg1 : i32, i32
  }
  func.func @transform_3(%arg0: i32, %arg1: i32) -> (i32, i32) {
    %c0_i32 = arith.constant 0 : i32
    return %arg0, %arg1 : i32, i32
  }
}

module attributes {stable_mosaic.version = 11 : i64} {
  func.func @_matvec_sigmoid_kernel(%arg0: memref<8x8192xbf16, #tpu.memory_space<vmem>>, %arg1: memref<1x8192xbf16, #tpu.memory_space<vmem>>, %arg2: memref<1x1xf32, #tpu.memory_space<vmem>>, %arg3: memref<8x1xf32, #tpu.memory_space<vmem>>) attributes {dimension_semantics = [], scalar_prefetch = 0 : i64, scratch_operands = 0 : i64, tpu.core_type = #tpu.core_type<tc>} {
    %c0 = arith.constant 0 : index
    %c0_0 = arith.constant 0 : index
    %0 = vector.load %arg0[%c0, %c0_0] : memref<8x8192xbf16, #tpu.memory_space<vmem>>, vector<8x8192xbf16>
    %1 = arith.extf %0 : vector<8x8192xbf16> to vector<8x8192xf32>
    %c0_1 = arith.constant 0 : index
    %c0_2 = arith.constant 0 : index
    %2 = vector.load %arg1[%c0_1, %c0_2] : memref<1x8192xbf16, #tpu.memory_space<vmem>>, vector<1x8192xbf16>
    %3 = arith.extf %2 : vector<1x8192xbf16> to vector<1x8192xf32>
    %4 = vector.broadcast %3 : vector<1x8192xf32> to vector<8x8192xf32>
    %5 = arith.mulf %1, %4 : vector<8x8192xf32>
    %cst = arith.constant dense<0.000000e+00> : vector<8xf32>
    %6 = vector.multi_reduction <add>, %5, %cst [1] : vector<8x8192xf32> to vector<8xf32>
    %7 = vector.shape_cast %6 : vector<8xf32> to vector<8x1xf32>
    %c0_3 = arith.constant 0 : index
    %c0_4 = arith.constant 0 : index
    %8 = vector.load %arg2[%c0_3, %c0_4] : memref<1x1xf32, #tpu.memory_space<vmem>>, vector<1x1xf32>
    %9 = vector.broadcast %8 : vector<1x1xf32> to vector<8x1xf32>
    %10 = arith.addf %7, %9 : vector<8x1xf32>
    %11 = arith.negf %10 : vector<8x1xf32>
    %12 = math.exp %11 : vector<8x1xf32>
    %cst_5 = arith.constant 1.000000e+00 : f32
    %13 = vector.broadcast %cst_5 : f32 to vector<8x1xf32>
    %14 = arith.addf %13, %12 : vector<8x1xf32>
    %15 = arith.divf %13, %14 : vector<8x1xf32>
    %c0_6 = arith.constant 0 : index
    %c0_7 = arith.constant 0 : index
    %16 = vector.load %arg3[%c0_6, %c0_7] : memref<8x1xf32, #tpu.memory_space<vmem>>, vector<8x1xf32>
    tpu.vector_store %arg3[%c0_6, %c0_7], %15 {strides = array<i32>} : memref<8x1xf32, #tpu.memory_space<vmem>>, vector<8x1xf32>,
    return
  }
}

</mosaic_0001>

<bundles_post_ra>
// kernel: discriminator_forward.5
= control target key start
LH: loop header
LB: loop body
LE: loop exit
PB: predicated region body
PF: predicated region fallthrough
CT: control target
= control target key end

     0   :  { %s1997_s1 = inlined_call_operand.vmem [shape: bf16[128,128], index: 1, kind: input, shape index: {}]   ;;  %s1998_s0 = inlined_call_operand.vmem [shape: bf16[512,128], index: 0, kind: input, shape index: {}]   ;;  %s1999_s2 = inlined_call_operand.vmem [shape: f32[1,128], index: 2, kind: input, shape index: {}]   ;;  %s2000_s3 = inlined_call_operand.vmem [shape: bf16[512,128], index: 3, kind: output, shape index: {}]  }
   0x1   :  { %v1643_v0 = vld [vmem:[%s1997_s1] sm:$0xff]   ;;  %v1644_v1 = vld [vmem:[%s1997_s1 + $0x8] sm:$0xff]   ;;  %v1645_v2 = vld [vmem:[%s1997_s1 + $0x10] sm:$0xff]  }
   0x2   :  { %1547 = vmatprep.subr.bf16.mxu0 %v1643_v0  ;;  %1627 = vmatprep.subr.bf16.mxu1 %v1643_v0  ;;  %v1646_v3 = vld [vmem:[%s1997_s1 + $0x18] sm:$0xff]   ;;  %v1651_v4 = vld [vmem:[%s1998_s0] sm:$0xff]   ;;  %v1648_v7 = vld [vmem:[%s1997_s1 + $0x28] sm:$0xff]  }
   0x3   :  { %1548 = vmatpush3.bf16.msra.mxu0 %v1643_v0  ;;  %1635 = vmatpush3.bf16.msra.mxu1 %v1643_v0  ;;  %v1652_v5 = vld [vmem:[%s1998_s0 + $0x80] sm:$0xff]   ;;  %v1649_v8 = vld [vmem:[%s1997_s1 + $0x30] sm:$0xff]   ;;  %v1650_v9 = vld [vmem:[%s1997_s1 + $0x38] sm:$0xff]  }
   0x4   :  { %1549 = vmatprep.subr.bf16.mxu0 %v1644_v1  ;;  %1628 = vmatprep.subr.bf16.mxu1 %v1644_v1  ;;  %v1647_v6 = vld [vmem:[%s1997_s1 + $0x20] sm:$0xff]   ;;  %v1653_v10 = vld [vmem:[%s1998_s0 + $0x8] sm:$0xff]   ;;  %v1655_v12 = vld [vmem:[%s1998_s0 + $0x10] sm:$0xff]  }
   0x5   :  { %1563 = vmatprep.mubr.bf16.mxu0 %v1651_v4  ;;  %1595 = vmatprep.mubr.bf16.mxu1 %v1652_v5  ;;  %v1654_v11 = vld [vmem:[%s1998_s0 + $0x88] sm:$0xff]   ;;  %v1656_v13 = vld [vmem:[%s1998_s0 + $0x90] sm:$0xff]   ;;  %v1657_v14 = vld [vmem:[%s1998_s0 + $0x18] sm:$0xff]  }
   0x6   :  { %v1658_v15 = vld [vmem:[%s1998_s0 + $0x98] sm:$0xff]   ;;  %v1659_v16 = vld [vmem:[%s1998_s0 + $0x20] sm:$0xff]   ;;  %v1661_v18 = vld [vmem:[%s1998_s0 + $0x28] sm:$0xff]  }
   0x7   :  { %1550 = vmatpush3.bf16.msra.mxu0 %v1644_v1  ;;  %1636 = vmatpush3.bf16.msra.mxu1 %v1644_v1  ;;  %v1660_v17 = vld [vmem:[%s1998_s0 + $0xa0] sm:$0xff]   ;;  %v1662_v19 = vld [vmem:[%s1998_s0 + $0xa8] sm:$0xff]   ;;  %v1663_v20 = vld [vmem:[%s1998_s0 + $0x30] sm:$0xff]  }
   0x8   :  { %1551 = vmatprep.subr.bf16.mxu0 %v1645_v2  ;;  %1629 = vmatprep.subr.bf16.mxu1 %v1645_v2  ;;  %v1664_v21 = vld [vmem:[%s1998_s0 + $0xb0] sm:$0xff]   ;;  %v1665_v22 = vld [vmem:[%s1998_s0 + $0x38] sm:$0xff]   ;;  %v1667_v24 = vld [vmem:[%s1998_s0 + $0x40] sm:$0xff]  }
   0x9   :  { %v1666_v23 = vld [vmem:[%s1998_s0 + $0xb8] sm:$0xff]   ;;  %v1668_v25 = vld [vmem:[%s1998_s0 + $0xc0] sm:$0xff]   ;;  %v1669_v26 = vld [vmem:[%s1998_s0 + $0x48] sm:$0xff]  }
   0xa   :  { %v1670_v27 = vld [vmem:[%s1998_s0 + $0xc8] sm:$0xff]   ;;  %v1671_v28 = vld [vmem:[%s1998_s0 + $0x50] sm:$0xff]   ;;  %v1673_v30 = vld [vmem:[%s1998_s0 + $0x58] sm:$0xff]  }
   0xb   :  { %1552 = vmatpush3.bf16.msra.mxu0 %v1645_v2  ;;  %1637 = vmatpush3.bf16.msra.mxu1 %v1645_v2  ;;  %v1672_v29 = vld [vmem:[%s1998_s0 + $0xd0] sm:$0xff]   ;;  %v1674_v31 = vld [vmem:[%s1998_s0 + $0xd8] sm:$0xff]   ;;  %v1675_v32 = vld [vmem:[%s1998_s0 + $0x60] sm:$0xff]  }
   0xc   :  { %1553 = vmatprep.subr.bf16.mxu0 %v1646_v3  ;;  %1630 = vmatprep.subr.bf16.mxu1 %v1646_v3  ;;  %v1676_v33 = vld [vmem:[%s1998_s0 + $0xe0] sm:$0xff]   ;;  %v1677_v34 = vld [vmem:[%s1998_s0 + $0x68] sm:$0xff]   ;;  %v1679_v36 = vld [vmem:[%s1998_s0 + $0x70] sm:$0xff]  }
   0xd   :  { %v1678_v35 = vld [vmem:[%s1998_s0 + $0xe8] sm:$0xff]   ;;  %v1680_v37 = vld [vmem:[%s1998_s0 + $0xf0] sm:$0xff]   ;;  %v1681_v38 = vld [vmem:[%s1998_s0 + $0x78] sm:$0xff]  }
   0xe   :  { %v1682_v39 = vld [vmem:[%s1998_s0 + $0xf8] sm:$0xff]   ;;  %v1826_v40 = vld [vmem:[%s1999_s2] ss:$0 sm:$0xff] }
   0xf   :  { %1554 = vmatpush3.bf16.msra.mxu0 %v1646_v3  ;;  %1638 = vmatpush3.bf16.msra.mxu1 %v1646_v3 }
  0x10   :  { %1555 = vmatprep.subr.bf16.mxu0 %v1647_v6  ;;  %1631 = vmatprep.subr.bf16.mxu1 %v1647_v6 }
  0x13   :  { %1556 = vmatpush3.bf16.msra.mxu0 %v1647_v6  ;;  %1639 = vmatpush3.bf16.msra.mxu1 %v1647_v6 }
  0x14   :  { %1557 = vmatprep.subr.bf16.mxu0 %v1648_v7  ;;  %1632 = vmatprep.subr.bf16.mxu1 %v1648_v7 }
  0x17   :  { %1558 = vmatpush3.bf16.msra.mxu0 %v1648_v7  ;;  %1640 = vmatpush3.bf16.msra.mxu1 %v1648_v7 }
  0x18   :  { %1559 = vmatprep.subr.bf16.mxu0 %v1649_v8  ;;  %1633 = vmatprep.subr.bf16.mxu1 %v1649_v8 }
  0x1b   :  { %1560 = vmatpush3.bf16.msra.mxu0 %v1649_v8  ;;  %1641 = vmatpush3.bf16.msra.mxu1 %v1649_v8 }
  0x1c   :  { %1561 = vmatprep.subr.bf16.mxu0 %v1650_v9  ;;  %1634 = vmatprep.subr.bf16.mxu1 %v1650_v9 }
  0x1f   :  { %1562 = vmatpush3.bf16.msra.mxu0 %v1650_v9  ;;  %1642 = vmatpush3.bf16.msra.mxu1 %v1650_v9 }
  0x22   :  { %1564 = vmatmul.mubr.bf16.vlgmr.msra.gmra.mrb[0].mxu0 %v1653_v10  ;;  %1596 = vmatmul.mubr.bf16.vlgmr.msra.gmra.mrb[0].mxu1 %v1654_v11 }
  0x23   :  { %1567 = vmatprep.mubr.bf16.mxu0 %v1655_v12  ;;  %1599 = vmatprep.mubr.bf16.mxu1 %v1656_v13 }
  0x2a   :  { %1568 = vmatmul.mubr.bf16.gmra.mrb[4].mxu0 %v1657_v14  ;;  %1600 = vmatmul.mubr.bf16.gmra.mrb[4].mxu1 %v1658_v15 }
  0x2b   :  { %1571 = vmatprep.mubr.bf16.mxu0 %v1659_v16  ;;  %1603 = vmatprep.mubr.bf16.mxu1 %v1660_v17 }
  0x32   :  { %1572 = vmatmul.mubr.bf16.gmra.mrb[8].mxu0 %v1661_v18  ;;  %1604 = vmatmul.mubr.bf16.gmra.mrb[8].mxu1 %v1662_v19 }
  0x33   :  { %1575 = vmatprep.mubr.bf16.mxu0 %v1663_v20  ;;  %1607 = vmatprep.mubr.bf16.mxu1 %v1664_v21 }
  0x3a   :  { %1576 = vmatmul.mubr.bf16.gmra.mrb[12].mxu0 %v1665_v22  ;;  %1608 = vmatmul.mubr.bf16.gmra.mrb[12].mxu1 %v1666_v23 }
  0x3b   :  { %1579 = vmatprep.mubr.bf16.mxu0 %v1667_v24  ;;  %1611 = vmatprep.mubr.bf16.mxu1 %v1668_v25 }
  0x42   :  { %1580 = vmatmul.mubr.bf16.gmra.mrb[16].mxu0 %v1669_v26  ;;  %1612 = vmatmul.mubr.bf16.gmra.mrb[16].mxu1 %v1670_v27 }
  0x43   :  { %1583 = vmatprep.mubr.bf16.mxu0 %v1671_v28  ;;  %1615 = vmatprep.mubr.bf16.mxu1 %v1672_v29 }
  0x4a   :  { %1584 = vmatmul.mubr.bf16.gmra.mrb[20].mxu0 %v1673_v30  ;;  %1616 = vmatmul.mubr.bf16.gmra.mrb[20].mxu1 %v1674_v31 }
  0x4b   :  { %1587 = vmatprep.mubr.bf16.mxu0 %v1675_v32  ;;  %1619 = vmatprep.mubr.bf16.mxu1 %v1676_v33 }
  0x52   :  { %1588 = vmatmul.mubr.bf16.gmra.mrb[24].mxu0 %v1677_v34  ;;  %1620 = vmatmul.mubr.bf16.gmra.mrb[24].mxu1 %v1678_v35 }
  0x53   :  { %1591 = vmatprep.mubr.bf16.mxu0 %v1679_v36  ;;  %1623 = vmatprep.mubr.bf16.mxu1 %v1680_v37 }
  0x5a   :  { %1592 = vmatmul.mubr.bf16.gmra.mrb[28].mxu0 %v1681_v38  ;;  %1624 = vmatmul.mubr.bf16.gmra.mrb[28].mxu1 %v1682_v39 }
  0xf5   :  { %v1565_v41 = vpop.f32.mrb[0].mxu0  ;;  %v1597_v42 = vpop.f32.mrb[0].mxu1 }
  0xf6   :  { %v385_v43 = vadd.f32 %v1565_v41, %v1826_v40  ;;  %v513_v44 = vadd.f32 %v1597_v42, %v1826_v40  ;;  %v376_v45 = vpop.f32.mrb[1].mxu0  ;;  %v504_v46 = vpop.f32.mrb[1].mxu1 }
  0xf7   :  { %v377_v47 = vadd.f32 %v1826_v40, %v376_v45  ;;  %v505_v48 = vadd.f32 %v1826_v40, %v504_v46  ;;  %v1566_v49 = vpop.f32.mrb[2].mxu0  ;;  %v1598_v50 = vpop.f32.mrb[2].mxu1 }
  0xf8   :  { %vm633_vm0 = vcmp.gt.f32.partialorder %v385_v43, 0.0  ;;  %v697_v51 = vmul.f32 0.2, %v385_v43  ;;  %vm665_vm1 = vcmp.gt.f32.partialorder %v513_v44, 0.0  ;;  %v729_v52 = vmul.f32 0.2, %v513_v44 }
  0xf9   :  { %vm631_vm2 = vcmp.gt.f32.partialorder %v377_v47, 0.0  ;;  %v695_v53 = vmul.f32 0.2, %v377_v47  ;;  %vm663_vm3 = vcmp.gt.f32.partialorder %v505_v48, 0.0  ;;  %v727_v54 = vmul.f32 0.2, %v505_v48 }
  0xfa   :  { %v388_v55 = vadd.f32 %v1566_v49, %v1826_v40  ;;  %v516_v56 = vadd.f32 %v1598_v50, %v1826_v40  ;;  %v379_v57 = vpop.f32.mrb[3].mxu0  ;;  %v507_v58 = vpop.f32.mrb[3].mxu1  ;;  %v761_v59 = vsel %vm633_vm0, %v385_v43, %v697_v51  ;;  %v793_v60 = vsel %vm665_vm1, %v513_v44, %v729_v52 }
  0xfb   :  { %v380_v61 = vadd.f32 %v1826_v40, %v379_v57  ;;  %v508_v62 = vadd.f32 %v1826_v40, %v507_v58  ;;  %v759_v3 = vsel %vm631_vm2, %v377_v47, %v695_v53  ;;  %v791_v4 = vsel %vm663_vm3, %v505_v48, %v727_v54 }
  0xfc   :  { %vm634_vm4 = vcmp.gt.f32.partialorder %v388_v55, 0.0  ;;  %v698_v63 = vmul.f32 0.2, %v388_v55  ;;  %vm666_vm5 = vcmp.gt.f32.partialorder %v516_v56, 0.0  ;;  %v730_v0 = vmul.f32 0.2, %v516_v56 }
  0xfd   :  { %vm632_vm6 = vcmp.gt.f32.partialorder %v380_v61, 0.0  ;;  %v696_v1 = vmul.f32 0.2, %v380_v61  ;;  %vm664_vm7 = vcmp.gt.f32.partialorder %v508_v62, 0.0  ;;  %v728_v2 = vmul.f32 0.2, %v508_v62 }
  0xfe   :  { %v762_v5 = vsel %vm634_vm4, %v388_v55, %v698_v63  ;;  %v794_v6 = vsel %vm666_vm5, %v516_v56, %v730_v0  ;;  %v1569_v7 = vpop.f32.mrb[4].mxu0  ;;  %v1601_v8 = vpop.f32.mrb[4].mxu1 }
  0xff   :  { %v1324_v9 = vpack.c.bf16 %v762_v5, %v761_v59  ;;  %v1404_v10 = vpack.c.bf16 %v794_v6, %v793_v60  ;;  %v760_v11 = vsel %vm632_vm6, %v380_v61, %v696_v1  ;;  %v792_v12 = vsel %vm664_vm7, %v508_v62, %v728_v2  ;;  %v392_v13 = vpop.f32.mrb[5].mxu0  ;;  %v520_v14 = vpop.f32.mrb[5].mxu1 }
 0x100   :  { %v1319_v15 = vpack.c.bf16 %v760_v11, %v759_v3  ;;  %v1399_v16 = vpack.c.bf16 %v792_v12, %v791_v4  ;;  %v401_v17 = vadd.f32 %v1569_v7, %v1826_v40  ;;  %v529_v18 = vadd.f32 %v1601_v8, %v1826_v40  ;;  %v1570_v19 = vpop.f32.mrb[6].mxu0  ;;  %v1602_v20 = vpop.f32.mrb[6].mxu1 }
 0x101   :  { %1476 = vst [vmem:[%s2000_s3 + $0x8] sm:$0xff] %v1324_v9   ;;  %1492 = vst [vmem:[%s2000_s3 + $0x88] sm:$0xff] %v1404_v10   ;;  %v393_v21 = vadd.f32 %v1826_v40, %v392_v13  ;;  %v521_v22 = vadd.f32 %v1826_v40, %v520_v14  ;;  %v404_v23 = vadd.f32 %v1570_v19, %v1826_v40  ;;  %v395_v25 = vpop.f32.mrb[7].mxu0  ;;  %v523_v26 = vpop.f32.mrb[7].mxu1 }
 0x102   :  { %v532_v24 = vadd.f32 %v1602_v20, %v1826_v40  ;;  %1320 = vst [vmem:[%s2000_s3] sm:$0xff] %v1319_v15   ;;  %1491 = vst [vmem:[%s2000_s3 + $0x80] sm:$0xff] %v1399_v16   ;;  %vm637_vm8 = vcmp.gt.f32.partialorder %v401_v17, 0.0  ;;  %v701_v27 = vmul.f32 0.2, %v401_v17  ;;  %vm669_vm9 = vcmp.gt.f32.partialorder %v529_v18, 0.0 }
 0x103   :  { %v733_v28 = vmul.f32 0.2, %v529_v18  ;;  %vm635_vm10 = vcmp.gt.f32.partialorder %v393_v21, 0.0  ;;  %v699_v29 = vmul.f32 0.2, %v393_v21  ;;  %vm667_vm11 = vcmp.gt.f32.partialorder %v521_v22, 0.0 }
 0x104   :  { %v731_v30 = vmul.f32 0.2, %v521_v22  ;;  %v765_v31 = vsel %vm637_vm8, %v401_v17, %v701_v27  ;;  %vm638_vm12 = vcmp.gt.f32.partialorder %v404_v23, 0.0  ;;  %v702_v33 = vmul.f32 0.2, %v404_v23 }
 0x105   :  { %v797_v32 = vsel %vm669_vm9, %v529_v18, %v733_v28  ;;  %v763_v34 = vsel %vm635_vm10, %v393_v21, %v699_v29  ;;  %vm670_vm13 = vcmp.gt.f32.partialorder %v532_v24, 0.0  ;;  %v734_v36 = vmul.f32 0.2, %v532_v24  ;;  %v1573_v37 = vpop.f32.mrb[8].mxu0  ;;  %v1605_v38 = vpop.f32.mrb[8].mxu1 }
 0x106   :  { %v795_v35 = vsel %vm667_vm11, %v521_v22, %v731_v30  ;;  %v766_v39 = vsel %vm638_vm12, %v404_v23, %v702_v33  ;;  %v396_v41 = vadd.f32 %v1826_v40, %v395_v25  ;;  %v524_v42 = vadd.f32 %v1826_v40, %v523_v26  ;;  %v408_v44 = vpop.f32.mrb[9].mxu0  ;;  %v536_v45 = vpop.f32.mrb[9].mxu1 }
 0x107   :  { %v417_v43 = vadd.f32 %v1573_v37, %v1826_v40  ;;  %v1334_v46 = vpack.c.bf16 %v766_v39, %v765_v31  ;;  %v798_v47 = vsel %vm670_vm13, %v532_v24, %v734_v36  ;;  %v545_v48 = vadd.f32 %v1605_v38, %v1826_v40  ;;  %v1574_v50 = vpop.f32.mrb[10].mxu0  ;;  %v1606_v51 = vpop.f32.mrb[10].mxu1 }
 0x108   :  { %v409_v49 = vadd.f32 %v1826_v40, %v408_v44  ;;  %v1414_v52 = vpack.c.bf16 %v798_v47, %v797_v32  ;;  %vm636_vm14 = vcmp.gt.f32.partialorder %v396_v41, 0.0  ;;  %v700_v53 = vmul.f32 0.2, %v396_v41  ;;  %v411_v54 = vpop.f32.mrb[11].mxu0  ;;  %v539_v55 = vpop.f32.mrb[11].mxu1 }
 0x109   :  { %vm668_vm15 = vcmp.gt.f32.partialorder %v524_v42, 0.0  ;;  %1478 = vst [vmem:[%s2000_s3 + $0x18] sm:$0xff] %v1334_v46   ;;  %v732_v56 = vmul.f32 0.2, %v524_v42  ;;  %vm641_vm0 = vcmp.gt.f32.partialorder %v417_v43, 0.0  ;;  %vm673_vm1 = vcmp.gt.f32.partialorder %v545_v48, 0.0 }
 0x10a   :  { %v705_v57 = vmul.f32 0.2, %v417_v43  ;;  %1494 = vst [vmem:[%s2000_s3 + $0x98] sm:$0xff] %v1414_v52   ;;  %v764_v58 = vsel %vm636_vm14, %v396_v41, %v700_v53  ;;  %v737_v59 = vmul.f32 0.2, %v545_v48  ;;  %vm639_vm2 = vcmp.gt.f32.partialorder %v409_v49, 0.0 }
 0x10b   :  { %v703_v60 = vmul.f32 0.2, %v409_v49  ;;  %v1329_v61 = vpack.c.bf16 %v764_v58, %v763_v34  ;;  %v796_v62 = vsel %vm668_vm15, %v524_v42, %v732_v56  ;;  %v537_v0 = vadd.f32 %v1826_v40, %v536_v45 }
 0x10c   :  { %v769_v63 = vsel %vm641_vm0, %v417_v43, %v705_v57  ;;  %v1409_v1 = vpack.c.bf16 %v796_v62, %v795_v35  ;;  %v801_v2 = vsel %vm673_vm1, %v545_v48, %v737_v59  ;;  %v420_v4 = vadd.f32 %v1574_v50, %v1826_v40 }
 0x10d   :  { %v767_v3 = vsel %vm639_vm2, %v409_v49, %v703_v60  ;;  %1477 = vst [vmem:[%s2000_s3 + $0x10] sm:$0xff] %v1329_v61   ;;  %vm671_vm3 = vcmp.gt.f32.partialorder %v537_v0, 0.0  ;;  %v735_v5 = vmul.f32 0.2, %v537_v0  ;;  %v548_v6 = vadd.f32 %v1606_v51, %v1826_v40  ;;  %v1577_v8 = vpop.f32.mrb[12].mxu0  ;;  %v1609_v9 = vpop.f32.mrb[12].mxu1 }
 0x10e   :  { %v412_v7 = vadd.f32 %v1826_v40, %v411_v54  ;;  %1493 = vst [vmem:[%s2000_s3 + $0x90] sm:$0xff] %v1409_v1   ;;  %vm642_vm4 = vcmp.gt.f32.partialorder %v420_v4, 0.0  ;;  %v706_v10 = vmul.f32 0.2, %v420_v4  ;;  %v540_v11 = vadd.f32 %v1826_v40, %v539_v55  ;;  %v424_v13 = vpop.f32.mrb[13].mxu0  ;;  %v552_v14 = vpop.f32.mrb[13].mxu1 }
 0x10f   :  { %v433_v12 = vadd.f32 %v1577_v8, %v1826_v40  ;;  %v799_v15 = vsel %vm671_vm3, %v537_v0, %v735_v5  ;;  %vm674_vm5 = vcmp.gt.f32.partialorder %v548_v6, 0.0  ;;  %v738_v16 = vmul.f32 0.2, %v548_v6  ;;  %v1578_v17 = vpop.f32.mrb[14].mxu0  ;;  %v1610_v18 = vpop.f32.mrb[14].mxu1 }
 0x110   :  { %vm640_vm6 = vcmp.gt.f32.partialorder %v412_v7, 0.0  ;;  %v770_v19 = vsel %vm642_vm4, %v420_v4, %v706_v10  ;;  %v704_v20 = vmul.f32 0.2, %v412_v7  ;;  %vm672_vm7 = vcmp.gt.f32.partialorder %v540_v11, 0.0  ;;  %v427_v22 = vpop.f32.mrb[15].mxu0  ;;  %v555_v26 = vpop.f32.mrb[15].mxu1 }
 0x111   :  { %v736_v21 = vmul.f32 0.2, %v540_v11  ;;  %v1344_v23 = vpack.c.bf16 %v770_v19, %v769_v63  ;;  %v802_v24 = vsel %vm674_vm5, %v548_v6, %v738_v16  ;;  %vm645_vm8 = vcmp.gt.f32.partialorder %v433_v12, 0.0 }
 0x112   :  { %v709_v25 = vmul.f32 0.2, %v433_v12  ;;  %v1424_v27 = vpack.c.bf16 %v802_v24, %v801_v2  ;;  %v768_v28 = vsel %vm640_vm6, %v412_v7, %v704_v20  ;;  %v561_v30 = vadd.f32 %v1609_v9, %v1826_v40 }
 0x113   :  { %v800_v29 = vsel %vm672_vm7, %v540_v11, %v736_v21  ;;  %1480 = vst [vmem:[%s2000_s3 + $0x28] sm:$0xff] %v1344_v23   ;;  %v1339_v31 = vpack.c.bf16 %v768_v28, %v767_v3  ;;  %v425_v34 = vadd.f32 %v1826_v40, %v424_v13  ;;  %v553_v36 = vadd.f32 %v1826_v40, %v552_v14 }
 0x114   :  { %v1419_v32 = vpack.c.bf16 %v800_v29, %v799_v15  ;;  %v773_v33 = vsel %vm645_vm8, %v433_v12, %v709_v25  ;;  %1496 = vst [vmem:[%s2000_s3 + $0xa8] sm:$0xff] %v1424_v27   ;;  %vm677_vm9 = vcmp.gt.f32.partialorder %v561_v30, 0.0  ;;  %v741_v35 = vmul.f32 0.2, %v561_v30 }
 0x115   :  { %v436_v37 = vadd.f32 %v1578_v17, %v1826_v40  ;;  %1479 = vst [vmem:[%s2000_s3 + $0x20] sm:$0xff] %v1339_v31   ;;  %vm643_vm10 = vcmp.gt.f32.partialorder %v425_v34, 0.0  ;;  %v707_v38 = vmul.f32 0.2, %v425_v34  ;;  %v564_v39 = vadd.f32 %v1610_v18, %v1826_v40  ;;  %v1581_v42 = vpop.f32.mrb[16].mxu0  ;;  %v1613_v43 = vpop.f32.mrb[16].mxu1 }
 0x116   :  { %1495 = vst [vmem:[%s2000_s3 + $0xa0] sm:$0xff] %v1419_v32   ;;  %v428_v41 = vadd.f32 %v1826_v40, %v427_v22  ;;  %v805_v44 = vsel %vm677_vm9, %v561_v30, %v741_v35  ;;  %vm675_vm11 = vcmp.gt.f32.partialorder %v553_v36, 0.0  ;;  %v739_v45 = vmul.f32 0.2, %v553_v36  ;;  %v440_v46 = vpop.f32.mrb[17].mxu0  ;;  %v568_v47 = vpop.f32.mrb[17].mxu1 }
 0x117   :  { %vm646_vm12 = vcmp.gt.f32.partialorder %v436_v37, 0.0  ;;  %v771_v48 = vsel %vm643_vm10, %v425_v34, %v707_v38  ;;  %v710_v49 = vmul.f32 0.2, %v436_v37  ;;  %vm678_vm13 = vcmp.gt.f32.partialorder %v564_v39, 0.0  ;;  %v1582_v51 = vpop.f32.mrb[18].mxu0  ;;  %v1614_v55 = vpop.f32.mrb[18].mxu1 }
 0x118   :  { %v742_v50 = vmul.f32 0.2, %v564_v39  ;;  %v803_v52 = vsel %vm675_vm11, %v553_v36, %v739_v45  ;;  %vm644_vm14 = vcmp.gt.f32.partialorder %v428_v41, 0.0  ;;  %v708_v53 = vmul.f32 0.2, %v428_v41  ;;  %v443_v56 = vpop.f32.mrb[19].mxu0 }
 0x119   :  { %v556_v54 = vadd.f32 %v1826_v40, %v555_v26  ;;  %v774_v57 = vsel %vm646_vm12, %v436_v37, %v710_v49  ;;  %v449_v59 = vadd.f32 %v1581_v42, %v1826_v40  ;;  %v577_v60 = vadd.f32 %v1613_v43, %v1826_v40  ;;  %v571_v61 = vpop.f32.mrb[19].mxu1 }
 0x11a   :  { %v806_v58 = vsel %vm678_vm13, %v564_v39, %v742_v50  ;;  %v1354_v62 = vpack.c.bf16 %v774_v57, %v773_v33  ;;  %v772_v0 = vsel %vm644_vm14, %v428_v41, %v708_v53  ;;  %v441_v5 = vadd.f32 %v1826_v40, %v440_v46 }
 0x11b   :  { %v1434_v63 = vpack.c.bf16 %v806_v58, %v805_v44  ;;  %vm676_vm15 = vcmp.gt.f32.partialorder %v556_v54, 0.0  ;;  %v1349_v1 = vpack.c.bf16 %v772_v0, %v771_v48  ;;  %v740_v2 = vmul.f32 0.2, %v556_v54 }
 0x11c   :  { %vm649_vm0 = vcmp.gt.f32.partialorder %v449_v59, 0.0  ;;  %v713_v3 = vmul.f32 0.2, %v449_v59  ;;  %1482 = vst [vmem:[%s2000_s3 + $0x38] sm:$0xff] %v1354_v62   ;;  %vm681_vm1 = vcmp.gt.f32.partialorder %v577_v60, 0.0  ;;  %v569_v6 = vadd.f32 %v1826_v40, %v568_v47 }
 0x11d   :  { %1498 = vst [vmem:[%s2000_s3 + $0xb8] sm:$0xff] %v1434_v63   ;;  %v745_v4 = vmul.f32 0.2, %v577_v60  ;;  %1481 = vst [vmem:[%s2000_s3 + $0x30] sm:$0xff] %v1349_v1   ;;  %v804_v7 = vsel %vm676_vm15, %v556_v54, %v740_v2  ;;  %v452_v9 = vadd.f32 %v1582_v51, %v1826_v40  ;;  %v580_v10 = vadd.f32 %v1614_v55, %v1826_v40  ;;  %v1585_v11 = vpop.f32.mrb[20].mxu0  ;;  %v1617_v12 = vpop.f32.mrb[20].mxu1 }
 0x11e   :  { %v777_v8 = vsel %vm649_vm0, %v449_v59, %v713_v3  ;;  %v1429_v13 = vpack.c.bf16 %v804_v7, %v803_v52  ;;  %vm647_vm2 = vcmp.gt.f32.partialorder %v441_v5, 0.0  ;;  %v711_v15 = vmul.f32 0.2, %v441_v5  ;;  %v456_v16 = vpop.f32.mrb[21].mxu0  ;;  %v584_v17 = vpop.f32.mrb[21].mxu1 }
 0x11f   :  { %v809_v14 = vsel %vm681_vm1, %v577_v60, %v745_v4  ;;  %vm679_vm3 = vcmp.gt.f32.partialorder %v569_v6, 0.0  ;;  %v743_v18 = vmul.f32 0.2, %v569_v6  ;;  %vm650_vm4 = vcmp.gt.f32.partialorder %v452_v9, 0.0  ;;  %v1586_v23 = vpop.f32.mrb[22].mxu0  ;;  %v1618_v24 = vpop.f32.mrb[22].mxu1 }
 0x120   :  { %v714_v19 = vmul.f32 0.2, %v452_v9  ;;  %1497 = vst [vmem:[%s2000_s3 + $0xb0] sm:$0xff] %v1429_v13   ;;  %v775_v20 = vsel %vm647_vm2, %v441_v5, %v711_v15  ;;  %vm682_vm5 = vcmp.gt.f32.partialorder %v580_v10, 0.0  ;;  %v746_v21 = vmul.f32 0.2, %v580_v10 }
 0x121   :  { %v444_v22 = vadd.f32 %v1826_v40, %v443_v56  ;;  %v807_v25 = vsel %vm679_vm3, %v569_v6, %v743_v18  ;;  %v572_v27 = vadd.f32 %v1826_v40, %v571_v61  ;;  %v465_v28 = vadd.f32 %v1585_v11, %v1826_v40  ;;  %v459_v29 = vpop.f32.mrb[23].mxu0  ;;  %v587_v30 = vpop.f32.mrb[23].mxu1 }
 0x122   :  { %v778_v26 = vsel %vm650_vm4, %v452_v9, %v714_v19  ;;  %v810_v32 = vsel %vm682_vm5, %v580_v10, %v746_v21  ;;  %v593_v38 = vadd.f32 %v1617_v12, %v1826_v40  ;;  %v457_v39 = vadd.f32 %v1826_v40, %v456_v16 }
 0x123   :  { %v1364_v31 = vpack.c.bf16 %v778_v26, %v777_v8  ;;  %vm648_vm6 = vcmp.gt.f32.partialorder %v444_v22, 0.0  ;;  %v712_v33 = vmul.f32 0.2, %v444_v22  ;;  %v1444_v34 = vpack.c.bf16 %v810_v32, %v809_v14 }
 0x124   :  { %vm680_vm7 = vcmp.gt.f32.partialorder %v572_v27, 0.0  ;;  %v744_v35 = vmul.f32 0.2, %v572_v27  ;;  %vm653_vm8 = vcmp.gt.f32.partialorder %v465_v28, 0.0  ;;  %v717_v37 = vmul.f32 0.2, %v465_v28 }
 0x125   :  { %1484 = vst [vmem:[%s2000_s3 + $0x48] sm:$0xff] %v1364_v31   ;;  %v776_v36 = vsel %vm648_vm6, %v444_v22, %v712_v33  ;;  %1500 = vst [vmem:[%s2000_s3 + $0xc8] sm:$0xff] %v1444_v34   ;;  %v585_v43 = vadd.f32 %v1826_v40, %v584_v17  ;;  %v468_v44 = vadd.f32 %v1586_v23, %v1826_v40  ;;  %v1589_v45 = vpop.f32.mrb[24].mxu0  ;;  %v1621_v46 = vpop.f32.mrb[24].mxu1  ;;  %vm685_vm9 = vcmp.gt.f32.partialorder %v593_v38, 0.0 }
 0x126   :  { %v1359_v41 = vpack.c.bf16 %v776_v36, %v775_v20  ;;  %v808_v42 = vsel %vm680_vm7, %v572_v27, %v744_v35  ;;  %v749_v48 = vmul.f32 0.2, %v593_v38  ;;  %v472_v49 = vpop.f32.mrb[25].mxu0  ;;  %v600_v50 = vpop.f32.mrb[25].mxu1  ;;  %v781_v51 = vsel %vm653_vm8, %v465_v28, %v717_v37 }
 0x127   :  { %v1439_v47 = vpack.c.bf16 %v808_v42, %v807_v25  ;;  %vm651_vm10 = vcmp.gt.f32.partialorder %v457_v39, 0.0  ;;  %v715_v52 = vmul.f32 0.2, %v457_v39  ;;  %v747_v53 = vmul.f32 0.2, %v585_v43  ;;  %v1590_v56 = vpop.f32.mrb[26].mxu0 }
 0x128   :  { %1483 = vst [vmem:[%s2000_s3 + $0x40] sm:$0xff] %v1359_v41   ;;  %vm683_vm11 = vcmp.gt.f32.partialorder %v585_v43, 0.0  ;;  %vm654_vm12 = vcmp.gt.f32.partialorder %v468_v44, 0.0  ;;  %v718_v54 = vmul.f32 0.2, %v468_v44  ;;  %v596_v55 = vadd.f32 %v1618_v24, %v1826_v40  ;;  %v1622_v57 = vpop.f32.mrb[26].mxu1 }
 0x129   :  { %1499 = vst [vmem:[%s2000_s3 + $0xc0] sm:$0xff] %v1439_v47   ;;  %v813_v58 = vsel %vm685_vm9, %v593_v38, %v749_v48  ;;  %v779_v59 = vsel %vm651_vm10, %v457_v39, %v715_v52  ;;  %v460_v60 = vadd.f32 %v1826_v40, %v459_v29  ;;  %v588_v61 = vadd.f32 %v1826_v40, %v587_v30  ;;  %v475_v62 = vpop.f32.mrb[27].mxu0  ;;  %v603_v63 = vpop.f32.mrb[27].mxu1 }
 0x12a   :  { %v782_v0 = vsel %vm654_vm12, %v468_v44, %v718_v54  ;;  %vm686_vm13 = vcmp.gt.f32.partialorder %v596_v55, 0.0  ;;  %v750_v1 = vmul.f32 0.2, %v596_v55  ;;  %v481_v2 = vadd.f32 %v1589_v45, %v1826_v40 }
 0x12b   :  { %v1374_v3 = vpack.c.bf16 %v782_v0, %v781_v51  ;;  %vm652_vm14 = vcmp.gt.f32.partialorder %v460_v60, 0.0  ;;  %v716_v4 = vmul.f32 0.2, %v460_v60  ;;  %vm684_vm15 = vcmp.gt.f32.partialorder %v588_v61, 0.0 }
 0x12c   :  { %v814_v5 = vsel %vm686_vm13, %v596_v55, %v750_v1  ;;  %v748_v6 = vmul.f32 0.2, %v588_v61  ;;  %vm657_vm0 = vcmp.gt.f32.partialorder %v481_v2, 0.0  ;;  %v721_v7 = vmul.f32 0.2, %v481_v2 }
 0x12d   :  { %1486 = vst [vmem:[%s2000_s3 + $0x58] sm:$0xff] %v1374_v3   ;;  %v1454_v8 = vpack.c.bf16 %v814_v5, %v813_v58  ;;  %v780_v9 = vsel %vm652_vm14, %v460_v60, %v716_v4  ;;  %v609_v10 = vadd.f32 %v1621_v46, %v1826_v40  ;;  %v473_v11 = vadd.f32 %v1826_v40, %v472_v49  ;;  %v1593_v12 = vpop.f32.mrb[28].mxu0  ;;  %v1625_v13 = vpop.f32.mrb[28].mxu1 }
 0x12e   :  { %v811_v14 = vsel %vm683_vm11, %v585_v43, %v747_v53  ;;  %v1369_v15 = vpack.c.bf16 %v780_v9, %v779_v59  ;;  %v812_v16 = vsel %vm684_vm15, %v588_v61, %v748_v6  ;;  %v601_v17 = vadd.f32 %v1826_v40, %v600_v50  ;;  %v488_v18 = vpop.f32.mrb[29].mxu0  ;;  %v616_v19 = vpop.f32.mrb[29].mxu1 }
 0x12f   :  { %1502 = vst [vmem:[%s2000_s3 + $0xd8] sm:$0xff] %v1454_v8   ;;  %v1449_v20 = vpack.c.bf16 %v812_v16, %v811_v14  ;;  %vm689_vm1 = vcmp.gt.f32.partialorder %v609_v10, 0.0  ;;  %v753_v21 = vmul.f32 0.2, %v609_v10  ;;  %vm655_vm2 = vcmp.gt.f32.partialorder %v473_v11, 0.0  ;;  %v1594_v22 = vpop.f32.mrb[30].mxu0 }
 0x130   :  { %v1626_v23 = vpop.f32.mrb[30].mxu1  ;;  %1485 = vst [vmem:[%s2000_s3 + $0x50] sm:$0xff] %v1369_v15   ;;  %v785_v24 = vsel %vm657_vm0, %v481_v2, %v721_v7  ;;  %v719_v25 = vmul.f32 0.2, %v473_v11  ;;  %vm687_vm3 = vcmp.gt.f32.partialorder %v601_v17, 0.0  ;;  %v484_v26 = vadd.f32 %v1590_v56, %v1826_v40  ;;  %v491_v27 = vpop.f32.mrb[31].mxu0 }
 0x131   :  { %1501 = vst [vmem:[%s2000_s3 + $0xd0] sm:$0xff] %v1449_v20   ;;  %v751_v28 = vmul.f32 0.2, %v601_v17  ;;  %v612_v29 = vadd.f32 %v1622_v57, %v1826_v40  ;;  %v476_v30 = vadd.f32 %v1826_v40, %v475_v62  ;;  %v604_v31 = vadd.f32 %v1826_v40, %v603_v63  ;;  %v619_v32 = vpop.f32.mrb[31].mxu1 }
 0x132   :  { %v817_v33 = vsel %vm689_vm1, %v609_v10, %v753_v21  ;;  %v783_v34 = vsel %vm655_vm2, %v473_v11, %v719_v25  ;;  %vm658_vm4 = vcmp.gt.f32.partialorder %v484_v26, 0.0  ;;  %v722_v35 = vmul.f32 0.2, %v484_v26 }
 0x133   :  { %vm690_vm5 = vcmp.gt.f32.partialorder %v612_v29, 0.0  ;;  %v754_v36 = vmul.f32 0.2, %v612_v29  ;;  %vm656_vm6 = vcmp.gt.f32.partialorder %v476_v30, 0.0  ;;  %v720_v37 = vmul.f32 0.2, %v476_v30 }
 0x134   :  { %v786_v38 = vsel %vm658_vm4, %v484_v26, %v722_v35  ;;  %vm688_vm7 = vcmp.gt.f32.partialorder %v604_v31, 0.0  ;;  %v752_v39 = vmul.f32 0.2, %v604_v31  ;;  %v497_v41 = vadd.f32 %v1593_v12, %v1826_v40 }
 0x135   :  { %v1384_v42 = vpack.c.bf16 %v786_v38, %v785_v24  ;;  %v818_v43 = vsel %vm690_vm5, %v612_v29, %v754_v36  ;;  %v784_v44 = vsel %vm656_vm6, %v476_v30, %v720_v37  ;;  %v625_v45 = vadd.f32 %v1625_v13, %v1826_v40 }
 0x136   :  { %v815_v46 = vsel %vm687_vm3, %v601_v17, %v751_v28  ;;  %v1464_v47 = vpack.c.bf16 %v818_v43, %v817_v33  ;;  %v1379_v48 = vpack.c.bf16 %v784_v44, %v783_v34  ;;  %v816_v49 = vsel %vm688_vm7, %v604_v31, %v752_v39 }
 0x137   :  { %1488 = vst [vmem:[%s2000_s3 + $0x68] sm:$0xff] %v1384_v42   ;;  %v1459_v50 = vpack.c.bf16 %v816_v49, %v815_v46  ;;  %vm661_vm8 = vcmp.gt.f32.partialorder %v497_v41, 0.0  ;;  %v725_v51 = vmul.f32 0.2, %v497_v41  ;;  %v757_v52 = vmul.f32 0.2, %v625_v45 }
 0x138   :  { %1504 = vst [vmem:[%s2000_s3 + $0xe8] sm:$0xff] %v1464_v47   ;;  %1487 = vst [vmem:[%s2000_s3 + $0x60] sm:$0xff] %v1379_v48   ;;  %v489_v53 = vadd.f32 %v1826_v40, %v488_v18  ;;  %v617_v54 = vadd.f32 %v1826_v40, %v616_v19  ;;  %v500_v55 = vadd.f32 %v1594_v22, %v1826_v40  ;;  %vm693_vm9 = vcmp.gt.f32.partialorder %v625_v45, 0.0 }
 0x139   :  { %v628_v56 = vadd.f32 %v1626_v23, %v1826_v40  ;;  %1503 = vst [vmem:[%s2000_s3 + $0xe0] sm:$0xff] %v1459_v50   ;;  %v492_v57 = vadd.f32 %v1826_v40, %v491_v27  ;;  %v620_v58 = vadd.f32 %v1826_v40, %v619_v32  ;;  %v789_v59 = vsel %vm661_vm8, %v497_v41, %v725_v51 }
 0x13a   :  { %vm659_vm10 = vcmp.gt.f32.partialorder %v489_v53, 0.0  ;;  %v723_v60 = vmul.f32 0.2, %v489_v53  ;;  %v755_v61 = vmul.f32 0.2, %v617_v54  ;;  %vm662_vm11 = vcmp.gt.f32.partialorder %v500_v55, 0.0 }
 0x13b   :  { %v726_v62 = vmul.f32 0.2, %v500_v55  ;;  %vm694_vm12 = vcmp.gt.f32.partialorder %v628_v56, 0.0  ;;  %v758_v63 = vmul.f32 0.2, %v628_v56  ;;  %v821_v0 = vsel %vm693_vm9, %v625_v45, %v757_v52 }
 0x13c   :  { %vm691_vm13 = vcmp.gt.f32.partialorder %v617_v54, 0.0  ;;  %vm660_vm14 = vcmp.gt.f32.partialorder %v492_v57, 0.0  ;;  %v724_v1 = vmul.f32 0.2, %v492_v57  ;;  %vm692_vm15 = vcmp.gt.f32.partialorder %v620_v58, 0.0 }
 0x13d   :  { %v790_v2 = vsel %vm662_vm11, %v500_v55, %v726_v62  ;;  %v822_v3 = vsel %vm694_vm12, %v628_v56, %v758_v63  ;;  %v756_v4 = vmul.f32 0.2, %v620_v58  ;;  %v787_v5 = vsel %vm659_vm10, %v489_v53, %v723_v60 }
 0x13e   :  { %v1394_v6 = vpack.c.bf16 %v790_v2, %v789_v59  ;;  %v1474_v7 = vpack.c.bf16 %v822_v3, %v821_v0  ;;  %v788_v40 = vsel %vm660_vm14, %v492_v57, %v724_v1  ;;  %v819_v8 = vsel %vm691_vm13, %v617_v54, %v755_v61 }
 0x13f   :  { %v1389_v9 = vpack.c.bf16 %v788_v40, %v787_v5  ;;  %v820_v10 = vsel %vm692_vm15, %v620_v58, %v756_v4 }
 0x140   :  { %1490 = vst [vmem:[%s2000_s3 + $0x78] sm:$0xff] %v1394_v6   ;;  %1506 = vst [vmem:[%s2000_s3 + $0xf8] sm:$0xff] %v1474_v7   ;;  %v1469_v11 = vpack.c.bf16 %v820_v10, %v819_v8 }
 0x141   :  { %1489 = vst [vmem:[%s2000_s3 + $0x70] sm:$0xff] %v1389_v9  }
 0x142   :  { %1505 = vst [vmem:[%s2000_s3 + $0xf0] sm:$0xff] %v1469_v11  }

// kernel: discriminator_forward.6
= control target key start
LH: loop header
LB: loop body
LE: loop exit
PB: predicated region body
PF: predicated region fallthrough
CT: control target
= control target key end

     0   :  { %s2463_s1 = inlined_call_operand.vmem [shape: bf16[1024,128], index: 1, kind: input, shape index: {}]   ;;  %s2464_s0 = inlined_call_operand.vmem [shape: bf16[128,1024], index: 0, kind: input, shape index: {}]   ;;  %s2465_s2 = inlined_call_operand.vmem [shape: f32[1,128], index: 2, kind: input, shape index: {}]   ;;  %s2466_s3 = inlined_call_operand.vmem [shape: bf16[128,128], index: 3, kind: output, shape index: {}]  }
   0x1   :  { %v1902_v0 = vld [vmem:[%s2463_s1 + $0x40] sm:$0xff]   ;;  %v1906_v4 = vld [vmem:[%s2463_s1 + $0x48] sm:$0xff]   ;;  %v1910_v8 = vld [vmem:[%s2463_s1 + $0x50] sm:$0xff]  }
   0x2   :  { %v1903_v1 = vld [vmem:[%s2463_s1 + $0xc0] sm:$0xff]   ;;  %1646 = vmatprep.subr.bf16.mxu0 %v1902_v0  ;;  %v1907_v5 = vld [vmem:[%s2463_s1 + $0xc8] sm:$0xff]   ;;  %v1911_v9 = vld [vmem:[%s2463_s1 + $0xd0] sm:$0xff]  }
   0x3   :  { %v1904_v2 = vld [vmem:[%s2463_s1] sm:$0xff]   ;;  %1710 = vmatprep.subr.bf16.mxu1 %v1903_v1  ;;  %v1908_v6 = vld [vmem:[%s2463_s1 + $0x8] sm:$0xff]   ;;  %v1912_v10 = vld [vmem:[%s2463_s1 + $0x10] sm:$0xff]  }
   0x4   :  { %v1905_v3 = vld [vmem:[%s2463_s1 + $0x80] sm:$0xff]   ;;  %1647 = vmatpush3.bf16.msra.mxu0 %v1904_v2  ;;  %v1909_v7 = vld [vmem:[%s2463_s1 + $0x88] sm:$0xff]   ;;  %v1913_v11 = vld [vmem:[%s2463_s1 + $0x90] sm:$0xff]  }
   0x5   :  { %1711 = vmatpush3.bf16.msra.mxu1 %v1905_v3  ;;  %1648 = vmatprep.subr.bf16.mxu0 %v1906_v4  ;;  %v1914_v12 = vld [vmem:[%s2463_s1 + $0x58] sm:$0xff]   ;;  %v1918_v16 = vld [vmem:[%s2463_s1 + $0x60] sm:$0xff]   ;;  %v1922_v20 = vld [vmem:[%s2463_s1 + $0x68] sm:$0xff]  }
   0x6   :  { %1712 = vmatprep.subr.bf16.mxu1 %v1907_v5  ;;  %v1915_v13 = vld [vmem:[%s2463_s1 + $0xd8] sm:$0xff]   ;;  %v1919_v17 = vld [vmem:[%s2463_s1 + $0xe0] sm:$0xff]   ;;  %v1923_v21 = vld [vmem:[%s2463_s1 + $0xe8] sm:$0xff]  }
   0x7   :  { %v1916_v14 = vld [vmem:[%s2463_s1 + $0x18] sm:$0xff]   ;;  %v1920_v18 = vld [vmem:[%s2463_s1 + $0x20] sm:$0xff]   ;;  %v1924_v22 = vld [vmem:[%s2463_s1 + $0x28] sm:$0xff]  }
   0x8   :  { %1649 = vmatpush3.bf16.msra.mxu0 %v1908_v6  ;;  %v1917_v15 = vld [vmem:[%s2463_s1 + $0x98] sm:$0xff]   ;;  %v1921_v19 = vld [vmem:[%s2463_s1 + $0xa0] sm:$0xff]   ;;  %v1925_v23 = vld [vmem:[%s2463_s1 + $0xa8] sm:$0xff]  }
   0x9   :  { %1713 = vmatpush3.bf16.msra.mxu1 %v1909_v7  ;;  %1650 = vmatprep.subr.bf16.mxu0 %v1910_v8  ;;  %v1926_v24 = vld [vmem:[%s2463_s1 + $0x70] sm:$0xff]   ;;  %v1930_v28 = vld [vmem:[%s2463_s1 + $0x78] sm:$0xff]   ;;  %v15_v32 = vld [vmem:[%s2464_s0] sm:$0xff] }
   0xa   :  { %1714 = vmatprep.subr.bf16.mxu1 %v1911_v9  ;;  %v1927_v25 = vld [vmem:[%s2463_s1 + $0xf0] sm:$0xff]   ;;  %v1931_v29 = vld [vmem:[%s2463_s1 + $0xf8] sm:$0xff]   ;;  %v19_v33 = vld [vmem:[%s2464_s0 + $0x20] sm:$0xff] }
   0xb   :  { %v1928_v26 = vld [vmem:[%s2463_s1 + $0x30] sm:$0xff]   ;;  %v1932_v30 = vld [vmem:[%s2463_s1 + $0x38] sm:$0xff]   ;;  %v16_v34 = vld [vmem:[%s2464_s0 + $0x8] sm:$0xff]  ;;  %v1439_v35 = vcombine.low %v15_v32, %v19_v33  ;;  %v1440_v36 = vcombine.high %v15_v32, %v19_v33 }
   0xc   :  { %1651 = vmatpush3.bf16.msra.mxu0 %v1912_v10  ;;  %v1929_v27 = vld [vmem:[%s2463_s1 + $0xb0] sm:$0xff]   ;;  %v1933_v31 = vld [vmem:[%s2463_s1 + $0xb8] sm:$0xff]   ;;  %v20_v37 = vld [vmem:[%s2464_s0 + $0x28] sm:$0xff] }
   0xd   :  { %1715 = vmatpush3.bf16.msra.mxu1 %v1913_v11  ;;  %1652 = vmatprep.subr.bf16.mxu0 %v1914_v12  ;;  %v1441_v38 = vcombine.low %v16_v34, %v20_v37  ;;  %v1442_v39 = vcombine.high %v16_v34, %v20_v37  ;;  %v1934_v40 = vld [vmem:[%s2463_s1 + $0x140] sm:$0xff]   ;;  %v24_v47 = vld [vmem:[%s2464_s0 + $0x48] sm:$0xff]  ;;  %v1942_v62 = vld [vmem:[%s2463_s1 + $0x150] sm:$0xff]  }
   0xe   :  { %1716 = vmatprep.subr.bf16.mxu1 %v1915_v13  ;;  %950 = vmatprep.mubr.bf16.mxu0 %v1440_v36  ;;  %v1935_v41 = vld [vmem:[%s2463_s1 + $0x100] sm:$0xff]   ;;  %v28_v48 = vld [vmem:[%s2464_s0 + $0x68] sm:$0xff]  ;;  %v1943_v63 = vld [vmem:[%s2463_s1 + $0x110] sm:$0xff]  }
   0xf   :  { %1047 = vmatprep.mubr.bf16.mxu1 %v1442_v39  ;;  %v1936_v42 = vld [vmem:[%s2463_s1 + $0x1c0] sm:$0xff]   ;;  %v1450_v49 = vcombine.high %v24_v47, %v28_v48  ;;  %v1938_v50 = vld [vmem:[%s2463_s1 + $0x148] sm:$0xff]   ;;  %v1449_v53 = vcombine.low %v24_v47, %v28_v48  ;;  %v1944_v0 = vld [vmem:[%s2463_s1 + $0x1d0] sm:$0xff]  }
  0x10   :  { %1653 = vmatpush3.bf16.msra.mxu0 %v1916_v14  ;;  %v1937_v43 = vld [vmem:[%s2463_s1 + $0x180] sm:$0xff]   ;;  %v1939_v52 = vld [vmem:[%s2463_s1 + $0x108] sm:$0xff]   ;;  %v1945_v1 = vld [vmem:[%s2463_s1 + $0x190] sm:$0xff]  }
  0x11   :  { %1717 = vmatpush3.bf16.msra.mxu1 %v1917_v15  ;;  %1654 = vmatprep.subr.bf16.mxu0 %v1918_v16  ;;  %v23_v44 = vld [vmem:[%s2464_s0 + $0x40] sm:$0xff]  ;;  %v1940_v54 = vld [vmem:[%s2463_s1 + $0x1c8] sm:$0xff]   ;;  %v1946_v10 = vld [vmem:[%s2463_s1 + $0x158] sm:$0xff]  }
  0x12   :  { %1718 = vmatprep.subr.bf16.mxu1 %v1919_v17  ;;  %v27_v45 = vld [vmem:[%s2464_s0 + $0x60] sm:$0xff]  ;;  %v1941_v55 = vld [vmem:[%s2463_s1 + $0x188] sm:$0xff]   ;;  %v1947_v11 = vld [vmem:[%s2463_s1 + $0x118] sm:$0xff]  }
  0x13   :  { %v1448_v46 = vcombine.high %v23_v44, %v27_v45  ;;  %v1447_v51 = vcombine.low %v23_v44, %v27_v45  ;;  %v31_v56 = vld [vmem:[%s2464_s0 + $0x80] sm:$0xff]  ;;  %v32_v58 = vld [vmem:[%s2464_s0 + $0x88] sm:$0xff]  ;;  %v1948_v12 = vld [vmem:[%s2463_s1 + $0x1d8] sm:$0xff]  }
  0x14   :  { %1655 = vmatpush3.bf16.msra.mxu0 %v1920_v18  ;;  %v35_v57 = vld [vmem:[%s2464_s0 + $0xa0] sm:$0xff]  ;;  %v36_v59 = vld [vmem:[%s2464_s0 + $0xa8] sm:$0xff]  ;;  %v1949_v13 = vld [vmem:[%s2463_s1 + $0x198] sm:$0xff]  }
  0x15   :  { %1719 = vmatpush3.bf16.msra.mxu1 %v1921_v19  ;;  %1656 = vmatprep.subr.bf16.mxu0 %v1922_v20  ;;  %v1456_v60 = vcombine.high %v31_v56, %v35_v57  ;;  %v1458_v61 = vcombine.high %v32_v58, %v36_v59  ;;  %v1455_v2 = vcombine.low %v31_v56, %v35_v57  ;;  %v39_v3 = vld [vmem:[%s2464_s0 + $0xc0] sm:$0xff]  ;;  %v40_v5 = vld [vmem:[%s2464_s0 + $0xc8] sm:$0xff]  ;;  %v1959_v39 = vld [vmem:[%s2463_s1 + $0x130] sm:$0xff]  }
  0x16   :  { %1720 = vmatprep.subr.bf16.mxu1 %v1923_v21  ;;  %v43_v4 = vld [vmem:[%s2464_s0 + $0xe0] sm:$0xff]  ;;  %v1457_v6 = vcombine.low %v32_v58, %v36_v59  ;;  %v44_v8 = vld [vmem:[%s2464_s0 + $0xe8] sm:$0xff]  ;;  %v1963_v48 = vld [vmem:[%s2463_s1 + $0x138] sm:$0xff]  }
  0x17   :  { %v1464_v7 = vcombine.high %v39_v3, %v43_v4  ;;  %v1466_v9 = vcombine.high %v40_v5, %v44_v8  ;;  %v47_v14 = vld [vmem:[%s2464_s0 + $0x100] sm:$0xff]  ;;  %v48_v16 = vld [vmem:[%s2464_s0 + $0x108] sm:$0xff]  ;;  %v1463_v19 = vcombine.low %v39_v3, %v43_v4  ;;  %v1465_v21 = vcombine.low %v40_v5, %v44_v8  ;;  %v26_v8 = vld [vmem:[%s2464_s0 + $0x58] sm:$0xff] }
  0x18   :  { %1657 = vmatpush3.bf16.msra.mxu0 %v1924_v22  ;;  %v51_v15 = vld [vmem:[%s2464_s0 + $0x120] sm:$0xff]  ;;  %v52_v17 = vld [vmem:[%s2464_s0 + $0x128] sm:$0xff] }
  0x19   :  { %1721 = vmatpush3.bf16.msra.mxu1 %v1925_v23  ;;  %1658 = vmatprep.subr.bf16.mxu0 %v1926_v24  ;;  %v1950_v18 = vld [vmem:[%s2463_s1 + $0x160] sm:$0xff]   ;;  %v1472_v22 = vcombine.high %v47_v14, %v51_v15  ;;  %v1474_v24 = vcombine.high %v48_v16, %v52_v17  ;;  %v1956_v32 = vld [vmem:[%s2463_s1 + $0x1e8] sm:$0xff]   ;;  %v1471_v34 = vcombine.low %v47_v14, %v51_v15  ;;  %v33_v14 = vld [vmem:[%s2464_s0 + $0x90] sm:$0xff] }
  0x1a   :  { %1722 = vmatprep.subr.bf16.mxu1 %v1927_v25  ;;  %v1951_v20 = vld [vmem:[%s2463_s1 + $0x120] sm:$0xff]   ;;  %v1957_v33 = vld [vmem:[%s2463_s1 + $0x1a8] sm:$0xff]   ;;  %v37_v15 = vld [vmem:[%s2464_s0 + $0xb0] sm:$0xff] }
  0x1b   :  { %v1952_v23 = vld [vmem:[%s2463_s1 + $0x1e0] sm:$0xff]   ;;  %v64_v44 = vld [vmem:[%s2464_s0 + $0x188] sm:$0xff] }
  0x1c   :  { %1659 = vmatpush3.bf16.msra.mxu0 %v1928_v26  ;;  %v1953_v25 = vld [vmem:[%s2463_s1 + $0x1a0] sm:$0xff]   ;;  %v68_v45 = vld [vmem:[%s2464_s0 + $0x1a8] sm:$0xff] }
  0x1d   :  { %1723 = vmatpush3.bf16.msra.mxu1 %v1929_v27  ;;  %1660 = vmatprep.subr.bf16.mxu0 %v1930_v28  ;;  %v55_v26 = vld [vmem:[%s2464_s0 + $0x140] sm:$0xff]  ;;  %v1954_v28 = vld [vmem:[%s2463_s1 + $0x168] sm:$0xff]   ;;  %v1489_v59 = vcombine.low %v64_v44, %v68_v45 }
  0x1e   :  { %1724 = vmatprep.subr.bf16.mxu1 %v1931_v29  ;;  %v59_v27 = vld [vmem:[%s2464_s0 + $0x160] sm:$0xff]  ;;  %v56_v29 = vld [vmem:[%s2464_s0 + $0x148] sm:$0xff] }
  0x1f   :  { %v1480_v36 = vcombine.high %v55_v26, %v59_v27  ;;  %v1479_v47 = vcombine.low %v55_v26, %v59_v27  ;;  %v72_v56 = vld [vmem:[%s2464_s0 + $0x1c8] sm:$0xff]  ;;  %v1459_v26 = vcombine.low %v33_v14, %v37_v15 }
  0x20   :  { %1661 = vmatpush3.bf16.msra.mxu0 %v1932_v30  ;;  %v60_v30 = vld [vmem:[%s2464_s0 + $0x168] sm:$0xff] }
  0x21   :  { %1725 = vmatpush3.bf16.msra.mxu1 %v1933_v31  ;;  %1774 = vmatprep.subr.bf16.mxu0 %v1934_v40  ;;  %v1955_v31 = vld [vmem:[%s2463_s1 + $0x128] sm:$0xff]   ;;  %v1482_v37 = vcombine.high %v56_v29, %v60_v30  ;;  %v1960_v40 = vld [vmem:[%s2463_s1 + $0x1f0] sm:$0xff]  }
  0x22   :  { %1838 = vmatprep.subr.bf16.mxu1 %v1936_v42  ;;  %v67_v42 = vld [vmem:[%s2464_s0 + $0x1a0] sm:$0xff]  ;;  %v76_v57 = vld [vmem:[%s2464_s0 + $0x1e8] sm:$0xff] }
  0x23   :  { %951 = vmatmul.mubr.bf16.vlgmr.msra.gmra.mrb[0].mxu0 %v1439_v35  ;;  %v1473_v35 = vcombine.low %v48_v16, %v52_v17  ;;  %v1497_v3 = vcombine.low %v72_v56, %v76_v57  ;;  %v34_v16 = vld [vmem:[%s2464_s0 + $0x98] sm:$0xff] }
  0x24   :  { %1048 = vmatmul.mubr.bf16.vlgmr.msra.gmra.mrb[0].mxu1 %v1441_v38  ;;  %1775 = vmatpush3.bf16.msra.mxu0 %v1935_v41  ;;  %v1958_v38 = vld [vmem:[%s2463_s1 + $0x170] sm:$0xff]   ;;  %v63_v41 = vld [vmem:[%s2464_s0 + $0x180] sm:$0xff]  ;;  %v38_v17 = vld [vmem:[%s2464_s0 + $0xb8] sm:$0xff] }
  0x25   :  { %1839 = vmatpush3.bf16.msra.mxu1 %v1937_v43  ;;  %958 = vmatprep.mubr.bf16.mxu0 %v1448_v46  ;;  %v1961_v43 = vld [vmem:[%s2463_s1 + $0x1b0] sm:$0xff]   ;;  %v1962_v46 = vld [vmem:[%s2463_s1 + $0x178] sm:$0xff]   ;;  %v1487_v58 = vcombine.low %v63_v41, %v67_v42  ;;  %v1461_v27 = vcombine.low %v34_v16, %v38_v17 }
  0x26   :  { %1055 = vmatprep.mubr.bf16.mxu1 %v1450_v49  ;;  %1776 = vmatprep.subr.bf16.mxu0 %v1938_v50  ;;  %v1481_v49 = vcombine.low %v56_v29, %v60_v30  ;;  %v1488_v50 = vcombine.high %v63_v41, %v67_v42  ;;  %v49_v30 = vld [vmem:[%s2464_s0 + $0x110] sm:$0xff]  ;;  %v62_v41 = vld [vmem:[%s2464_s0 + $0x178] sm:$0xff] }
  0x27   :  { %1840 = vmatprep.subr.bf16.mxu1 %v1940_v54  ;;  %v71_v54 = vld [vmem:[%s2464_s0 + $0x1c0] sm:$0xff] }
  0x28   :  { %1777 = vmatpush3.bf16.msra.mxu0 %v1939_v52  ;;  %v1490_v52 = vcombine.high %v64_v44, %v68_v45 }
  0x29   :  { %1841 = vmatpush3.bf16.msra.mxu1 %v1941_v55  ;;  %1778 = vmatprep.subr.bf16.mxu0 %v1942_v62  ;;  %v75_v55 = vld [vmem:[%s2464_s0 + $0x1e0] sm:$0xff]  ;;  %v17_v62 = vld [vmem:[%s2464_s0 + $0x10] sm:$0xff] }
  0x2a   :  { %1842 = vmatprep.subr.bf16.mxu1 %v1944_v0  ;;  %v18_v0 = vld [vmem:[%s2464_s0 + $0x18] sm:$0xff] }
  0x2b   :  { %959 = vmatmul.mubr.bf16.gmra.mrb[4].mxu0 %v1447_v51  ;;  %v1964_v51 = vld [vmem:[%s2463_s1 + $0x1f8] sm:$0xff]  }
  0x2c   :  { %1056 = vmatmul.mubr.bf16.gmra.mrb[4].mxu1 %v1449_v53  ;;  %966 = vmatprep.mubr.bf16.mxu0 %v1456_v60  ;;  %v1965_v53 = vld [vmem:[%s2463_s1 + $0x1b8] sm:$0xff]   ;;  %v1496_v60 = vcombine.high %v71_v54, %v75_v55 }
  0x2d   :  { %1063 = vmatprep.mubr.bf16.mxu1 %v1458_v61  ;;  %1779 = vmatpush3.bf16.msra.mxu0 %v1943_v63  ;;  %v1498_v61 = vcombine.high %v72_v56, %v76_v57  ;;  %v21_v63 = vld [vmem:[%s2464_s0 + $0x30] sm:$0xff]  ;;  %v74_v56 = vld [vmem:[%s2464_s0 + $0x1d8] sm:$0xff] }
  0x2e   :  { %1843 = vmatpush3.bf16.msra.mxu1 %v1945_v1  ;;  %1780 = vmatprep.subr.bf16.mxu0 %v1946_v10  ;;  %v22_v1 = vld [vmem:[%s2464_s0 + $0x38] sm:$0xff]  ;;  %v1444_v4 = vcombine.high %v17_v62, %v21_v63  ;;  %v1443_v10 = vcombine.low %v17_v62, %v21_v63 }
  0x2f   :  { %1844 = vmatprep.subr.bf16.mxu1 %v1948_v12  ;;  %v1446_v5 = vcombine.high %v18_v0, %v22_v1  ;;  %v78_v57 = vld [vmem:[%s2464_s0 + $0x1f8] sm:$0xff] }
  0x30   :  { %v1501_v63 = vcombine.low %v74_v56, %v78_v57 }
  0x31   :  { %1781 = vmatpush3.bf16.msra.mxu0 %v1947_v11  ;;  %v1445_v11 = vcombine.low %v18_v0, %v22_v1 }
  0x32   :  { %1845 = vmatpush3.bf16.msra.mxu1 %v1949_v13  ;;  %1782 = vmatprep.subr.bf16.mxu0 %v1950_v18 }
  0x33   :  { %967 = vmatmul.mubr.bf16.gmra.mrb[8].mxu0 %v1455_v2  ;;  %1846 = vmatprep.subr.bf16.mxu1 %v1952_v23  ;;  %v1495_v2 = vcombine.low %v71_v54, %v75_v55  ;;  %v45_v23 = vld [vmem:[%s2464_s0 + $0xf0] sm:$0xff] }
  0x34   :  { %1064 = vmatmul.mubr.bf16.gmra.mrb[8].mxu1 %v1457_v6  ;;  %974 = vmatprep.mubr.bf16.mxu0 %v1464_v7  ;;  %v25_v6 = vld [vmem:[%s2464_s0 + $0x50] sm:$0xff] }
  0x35   :  { %1071 = vmatprep.mubr.bf16.mxu1 %v1466_v9  ;;  %1783 = vmatpush3.bf16.msra.mxu0 %v1951_v20  ;;  %v29_v7 = vld [vmem:[%s2464_s0 + $0x70] sm:$0xff]  ;;  %v30_v9 = vld [vmem:[%s2464_s0 + $0x78] sm:$0xff]  ;;  %v1460_v20 = vcombine.high %v33_v14, %v37_v15 }
  0x36   :  { %1847 = vmatpush3.bf16.msra.mxu1 %v1953_v25  ;;  %1784 = vmatprep.subr.bf16.mxu0 %v1954_v28  ;;  %v1452_v12 = vcombine.high %v25_v6, %v29_v7  ;;  %v1454_v13 = vcombine.high %v26_v8, %v30_v9  ;;  %v1451_v18 = vcombine.low %v25_v6, %v29_v7  ;;  %v46_v25 = vld [vmem:[%s2464_s0 + $0xf8] sm:$0xff]  ;;  %v73_v54 = vld [vmem:[%s2464_s0 + $0x1d0] sm:$0xff] }
  0x37   :  { %1848 = vmatprep.subr.bf16.mxu1 %v1956_v32  ;;  %v50_v32 = vld [vmem:[%s2464_s0 + $0x118] sm:$0xff]  ;;  %v77_v55 = vld [vmem:[%s2464_s0 + $0x1f0] sm:$0xff] }
  0x38   :  { %v1499_v62 = vcombine.low %v73_v54, %v77_v55 }
  0x39   :  { %1785 = vmatpush3.bf16.msra.mxu0 %v1955_v31  ;;  %v53_v31 = vld [vmem:[%s2464_s0 + $0x130] sm:$0xff] }
  0x3a   :  { %1849 = vmatpush3.bf16.msra.mxu1 %v1957_v33  ;;  %1786 = vmatprep.subr.bf16.mxu0 %v1958_v38  ;;  %v54_v33 = vld [vmem:[%s2464_s0 + $0x138] sm:$0xff]  ;;  %v57_v38 = vld [vmem:[%s2464_s0 + $0x150] sm:$0xff]  ;;  %v1475_v42 = vcombine.low %v49_v30, %v53_v31 }
  0x3b   :  { %975 = vmatmul.mubr.bf16.gmra.mrb[12].mxu0 %v1463_v19  ;;  %1850 = vmatprep.subr.bf16.mxu1 %v1960_v40  ;;  %v1453_v19 = vcombine.low %v26_v8, %v30_v9  ;;  %v58_v40 = vld [vmem:[%s2464_s0 + $0x158] sm:$0xff] }
  0x3c   :  { %1072 = vmatmul.mubr.bf16.gmra.mrb[12].mxu1 %v1465_v21  ;;  %982 = vmatprep.mubr.bf16.mxu0 %v1472_v22  ;;  %v1462_v21 = vcombine.high %v34_v16, %v38_v17  ;;  %v41_v22 = vld [vmem:[%s2464_s0 + $0xd0] sm:$0xff]  ;;  %v1486_v45 = vcombine.high %v58_v40, %v62_v41 }
  0x3d   :  { %1079 = vmatprep.mubr.bf16.mxu1 %v1474_v24  ;;  %1787 = vmatpush3.bf16.msra.mxu0 %v1959_v39  ;;  %v42_v24 = vld [vmem:[%s2464_s0 + $0xd8] sm:$0xff]  ;;  %v1468_v28 = vcombine.high %v41_v22, %v45_v23  ;;  %v61_v39 = vld [vmem:[%s2464_s0 + $0x170] sm:$0xff] }
  0x3e   :  { %1851 = vmatpush3.bf16.msra.mxu1 %v1961_v43  ;;  %1788 = vmatprep.subr.bf16.mxu0 %v1962_v46  ;;  %v1470_v29 = vcombine.high %v42_v24, %v46_v25  ;;  %v1477_v43 = vcombine.low %v50_v32, %v54_v33  ;;  %v1484_v44 = vcombine.high %v57_v38, %v61_v39  ;;  %v65_v46 = vld [vmem:[%s2464_s0 + $0x190] sm:$0xff] }
  0x3f   :  { %1852 = vmatprep.subr.bf16.mxu1 %v1964_v51  ;;  %v1485_v51 = vcombine.low %v58_v40, %v62_v41 }
  0x41   :  { %1789 = vmatpush3.bf16.msra.mxu0 %v1963_v48  ;;  %v66_v48 = vld [vmem:[%s2464_s0 + $0x198] sm:$0xff] }
  0x42   :  { %1853 = vmatpush3.bf16.msra.mxu1 %v1965_v53 }
  0x43   :  { %983 = vmatmul.mubr.bf16.gmra.mrb[16].mxu0 %v1471_v34  ;;  %v1467_v34 = vcombine.low %v41_v22, %v45_v23 }
  0x44   :  { %1080 = vmatmul.mubr.bf16.gmra.mrb[16].mxu1 %v1473_v35  ;;  %990 = vmatprep.mubr.bf16.mxu0 %v1480_v36  ;;  %v1469_v35 = vcombine.low %v42_v24, %v46_v25  ;;  %v1476_v36 = vcombine.high %v49_v30, %v53_v31 }
  0x45   :  { %1087 = vmatprep.mubr.bf16.mxu1 %v1482_v37  ;;  %v1478_v37 = vcombine.high %v50_v32, %v54_v33 }
  0x4b   :  { %991 = vmatmul.mubr.bf16.gmra.mrb[20].mxu0 %v1479_v47  ;;  %v69_v47 = vld [vmem:[%s2464_s0 + $0x1b0] sm:$0xff] }
  0x4c   :  { %1088 = vmatmul.mubr.bf16.gmra.mrb[20].mxu1 %v1481_v49  ;;  %998 = vmatprep.mubr.bf16.mxu0 %v1488_v50  ;;  %v70_v49 = vld [vmem:[%s2464_s0 + $0x1b8] sm:$0xff]  ;;  %v1483_v50 = vcombine.low %v57_v38, %v61_v39 }
  0x4d   :  { %1095 = vmatprep.mubr.bf16.mxu1 %v1490_v52  ;;  %v1492_v52 = vcombine.high %v65_v46, %v69_v47  ;;  %v1494_v53 = vcombine.high %v66_v48, %v70_v49 }
  0x53   :  { %999 = vmatmul.mubr.bf16.gmra.mrb[24].mxu0 %v1487_v58  ;;  %v1491_v58 = vcombine.low %v65_v46, %v69_v47 }
  0x54   :  { %1096 = vmatmul.mubr.bf16.gmra.mrb[24].mxu1 %v1489_v59  ;;  %1006 = vmatprep.mubr.bf16.mxu0 %v1496_v60  ;;  %v1493_v59 = vcombine.low %v66_v48, %v70_v49  ;;  %v1500_v60 = vcombine.high %v73_v54, %v77_v55 }
  0x55   :  { %1103 = vmatprep.mubr.bf16.mxu1 %v1498_v61  ;;  %v1502_v61 = vcombine.high %v74_v56, %v78_v57 }
  0x5b   :  { %1007 = vmatmul.mubr.bf16.gmra.mrb[28].mxu0 %v1495_v2  ;;  %v2373_v2 = vld [vmem:[%s2465_s2] ss:$0 sm:$0xff] }
  0x5c   :  { %1104 = vmatmul.mubr.bf16.gmra.mrb[28].mxu1 %v1497_v3  ;;  %1144 = vmatprep.mubr.bf16.mxu0 %v1444_v4 }
  0x5d   :  { %1241 = vmatprep.mubr.bf16.mxu1 %v1446_v5 }
  0x63   :  { %1145 = vmatmul.mubr.bf16.vlgmr.msra.gmra.mrb[32].mxu0 %v1443_v10 }
  0x64   :  { %1242 = vmatmul.mubr.bf16.vlgmr.msra.gmra.mrb[32].mxu1 %v1445_v11  ;;  %1152 = vmatprep.mubr.bf16.mxu0 %v1452_v12 }
  0x65   :  { %1249 = vmatprep.mubr.bf16.mxu1 %v1454_v13 }
  0x6b   :  { %1153 = vmatmul.mubr.bf16.gmra.mrb[36].mxu0 %v1451_v18 }
  0x6c   :  { %1250 = vmatmul.mubr.bf16.gmra.mrb[36].mxu1 %v1453_v19  ;;  %1160 = vmatprep.mubr.bf16.mxu0 %v1460_v20 }
  0x6d   :  { %1257 = vmatprep.mubr.bf16.mxu1 %v1462_v21 }
  0x73   :  { %1161 = vmatmul.mubr.bf16.gmra.mrb[40].mxu0 %v1459_v26 }
  0x74   :  { %1258 = vmatmul.mubr.bf16.gmra.mrb[40].mxu1 %v1461_v27  ;;  %1168 = vmatprep.mubr.bf16.mxu0 %v1468_v28 }
  0x75   :  { %1265 = vmatprep.mubr.bf16.mxu1 %v1470_v29 }
  0x7b   :  { %1169 = vmatmul.mubr.bf16.gmra.mrb[44].mxu0 %v1467_v34 }
  0x7c   :  { %1266 = vmatmul.mubr.bf16.gmra.mrb[44].mxu1 %v1469_v35  ;;  %1176 = vmatprep.mubr.bf16.mxu0 %v1476_v36 }
  0x7d   :  { %1273 = vmatprep.mubr.bf16.mxu1 %v1478_v37 }
  0x83   :  { %1177 = vmatmul.mubr.bf16.gmra.mrb[48].mxu0 %v1475_v42 }
  0x84   :  { %1274 = vmatmul.mubr.bf16.gmra.mrb[48].mxu1 %v1477_v43  ;;  %1184 = vmatprep.mubr.bf16.mxu0 %v1484_v44 }
  0x85   :  { %1281 = vmatprep.mubr.bf16.mxu1 %v1486_v45 }
  0x8b   :  { %1185 = vmatmul.mubr.bf16.gmra.mrb[52].mxu0 %v1483_v50 }
  0x8c   :  { %1282 = vmatmul.mubr.bf16.gmra.mrb[52].mxu1 %v1485_v51  ;;  %1192 = vmatprep.mubr.bf16.mxu0 %v1492_v52 }
  0x8d   :  { %1289 = vmatprep.mubr.bf16.mxu1 %v1494_v53 }
  0x93   :  { %1193 = vmatmul.mubr.bf16.gmra.mrb[56].mxu0 %v1491_v58 }
  0x94   :  { %1290 = vmatmul.mubr.bf16.gmra.mrb[56].mxu1 %v1493_v59  ;;  %1200 = vmatprep.mubr.bf16.mxu0 %v1500_v60 }
  0x95   :  { %1297 = vmatprep.mubr.bf16.mxu1 %v1502_v61 }
  0x9b   :  { %1201 = vmatmul.mubr.bf16.gmra.mrb[60].mxu0 %v1499_v62 }
  0x9c   :  { %1298 = vmatmul.mubr.bf16.gmra.mrb[60].mxu1 %v1501_v63 }
  0xf6   :  { %v1662_v0 = vpop.f32.mrb[0].mxu0 }
  0xf7   :  { %v1726_v1 = vpop.f32.mrb[0].mxu1  ;;  %v1663_v3 = vpop.f32.mrb[1].mxu0 }
  0xf8   :  { %v1664_v4 = vadd.f32 %v1663_v3, %v1662_v0  ;;  %v1727_v5 = vpop.f32.mrb[1].mxu1  ;;  %v1665_v6 = vpop.f32.mrb[2].mxu0 }
  0xf9   :  { %v1728_v7 = vadd.f32 %v1727_v5, %v1726_v1  ;;  %v1729_v8 = vpop.f32.mrb[2].mxu1  ;;  %v1666_v9 = vpop.f32.mrb[3].mxu0 }
  0xfa   :  { %v953_v10 = vadd.f32 %v1664_v4, %v2373_v2  ;;  %v1667_v11 = vadd.f32 %v1666_v9, %v1665_v6  ;;  %v1730_v12 = vpop.f32.mrb[3].mxu1 }
  0xfb   :  { %v1731_v13 = vadd.f32 %v1730_v12, %v1729_v8 }
  0xfc   :  { %v2376_v14 = vadd.f32 %v1728_v7, %v953_v10  ;;  %v956_v15 = vadd.f32 %v1667_v11, %v2373_v2 }
  0xfe   :  { %v2379_v16 = vadd.f32 %v1731_v13, %v956_v15  ;;  %v1668_v17 = vpop.f32.mrb[4].mxu0 }
  0xff   :  { %v1732_v18 = vpop.f32.mrb[4].mxu1  ;;  %v1669_v19 = vpop.f32.mrb[5].mxu0 }
 0x100   :  { %v1670_v20 = vadd.f32 %v1669_v19, %v1668_v17  ;;  %v1733_v21 = vpop.f32.mrb[5].mxu1  ;;  %v1671_v22 = vpop.f32.mrb[6].mxu0 }
 0x101   :  { %v1734_v23 = vadd.f32 %v1733_v21, %v1732_v18  ;;  %v1735_v24 = vpop.f32.mrb[6].mxu1  ;;  %v1672_v25 = vpop.f32.mrb[7].mxu0 }
 0x102   :  { %v961_v26 = vadd.f32 %v1670_v20, %v2373_v2  ;;  %v1673_v27 = vadd.f32 %v1672_v25, %v1671_v22  ;;  %v1736_v28 = vpop.f32.mrb[7].mxu1 }
 0x103   :  { %v1737_v29 = vadd.f32 %v1736_v28, %v1735_v24 }
 0x104   :  { %v2382_v30 = vadd.f32 %v1734_v23, %v961_v26  ;;  %v964_v31 = vadd.f32 %v1673_v27, %v2373_v2 }
 0x106   :  { %v2385_v32 = vadd.f32 %v1737_v29, %v964_v31  ;;  %v1674_v33 = vpop.f32.mrb[8].mxu0 }
 0x107   :  { %v1738_v34 = vpop.f32.mrb[8].mxu1  ;;  %v1675_v35 = vpop.f32.mrb[9].mxu0 }
 0x108   :  { %v1676_v36 = vadd.f32 %v1675_v35, %v1674_v33  ;;  %v1739_v37 = vpop.f32.mrb[9].mxu1  ;;  %v1677_v38 = vpop.f32.mrb[10].mxu0 }
 0x109   :  { %v1740_v39 = vadd.f32 %v1739_v37, %v1738_v34  ;;  %v1741_v40 = vpop.f32.mrb[10].mxu1  ;;  %v1678_v41 = vpop.f32.mrb[11].mxu0 }
 0x10a   :  { %v969_v42 = vadd.f32 %v1676_v36, %v2373_v2  ;;  %v1679_v43 = vadd.f32 %v1678_v41, %v1677_v38  ;;  %v1742_v44 = vpop.f32.mrb[11].mxu1 }
 0x10b   :  { %v1743_v45 = vadd.f32 %v1742_v44, %v1741_v40 }
 0x10c   :  { %v2388_v46 = vadd.f32 %v1740_v39, %v969_v42  ;;  %v972_v47 = vadd.f32 %v1679_v43, %v2373_v2 }
 0x10e   :  { %v2391_v48 = vadd.f32 %v1743_v45, %v972_v47  ;;  %v1680_v49 = vpop.f32.mrb[12].mxu0 }
 0x10f   :  { %v1744_v50 = vpop.f32.mrb[12].mxu1  ;;  %v1681_v51 = vpop.f32.mrb[13].mxu0 }
 0x110   :  { %v1682_v52 = vadd.f32 %v1681_v51, %v1680_v49  ;;  %v1745_v53 = vpop.f32.mrb[13].mxu1  ;;  %v1683_v54 = vpop.f32.mrb[14].mxu0 }
 0x111   :  { %v1746_v55 = vadd.f32 %v1745_v53, %v1744_v50  ;;  %v1747_v56 = vpop.f32.mrb[14].mxu1  ;;  %v1684_v57 = vpop.f32.mrb[15].mxu0 }
 0x112   :  { %v977_v58 = vadd.f32 %v1682_v52, %v2373_v2  ;;  %v1685_v59 = vadd.f32 %v1684_v57, %v1683_v54  ;;  %v1748_v60 = vpop.f32.mrb[15].mxu1 }
 0x113   :  { %v1749_v61 = vadd.f32 %v1748_v60, %v1747_v56 }
 0x114   :  { %v2394_v62 = vadd.f32 %v1746_v55, %v977_v58  ;;  %v980_v63 = vadd.f32 %v1685_v59, %v2373_v2 }
 0x116   :  { %v2397_v0 = vadd.f32 %v1749_v61, %v980_v63  ;;  %v1686_v1 = vpop.f32.mrb[16].mxu0 }
 0x117   :  { %v1750_v3 = vpop.f32.mrb[16].mxu1  ;;  %v1687_v4 = vpop.f32.mrb[17].mxu0 }
 0x118   :  { %v1688_v5 = vadd.f32 %v1687_v4, %v1686_v1  ;;  %v1751_v6 = vpop.f32.mrb[17].mxu1  ;;  %v1689_v7 = vpop.f32.mrb[18].mxu0 }
 0x119   :  { %v1752_v8 = vadd.f32 %v1751_v6, %v1750_v3  ;;  %v1753_v9 = vpop.f32.mrb[18].mxu1  ;;  %v1690_v10 = vpop.f32.mrb[19].mxu0 }
 0x11a   :  { %v985_v11 = vadd.f32 %v1688_v5, %v2373_v2  ;;  %v1691_v12 = vadd.f32 %v1690_v10, %v1689_v7  ;;  %v1754_v13 = vpop.f32.mrb[19].mxu1 }
 0x11b   :  { %v1755_v15 = vadd.f32 %v1754_v13, %v1753_v9 }
 0x11c   :  { %v2400_v17 = vadd.f32 %v1752_v8, %v985_v11  ;;  %v988_v18 = vadd.f32 %v1691_v12, %v2373_v2 }
 0x11e   :  { %v2403_v19 = vadd.f32 %v1755_v15, %v988_v18  ;;  %v1692_v20 = vpop.f32.mrb[20].mxu0 }
 0x11f   :  { %v1756_v21 = vpop.f32.mrb[20].mxu1  ;;  %v1693_v22 = vpop.f32.mrb[21].mxu0 }
 0x120   :  { %v1694_v23 = vadd.f32 %v1693_v22, %v1692_v20  ;;  %v1757_v24 = vpop.f32.mrb[21].mxu1  ;;  %v1695_v25 = vpop.f32.mrb[22].mxu0 }
 0x121   :  { %v1758_v26 = vadd.f32 %v1757_v24, %v1756_v21  ;;  %v1759_v27 = vpop.f32.mrb[22].mxu1  ;;  %v1696_v28 = vpop.f32.mrb[23].mxu0 }
 0x122   :  { %v993_v29 = vadd.f32 %v1694_v23, %v2373_v2  ;;  %v1697_v31 = vadd.f32 %v1696_v28, %v1695_v25  ;;  %v1760_v33 = vpop.f32.mrb[23].mxu1 }
 0x123   :  { %v1761_v34 = vadd.f32 %v1760_v33, %v1759_v27 }
 0x124   :  { %v2406_v35 = vadd.f32 %v1758_v26, %v993_v29  ;;  %v996_v36 = vadd.f32 %v1697_v31, %v2373_v2 }
 0x126   :  { %v2409_v37 = vadd.f32 %v1761_v34, %v996_v36  ;;  %v1698_v38 = vpop.f32.mrb[24].mxu0 }
 0x127   :  { %v1762_v39 = vpop.f32.mrb[24].mxu1  ;;  %v1699_v40 = vpop.f32.mrb[25].mxu0 }
 0x128   :  { %v1700_v41 = vadd.f32 %v1699_v40, %v1698_v38  ;;  %v1763_v42 = vpop.f32.mrb[25].mxu1  ;;  %v1701_v43 = vpop.f32.mrb[26].mxu0 }
 0x129   :  { %v1764_v44 = vadd.f32 %v1763_v42, %v1762_v39  ;;  %v1765_v45 = vpop.f32.mrb[26].mxu1  ;;  %v1702_v47 = vpop.f32.mrb[27].mxu0 }
 0x12a   :  { %v1001_v49 = vadd.f32 %v1700_v41, %v2373_v2  ;;  %v1703_v50 = vadd.f32 %v1702_v47, %v1701_v43  ;;  %v1766_v51 = vpop.f32.mrb[27].mxu1 }
 0x12b   :  { %v1767_v52 = vadd.f32 %v1766_v51, %v1765_v45 }
 0x12c   :  { %v2412_v53 = vadd.f32 %v1764_v44, %v1001_v49  ;;  %v1004_v54 = vadd.f32 %v1703_v50, %v2373_v2 }
 0x12e   :  { %v2415_v55 = vadd.f32 %v1767_v52, %v1004_v54  ;;  %v1704_v56 = vpop.f32.mrb[28].mxu0 }
 0x12f   :  { %v1768_v57 = vpop.f32.mrb[28].mxu1  ;;  %v1705_v58 = vpop.f32.mrb[29].mxu0 }
 0x130   :  { %v1706_v59 = vadd.f32 %v1705_v58, %v1704_v56  ;;  %v1769_v60 = vpop.f32.mrb[29].mxu1  ;;  %v1707_v61 = vpop.f32.mrb[30].mxu0 }
 0x131   :  { %v1770_v63 = vadd.f32 %v1769_v60, %v1768_v57  ;;  %v1771_v1 = vpop.f32.mrb[30].mxu1  ;;  %v1708_v3 = vpop.f32.mrb[31].mxu0 }
 0x132   :  { %v1009_v4 = vadd.f32 %v1706_v59, %v2373_v2  ;;  %v1709_v5 = vadd.f32 %v1708_v3, %v1707_v61  ;;  %v1772_v6 = vpop.f32.mrb[31].mxu1 }
 0x133   :  { %v1773_v7 = vadd.f32 %v1772_v6, %v1771_v1 }
 0x134   :  { %v2418_v8 = vadd.f32 %v1770_v63, %v1009_v4  ;;  %v1012_v9 = vadd.f32 %v1709_v5, %v2373_v2 }
 0x136   :  { %v2421_v10 = vadd.f32 %v1773_v7, %v1012_v9  ;;  %v1790_v11 = vpop.f32.mrb[32].mxu0 }
 0x137   :  { %v1854_v12 = vpop.f32.mrb[32].mxu1  ;;  %v1791_v13 = vpop.f32.mrb[33].mxu0 }
 0x138   :  { %v1792_v15 = vadd.f32 %v1791_v13, %v1790_v11  ;;  %v1855_v18 = vpop.f32.mrb[33].mxu1  ;;  %v1793_v20 = vpop.f32.mrb[34].mxu0 }
 0x139   :  { %v1856_v21 = vadd.f32 %v1855_v18, %v1854_v12  ;;  %v1857_v22 = vpop.f32.mrb[34].mxu1  ;;  %v1794_v23 = vpop.f32.mrb[35].mxu0 }
 0x13a   :  { %v1147_v24 = vadd.f32 %v1792_v15, %v2376_v14  ;;  %v1795_v25 = vadd.f32 %v1794_v23, %v1793_v20  ;;  %v1858_v26 = vpop.f32.mrb[35].mxu1 }
 0x13b   :  { %v1859_v27 = vadd.f32 %v1858_v26, %v1857_v22 }
 0x13c   :  { %v1244_v28 = vadd.f32 %v1856_v21, %v1147_v24  ;;  %v1150_v29 = vadd.f32 %v1795_v25, %v2379_v16 }
 0x13e   :  { %v1322_v2 = vmul.f32 0.2, %v1244_v28  ;;  %v1247_v31 = vadd.f32 %v1859_v27, %v1150_v29  ;;  %v1796_v33 = vpop.f32.mrb[36].mxu0  ;;  %vm1306_vm0 = vcmp.gt.f32.partialorder %v1244_v28, 0.0 }
 0x13f   :  { %v1860_v34 = vpop.f32.mrb[36].mxu1  ;;  %v1797_v36 = vpop.f32.mrb[37].mxu0 }
 0x140   :  { %vm1307_vm1 = vcmp.gt.f32.partialorder %v1247_v31, 0.0  ;;  %v1323_v38 = vmul.f32 0.2, %v1247_v31  ;;  %v1798_v39 = vadd.f32 %v1797_v36, %v1796_v33  ;;  %v1861_v40 = vpop.f32.mrb[37].mxu1  ;;  %v1799_v41 = vpop.f32.mrb[38].mxu0  ;;  %v1338_v44 = vsel %vm1306_vm0, %v1244_v28, %v1322_v2 }
 0x141   :  { %v1862_v42 = vadd.f32 %v1861_v40, %v1860_v34  ;;  %v1863_v43 = vpop.f32.mrb[38].mxu1  ;;  %v1800_v14 = vpop.f32.mrb[39].mxu0 }
 0x142   :  { %v1339_v45 = vsel %vm1307_vm1, %v1247_v31, %v1323_v38  ;;  %v1155_v47 = vadd.f32 %v1798_v39, %v2382_v30  ;;  %v1801_v49 = vadd.f32 %v1800_v14, %v1799_v41  ;;  %v1864_v16 = vpop.f32.mrb[39].mxu1 }
 0x143   :  { %v1602_v50 = vpack.c.bf16 %v1339_v45, %v1338_v44  ;;  %v1865_v51 = vadd.f32 %v1864_v16, %v1863_v43 }
 0x144   :  { %v1252_v52 = vadd.f32 %v1862_v42, %v1155_v47  ;;  %v1158_v54 = vadd.f32 %v1801_v49, %v2385_v32 }
 0x145   :  { %1603 = vst [vmem:[%s2466_s3] sm:$0xff] %v1602_v50  }
 0x146   :  { %v1324_v56 = vmul.f32 0.2, %v1252_v52  ;;  %v1255_v57 = vadd.f32 %v1865_v51, %v1158_v54  ;;  %v1802_v58 = vpop.f32.mrb[40].mxu0  ;;  %vm1308_vm2 = vcmp.gt.f32.partialorder %v1252_v52, 0.0 }
 0x147   :  { %v1866_v59 = vpop.f32.mrb[40].mxu1  ;;  %v1803_v60 = vpop.f32.mrb[41].mxu0 }
 0x148   :  { %vm1309_vm3 = vcmp.gt.f32.partialorder %v1255_v57, 0.0  ;;  %v1325_v61 = vmul.f32 0.2, %v1255_v57  ;;  %v1804_v30 = vadd.f32 %v1803_v60, %v1802_v58  ;;  %v1867_v63 = vpop.f32.mrb[41].mxu1  ;;  %v1805_v1 = vpop.f32.mrb[42].mxu0  ;;  %v1340_v6 = vsel %vm1308_vm2, %v1252_v52, %v1324_v56 }
 0x149   :  { %v1868_v3 = vadd.f32 %v1867_v63, %v1866_v59  ;;  %v1869_v4 = vpop.f32.mrb[42].mxu1  ;;  %v1806_v5 = vpop.f32.mrb[43].mxu0 }
 0x14a   :  { %v1341_v32 = vsel %vm1309_vm3, %v1255_v57, %v1325_v61  ;;  %v1163_v7 = vadd.f32 %v1804_v30, %v2388_v46  ;;  %v1807_v9 = vadd.f32 %v1806_v5, %v1805_v1  ;;  %v1870_v11 = vpop.f32.mrb[43].mxu1 }
 0x14b   :  { %v1607_v12 = vpack.c.bf16 %v1341_v32, %v1340_v6  ;;  %v1871_v13 = vadd.f32 %v1870_v11, %v1869_v4 }
 0x14c   :  { %v1260_v15 = vadd.f32 %v1868_v3, %v1163_v7  ;;  %v1166_v18 = vadd.f32 %v1807_v9, %v2391_v48 }
 0x14d   :  { %1639 = vst [vmem:[%s2466_s3 + $0x8] sm:$0xff] %v1607_v12  }
 0x14e   :  { %v1326_v20 = vmul.f32 0.2, %v1260_v15  ;;  %v1263_v21 = vadd.f32 %v1871_v13, %v1166_v18  ;;  %v1808_v22 = vpop.f32.mrb[44].mxu0  ;;  %vm1310_vm4 = vcmp.gt.f32.partialorder %v1260_v15, 0.0 }
 0x14f   :  { %v1872_v23 = vpop.f32.mrb[44].mxu1  ;;  %v1809_v24 = vpop.f32.mrb[45].mxu0 }
 0x150   :  { %vm1311_vm5 = vcmp.gt.f32.partialorder %v1263_v21, 0.0  ;;  %v1327_v25 = vmul.f32 0.2, %v1263_v21  ;;  %v1810_v46 = vadd.f32 %v1809_v24, %v1808_v22  ;;  %v1873_v26 = vpop.f32.mrb[45].mxu1  ;;  %v1811_v27 = vpop.f32.mrb[46].mxu0  ;;  %v1342_v31 = vsel %vm1310_vm4, %v1260_v15, %v1326_v20 }
 0x151   :  { %v1874_v28 = vadd.f32 %v1873_v26, %v1872_v23  ;;  %v1875_v29 = vpop.f32.mrb[46].mxu1  ;;  %v1812_v2 = vpop.f32.mrb[47].mxu0 }
 0x152   :  { %v1343_v48 = vsel %vm1311_vm5, %v1263_v21, %v1327_v25  ;;  %v1171_v33 = vadd.f32 %v1810_v46, %v2394_v62  ;;  %v1813_v34 = vadd.f32 %v1812_v2, %v1811_v27  ;;  %v1876_v36 = vpop.f32.mrb[47].mxu1 }
 0x153   :  { %v1612_v38 = vpack.c.bf16 %v1343_v48, %v1342_v31  ;;  %v1877_v39 = vadd.f32 %v1876_v36, %v1875_v29 }
 0x154   :  { %v1268_v40 = vadd.f32 %v1874_v28, %v1171_v33  ;;  %v1174_v41 = vadd.f32 %v1813_v34, %v2397_v0 }
 0x155   :  { %1640 = vst [vmem:[%s2466_s3 + $0x10] sm:$0xff] %v1612_v38  }
 0x156   :  { %v1328_v42 = vmul.f32 0.2, %v1268_v40  ;;  %v1271_v43 = vadd.f32 %v1877_v39, %v1174_v41  ;;  %v1814_v14 = vpop.f32.mrb[48].mxu0  ;;  %vm1312_vm6 = vcmp.gt.f32.partialorder %v1268_v40, 0.0 }
 0x157   :  { %v1878_v44 = vpop.f32.mrb[48].mxu1  ;;  %v1815_v45 = vpop.f32.mrb[49].mxu0 }
 0x158   :  { %vm1313_vm7 = vcmp.gt.f32.partialorder %v1271_v43, 0.0  ;;  %v1329_v47 = vmul.f32 0.2, %v1271_v43  ;;  %v1816_v62 = vadd.f32 %v1815_v45, %v1814_v14  ;;  %v1879_v49 = vpop.f32.mrb[49].mxu1  ;;  %v1817_v16 = vpop.f32.mrb[50].mxu0  ;;  %v1344_v54 = vsel %vm1312_vm6, %v1268_v40, %v1328_v42 }
 0x159   :  { %v1880_v50 = vadd.f32 %v1879_v49, %v1878_v44  ;;  %v1881_v51 = vpop.f32.mrb[50].mxu1  ;;  %v1818_v52 = vpop.f32.mrb[51].mxu0 }
 0x15a   :  { %v1345_v0 = vsel %vm1313_vm7, %v1271_v43, %v1329_v47  ;;  %v1179_v56 = vadd.f32 %v1816_v62, %v2400_v17  ;;  %v1819_v57 = vadd.f32 %v1818_v52, %v1817_v16  ;;  %v1882_v58 = vpop.f32.mrb[51].mxu1 }
 0x15b   :  { %v1617_v59 = vpack.c.bf16 %v1345_v0, %v1344_v54  ;;  %v1883_v60 = vadd.f32 %v1882_v58, %v1881_v51 }
 0x15c   :  { %v1276_v61 = vadd.f32 %v1880_v50, %v1179_v56  ;;  %v1182_v30 = vadd.f32 %v1819_v57, %v2403_v19 }
 0x15d   :  { %1641 = vst [vmem:[%s2466_s3 + $0x18] sm:$0xff] %v1617_v59  }
 0x15e   :  { %v1330_v63 = vmul.f32 0.2, %v1276_v61  ;;  %v1279_v1 = vadd.f32 %v1883_v60, %v1182_v30  ;;  %v1820_v3 = vpop.f32.mrb[52].mxu0  ;;  %vm1314_vm8 = vcmp.gt.f32.partialorder %v1276_v61, 0.0 }
 0x15f   :  { %v1884_v4 = vpop.f32.mrb[52].mxu1  ;;  %v1821_v5 = vpop.f32.mrb[53].mxu0 }
 0x160   :  { %vm1315_vm9 = vcmp.gt.f32.partialorder %v1279_v1, 0.0  ;;  %v1331_v6 = vmul.f32 0.2, %v1279_v1  ;;  %v1822_v17 = vadd.f32 %v1821_v5, %v1820_v3  ;;  %v1885_v32 = vpop.f32.mrb[53].mxu1  ;;  %v1823_v7 = vpop.f32.mrb[54].mxu0  ;;  %v1346_v13 = vsel %vm1314_vm8, %v1276_v61, %v1330_v63 }
 0x161   :  { %v1886_v9 = vadd.f32 %v1885_v32, %v1884_v4  ;;  %v1887_v11 = vpop.f32.mrb[54].mxu1  ;;  %v1824_v12 = vpop.f32.mrb[55].mxu0 }
 0x162   :  { %v1347_v19 = vsel %vm1315_vm9, %v1279_v1, %v1331_v6  ;;  %v1187_v15 = vadd.f32 %v1822_v17, %v2406_v35  ;;  %v1825_v18 = vadd.f32 %v1824_v12, %v1823_v7  ;;  %v1888_v20 = vpop.f32.mrb[55].mxu1 }
 0x163   :  { %v1622_v21 = vpack.c.bf16 %v1347_v19, %v1346_v13  ;;  %v1889_v22 = vadd.f32 %v1888_v20, %v1887_v11 }
 0x164   :  { %v1284_v23 = vadd.f32 %v1886_v9, %v1187_v15  ;;  %v1190_v24 = vadd.f32 %v1825_v18, %v2409_v37 }
 0x165   :  { %1642 = vst [vmem:[%s2466_s3 + $0x20] sm:$0xff] %v1622_v21  }
 0x166   :  { %v1332_v25 = vmul.f32 0.2, %v1284_v23  ;;  %v1287_v46 = vadd.f32 %v1889_v22, %v1190_v24  ;;  %v1826_v26 = vpop.f32.mrb[56].mxu0  ;;  %vm1316_vm10 = vcmp.gt.f32.partialorder %v1284_v23, 0.0 }
 0x167   :  { %v1890_v27 = vpop.f32.mrb[56].mxu1  ;;  %v1827_v28 = vpop.f32.mrb[57].mxu0 }
 0x168   :  { %vm1317_vm11 = vcmp.gt.f32.partialorder %v1287_v46, 0.0  ;;  %v1333_v29 = vmul.f32 0.2, %v1287_v46  ;;  %v1828_v35 = vadd.f32 %v1827_v28, %v1826_v26  ;;  %v1891_v2 = vpop.f32.mrb[57].mxu1  ;;  %v1829_v31 = vpop.f32.mrb[58].mxu0  ;;  %v1348_v36 = vsel %vm1316_vm10, %v1284_v23, %v1332_v25 }
 0x169   :  { %v1892_v48 = vadd.f32 %v1891_v2, %v1890_v27  ;;  %v1893_v33 = vpop.f32.mrb[58].mxu1  ;;  %v1830_v34 = vpop.f32.mrb[59].mxu0 }
 0x16a   :  { %v1349_v37 = vsel %vm1317_vm11, %v1287_v46, %v1333_v29  ;;  %v1195_v38 = vadd.f32 %v1828_v35, %v2412_v53  ;;  %v1831_v39 = vadd.f32 %v1830_v34, %v1829_v31  ;;  %v1894_v40 = vpop.f32.mrb[59].mxu1 }
 0x16b   :  { %v1627_v41 = vpack.c.bf16 %v1349_v37, %v1348_v36  ;;  %v1895_v42 = vadd.f32 %v1894_v40, %v1893_v33 }
 0x16c   :  { %v1292_v43 = vadd.f32 %v1892_v48, %v1195_v38  ;;  %v1198_v14 = vadd.f32 %v1831_v39, %v2415_v55 }
 0x16d   :  { %1643 = vst [vmem:[%s2466_s3 + $0x28] sm:$0xff] %v1627_v41  }
 0x16e   :  { %v1334_v44 = vmul.f32 0.2, %v1292_v43  ;;  %v1295_v45 = vadd.f32 %v1895_v42, %v1198_v14  ;;  %v1832_v47 = vpop.f32.mrb[60].mxu0  ;;  %vm1318_vm12 = vcmp.gt.f32.partialorder %v1292_v43, 0.0 }
 0x16f   :  { %v1896_v62 = vpop.f32.mrb[60].mxu1  ;;  %v1833_v49 = vpop.f32.mrb[61].mxu0 }
 0x170   :  { %vm1319_vm13 = vcmp.gt.f32.partialorder %v1295_v45, 0.0  ;;  %v1335_v16 = vmul.f32 0.2, %v1295_v45  ;;  %v1834_v53 = vadd.f32 %v1833_v49, %v1832_v47  ;;  %v1897_v50 = vpop.f32.mrb[61].mxu1  ;;  %v1835_v51 = vpop.f32.mrb[62].mxu0  ;;  %v1350_v56 = vsel %vm1318_vm12, %v1292_v43, %v1334_v44 }
 0x171   :  { %v1898_v52 = vadd.f32 %v1897_v50, %v1896_v62  ;;  %v1899_v54 = vpop.f32.mrb[62].mxu1  ;;  %v1836_v0 = vpop.f32.mrb[63].mxu0 }
 0x172   :  { %v1351_v55 = vsel %vm1319_vm13, %v1295_v45, %v1335_v16  ;;  %v1203_v57 = vadd.f32 %v1834_v53, %v2418_v8  ;;  %v1837_v58 = vadd.f32 %v1836_v0, %v1835_v51  ;;  %v1900_v59 = vpop.f32.mrb[63].mxu1 }
 0x173   :  { %v1632_v60 = vpack.c.bf16 %v1351_v55, %v1350_v56  ;;  %v1901_v61 = vadd.f32 %v1900_v59, %v1899_v54 }
 0x174   :  { %v1300_v30 = vadd.f32 %v1898_v52, %v1203_v57  ;;  %v1206_v63 = vadd.f32 %v1837_v58, %v2421_v10 }
 0x175   :  { %1644 = vst [vmem:[%s2466_s3 + $0x30] sm:$0xff] %v1632_v60  }
 0x176   :  { %v1336_v1 = vmul.f32 0.2, %v1300_v30  ;;  %v1303_v3 = vadd.f32 %v1901_v61, %v1206_v63  ;;  %vm1320_vm14 = vcmp.gt.f32.partialorder %v1300_v30, 0.0 }
 0x178   :  { %vm1321_vm15 = vcmp.gt.f32.partialorder %v1303_v3, 0.0  ;;  %v1337_v4 = vmul.f32 0.2, %v1303_v3  ;;  %v1352_v5 = vsel %vm1320_vm14, %v1300_v30, %v1336_v1 }
 0x17a   :  { %v1353_v6 = vsel %vm1321_vm15, %v1303_v3, %v1337_v4 }
 0x17b   :  { %v1637_v17 = vpack.c.bf16 %v1353_v6, %v1352_v5 }
 0x17d   :  { %1645 = vst [vmem:[%s2466_s3 + $0x38] sm:$0xff] %v1637_v17  }

// kernel: discriminator_forward.7
= control target key start
LH: loop header
LB: loop body
LE: loop exit
PB: predicated region body
PF: predicated region fallthrough
CT: control target
= control target key end

     0   :  { %s3925_s1 = inlined_call_operand.vmem [shape: bf16[2048,256], index: 1, kind: input, shape index: {}]   ;;  %s3926_s0 = inlined_call_operand.vmem [shape: bf16[32,2048], index: 0, kind: input, shape index: {}]   ;;  %s3927_s2 = inlined_call_operand.vmem [shape: f32[1,256], index: 2, kind: input, shape index: {}]   ;;  %s3928_s3 = inlined_call_operand.vmem [shape: bf16[32,256], index: 3, kind: output, shape index: {}]  }
   0x1   :  { %v2594_v0 = vld [vmem:[%s3925_s1 + $0x4] ss:$8 sps:$4 sm:$0xff]   ;;  %v2598_v2 = vld [vmem:[%s3925_s1] ss:$8 sps:$4 sm:$0xff]   ;;  %v2600_v4 = vld [vmem:[%s3925_s1 + $0x14] ss:$8 sps:$4 sm:$0xff]  }
   0x2   :  { %v2596_v1 = vld [vmem:[%s3925_s1 + $0x404] ss:$8 sps:$4 sm:$0xff]   ;;  %1754 = vmatprep.subr.bf16.mxu1 %v2594_v0  ;;  %v2599_v3 = vld [vmem:[%s3925_s1 + $0x400] ss:$8 sps:$4 sm:$0xff]   ;;  %v2602_v5 = vld [vmem:[%s3925_s1 + $0x414] ss:$8 sps:$4 sm:$0xff]  }
   0x3   :  { %1966 = vmatprep.subr.bf16.mxu0 %v2596_v1  ;;  %1755 = vmatpush1.bf16.msra.mxu1 %v2598_v2  ;;  %v2604_v6 = vld [vmem:[%s3925_s1 + $0x10] ss:$8 sps:$4 sm:$0xff]   ;;  %v2606_v8 = vld [vmem:[%s3925_s1 + $0x24] ss:$8 sps:$4 sm:$0xff]   ;;  %v2610_v10 = vld [vmem:[%s3925_s1 + $0x20] ss:$8 sps:$4 sm:$0xff]  }
   0x4   :  { %1967 = vmatpush1.bf16.msra.mxu0 %v2599_v3  ;;  %1756 = vmatprep.subr.bf16.mxu1 %v2600_v4  ;;  %v2605_v7 = vld [vmem:[%s3925_s1 + $0x410] ss:$8 sps:$4 sm:$0xff]   ;;  %v2608_v9 = vld [vmem:[%s3925_s1 + $0x424] ss:$8 sps:$4 sm:$0xff]   ;;  %v2611_v11 = vld [vmem:[%s3925_s1 + $0x420] ss:$8 sps:$4 sm:$0xff]  }
   0x5   :  { %1968 = vmatprep.subr.bf16.mxu0 %v2602_v5  ;;  %v2612_v12 = vld [vmem:[%s3925_s1 + $0x34] ss:$8 sps:$4 sm:$0xff]   ;;  %v2616_v14 = vld [vmem:[%s3925_s1 + $0x30] ss:$8 sps:$4 sm:$0xff]   ;;  %v2618_v16 = vld [vmem:[%s3925_s1 + $0x44] ss:$8 sps:$4 sm:$0xff]  }
   0x6   :  { %v2614_v13 = vld [vmem:[%s3925_s1 + $0x434] ss:$8 sps:$4 sm:$0xff]   ;;  %v2617_v15 = vld [vmem:[%s3925_s1 + $0x430] ss:$8 sps:$4 sm:$0xff]   ;;  %v2620_v17 = vld [vmem:[%s3925_s1 + $0x444] ss:$8 sps:$4 sm:$0xff]  }
   0x7   :  { %1757 = vmatpush1.bf16.msra.mxu1 %v2604_v6  ;;  %v2622_v18 = vld [vmem:[%s3925_s1 + $0x40] ss:$8 sps:$4 sm:$0xff]   ;;  %v2624_v20 = vld [vmem:[%s3925_s1 + $0x54] ss:$8 sps:$4 sm:$0xff]   ;;  %v2628_v22 = vld [vmem:[%s3925_s1 + $0x50] ss:$8 sps:$4 sm:$0xff]  }
   0x8   :  { %1969 = vmatpush1.bf16.msra.mxu0 %v2605_v7  ;;  %1758 = vmatprep.subr.bf16.mxu1 %v2606_v8  ;;  %v2623_v19 = vld [vmem:[%s3925_s1 + $0x440] ss:$8 sps:$4 sm:$0xff]   ;;  %v2626_v21 = vld [vmem:[%s3925_s1 + $0x454] ss:$8 sps:$4 sm:$0xff]   ;;  %v2629_v23 = vld [vmem:[%s3925_s1 + $0x450] ss:$8 sps:$4 sm:$0xff]  }
   0x9   :  { %1970 = vmatprep.subr.bf16.mxu0 %v2608_v9  ;;  %v2630_v24 = vld [vmem:[%s3925_s1 + $0x64] ss:$8 sps:$4 sm:$0xff]   ;;  %v2634_v26 = vld [vmem:[%s3925_s1 + $0x60] ss:$8 sps:$4 sm:$0xff]   ;;  %v2636_v28 = vld [vmem:[%s3925_s1 + $0x74] ss:$8 sps:$4 sm:$0xff]  }
   0xa   :  { %v2632_v25 = vld [vmem:[%s3925_s1 + $0x464] ss:$8 sps:$4 sm:$0xff]   ;;  %v2635_v27 = vld [vmem:[%s3925_s1 + $0x460] ss:$8 sps:$4 sm:$0xff]   ;;  %v2638_v29 = vld [vmem:[%s3925_s1 + $0x474] ss:$8 sps:$4 sm:$0xff]  }
   0xb   :  { %1759 = vmatpush1.bf16.msra.mxu1 %v2610_v10  ;;  %v2640_v30 = vld [vmem:[%s3925_s1 + $0x70] ss:$8 sps:$4 sm:$0xff]   ;;  %v2642_v32 = vld [vmem:[%s3925_s1 + $0x84] ss:$8 sps:$4 sm:$0xff]   ;;  %v2646_v34 = vld [vmem:[%s3925_s1 + $0x80] ss:$8 sps:$4 sm:$0xff]  }
   0xc   :  { %1971 = vmatpush1.bf16.msra.mxu0 %v2611_v11  ;;  %1760 = vmatprep.subr.bf16.mxu1 %v2612_v12  ;;  %v2641_v31 = vld [vmem:[%s3925_s1 + $0x470] ss:$8 sps:$4 sm:$0xff]   ;;  %v2644_v33 = vld [vmem:[%s3925_s1 + $0x484] ss:$8 sps:$4 sm:$0xff]   ;;  %v2647_v35 = vld [vmem:[%s3925_s1 + $0x480] ss:$8 sps:$4 sm:$0xff]  }
   0xd   :  { %1972 = vmatprep.subr.bf16.mxu0 %v2614_v13  ;;  %v2648_v36 = vld [vmem:[%s3925_s1 + $0x94] ss:$8 sps:$4 sm:$0xff]   ;;  %v2652_v38 = vld [vmem:[%s3925_s1 + $0x90] ss:$8 sps:$4 sm:$0xff]   ;;  %v2654_v40 = vld [vmem:[%s3925_s1 + $0xa4] ss:$8 sps:$4 sm:$0xff]  }
   0xe   :  { %v2650_v37 = vld [vmem:[%s3925_s1 + $0x494] ss:$8 sps:$4 sm:$0xff]   ;;  %v2653_v39 = vld [vmem:[%s3925_s1 + $0x490] ss:$8 sps:$4 sm:$0xff]   ;;  %v2656_v41 = vld [vmem:[%s3925_s1 + $0x4a4] ss:$8 sps:$4 sm:$0xff]  }
   0xf   :  { %1761 = vmatpush1.bf16.msra.mxu1 %v2616_v14  ;;  %v2658_v42 = vld [vmem:[%s3925_s1 + $0xa0] ss:$8 sps:$4 sm:$0xff]   ;;  %v2660_v44 = vld [vmem:[%s3925_s1 + $0xb4] ss:$8 sps:$4 sm:$0xff]   ;;  %v2664_v46 = vld [vmem:[%s3925_s1 + $0xb0] ss:$8 sps:$4 sm:$0xff]  }
  0x10   :  { %1973 = vmatpush1.bf16.msra.mxu0 %v2617_v15  ;;  %1762 = vmatprep.subr.bf16.mxu1 %v2618_v16  ;;  %v2659_v43 = vld [vmem:[%s3925_s1 + $0x4a0] ss:$8 sps:$4 sm:$0xff]   ;;  %v2662_v45 = vld [vmem:[%s3925_s1 + $0x4b4] ss:$8 sps:$4 sm:$0xff]   ;;  %v2665_v47 = vld [vmem:[%s3925_s1 + $0x4b0] ss:$8 sps:$4 sm:$0xff]  }
  0x11   :  { %1974 = vmatprep.subr.bf16.mxu0 %v2620_v17  ;;  %v14_v48 = vld [vmem:[%s3926_s0] sm:$0xff]  ;;  %v2672_v58 = vld [vmem:[%s3925_s1 + $0xd4] ss:$8 sps:$4 sm:$0xff]   ;;  %v2676_v60 = vld [vmem:[%s3925_s1 + $0xd0] ss:$8 sps:$4 sm:$0xff]  }
  0x12   :  { %v22_v49 = vld [vmem:[%s3926_s0 + $0x40] sm:$0xff]  ;;  %v2674_v59 = vld [vmem:[%s3925_s1 + $0x4d4] ss:$8 sps:$4 sm:$0xff]   ;;  %v2677_v61 = vld [vmem:[%s3925_s1 + $0x4d0] ss:$8 sps:$4 sm:$0xff]  }
  0x13   :  { %1763 = vmatpush1.bf16.msra.mxu1 %v2622_v18  ;;  %v2666_v50 = vld [vmem:[%s3925_s1 + $0xc4] ss:$8 sps:$4 sm:$0xff]   ;;  %v2235_v52 = vcombine.high %v14_v48, %v22_v49  ;;  %v2670_v56 = vld [vmem:[%s3925_s1 + $0xc0] ss:$8 sps:$4 sm:$0xff]   ;;  %v2684_v2 = vld [vmem:[%s3925_s1 + $0xf4] ss:$8 sps:$4 sm:$0xff]   ;;  %v2234_v8 = vcombine.low %v14_v48, %v22_v49 }
  0x14   :  { %1975 = vmatpush1.bf16.msra.mxu0 %v2623_v19  ;;  %1764 = vmatprep.subr.bf16.mxu1 %v2624_v20  ;;  %v2668_v51 = vld [vmem:[%s3925_s1 + $0x4c4] ss:$8 sps:$4 sm:$0xff]   ;;  %v2671_v57 = vld [vmem:[%s3925_s1 + $0x4c0] ss:$8 sps:$4 sm:$0xff]   ;;  %v2686_v3 = vld [vmem:[%s3925_s1 + $0x4f4] ss:$8 sps:$4 sm:$0xff]  }
  0x15   :  { %1976 = vmatprep.subr.bf16.mxu0 %v2626_v21  ;;  %v18_v53 = vld [vmem:[%s3926_s0 + $0x20] sm:$0xff]  ;;  %1786 = vmatprep.mubr.bf16.mxu1 %v2235_v52  ;;  %v2688_v4 = vld [vmem:[%s3925_s1 + $0xf0] ss:$8 sps:$4 sm:$0xff]   ;;  %v2698_v12 = vld [vmem:[%s3925_s1 + $0x114] ss:$8 sps:$4 sm:$0xff]  }
  0x16   :  { %v26_v54 = vld [vmem:[%s3926_s0 + $0x60] sm:$0xff]  ;;  %v2689_v5 = vld [vmem:[%s3925_s1 + $0x4f0] ss:$8 sps:$4 sm:$0xff]   ;;  %v2701_v13 = vld [vmem:[%s3925_s1 + $0x514] ss:$8 sps:$4 sm:$0xff]  }
  0x17   :  { %1765 = vmatpush1.bf16.msra.mxu1 %v2628_v22  ;;  %v2243_v55 = vcombine.high %v18_v53, %v26_v54  ;;  %v2678_v62 = vld [vmem:[%s3925_s1 + $0xe4] ss:$8 sps:$4 sm:$0xff]   ;;  %v2682_v0 = vld [vmem:[%s3925_s1 + $0xe0] ss:$8 sps:$4 sm:$0xff]   ;;  %v2242_v10 = vcombine.low %v18_v53, %v26_v54  ;;  %v2696_v14 = vld [vmem:[%s3925_s1 + $0x110] ss:$8 sps:$4 sm:$0xff]  }
  0x18   :  { %1977 = vmatpush1.bf16.msra.mxu0 %v2629_v23  ;;  %1766 = vmatprep.subr.bf16.mxu1 %v2630_v24  ;;  %v2680_v63 = vld [vmem:[%s3925_s1 + $0x4e4] ss:$8 sps:$4 sm:$0xff]   ;;  %v2683_v1 = vld [vmem:[%s3925_s1 + $0x4e0] ss:$8 sps:$4 sm:$0xff]   ;;  %v2699_v15 = vld [vmem:[%s3925_s1 + $0x510] ss:$8 sps:$4 sm:$0xff]  }
  0x19   :  { %1978 = vmatprep.subr.bf16.mxu0 %v2632_v25  ;;  %1998 = vmatprep.mubr.bf16.mxu0 %v2243_v55  ;;  %v2692_v6 = vld [vmem:[%s3925_s1 + $0x104] ss:$8 sps:$4 sm:$0xff]   ;;  %v2690_v9 = vld [vmem:[%s3925_s1 + $0x100] ss:$8 sps:$4 sm:$0xff]   ;;  %v2710_v20 = vld [vmem:[%s3925_s1 + $0x134] ss:$8 sps:$4 sm:$0xff]  }
  0x1a   :  { %v2695_v7 = vld [vmem:[%s3925_s1 + $0x504] ss:$8 sps:$4 sm:$0xff]   ;;  %v2693_v11 = vld [vmem:[%s3925_s1 + $0x500] ss:$8 sps:$4 sm:$0xff]   ;;  %v2713_v21 = vld [vmem:[%s3925_s1 + $0x534] ss:$8 sps:$4 sm:$0xff]  }
  0x1b   :  { %1767 = vmatpush1.bf16.msra.mxu1 %v2634_v26  ;;  %v2704_v16 = vld [vmem:[%s3925_s1 + $0x124] ss:$8 sps:$4 sm:$0xff]   ;;  %v2702_v18 = vld [vmem:[%s3925_s1 + $0x120] ss:$8 sps:$4 sm:$0xff]   ;;  %v2708_v22 = vld [vmem:[%s3925_s1 + $0x130] ss:$8 sps:$4 sm:$0xff]  }
  0x1c   :  { %1979 = vmatpush1.bf16.msra.mxu0 %v2635_v27  ;;  %1768 = vmatprep.subr.bf16.mxu1 %v2636_v28  ;;  %v2707_v17 = vld [vmem:[%s3925_s1 + $0x524] ss:$8 sps:$4 sm:$0xff]   ;;  %v2705_v19 = vld [vmem:[%s3925_s1 + $0x520] ss:$8 sps:$4 sm:$0xff]   ;;  %v2711_v23 = vld [vmem:[%s3925_s1 + $0x530] ss:$8 sps:$4 sm:$0xff]  }
  0x1d   :  { %1980 = vmatprep.subr.bf16.mxu0 %v2638_v29  ;;  %v2716_v24 = vld [vmem:[%s3925_s1 + $0x144] ss:$8 sps:$4 sm:$0xff]   ;;  %v2714_v26 = vld [vmem:[%s3925_s1 + $0x140] ss:$8 sps:$4 sm:$0xff]   ;;  %v2722_v28 = vld [vmem:[%s3925_s1 + $0x154] ss:$8 sps:$4 sm:$0xff]  }
  0x1e   :  { %v2719_v25 = vld [vmem:[%s3925_s1 + $0x544] ss:$8 sps:$4 sm:$0xff]   ;;  %v2717_v27 = vld [vmem:[%s3925_s1 + $0x540] ss:$8 sps:$4 sm:$0xff]   ;;  %v2725_v29 = vld [vmem:[%s3925_s1 + $0x554] ss:$8 sps:$4 sm:$0xff]  }
  0x1f   :  { %1769 = vmatpush1.bf16.msra.mxu1 %v2640_v30  ;;  %v30_v30 = vld [vmem:[%s3926_s0 + $0x80] sm:$0xff]  ;;  %v3319_v49 = vld [vmem:[%s3926_s0 + $0x28] sm:$0xff]  ;;  %v2735_v52 = vld [vmem:[%s3925_s1 + $0x570] ss:$8 sps:$4 sm:$0xff]  }
  0x20   :  { %1981 = vmatpush1.bf16.msra.mxu0 %v2641_v31  ;;  %1770 = vmatprep.subr.bf16.mxu1 %v2642_v32  ;;  %v38_v31 = vld [vmem:[%s3926_s0 + $0xc0] sm:$0xff]  ;;  %v2720_v32 = vld [vmem:[%s3925_s1 + $0x150] ss:$8 sps:$4 sm:$0xff]  }
  0x21   :  { %1982 = vmatprep.subr.bf16.mxu0 %v2644_v33  ;;  %v2251_v33 = vcombine.high %v30_v30, %v38_v31  ;;  %v2740_v54 = vld [vmem:[%s3925_s1 + $0x184] ss:$8 sps:$4 sm:$0xff]  }
  0x22   :  { %v2743_v55 = vld [vmem:[%s3925_s1 + $0x584] ss:$8 sps:$4 sm:$0xff]  }
  0x23   :  { %1771 = vmatpush1.bf16.msra.mxu1 %v2646_v34  ;;  %v2723_v34 = vld [vmem:[%s3925_s1 + $0x550] ss:$8 sps:$4 sm:$0xff]  }
  0x24   :  { %1983 = vmatpush1.bf16.msra.mxu0 %v2647_v35  ;;  %1772 = vmatprep.subr.bf16.mxu1 %v2648_v36  ;;  %v34_v35 = vld [vmem:[%s3926_s0 + $0xa0] sm:$0xff] }
  0x25   :  { %1984 = vmatprep.subr.bf16.mxu0 %v2650_v37  ;;  %v42_v36 = vld [vmem:[%s3926_s0 + $0xe0] sm:$0xff]  ;;  %v2250_v37 = vcombine.low %v30_v30, %v38_v31  ;;  %v2794_v30 = vld [vmem:[%s3925_s1 + $0x214] ss:$8 sps:$4 sm:$0xff]  }
  0x26   :  { %v2797_v31 = vld [vmem:[%s3925_s1 + $0x614] ss:$8 sps:$4 sm:$0xff]  }
  0x27   :  { %1773 = vmatpush1.bf16.msra.mxu1 %v2652_v38  ;;  %v2728_v38 = vld [vmem:[%s3925_s1 + $0x164] ss:$8 sps:$4 sm:$0xff]  }
  0x28   :  { %1985 = vmatpush1.bf16.msra.mxu0 %v2653_v39  ;;  %1774 = vmatprep.subr.bf16.mxu1 %v2654_v40  ;;  %v2259_v39 = vcombine.high %v34_v35, %v42_v36  ;;  %v2258_v40 = vcombine.low %v34_v35, %v42_v36  ;;  %v2792_v36 = vld [vmem:[%s3925_s1 + $0x210] ss:$8 sps:$4 sm:$0xff]  }
  0x29   :  { %1986 = vmatprep.subr.bf16.mxu0 %v2656_v41  ;;  %v2731_v41 = vld [vmem:[%s3925_s1 + $0x564] ss:$8 sps:$4 sm:$0xff]  }
  0x2b   :  { %1775 = vmatpush1.bf16.msra.mxu1 %v2658_v42  ;;  %v2726_v42 = vld [vmem:[%s3925_s1 + $0x160] ss:$8 sps:$4 sm:$0xff]  }
  0x2c   :  { %1987 = vmatpush1.bf16.msra.mxu0 %v2659_v43  ;;  %1776 = vmatprep.subr.bf16.mxu1 %v2660_v44  ;;  %v2729_v43 = vld [vmem:[%s3925_s1 + $0x560] ss:$8 sps:$4 sm:$0xff]  }
  0x2d   :  { %1988 = vmatprep.subr.bf16.mxu0 %v2662_v45  ;;  %v3301_v44 = vld [vmem:[%s3926_s0 + $0x8] sm:$0xff] }
  0x2e   :  { %v3306_v45 = vld [vmem:[%s3926_s0 + $0x48] sm:$0xff] }
  0x2f   :  { %1777 = vmatpush1.bf16.msra.mxu1 %v2664_v46  ;;  %v2734_v46 = vld [vmem:[%s3925_s1 + $0x174] ss:$8 sps:$4 sm:$0xff]   ;;  %v2237_v48 = vcombine.high %v3301_v44, %v3306_v45 }
  0x30   :  { %1989 = vmatpush1.bf16.msra.mxu0 %v2665_v47  ;;  %1778 = vmatprep.subr.bf16.mxu1 %v2666_v50  ;;  %v2737_v47 = vld [vmem:[%s3925_s1 + $0x574] ss:$8 sps:$4 sm:$0xff]   ;;  %v3324_v50 = vld [vmem:[%s3926_s0 + $0x68] sm:$0xff] }
  0x31   :  { %1990 = vmatprep.subr.bf16.mxu0 %v2668_v51  ;;  %v2732_v51 = vld [vmem:[%s3925_s1 + $0x170] ss:$8 sps:$4 sm:$0xff]   ;;  %v2245_v53 = vcombine.high %v3319_v49, %v3324_v50 }
  0x33   :  { %1779 = vmatpush1.bf16.msra.mxu1 %v2670_v56  ;;  %v2738_v56 = vld [vmem:[%s3925_s1 + $0x180] ss:$8 sps:$4 sm:$0xff]  }
  0x34   :  { %1991 = vmatpush1.bf16.msra.mxu0 %v2671_v57  ;;  %1780 = vmatprep.subr.bf16.mxu1 %v2672_v58  ;;  %v2741_v57 = vld [vmem:[%s3925_s1 + $0x580] ss:$8 sps:$4 sm:$0xff]   ;;  %v2746_v58 = vld [vmem:[%s3925_s1 + $0x194] ss:$8 sps:$4 sm:$0xff]  }
  0x35   :  { %1992 = vmatprep.subr.bf16.mxu0 %v2674_v59  ;;  %v2749_v59 = vld [vmem:[%s3925_s1 + $0x594] ss:$8 sps:$4 sm:$0xff]  }
  0x37   :  { %1781 = vmatpush1.bf16.msra.mxu1 %v2676_v60  ;;  %v2744_v60 = vld [vmem:[%s3925_s1 + $0x190] ss:$8 sps:$4 sm:$0xff]  }
  0x38   :  { %1993 = vmatpush1.bf16.msra.mxu0 %v2677_v61  ;;  %1782 = vmatprep.subr.bf16.mxu1 %v2678_v62  ;;  %v2747_v61 = vld [vmem:[%s3925_s1 + $0x590] ss:$8 sps:$4 sm:$0xff]   ;;  %v2752_v62 = vld [vmem:[%s3925_s1 + $0x1a4] ss:$8 sps:$4 sm:$0xff]  }
  0x39   :  { %1994 = vmatprep.subr.bf16.mxu0 %v2680_v63  ;;  %v2755_v63 = vld [vmem:[%s3925_s1 + $0x5a4] ss:$8 sps:$4 sm:$0xff]  }
  0x3b   :  { %1783 = vmatpush1.bf16.msra.mxu1 %v2682_v0  ;;  %v2750_v0 = vld [vmem:[%s3925_s1 + $0x1a0] ss:$8 sps:$4 sm:$0xff]  }
  0x3c   :  { %1995 = vmatpush1.bf16.msra.mxu0 %v2683_v1  ;;  %1784 = vmatprep.subr.bf16.mxu1 %v2684_v2  ;;  %v2753_v1 = vld [vmem:[%s3925_s1 + $0x5a0] ss:$8 sps:$4 sm:$0xff]   ;;  %v2758_v2 = vld [vmem:[%s3925_s1 + $0x1b4] ss:$8 sps:$4 sm:$0xff]  }
  0x3d   :  { %1996 = vmatprep.subr.bf16.mxu0 %v2686_v3  ;;  %v2761_v3 = vld [vmem:[%s3925_s1 + $0x5b4] ss:$8 sps:$4 sm:$0xff]  }
  0x3f   :  { %1785 = vmatpush1.bf16.msra.mxu1 %v2688_v4  ;;  %v2756_v4 = vld [vmem:[%s3925_s1 + $0x1b0] ss:$8 sps:$4 sm:$0xff]  }
  0x40   :  { %1997 = vmatpush1.bf16.msra.mxu0 %v2689_v5  ;;  %1807 = vmatprep.subr.bf16.mxu1 %v2692_v6  ;;  %v2759_v5 = vld [vmem:[%s3925_s1 + $0x5b0] ss:$8 sps:$4 sm:$0xff]   ;;  %v2764_v6 = vld [vmem:[%s3925_s1 + $0x1c4] ss:$8 sps:$4 sm:$0xff]  }
  0x41   :  { %2019 = vmatprep.subr.bf16.mxu0 %v2695_v7  ;;  %v2767_v7 = vld [vmem:[%s3925_s1 + $0x5c4] ss:$8 sps:$4 sm:$0xff]  }
  0x42   :  { %1787 = vmatmul.mubr.bf16.vlgmr.msra.gmra.mrb[0].mxu1 %v2234_v8  ;;  %v2762_v8 = vld [vmem:[%s3925_s1 + $0x1c0] ss:$8 sps:$4 sm:$0xff]  }
  0x43   :  { %1999 = vmatmul.mubr.bf16.vlgmr.msra.gmra.mrb[0].mxu0 %v2242_v10  ;;  %1808 = vmatpush1.bf16.msra.mxu1 %v2690_v9  ;;  %v2765_v9 = vld [vmem:[%s3925_s1 + $0x5c0] ss:$8 sps:$4 sm:$0xff]   ;;  %v2770_v10 = vld [vmem:[%s3925_s1 + $0x1d4] ss:$8 sps:$4 sm:$0xff]  }
  0x44   :  { %2020 = vmatpush1.bf16.msra.mxu0 %v2693_v11  ;;  %1809 = vmatprep.subr.bf16.mxu1 %v2698_v12  ;;  %v2773_v11 = vld [vmem:[%s3925_s1 + $0x5d4] ss:$8 sps:$4 sm:$0xff]   ;;  %v2768_v12 = vld [vmem:[%s3925_s1 + $0x1d0] ss:$8 sps:$4 sm:$0xff]  }
  0x45   :  { %2021 = vmatprep.subr.bf16.mxu0 %v2701_v13  ;;  %1796 = vmatprep.mubr.bf16.mxu1 %v2251_v33  ;;  %v2771_v13 = vld [vmem:[%s3925_s1 + $0x5d0] ss:$8 sps:$4 sm:$0xff]   ;;  %v43_v33 = vld [vmem:[%s3926_s0 + $0xe8] sm:$0xff] }
  0x46   :  { %2008 = vmatprep.mubr.bf16.mxu0 %v2259_v39  ;;  %v2803_v39 = vld [vmem:[%s3925_s1 + $0x624] ss:$8 sps:$4 sm:$0xff]  }
  0x47   :  { %1810 = vmatpush1.bf16.msra.mxu1 %v2696_v14  ;;  %v2776_v14 = vld [vmem:[%s3925_s1 + $0x1e4] ss:$8 sps:$4 sm:$0xff]  }
  0x48   :  { %2022 = vmatpush1.bf16.msra.mxu0 %v2699_v15  ;;  %1811 = vmatprep.subr.bf16.mxu1 %v2704_v16  ;;  %v2779_v15 = vld [vmem:[%s3925_s1 + $0x5e4] ss:$8 sps:$4 sm:$0xff]   ;;  %v2774_v16 = vld [vmem:[%s3925_s1 + $0x1e0] ss:$8 sps:$4 sm:$0xff]  }
  0x49   :  { %2023 = vmatprep.subr.bf16.mxu0 %v2707_v17  ;;  %v2777_v17 = vld [vmem:[%s3925_s1 + $0x5e0] ss:$8 sps:$4 sm:$0xff]  }
  0x4a   :  { %1797 = vmatmul.mubr.bf16.gmra.mrb[4].mxu1 %v2250_v37  ;;  %v2795_v37 = vld [vmem:[%s3925_s1 + $0x610] ss:$8 sps:$4 sm:$0xff]  }
  0x4b   :  { %1812 = vmatpush1.bf16.msra.mxu1 %v2702_v18  ;;  %2009 = vmatmul.mubr.bf16.gmra.mrb[4].mxu0 %v2258_v40  ;;  %v2782_v18 = vld [vmem:[%s3925_s1 + $0x1f4] ss:$8 sps:$4 sm:$0xff]   ;;  %v2798_v40 = vld [vmem:[%s3925_s1 + $0x220] ss:$8 sps:$4 sm:$0xff]  }
  0x4c   :  { %2024 = vmatpush1.bf16.msra.mxu0 %v2705_v19  ;;  %1813 = vmatprep.subr.bf16.mxu1 %v2710_v20  ;;  %v2785_v19 = vld [vmem:[%s3925_s1 + $0x5f4] ss:$8 sps:$4 sm:$0xff]   ;;  %v2780_v20 = vld [vmem:[%s3925_s1 + $0x1f0] ss:$8 sps:$4 sm:$0xff]  }
  0x4d   :  { %2025 = vmatprep.subr.bf16.mxu0 %v2713_v21  ;;  %1839 = vmatprep.mubr.bf16.mxu1 %v2237_v48  ;;  %v2783_v21 = vld [vmem:[%s3925_s1 + $0x5f0] ss:$8 sps:$4 sm:$0xff]   ;;  %v2806_v48 = vld [vmem:[%s3925_s1 + $0x234] ss:$8 sps:$4 sm:$0xff]  }
  0x4e   :  { %2051 = vmatprep.mubr.bf16.mxu0 %v2245_v53  ;;  %v2807_v53 = vld [vmem:[%s3925_s1 + $0x630] ss:$8 sps:$4 sm:$0xff]  }
  0x4f   :  { %1814 = vmatpush1.bf16.msra.mxu1 %v2708_v22  ;;  %v2788_v22 = vld [vmem:[%s3925_s1 + $0x204] ss:$8 sps:$4 sm:$0xff]  }
  0x50   :  { %2026 = vmatpush1.bf16.msra.mxu0 %v2711_v23  ;;  %1815 = vmatprep.subr.bf16.mxu1 %v2716_v24  ;;  %v2791_v23 = vld [vmem:[%s3925_s1 + $0x604] ss:$8 sps:$4 sm:$0xff]   ;;  %v2786_v24 = vld [vmem:[%s3925_s1 + $0x200] ss:$8 sps:$4 sm:$0xff]  }
  0x51   :  { %2027 = vmatprep.subr.bf16.mxu0 %v2719_v25  ;;  %v2789_v25 = vld [vmem:[%s3925_s1 + $0x600] ss:$8 sps:$4 sm:$0xff]  }
  0x53   :  { %1816 = vmatpush1.bf16.msra.mxu1 %v2714_v26  ;;  %v31_v26 = vld [vmem:[%s3926_s0 + $0x88] sm:$0xff] }
  0x54   :  { %2028 = vmatpush1.bf16.msra.mxu0 %v2717_v27  ;;  %1817 = vmatprep.subr.bf16.mxu1 %v2722_v28  ;;  %v2236_v27 = vcombine.low %v3301_v44, %v3306_v45  ;;  %v2244_v28 = vcombine.low %v3319_v49, %v3324_v50  ;;  %v3490_v45 = vld [vmem:[%s3926_s0 + $0x50] sm:$0xff] }
  0x55   :  { %2029 = vmatprep.subr.bf16.mxu0 %v2725_v29  ;;  %v39_v29 = vld [vmem:[%s3926_s0 + $0xc8] sm:$0xff]  ;;  %v2809_v49 = vld [vmem:[%s3925_s1 + $0x634] ss:$8 sps:$4 sm:$0xff]  }
  0x57   :  { %1818 = vmatpush1.bf16.msra.mxu1 %v2720_v32  ;;  %v35_v32 = vld [vmem:[%s3926_s0 + $0xa8] sm:$0xff] }
  0x58   :  { %2030 = vmatpush1.bf16.msra.mxu0 %v2723_v34  ;;  %1819 = vmatprep.subr.bf16.mxu1 %v2728_v38  ;;  %v2253_v34 = vcombine.high %v31_v26, %v39_v29  ;;  %v2261_v35 = vcombine.high %v35_v32, %v43_v33  ;;  %v2800_v38 = vld [vmem:[%s3925_s1 + $0x224] ss:$8 sps:$4 sm:$0xff]   ;;  %v2260_v44 = vcombine.low %v35_v32, %v43_v33  ;;  %v2870_v32 = vld [vmem:[%s3925_s1 + $0x2e0] ss:$8 sps:$4 sm:$0xff]  }
  0x59   :  { %2031 = vmatprep.subr.bf16.mxu0 %v2731_v41  ;;  %v2801_v41 = vld [vmem:[%s3925_s1 + $0x620] ss:$8 sps:$4 sm:$0xff]  }
  0x5a   :  { %v2873_v33 = vld [vmem:[%s3925_s1 + $0x6e0] ss:$8 sps:$4 sm:$0xff]  }
  0x5b   :  { %1820 = vmatpush1.bf16.msra.mxu1 %v2726_v42  ;;  %v3485_v42 = vld [vmem:[%s3926_s0 + $0x10] sm:$0xff] }
  0x5c   :  { %2032 = vmatpush1.bf16.msra.mxu0 %v2729_v43  ;;  %1821 = vmatprep.subr.bf16.mxu1 %v2734_v46  ;;  %v2252_v43 = vcombine.low %v31_v26, %v39_v29  ;;  %v3495_v46 = vld [vmem:[%s3926_s0 + $0x30] sm:$0xff]  ;;  %v2239_v50 = vcombine.high %v3485_v42, %v3490_v45 }
  0x5d   :  { %2033 = vmatprep.subr.bf16.mxu0 %v2737_v47  ;;  %v3500_v47 = vld [vmem:[%s3926_s0 + $0x70] sm:$0xff] }
  0x5e   :  { %v2866_v26 = vld [vmem:[%s3925_s1 + $0x2d4] ss:$8 sps:$4 sm:$0xff]   ;;  %v2867_v29 = vld [vmem:[%s3925_s1 + $0x6d0] ss:$8 sps:$4 sm:$0xff]  }
  0x5f   :  { %1822 = vmatpush1.bf16.msra.mxu1 %v2732_v51  ;;  %v2247_v51 = vcombine.high %v3495_v46, %v3500_v47 }
  0x60   :  { %2034 = vmatpush1.bf16.msra.mxu0 %v2735_v52  ;;  %1823 = vmatprep.subr.bf16.mxu1 %v2740_v54  ;;  %v2804_v52 = vld [vmem:[%s3925_s1 + $0x230] ss:$8 sps:$4 sm:$0xff]   ;;  %v2812_v54 = vld [vmem:[%s3925_s1 + $0x244] ss:$8 sps:$4 sm:$0xff]  }
  0x61   :  { %2035 = vmatprep.subr.bf16.mxu0 %v2743_v55  ;;  %v2815_v55 = vld [vmem:[%s3925_s1 + $0x644] ss:$8 sps:$4 sm:$0xff]  }
  0x63   :  { %1824 = vmatpush1.bf16.msra.mxu1 %v2738_v56  ;;  %v2810_v56 = vld [vmem:[%s3925_s1 + $0x240] ss:$8 sps:$4 sm:$0xff]  }
  0x64   :  { %2036 = vmatpush1.bf16.msra.mxu0 %v2741_v57  ;;  %1825 = vmatprep.subr.bf16.mxu1 %v2746_v58  ;;  %v2813_v57 = vld [vmem:[%s3925_s1 + $0x640] ss:$8 sps:$4 sm:$0xff]   ;;  %v2818_v58 = vld [vmem:[%s3925_s1 + $0x254] ss:$8 sps:$4 sm:$0xff]  }
  0x65   :  { %2037 = vmatprep.subr.bf16.mxu0 %v2749_v59  ;;  %v2821_v59 = vld [vmem:[%s3925_s1 + $0x654] ss:$8 sps:$4 sm:$0xff]  }
  0x67   :  { %1826 = vmatpush1.bf16.msra.mxu1 %v2744_v60  ;;  %v2816_v60 = vld [vmem:[%s3925_s1 + $0x250] ss:$8 sps:$4 sm:$0xff]  }
  0x68   :  { %2038 = vmatpush1.bf16.msra.mxu0 %v2747_v61  ;;  %1827 = vmatprep.subr.bf16.mxu1 %v2752_v62  ;;  %v2819_v61 = vld [vmem:[%s3925_s1 + $0x650] ss:$8 sps:$4 sm:$0xff]   ;;  %v2824_v62 = vld [vmem:[%s3925_s1 + $0x264] ss:$8 sps:$4 sm:$0xff]  }
  0x69   :  { %2039 = vmatprep.subr.bf16.mxu0 %v2755_v63  ;;  %v2827_v63 = vld [vmem:[%s3925_s1 + $0x664] ss:$8 sps:$4 sm:$0xff]  }
  0x6b   :  { %1828 = vmatpush1.bf16.msra.mxu1 %v2750_v0  ;;  %v2822_v0 = vld [vmem:[%s3925_s1 + $0x260] ss:$8 sps:$4 sm:$0xff]  }
  0x6c   :  { %2040 = vmatpush1.bf16.msra.mxu0 %v2753_v1  ;;  %1829 = vmatprep.subr.bf16.mxu1 %v2758_v2  ;;  %v2825_v1 = vld [vmem:[%s3925_s1 + $0x660] ss:$8 sps:$4 sm:$0xff]   ;;  %v2830_v2 = vld [vmem:[%s3925_s1 + $0x274] ss:$8 sps:$4 sm:$0xff]  }
  0x6d   :  { %2041 = vmatprep.subr.bf16.mxu0 %v2761_v3  ;;  %v2833_v3 = vld [vmem:[%s3925_s1 + $0x674] ss:$8 sps:$4 sm:$0xff]  }
  0x6f   :  { %1830 = vmatpush1.bf16.msra.mxu1 %v2756_v4  ;;  %v2828_v4 = vld [vmem:[%s3925_s1 + $0x270] ss:$8 sps:$4 sm:$0xff]  }
  0x70   :  { %2042 = vmatpush1.bf16.msra.mxu0 %v2759_v5  ;;  %1831 = vmatprep.subr.bf16.mxu1 %v2764_v6  ;;  %v2831_v5 = vld [vmem:[%s3925_s1 + $0x670] ss:$8 sps:$4 sm:$0xff]   ;;  %v2836_v6 = vld [vmem:[%s3925_s1 + $0x284] ss:$8 sps:$4 sm:$0xff]  }
  0x71   :  { %2043 = vmatprep.subr.bf16.mxu0 %v2767_v7  ;;  %v2839_v7 = vld [vmem:[%s3925_s1 + $0x684] ss:$8 sps:$4 sm:$0xff]  }
  0x73   :  { %1832 = vmatpush1.bf16.msra.mxu1 %v2762_v8  ;;  %v2834_v8 = vld [vmem:[%s3925_s1 + $0x280] ss:$8 sps:$4 sm:$0xff]  }
  0x74   :  { %2044 = vmatpush1.bf16.msra.mxu0 %v2765_v9  ;;  %1833 = vmatprep.subr.bf16.mxu1 %v2770_v10  ;;  %v2837_v9 = vld [vmem:[%s3925_s1 + $0x680] ss:$8 sps:$4 sm:$0xff]   ;;  %v2842_v10 = vld [vmem:[%s3925_s1 + $0x294] ss:$8 sps:$4 sm:$0xff]  }
  0x75   :  { %2045 = vmatprep.subr.bf16.mxu0 %v2773_v11  ;;  %v2845_v11 = vld [vmem:[%s3925_s1 + $0x694] ss:$8 sps:$4 sm:$0xff]  }
  0x77   :  { %1834 = vmatpush1.bf16.msra.mxu1 %v2768_v12  ;;  %v2840_v12 = vld [vmem:[%s3925_s1 + $0x290] ss:$8 sps:$4 sm:$0xff]  }
  0x78   :  { %2046 = vmatpush1.bf16.msra.mxu0 %v2771_v13  ;;  %1835 = vmatprep.subr.bf16.mxu1 %v2776_v14  ;;  %v2843_v13 = vld [vmem:[%s3925_s1 + $0x690] ss:$8 sps:$4 sm:$0xff]   ;;  %v2848_v14 = vld [vmem:[%s3925_s1 + $0x2a4] ss:$8 sps:$4 sm:$0xff]  }
  0x79   :  { %2047 = vmatprep.subr.bf16.mxu0 %v2779_v15  ;;  %v2851_v15 = vld [vmem:[%s3925_s1 + $0x6a4] ss:$8 sps:$4 sm:$0xff]  }
  0x7b   :  { %1836 = vmatpush1.bf16.msra.mxu1 %v2774_v16  ;;  %v2846_v16 = vld [vmem:[%s3925_s1 + $0x2a0] ss:$8 sps:$4 sm:$0xff]  }
  0x7c   :  { %2048 = vmatpush1.bf16.msra.mxu0 %v2777_v17  ;;  %1837 = vmatprep.subr.bf16.mxu1 %v2782_v18  ;;  %v2849_v17 = vld [vmem:[%s3925_s1 + $0x6a0] ss:$8 sps:$4 sm:$0xff]   ;;  %v2854_v18 = vld [vmem:[%s3925_s1 + $0x2b4] ss:$8 sps:$4 sm:$0xff]  }
  0x7d   :  { %2049 = vmatprep.subr.bf16.mxu0 %v2785_v19  ;;  %v2857_v19 = vld [vmem:[%s3925_s1 + $0x6b4] ss:$8 sps:$4 sm:$0xff]  }
  0x7f   :  { %1838 = vmatpush1.bf16.msra.mxu1 %v2780_v20  ;;  %v2852_v20 = vld [vmem:[%s3925_s1 + $0x2b0] ss:$8 sps:$4 sm:$0xff]  }
  0x80   :  { %2050 = vmatpush1.bf16.msra.mxu0 %v2783_v21  ;;  %1860 = vmatprep.subr.bf16.mxu1 %v2788_v22  ;;  %v2855_v21 = vld [vmem:[%s3925_s1 + $0x6b0] ss:$8 sps:$4 sm:$0xff]   ;;  %v2860_v22 = vld [vmem:[%s3925_s1 + $0x2c4] ss:$8 sps:$4 sm:$0xff]  }
  0x81   :  { %2072 = vmatprep.subr.bf16.mxu0 %v2791_v23  ;;  %v2863_v23 = vld [vmem:[%s3925_s1 + $0x6c4] ss:$8 sps:$4 sm:$0xff]  }
  0x82   :  { %1840 = vmatmul.mubr.bf16.vlgmr.msra.gmra.mrb[0].mxu1 %v2236_v27  ;;  %v2869_v27 = vld [vmem:[%s3925_s1 + $0x6d4] ss:$8 sps:$4 sm:$0xff]  }
  0x83   :  { %2052 = vmatmul.mubr.bf16.vlgmr.msra.gmra.mrb[0].mxu0 %v2244_v28  ;;  %1861 = vmatpush1.bf16.msra.mxu1 %v2786_v24  ;;  %v2858_v24 = vld [vmem:[%s3925_s1 + $0x2c0] ss:$8 sps:$4 sm:$0xff]   ;;  %v2864_v28 = vld [vmem:[%s3925_s1 + $0x2d0] ss:$8 sps:$4 sm:$0xff]  }
  0x84   :  { %2073 = vmatpush1.bf16.msra.mxu0 %v2789_v25  ;;  %1862 = vmatprep.subr.bf16.mxu1 %v2794_v30  ;;  %v2861_v25 = vld [vmem:[%s3925_s1 + $0x6c0] ss:$8 sps:$4 sm:$0xff]   ;;  %v2872_v30 = vld [vmem:[%s3925_s1 + $0x2e4] ss:$8 sps:$4 sm:$0xff]  }
  0x85   :  { %2074 = vmatprep.subr.bf16.mxu0 %v2797_v31  ;;  %1849 = vmatprep.mubr.bf16.mxu1 %v2253_v34  ;;  %v2875_v31 = vld [vmem:[%s3925_s1 + $0x6e4] ss:$8 sps:$4 sm:$0xff]   ;;  %v2878_v34 = vld [vmem:[%s3925_s1 + $0x2f4] ss:$8 sps:$4 sm:$0xff]  }
  0x86   :  { %2061 = vmatprep.mubr.bf16.mxu0 %v2261_v35  ;;  %v2881_v35 = vld [vmem:[%s3925_s1 + $0x6f4] ss:$8 sps:$4 sm:$0xff]  }
  0x87   :  { %1863 = vmatpush1.bf16.msra.mxu1 %v2792_v36  ;;  %v2876_v36 = vld [vmem:[%s3925_s1 + $0x2f0] ss:$8 sps:$4 sm:$0xff]  }
  0x88   :  { %2075 = vmatpush1.bf16.msra.mxu0 %v2795_v37  ;;  %1864 = vmatprep.subr.bf16.mxu1 %v2800_v38  ;;  %v2879_v37 = vld [vmem:[%s3925_s1 + $0x6f0] ss:$8 sps:$4 sm:$0xff]   ;;  %v2884_v38 = vld [vmem:[%s3925_s1 + $0x304] ss:$8 sps:$4 sm:$0xff]  }
  0x89   :  { %2076 = vmatprep.subr.bf16.mxu0 %v2803_v39  ;;  %v2887_v39 = vld [vmem:[%s3925_s1 + $0x704] ss:$8 sps:$4 sm:$0xff]  }
  0x8a   :  { %1850 = vmatmul.mubr.bf16.gmra.mrb[4].mxu1 %v2252_v43  ;;  %v2246_v43 = vcombine.low %v3495_v46, %v3500_v47  ;;  %v2890_v46 = vld [vmem:[%s3925_s1 + $0x314] ss:$8 sps:$4 sm:$0xff]  }
  0x8b   :  { %2062 = vmatmul.mubr.bf16.gmra.mrb[4].mxu0 %v2260_v44  ;;  %1865 = vmatpush1.bf16.msra.mxu1 %v2798_v40  ;;  %v32_v40 = vld [vmem:[%s3926_s0 + $0x90] sm:$0xff] }
  0x8c   :  { %2077 = vmatpush1.bf16.msra.mxu0 %v2801_v41  ;;  %1866 = vmatprep.subr.bf16.mxu1 %v2806_v48  ;;  %v2238_v41 = vcombine.low %v3485_v42, %v3490_v45  ;;  %v40_v44 = vld [vmem:[%s3926_s0 + $0xd0] sm:$0xff]  ;;  %v2882_v42 = vld [vmem:[%s3925_s1 + $0x300] ss:$8 sps:$4 sm:$0xff]  }
  0x8d   :  { %2078 = vmatprep.subr.bf16.mxu0 %v2809_v49  ;;  %1892 = vmatprep.mubr.bf16.mxu1 %v2239_v50  ;;  %v36_v48 = vld [vmem:[%s3926_s0 + $0xb0] sm:$0xff]  ;;  %v2885_v45 = vld [vmem:[%s3925_s1 + $0x700] ss:$8 sps:$4 sm:$0xff]   ;;  %v2255_v50 = vcombine.high %v32_v40, %v40_v44 }
  0x8e   :  { %2104 = vmatprep.mubr.bf16.mxu0 %v2247_v51  ;;  %v44_v49 = vld [vmem:[%s3926_s0 + $0xf0] sm:$0xff] }
  0x8f   :  { %1867 = vmatpush1.bf16.msra.mxu1 %v2804_v52  ;;  %v2893_v47 = vld [vmem:[%s3925_s1 + $0x714] ss:$8 sps:$4 sm:$0xff]   ;;  %v2263_v51 = vcombine.high %v36_v48, %v44_v49  ;;  %v2888_v52 = vld [vmem:[%s3925_s1 + $0x310] ss:$8 sps:$4 sm:$0xff]  }
  0x90   :  { %2079 = vmatpush1.bf16.msra.mxu0 %v2807_v53  ;;  %1868 = vmatprep.subr.bf16.mxu1 %v2812_v54  ;;  %v2891_v53 = vld [vmem:[%s3925_s1 + $0x710] ss:$8 sps:$4 sm:$0xff]   ;;  %v2896_v54 = vld [vmem:[%s3925_s1 + $0x324] ss:$8 sps:$4 sm:$0xff]  }
  0x91   :  { %2080 = vmatprep.subr.bf16.mxu0 %v2815_v55  ;;  %v2899_v55 = vld [vmem:[%s3925_s1 + $0x724] ss:$8 sps:$4 sm:$0xff]  }
  0x93   :  { %1869 = vmatpush1.bf16.msra.mxu1 %v2810_v56  ;;  %v3711_v56 = vld [vmem:[%s3926_s0 + $0x18] sm:$0xff] }
  0x94   :  { %2081 = vmatpush1.bf16.msra.mxu0 %v2813_v57  ;;  %1870 = vmatprep.subr.bf16.mxu1 %v2818_v58  ;;  %v2254_v57 = vcombine.low %v32_v40, %v40_v44  ;;  %v2262_v58 = vcombine.low %v36_v48, %v44_v49  ;;  %v2954_v40 = vld [vmem:[%s3925_s1 + $0x3c0] ss:$8 sps:$4 sm:$0xff]   ;;  %v2965_v44 = vld [vmem:[%s3925_s1 + $0x7d4] ss:$8 sps:$4 sm:$0xff]   ;;  %v2960_v48 = vld [vmem:[%s3925_s1 + $0x3d0] ss:$8 sps:$4 sm:$0xff]  }
  0x95   :  { %2082 = vmatprep.subr.bf16.mxu0 %v2821_v59  ;;  %v3716_v59 = vld [vmem:[%s3926_s0 + $0x58] sm:$0xff] }
  0x96   :  { %v2963_v49 = vld [vmem:[%s3925_s1 + $0x7d0] ss:$8 sps:$4 sm:$0xff]  }
  0x97   :  { %1871 = vmatpush1.bf16.msra.mxu1 %v2816_v60  ;;  %v3721_v60 = vld [vmem:[%s3926_s0 + $0x38] sm:$0xff] }
  0x98   :  { %2083 = vmatpush1.bf16.msra.mxu0 %v2819_v61  ;;  %1872 = vmatprep.subr.bf16.mxu1 %v2824_v62  ;;  %v3726_v61 = vld [vmem:[%s3926_s0 + $0x78] sm:$0xff]  ;;  %v2894_v62 = vld [vmem:[%s3925_s1 + $0x320] ss:$8 sps:$4 sm:$0xff]  }
  0x99   :  { %2084 = vmatprep.subr.bf16.mxu0 %v2827_v63  ;;  %v2897_v63 = vld [vmem:[%s3925_s1 + $0x720] ss:$8 sps:$4 sm:$0xff]  }
  0x9b   :  { %1873 = vmatpush1.bf16.msra.mxu1 %v2822_v0  ;;  %v2902_v0 = vld [vmem:[%s3925_s1 + $0x334] ss:$8 sps:$4 sm:$0xff]  }
  0x9c   :  { %2085 = vmatpush1.bf16.msra.mxu0 %v2825_v1  ;;  %1874 = vmatprep.subr.bf16.mxu1 %v2830_v2  ;;  %v2905_v1 = vld [vmem:[%s3925_s1 + $0x734] ss:$8 sps:$4 sm:$0xff]   ;;  %v2241_v2 = vcombine.high %v3711_v56, %v3716_v59 }
  0x9d   :  { %2086 = vmatprep.subr.bf16.mxu0 %v2833_v3  ;;  %v2249_v3 = vcombine.high %v3721_v60, %v3726_v61 }
  0x9f   :  { %1875 = vmatpush1.bf16.msra.mxu1 %v2828_v4  ;;  %v2900_v4 = vld [vmem:[%s3925_s1 + $0x330] ss:$8 sps:$4 sm:$0xff]  }
  0xa0   :  { %2087 = vmatpush1.bf16.msra.mxu0 %v2831_v5  ;;  %1876 = vmatprep.subr.bf16.mxu1 %v2836_v6  ;;  %v2903_v5 = vld [vmem:[%s3925_s1 + $0x730] ss:$8 sps:$4 sm:$0xff]   ;;  %v2908_v6 = vld [vmem:[%s3925_s1 + $0x344] ss:$8 sps:$4 sm:$0xff]  }
  0xa1   :  { %2088 = vmatprep.subr.bf16.mxu0 %v2839_v7  ;;  %v2911_v7 = vld [vmem:[%s3925_s1 + $0x744] ss:$8 sps:$4 sm:$0xff]  }
  0xa3   :  { %1877 = vmatpush1.bf16.msra.mxu1 %v2834_v8  ;;  %v2906_v8 = vld [vmem:[%s3925_s1 + $0x340] ss:$8 sps:$4 sm:$0xff]  }
  0xa4   :  { %2089 = vmatpush1.bf16.msra.mxu0 %v2837_v9  ;;  %1878 = vmatprep.subr.bf16.mxu1 %v2842_v10  ;;  %v2909_v9 = vld [vmem:[%s3925_s1 + $0x740] ss:$8 sps:$4 sm:$0xff]   ;;  %v2914_v10 = vld [vmem:[%s3925_s1 + $0x354] ss:$8 sps:$4 sm:$0xff]  }
  0xa5   :  { %2090 = vmatprep.subr.bf16.mxu0 %v2845_v11  ;;  %v2917_v11 = vld [vmem:[%s3925_s1 + $0x754] ss:$8 sps:$4 sm:$0xff]  }
  0xa7   :  { %1879 = vmatpush1.bf16.msra.mxu1 %v2840_v12  ;;  %v2912_v12 = vld [vmem:[%s3925_s1 + $0x350] ss:$8 sps:$4 sm:$0xff]  }
  0xa8   :  { %2091 = vmatpush1.bf16.msra.mxu0 %v2843_v13  ;;  %1880 = vmatprep.subr.bf16.mxu1 %v2848_v14  ;;  %v2915_v13 = vld [vmem:[%s3925_s1 + $0x750] ss:$8 sps:$4 sm:$0xff]   ;;  %v2920_v14 = vld [vmem:[%s3925_s1 + $0x364] ss:$8 sps:$4 sm:$0xff]  }
  0xa9   :  { %2092 = vmatprep.subr.bf16.mxu0 %v2851_v15  ;;  %v2923_v15 = vld [vmem:[%s3925_s1 + $0x764] ss:$8 sps:$4 sm:$0xff]  }
  0xab   :  { %1881 = vmatpush1.bf16.msra.mxu1 %v2846_v16  ;;  %v2918_v16 = vld [vmem:[%s3925_s1 + $0x360] ss:$8 sps:$4 sm:$0xff]  }
  0xac   :  { %2093 = vmatpush1.bf16.msra.mxu0 %v2849_v17  ;;  %1882 = vmatprep.subr.bf16.mxu1 %v2854_v18  ;;  %v2921_v17 = vld [vmem:[%s3925_s1 + $0x760] ss:$8 sps:$4 sm:$0xff]   ;;  %v2926_v18 = vld [vmem:[%s3925_s1 + $0x374] ss:$8 sps:$4 sm:$0xff]  }
  0xad   :  { %2094 = vmatprep.subr.bf16.mxu0 %v2857_v19  ;;  %v2929_v19 = vld [vmem:[%s3925_s1 + $0x774] ss:$8 sps:$4 sm:$0xff]  }
  0xaf   :  { %1883 = vmatpush1.bf16.msra.mxu1 %v2852_v20  ;;  %v2924_v20 = vld [vmem:[%s3925_s1 + $0x370] ss:$8 sps:$4 sm:$0xff]  }
  0xb0   :  { %2095 = vmatpush1.bf16.msra.mxu0 %v2855_v21  ;;  %1884 = vmatprep.subr.bf16.mxu1 %v2860_v22  ;;  %v2927_v21 = vld [vmem:[%s3925_s1 + $0x770] ss:$8 sps:$4 sm:$0xff]   ;;  %v2932_v22 = vld [vmem:[%s3925_s1 + $0x384] ss:$8 sps:$4 sm:$0xff]  }
  0xb1   :  { %2096 = vmatprep.subr.bf16.mxu0 %v2863_v23  ;;  %v2935_v23 = vld [vmem:[%s3925_s1 + $0x784] ss:$8 sps:$4 sm:$0xff]  }
  0xb3   :  { %1885 = vmatpush1.bf16.msra.mxu1 %v2858_v24  ;;  %v2930_v24 = vld [vmem:[%s3925_s1 + $0x380] ss:$8 sps:$4 sm:$0xff]  }
  0xb4   :  { %2097 = vmatpush1.bf16.msra.mxu0 %v2861_v25  ;;  %1886 = vmatprep.subr.bf16.mxu1 %v2866_v26  ;;  %v2933_v25 = vld [vmem:[%s3925_s1 + $0x780] ss:$8 sps:$4 sm:$0xff]   ;;  %v2938_v26 = vld [vmem:[%s3925_s1 + $0x394] ss:$8 sps:$4 sm:$0xff]  }
  0xb5   :  { %2098 = vmatprep.subr.bf16.mxu0 %v2869_v27  ;;  %v2941_v27 = vld [vmem:[%s3925_s1 + $0x794] ss:$8 sps:$4 sm:$0xff]  }
  0xb7   :  { %1887 = vmatpush1.bf16.msra.mxu1 %v2864_v28  ;;  %v2936_v28 = vld [vmem:[%s3925_s1 + $0x390] ss:$8 sps:$4 sm:$0xff]  }
  0xb8   :  { %2099 = vmatpush1.bf16.msra.mxu0 %v2867_v29  ;;  %1888 = vmatprep.subr.bf16.mxu1 %v2872_v30  ;;  %v2939_v29 = vld [vmem:[%s3925_s1 + $0x790] ss:$8 sps:$4 sm:$0xff]   ;;  %v2944_v30 = vld [vmem:[%s3925_s1 + $0x3a4] ss:$8 sps:$4 sm:$0xff]  }
  0xb9   :  { %2100 = vmatprep.subr.bf16.mxu0 %v2875_v31  ;;  %v2947_v31 = vld [vmem:[%s3925_s1 + $0x7a4] ss:$8 sps:$4 sm:$0xff]  }
  0xbb   :  { %1889 = vmatpush1.bf16.msra.mxu1 %v2870_v32  ;;  %v2942_v32 = vld [vmem:[%s3925_s1 + $0x3a0] ss:$8 sps:$4 sm:$0xff]  }
  0xbc   :  { %2101 = vmatpush1.bf16.msra.mxu0 %v2873_v33  ;;  %1890 = vmatprep.subr.bf16.mxu1 %v2878_v34  ;;  %v2945_v33 = vld [vmem:[%s3925_s1 + $0x7a0] ss:$8 sps:$4 sm:$0xff]   ;;  %v2950_v34 = vld [vmem:[%s3925_s1 + $0x3b4] ss:$8 sps:$4 sm:$0xff]  }
  0xbd   :  { %2102 = vmatprep.subr.bf16.mxu0 %v2881_v35  ;;  %v2953_v35 = vld [vmem:[%s3925_s1 + $0x7b4] ss:$8 sps:$4 sm:$0xff]  }
  0xbf   :  { %1891 = vmatpush1.bf16.msra.mxu1 %v2876_v36  ;;  %v2948_v36 = vld [vmem:[%s3925_s1 + $0x3b0] ss:$8 sps:$4 sm:$0xff]  }
  0xc0   :  { %2103 = vmatpush1.bf16.msra.mxu0 %v2879_v37  ;;  %1913 = vmatprep.subr.bf16.mxu1 %v2884_v38  ;;  %v2951_v37 = vld [vmem:[%s3925_s1 + $0x7b0] ss:$8 sps:$4 sm:$0xff]   ;;  %v2956_v38 = vld [vmem:[%s3925_s1 + $0x3c4] ss:$8 sps:$4 sm:$0xff]  }
  0xc1   :  { %2125 = vmatprep.subr.bf16.mxu0 %v2887_v39  ;;  %v2959_v39 = vld [vmem:[%s3925_s1 + $0x7c4] ss:$8 sps:$4 sm:$0xff]  }
  0xc2   :  { %1893 = vmatmul.mubr.bf16.vlgmr.msra.gmra.mrb[0].mxu1 %v2238_v41  ;;  %v2957_v41 = vld [vmem:[%s3925_s1 + $0x7c0] ss:$8 sps:$4 sm:$0xff]  }
  0xc3   :  { %2105 = vmatmul.mubr.bf16.vlgmr.msra.gmra.mrb[0].mxu0 %v2246_v43  ;;  %1914 = vmatpush1.bf16.msra.mxu1 %v2882_v42  ;;  %v2962_v43 = vld [vmem:[%s3925_s1 + $0x3d4] ss:$8 sps:$4 sm:$0xff]   ;;  %v2968_v42 = vld [vmem:[%s3925_s1 + $0x3e4] ss:$8 sps:$4 sm:$0xff]  }
  0xc4   :  { %2126 = vmatpush1.bf16.msra.mxu0 %v2885_v45  ;;  %1915 = vmatprep.subr.bf16.mxu1 %v2890_v46  ;;  %v2971_v45 = vld [vmem:[%s3925_s1 + $0x7e4] ss:$8 sps:$4 sm:$0xff]   ;;  %v2966_v46 = vld [vmem:[%s3925_s1 + $0x3e0] ss:$8 sps:$4 sm:$0xff]  }
  0xc5   :  { %2127 = vmatprep.subr.bf16.mxu0 %v2893_v47  ;;  %1902 = vmatprep.mubr.bf16.mxu1 %v2255_v50  ;;  %v2969_v47 = vld [vmem:[%s3925_s1 + $0x7e0] ss:$8 sps:$4 sm:$0xff]   ;;  %v2974_v50 = vld [vmem:[%s3925_s1 + $0x3f4] ss:$8 sps:$4 sm:$0xff]  }
  0xc6   :  { %2114 = vmatprep.mubr.bf16.mxu0 %v2263_v51  ;;  %v2977_v51 = vld [vmem:[%s3925_s1 + $0x7f4] ss:$8 sps:$4 sm:$0xff]  }
  0xc7   :  { %1916 = vmatpush1.bf16.msra.mxu1 %v2888_v52  ;;  %v2972_v52 = vld [vmem:[%s3925_s1 + $0x3f0] ss:$8 sps:$4 sm:$0xff]  }
  0xc8   :  { %2128 = vmatpush1.bf16.msra.mxu0 %v2891_v53  ;;  %1917 = vmatprep.subr.bf16.mxu1 %v2896_v54  ;;  %v2975_v53 = vld [vmem:[%s3925_s1 + $0x7f0] ss:$8 sps:$4 sm:$0xff]  }
  0xc9   :  { %2129 = vmatprep.subr.bf16.mxu0 %v2899_v55  ;;  %v33_v54 = vld [vmem:[%s3926_s0 + $0x98] sm:$0xff] }
  0xca   :  { %1903 = vmatmul.mubr.bf16.gmra.mrb[4].mxu1 %v2254_v57  ;;  %v41_v55 = vld [vmem:[%s3926_s0 + $0xd8] sm:$0xff] }
  0xcb   :  { %2115 = vmatmul.mubr.bf16.gmra.mrb[4].mxu0 %v2262_v58  ;;  %1918 = vmatpush1.bf16.msra.mxu1 %v2894_v62  ;;  %v37_v57 = vld [vmem:[%s3926_s0 + $0xb8] sm:$0xff]  ;;  %v2240_v62 = vcombine.low %v3711_v56, %v3716_v59  ;;  %v302_v56 = vld [vmem:[%s3927_s2] sm:$0x3] }
  0xcc   :  { %2130 = vmatpush1.bf16.msra.mxu0 %v2897_v63  ;;  %1919 = vmatprep.subr.bf16.mxu1 %v2902_v0  ;;  %v45_v58 = vld [vmem:[%s3926_s0 + $0xf8] sm:$0xff]  ;;  %v2248_v63 = vcombine.low %v3721_v60, %v3726_v61  ;;  %v2257_v0 = vcombine.high %v33_v54, %v41_v55 }
  0xcd   :  { %2131 = vmatprep.subr.bf16.mxu0 %v2905_v1  ;;  %1945 = vmatprep.mubr.bf16.mxu1 %v2241_v2  ;;  %v2265_v1 = vcombine.high %v37_v57, %v45_v58  ;;  %v2256_v2 = vcombine.low %v33_v54, %v41_v55 }
  0xce   :  { %2157 = vmatprep.mubr.bf16.mxu0 %v2249_v3  ;;  %v2264_v3 = vcombine.low %v37_v57, %v45_v58 }
  0xcf   :  { %1920 = vmatpush1.bf16.msra.mxu1 %v2900_v4  ;;  %v304_v4 = vlaneseq }
  0xd0   :  { %2132 = vmatpush1.bf16.msra.mxu0 %v2903_v5  ;;  %1921 = vmatprep.subr.bf16.mxu1 %v2908_v6 }
  0xd1   :  { %2133 = vmatprep.subr.bf16.mxu0 %v2911_v7  ;;  %v305_v5 = vshrl.u32 %v304_v4, 7 }
  0xd3   :  { %1922 = vmatpush1.bf16.msra.mxu1 %v2906_v8  ;;  %v306_v6 = vsub.s32 0, %v305_v5  ;;  %v310_v59 = vsub.s32 1, %v305_v5 }
  0xd4   :  { %2134 = vmatpush1.bf16.msra.mxu0 %v2909_v9  ;;  %1923 = vmatprep.subr.bf16.mxu1 %v2914_v10 }
  0xd5   :  { %2135 = vmatprep.subr.bf16.mxu0 %v2917_v11  ;;  %v307_v60 = vrot.slane %v302_v56, %v306_v6  ;;  %v311_v61 = vrot.slane %v302_v56, %v310_v59 }
  0xd7   :  { %1924 = vmatpush1.bf16.msra.mxu1 %v2912_v12 }
  0xd8   :  { %2136 = vmatpush1.bf16.msra.mxu0 %v2915_v13  ;;  %1925 = vmatprep.subr.bf16.mxu1 %v2920_v14 }
  0xd9   :  { %2137 = vmatprep.subr.bf16.mxu0 %v2923_v15 }
  0xdb   :  { %1926 = vmatpush1.bf16.msra.mxu1 %v2918_v16 }
  0xdc   :  { %2138 = vmatpush1.bf16.msra.mxu0 %v2921_v17  ;;  %1927 = vmatprep.subr.bf16.mxu1 %v2926_v18 }
  0xdd   :  { %2139 = vmatprep.subr.bf16.mxu0 %v2929_v19 }
  0xdf   :  { %1928 = vmatpush1.bf16.msra.mxu1 %v2924_v20 }
  0xe0   :  { %2140 = vmatpush1.bf16.msra.mxu0 %v2927_v21  ;;  %1929 = vmatprep.subr.bf16.mxu1 %v2932_v22 }
  0xe1   :  { %2141 = vmatprep.subr.bf16.mxu0 %v2935_v23 }
  0xe3   :  { %1930 = vmatpush1.bf16.msra.mxu1 %v2930_v24 }
  0xe4   :  { %2142 = vmatpush1.bf16.msra.mxu0 %v2933_v25  ;;  %1931 = vmatprep.subr.bf16.mxu1 %v2938_v26 }
  0xe5   :  { %2143 = vmatprep.subr.bf16.mxu0 %v2941_v27 }
  0xe7   :  { %1932 = vmatpush1.bf16.msra.mxu1 %v2936_v28 }
  0xe8   :  { %2144 = vmatpush1.bf16.msra.mxu0 %v2939_v29  ;;  %1933 = vmatprep.subr.bf16.mxu1 %v2944_v30 }
  0xe9   :  { %2145 = vmatprep.subr.bf16.mxu0 %v2947_v31 }
  0xeb   :  { %1934 = vmatpush1.bf16.msra.mxu1 %v2942_v32 }
  0xec   :  { %2146 = vmatpush1.bf16.msra.mxu0 %v2945_v33  ;;  %1935 = vmatprep.subr.bf16.mxu1 %v2950_v34 }
  0xed   :  { %2147 = vmatprep.subr.bf16.mxu0 %v2953_v35 }
  0xef   :  { %1936 = vmatpush1.bf16.msra.mxu1 %v2948_v36 }
  0xf0   :  { %2148 = vmatpush1.bf16.msra.mxu0 %v2951_v37  ;;  %1937 = vmatprep.subr.bf16.mxu1 %v2956_v38 }
  0xf1   :  { %2149 = vmatprep.subr.bf16.mxu0 %v2959_v39 }
  0xf3   :  { %1938 = vmatpush1.bf16.msra.mxu1 %v2954_v40 }
  0xf4   :  { %2150 = vmatpush1.bf16.msra.mxu0 %v2957_v41  ;;  %1939 = vmatprep.subr.bf16.mxu1 %v2962_v43 }
  0xf5   :  { %2151 = vmatprep.subr.bf16.mxu0 %v2965_v44 }
  0xf7   :  { %1940 = vmatpush1.bf16.msra.mxu1 %v2960_v48 }
  0xf8   :  { %2152 = vmatpush1.bf16.msra.mxu0 %v2963_v49  ;;  %1941 = vmatprep.subr.bf16.mxu1 %v2968_v42 }
  0xf9   :  { %2153 = vmatprep.subr.bf16.mxu0 %v2971_v45 }
  0xfb   :  { %1942 = vmatpush1.bf16.msra.mxu1 %v2966_v46 }
  0xfc   :  { %2154 = vmatpush1.bf16.msra.mxu0 %v2969_v47  ;;  %1943 = vmatprep.subr.bf16.mxu1 %v2974_v50 }
  0xfd   :  { %2155 = vmatprep.subr.bf16.mxu0 %v2977_v51 }
  0xff   :  { %1944 = vmatpush1.bf16.msra.mxu1 %v2972_v52 }
 0x100   :  { %2156 = vmatpush1.bf16.msra.mxu0 %v2975_v53 }
 0x102   :  { %1946 = vmatmul.mubr.bf16.vlgmr.msra.gmra.mrb[0].mxu1 %v2240_v62 }
 0x103   :  { %2158 = vmatmul.mubr.bf16.vlgmr.msra.gmra.mrb[0].mxu0 %v2248_v63  ;;  %1955 = vmatprep.mubr.bf16.mxu1 %v2257_v0 }
 0x104   :  { %2167 = vmatprep.mubr.bf16.mxu0 %v2265_v1 }
 0x10a   :  { %1956 = vmatmul.mubr.bf16.gmra.mrb[4].mxu1 %v2256_v2 }
 0x10b   :  { %2168 = vmatmul.mubr.bf16.gmra.mrb[4].mxu0 %v2264_v3 }
 0x1d5   :  { %v1947_v7 = vpop.f32.mrb[0].mxu1 }
 0x1d6   :  { %v2159_v8 = vpop.f32.mrb[0].mxu0  ;;  %v2530_v9 = vadd.f32 %v1947_v7, %v307_v60  ;;  %v1949_v10 = vpop.f32.mrb[1].mxu1 }
 0x1d7   :  { %v2161_v11 = vpop.f32.mrb[1].mxu0  ;;  %v2532_v12 = vadd.f32 %v1949_v10, %v311_v61  ;;  %v1951_v13 = vpop.f32.mrb[2].mxu1 }
 0x1d8   :  { %v2163_v14 = vpop.f32.mrb[2].mxu0  ;;  %v2531_v15 = vadd.f32 %v2530_v9, %v2159_v8  ;;  %v2534_v16 = vadd.f32 %v1951_v13, %v307_v60  ;;  %v1953_v17 = vpop.f32.mrb[3].mxu1 }
 0x1d9   :  { %v2165_v18 = vpop.f32.mrb[3].mxu0  ;;  %v2533_v19 = vadd.f32 %v2532_v12, %v2161_v11  ;;  %v2536_v20 = vadd.f32 %v1953_v17, %v311_v61 }
 0x1da   :  { %vm2178_vm0 = vcmp.gt.f32.partialorder %v2531_v15, 0.0  ;;  %v2186_v21 = vmul.f32 0.2, %v2531_v15  ;;  %v2535_v22 = vadd.f32 %v2534_v16, %v2163_v14 }
 0x1db   :  { %vm2179_vm1 = vcmp.gt.f32.partialorder %v2533_v19, 0.0  ;;  %v2187_v23 = vmul.f32 0.2, %v2533_v19  ;;  %v2537_v24 = vadd.f32 %v2536_v20, %v2165_v18 }
 0x1dc   :  { %v2194_v25 = vsel %vm2178_vm0, %v2531_v15, %v2186_v21  ;;  %vm2180_vm2 = vcmp.gt.f32.partialorder %v2535_v22, 0.0  ;;  %v2188_v26 = vmul.f32 0.2, %v2535_v22 }
 0x1dd   :  { %v2195_v27 = vsel %vm2179_vm1, %v2533_v19, %v2187_v23  ;;  %vm2181_vm3 = vcmp.gt.f32.partialorder %v2537_v24, 0.0  ;;  %v2189_v28 = vmul.f32 0.2, %v2537_v24  ;;  %v1957_v29 = vpop.f32.mrb[4].mxu1 }
 0x1de   :  { %v2169_v30 = vpop.f32.mrb[4].mxu0  ;;  %v2526_v31 = vpack.c.bf16 %v2195_v27, %v2194_v25  ;;  %v2196_v32 = vsel %vm2180_vm2, %v2535_v22, %v2188_v26  ;;  %v2538_v33 = vadd.f32 %v1957_v29, %v307_v60  ;;  %v1959_v34 = vpop.f32.mrb[5].mxu1 }
 0x1df   :  { %v2171_v35 = vpop.f32.mrb[5].mxu0  ;;  %v2197_v36 = vsel %vm2181_vm3, %v2537_v24, %v2189_v28  ;;  %v2540_v37 = vadd.f32 %v1959_v34, %v311_v61  ;;  %v1961_v38 = vpop.f32.mrb[6].mxu1 }
 0x1e0   :  { %v2173_v39 = vpop.f32.mrb[6].mxu0  ;;  %2226 = vst [vmem:[%s3928_s3] sm:$0xff] %v2526_v31  ;;  %v2527_v40 = vpack.c.bf16 %v2197_v36, %v2196_v32  ;;  %v2539_v41 = vadd.f32 %v2538_v33, %v2169_v30  ;;  %v2542_v43 = vadd.f32 %v1961_v38, %v307_v60  ;;  %v1963_v44 = vpop.f32.mrb[7].mxu1 }
 0x1e1   :  { %v2175_v48 = vpop.f32.mrb[7].mxu0  ;;  %v2541_v49 = vadd.f32 %v2540_v37, %v2171_v35  ;;  %v2544_v42 = vadd.f32 %v1963_v44, %v311_v61 }
 0x1e2   :  { %2227 = vst [vmem:[%s3928_s3 + $0x8] sm:$0xff] %v2527_v40  ;;  %vm2182_vm4 = vcmp.gt.f32.partialorder %v2539_v41, 0.0  ;;  %v2190_v45 = vmul.f32 0.2, %v2539_v41  ;;  %v2543_v46 = vadd.f32 %v2542_v43, %v2173_v39 }
 0x1e3   :  { %vm2183_vm5 = vcmp.gt.f32.partialorder %v2541_v49, 0.0  ;;  %v2191_v47 = vmul.f32 0.2, %v2541_v49  ;;  %v2545_v50 = vadd.f32 %v2544_v42, %v2175_v48 }
 0x1e4   :  { %v2198_v51 = vsel %vm2182_vm4, %v2539_v41, %v2190_v45  ;;  %vm2184_vm6 = vcmp.gt.f32.partialorder %v2543_v46, 0.0  ;;  %v2192_v52 = vmul.f32 0.2, %v2543_v46 }
 0x1e5   :  { %v2199_v53 = vsel %vm2183_vm5, %v2541_v49, %v2191_v47  ;;  %vm2185_vm7 = vcmp.gt.f32.partialorder %v2545_v50, 0.0  ;;  %v2193_v54 = vmul.f32 0.2, %v2545_v50 }
 0x1e6   :  { %v2528_v55 = vpack.c.bf16 %v2199_v53, %v2198_v51  ;;  %v2200_v57 = vsel %vm2184_vm6, %v2543_v46, %v2192_v52 }
 0x1e7   :  { %v2201_v58 = vsel %vm2185_vm7, %v2545_v50, %v2193_v54 }
 0x1e8   :  { %2228 = vst [vmem:[%s3928_s3 + $0x10] sm:$0xff] %v2528_v55  ;;  %v2529_v62 = vpack.c.bf16 %v2201_v58, %v2200_v57 }
 0x1ea   :  { %2229 = vst [vmem:[%s3928_s3 + $0x18] sm:$0xff] %v2529_v62 }

// kernel: discriminator_forward.9
= control target key start
LH: loop header
LB: loop body
LE: loop exit
PB: predicated region body
PF: predicated region fallthrough
CT: control target
= control target key end

     0   :  { %v152_v1 = vlaneseq  ;;  %vm871_vm0 = vcmask 7168   ;;  %s1585_s2 = inlined_call_operand.<no memory space> [shape: f32[1,1], index: 2, kind: input, shape index: {}]   ;;  %s1586_s1 = inlined_call_operand.vmem [shape: bf16[1,8192], index: 1, kind: input, shape index: {}]   ;;  %s1587_s0 = inlined_call_operand.vmem [shape: bf16[8,8192], index: 0, kind: input, shape index: {}]   ;;  %s1588_s3 = inlined_call_operand.vmem [shape: f32[8,1], index: 3, kind: output, shape index: {}]  }
   0x1   :  { %v8_v0 = vstv %s1585_s2  ;;  %v117_v2 = vld [vmem:[%s1586_s1 + $0x28] sm:$0xff]  ;;  %v118_v3 = vld [vmem:[%s1586_s1 + $0x30] sm:$0xff]  ;;  %v119_v5 = vld [vmem:[%s1586_s1 + $0x38] sm:$0xff] }
   0x2   :  { %9 = vst [vmem:[#allocation2] sm:$0x1] %v8_v0  ;;  %v153_v4 = vshrl.u32 %v152_v1, 7  ;;  %v915_v6 = vunpack.c.l.bf16 %v117_v2  ;;  %v917_v7 = vunpack.c.h.bf16 %v117_v2  ;;  %v919_v8 = vunpack.c.l.bf16 %v118_v3  ;;  %v970_v32 = vld [vmem:[%s1587_s0] sm:$0xff]  ;;  %v975_v33 = vld [vmem:[%s1587_s0 + $0x8] sm:$0xff]  ;;  %v988_v38 = vld [vmem:[%s1587_s0 + $0x10] sm:$0xff] }
   0x3   :  { %v929_v13 = vunpack.c.h.bf16 %v118_v3  ;;  %v931_v14 = vunpack.c.l.bf16 %v119_v5  ;;  %v933_v15 = vunpack.c.h.bf16 %v119_v5  ;;  %1606 = vst [vmem:[#allocation7_spill] sm:$0xff] %v988_v38  ;;  %v993_v39 = vld [vmem:[%s1587_s0 + $0x88] sm:$0xff]  ;;  %v116_v40 = vld [vmem:[%s1586_s1 + $0x20] sm:$0xff]  ;;  %v1009_v45 = vld [vmem:[%s1587_s0 + $0x90] sm:$0xff] }
   0x4   :  { %v921_v9 = vsub.s32 0, %v153_v4  ;;  %v923_v10 = vsub.s32 2, %v153_v4  ;;  %v925_v11 = vsub.s32 4, %v153_v4  ;;  %v927_v12 = vsub.s32 6, %v153_v4  ;;  %v1014_v46 = vld [vmem:[%s1587_s0 + $0x98] sm:$0xff]  ;;  %v112_v54 = vld [vmem:[%s1586_s1] sm:$0xff] }
   0x5   :  { %v1026_v55 = vunpack.c.l.bf16 %v116_v40  ;;  %v1031_v56 = vld [vmem:[%s1587_s0 + $0xa0] sm:$0xff]  ;;  %v1036_v57 = vld [vmem:[%s1587_s0 + $0xa8] sm:$0xff]  ;;  %v1041_v61 = vunpack.c.h.bf16 %v116_v40  ;;  %v1046_v62 = vld [vmem:[%s1587_s0 + $0xb0] sm:$0xff]  ;;  %v1060_v4 = vunpack.c.l.bf16 %v112_v54  ;;  %v1076_v48 = vunpack.c.h.bf16 %v112_v54 }
   0x6   :  { %1602 = vst [vmem:[#allocation3_spill] sm:$0xff] %v921_v9  ;;  %1603 = vst [vmem:[#allocation4_spill] sm:$0xff] %v923_v10  ;;  %v315_v16 = vrot.slane %v915_v6, %v921_v9  ;;  %v319_v17 = vrot.slane %v915_v6, %v923_v10  ;;  %v323_v18 = vrot.slane %v915_v6, %v925_v11  ;;  %v1051_v63 = vld [vmem:[%s1587_s0 + $0xb8] sm:$0xff]  ;;  %v46_v50 = vld [vmem:[%s1587_s0 + $0xf0] sm:$0xff] }
   0x7   :  { %1604 = vst [vmem:[#allocation5_spill] sm:$0xff] %v925_v11  ;;  %1605 = vst [vmem:[#allocation6_spill] sm:$0xff] %v927_v12  ;;  %v327_v19 = vrot.slane %v915_v6, %v927_v12  ;;  %v331_v20 = vrot.slane %v917_v7, %v921_v9  ;;  %v335_v21 = vrot.slane %v917_v7, %v923_v10 }
   0x8   :  { %v339_v22 = vrot.slane %v917_v7, %v925_v11  ;;  %v343_v23 = vrot.slane %v917_v7, %v927_v12  ;;  %v347_v24 = vrot.slane %v919_v8, %v921_v9  ;;  %v351_v25 = vrot.slane %v919_v8, %v923_v10  ;;  %1607 = vst [vmem:[#allocation8_spill] sm:$0xff] %v1026_v55 }
   0x9   :  { %v355_v26 = vrot.slane %v919_v8, %v925_v11  ;;  %v359_v27 = vrot.slane %v919_v8, %v927_v12  ;;  %v363_v28 = vrot.slane %v929_v13, %v921_v9  ;;  %v367_v29 = vrot.slane %v929_v13, %v923_v10 }
   0xa   :  { %v371_v30 = vrot.slane %v929_v13, %v925_v11  ;;  %v375_v31 = vrot.slane %v929_v13, %v927_v12  ;;  %v379_v34 = vrot.slane %v931_v14, %v921_v9  ;;  %v383_v35 = vrot.slane %v931_v14, %v923_v10 }
   0xb   :  { %v387_v36 = vrot.slane %v931_v14, %v925_v11  ;;  %v391_v37 = vrot.slane %v931_v14, %v927_v12  ;;  %v395_v41 = vrot.slane %v933_v15, %v921_v9  ;;  %v399_v42 = vrot.slane %v933_v15, %v923_v10 }
   0xc   :  { %v403_v43 = vrot.slane %v933_v15, %v925_v11  ;;  %v407_v44 = vrot.slane %v933_v15, %v927_v12  ;;  %v287_v1 = vrot.slane %v1026_v55, %v923_v10  ;;  %v291_v2 = vrot.slane %v1026_v55, %v925_v11  ;;  %v45_v15 = vld [vmem:[%s1587_s0 + $0xe8] sm:$0xff] }
   0xd   :  { %v295_v3 = vrot.slane %v1026_v55, %v927_v12  ;;  %v303_v5 = vrot.slane %v1041_v61, %v923_v10  ;;  %v307_v40 = vrot.slane %v1041_v61, %v925_v11  ;;  %v311_v52 = vrot.slane %v1041_v61, %v927_v12 }
   0xe   :  { %v1079_v47 = vrot.slane %v287_v1, %v921_v9  ;;  %v1082_v51 = vrot.slane %v291_v2, %v921_v9  ;;  %v155_v59 = vrot.slane %v1060_v4, %v921_v9  ;;  %v1102_v1 = vrot.slane %v315_v16, %v921_v9 }
   0xf   :  { %v1085_v0 = vrot.slane %v295_v3, %v921_v9  ;;  %v1090_v58 = vrot.slane %v303_v5, %v921_v9  ;;  %v1093_v53 = vrot.slane %v307_v40, %v921_v9  ;;  %v1096_v54 = vrot.slane %v311_v52, %v921_v9 }
  0x10   :  { %1608 = vst [vmem:[#allocation9_spill] sm:$0xff] %v1079_v47  ;;  %v1108_v2 = vrot.slane %v319_v17, %v921_v9  ;;  %v1114_v3 = vrot.slane %v323_v18, %v921_v9  ;;  %v1120_v52 = vrot.slane %v327_v19, %v921_v9  ;;  %v1126_v16 = vrot.slane %v331_v20, %v921_v9 }
  0x11   :  { %v1132_v17 = vrot.slane %v335_v21, %v921_v9  ;;  %v1138_v18 = vrot.slane %v339_v22, %v921_v9  ;;  %v1144_v6 = vrot.slane %v343_v23, %v921_v9  ;;  %v1150_v19 = vrot.slane %v347_v24, %v921_v9  ;;  %v1173_v22 = vld [vmem:[%s1587_s0 + $0xc0] sm:$0xff] }
  0x12   :  { %v1156_v20 = vrot.slane %v351_v25, %v921_v9  ;;  %v1162_v21 = vrot.slane %v355_v26, %v921_v9  ;;  %v1168_v7 = vrot.slane %v359_v27, %v921_v9  ;;  %v1179_v23 = vrot.slane %v363_v28, %v921_v9  ;;  %v1202_v26 = vld [vmem:[%s1587_s0 + $0xc8] sm:$0xff] }
  0x13   :  { %v1185_v24 = vrot.slane %v367_v29, %v921_v9  ;;  %v1191_v8 = vrot.slane %v371_v30, %v921_v9  ;;  %v1197_v25 = vrot.slane %v375_v31, %v921_v9  ;;  %v1208_v27 = vrot.slane %v379_v34, %v921_v9  ;;  %v1231_v30 = vld [vmem:[%s1587_s0 + $0xd0] sm:$0xff]  ;;  %v1236_v31 = vld [vmem:[%s1587_s0 + $0xd8] sm:$0xff] }
  0x14   :  { %1609 = vst [vmem:[#allocation10_spill] sm:$0xff] %v1179_v23  ;;  %v1214_v28 = vrot.slane %v383_v35, %v921_v9  ;;  %v1220_v13 = vrot.slane %v387_v36, %v921_v9  ;;  %v1226_v29 = vrot.slane %v391_v37, %v921_v9  ;;  %v1242_v34 = vrot.slane %v395_v41, %v921_v9  ;;  %v1265_v37 = vld [vmem:[%s1587_s0 + $0xe0] sm:$0xff] }
  0x15   :  { %1610 = vst [vmem:[#allocation11_spill] sm:$0xff] %v1185_v24  ;;  %1611 = vst [vmem:[#allocation12_spill] sm:$0xff] %v1191_v8  ;;  %v1248_v14 = vrot.slane %v399_v42, %v921_v9  ;;  %v1254_v35 = vrot.slane %v403_v43, %v921_v9  ;;  %v1260_v36 = vrot.slane %v407_v44, %v921_v9  ;;  %v95_v41 = vunpack.c.h.bf16 %v1051_v63 }
  0x16   :  { %1612 = vst [vmem:[#allocation13_spill] sm:$0xff] %v1197_v25  ;;  %1613 = vst [vmem:[#allocation14_spill] sm:$0xff] %v1208_v27  ;;  %v96_v42 = vunpack.c.l.bf16 %v1173_v22  ;;  %v159_v5 = vrot.slane %v1060_v4, %v923_v10  ;;  %v163_v43 = vrot.slane %v1060_v4, %v925_v11  ;;  %v97_v44 = vunpack.c.h.bf16 %v1173_v22  ;;  %v47_v22 = vld [vmem:[%s1587_s0 + $0xf8] sm:$0xff] }
  0x17   :  { %1614 = vst [vmem:[#allocation15_spill] sm:$0xff] %v1214_v28  ;;  %1615 = vst [vmem:[#allocation16_spill] sm:$0xff] %v1220_v13  ;;  %v98_v40 = vunpack.c.l.bf16 %v1202_v26  ;;  %v99_v49 = vunpack.c.h.bf16 %v1202_v26  ;;  %v299_v60 = vrot.slane %v1041_v61, %v921_v9  ;;  %v100_v47 = vunpack.c.l.bf16 %v1231_v30  ;;  %v1295_v61 = vld [vmem:[%s1586_s1 + $0x8] sm:$0xff] }
  0x18   :  { %1616 = vst [vmem:[#allocation17_spill] sm:$0xff] %v1226_v29  ;;  %1617 = vst [vmem:[#allocation18_spill] sm:$0xff] %v1242_v34  ;;  %v101_v55 = vunpack.c.h.bf16 %v1231_v30  ;;  %v102_v38 = vunpack.c.l.bf16 %v1236_v31  ;;  %v104_v26 = vunpack.c.l.bf16 %v1265_v37  ;;  %v171_v30 = vrot.slane %v1076_v48, %v921_v9 }
  0x19   :  { %1618 = vst [vmem:[#allocation19_spill] sm:$0xff] %v1248_v14  ;;  %1619 = vst [vmem:[#allocation20_spill] sm:$0xff] %v1254_v35  ;;  %v167_v35 = vrot.slane %v1060_v4, %v927_v12  ;;  %v475_v14 = vrot.slane %v155_v59, %v921_v9  ;;  %v106_v34 = vunpack.c.l.bf16 %v45_v15  ;;  %v479_v29 = vrot.slane %v159_v5, %v921_v9 }
  0x1a   :  { %1620 = vst [vmem:[#allocation21_spill] sm:$0xff] %v1260_v36  ;;  %v103_v36 = vunpack.c.h.bf16 %v1236_v31  ;;  %1621 = vst [vmem:[#allocation22_spill] sm:$0xff] %v1295_v61  ;;  %v105_v31 = vunpack.c.h.bf16 %v1265_v37  ;;  %v483_v13 = vrot.slane %v163_v43, %v921_v9  ;;  %v107_v28 = vunpack.c.h.bf16 %v45_v15 }
  0x1b   :  { %v108_v27 = vunpack.c.l.bf16 %v46_v50  ;;  %v109_v25 = vunpack.c.h.bf16 %v46_v50  ;;  %v619_v8 = vrot.slane %v299_v60, %v921_v9  ;;  %v110_v24 = vunpack.c.l.bf16 %v47_v22 }
  0x1c   :  { %v111_v23 = vunpack.c.h.bf16 %v47_v22  ;;  %v1307_v4 = vunpack.c.l.bf16 %v1295_v61  ;;  %v175_v59 = vrot.slane %v1076_v48, %v923_v10  ;;  %v179_v37 = vrot.slane %v1076_v48, %v925_v11 }
  0x1d   :  { %v487_v5 = vrot.slane %v167_v35, %v921_v9  ;;  %v491_v43 = vrot.slane %v171_v30, %v921_v9  ;;  %v1623_v15 = vunpack.c.l.bf16 %v970_v32  ;;  %v1624_v60 = vunpack.c.h.bf16 %v970_v32 }
  0x1e   :  { %1622 = vst [vmem:[#allocation23_spill] sm:$0xff] %v1307_v4  ;;  %v1625_v22 = vunpack.c.l.bf16 %v975_v33  ;;  %v1626_v4 = vunpack.c.l.bf16 %v993_v39  ;;  %v1627_v11 = vunpack.c.h.bf16 %v993_v39  ;;  %v1628_v30 = vunpack.c.l.bf16 %v1009_v45 }
  0x1f   :  { %v728_v50 = vmul.f32 %v475_v14, %v1623_v15  ;;  %v729_v12 = vmul.f32 %v479_v29, %v1624_v60  ;;  %v1629_v32 = vunpack.c.h.bf16 %v1009_v45  ;;  %v1633_v45 = vunpack.c.h.bf16 %v1031_v56 }
  0x20   :  { %v730_v61 = vmul.f32 %v483_v13, %v1625_v22  ;;  %v1324_v10 = vmul.f32 %v1082_v51, %v1626_v4  ;;  %v1329_v35 = vmul.f32 %v1085_v0, %v1627_v11  ;;  %v1333_v9 = vmul.f32 %v619_v8, %v1628_v30 }
  0x21   :  { %v1338_v29 = vmul.f32 %v1090_v58, %v1629_v32  ;;  %v1630_v13 = vunpack.c.l.bf16 %v1014_v46  ;;  %v1631_v51 = vunpack.c.h.bf16 %v1014_v46  ;;  %v1632_v11 = vunpack.c.l.bf16 %v1031_v56 }
  0x22   :  { %v1358_v58 = vmul.f32 %v1108_v2, %v1633_v45  ;;  %v1634_v8 = vunpack.c.l.bf16 %v1036_v57  ;;  %v1635_v46 = vunpack.c.h.bf16 %v1036_v57  ;;  %v1636_v4 = vunpack.c.l.bf16 %v1046_v62 }
  0x23   :  { %v1343_v14 = vmul.f32 %v1093_v53, %v1630_v13  ;;  %v1348_v39 = vmul.f32 %v1096_v54, %v1631_v51  ;;  %v1353_v0 = vmul.f32 %v1102_v1, %v1632_v11  ;;  %v1637_v56 = vunpack.c.h.bf16 %v1046_v62  ;;  %v1649_v51 = vld [vmem:[#allocation20_spill] sm:$0xff] }
  0x24   :  { %v1363_v53 = vmul.f32 %v1114_v3, %v1634_v8  ;;  %v1368_v54 = vmul.f32 %v1120_v52, %v1635_v46  ;;  %v1373_v1 = vmul.f32 %v1126_v16, %v1636_v4  ;;  %v1638_v15 = vunpack.c.l.bf16 %v1051_v63 }
  0x25   :  { %v1378_v2 = vmul.f32 %v1132_v17, %v1637_v56  ;;  %v1386_v57 = vmul.f32 %v1144_v6, %v95_v41  ;;  %v1389_v52 = vmul.f32 %v1150_v19, %v96_v42  ;;  %v1392_v60 = vmul.f32 %v1156_v20, %v97_v44  ;;  %v1639_v17 = vld [vmem:[#allocation10_spill] sm:$0xff]  ;;  %v1641_v6 = vld [vmem:[#allocation12_spill] sm:$0xff]  ;;  %v1642_v19 = vld [vmem:[#allocation13_spill] sm:$0xff] }
  0x26   :  { %v1383_v3 = vmul.f32 %v1138_v18, %v1638_v15  ;;  %v1395_v16 = vmul.f32 %v1162_v21, %v98_v40  ;;  %v1398_v62 = vmul.f32 %v1168_v7, %v99_v49  ;;  %v1401_v63 = vmul.f32 %v1639_v17, %v100_v47  ;;  %v1640_v18 = vld [vmem:[#allocation11_spill] sm:$0xff]  ;;  %v19_v20 = vld [vmem:[%s1587_s0 + $0x18] sm:$0xff]  ;;  %v1645_v47 = vld [vmem:[#allocation16_spill] sm:$0xff] }
  0x27   :  { %v1404_v22 = vmul.f32 %v1640_v18, %v101_v55  ;;  %v1407_v41 = vmul.f32 %v1641_v6, %v102_v38  ;;  %v1410_v42 = vmul.f32 %v1642_v19, %v103_v36  ;;  %v1643_v21 = vld [vmem:[#allocation14_spill] sm:$0xff]  ;;  %v1644_v49 = vld [vmem:[#allocation15_spill] sm:$0xff]  ;;  %v1422_v40 = vmul.f32 %v1645_v47, %v106_v34  ;;  %v1646_v55 = vld [vmem:[#allocation17_spill] sm:$0xff] }
  0x28   :  { %v1416_v44 = vmul.f32 %v1643_v21, %v104_v26  ;;  %v1419_v7 = vmul.f32 %v1644_v49, %v105_v31  ;;  %v1425_v30 = vmul.f32 %v1646_v55, %v107_v28  ;;  %v1647_v38 = vld [vmem:[#allocation18_spill] sm:$0xff]  ;;  %v1648_v36 = vld [vmem:[#allocation19_spill] sm:$0xff]  ;;  %v1434_v11 = vmul.f32 %v1649_v51, %v110_v24  ;;  %v1650_v26 = vld [vmem:[#allocation21_spill] sm:$0xff] }
  0x29   :  { %v1428_v32 = vmul.f32 %v1647_v38, %v108_v27  ;;  %v1431_v13 = vmul.f32 %v1648_v36, %v109_v25  ;;  %v1437_v45 = vmul.f32 %v1650_v26, %v111_v23  ;;  %v1651_v31 = vld [vmem:[#allocation6_spill] sm:$0xff]  ;;  %v1652_v34 = vld [vmem:[#allocation3_spill] sm:$0xff]  ;;  %v1653_v28 = vunpack.c.h.bf16 %v975_v33  ;;  %v1660_v38 = vld [vmem:[#allocation5_spill] sm:$0xff] }
  0x2a   :  { %v183_v8 = vrot.slane %v1076_v48, %v1651_v31  ;;  %v495_v46 = vrot.slane %v175_v59, %v1652_v34  ;;  %v792_v56 = vadd.f32 %v729_v12, %v728_v50  ;;  %v54_v27 = vunpack.c.l.bf16 %v19_v20  ;;  %v20_v25 = vld [vmem:[%s1587_s0 + $0x20] sm:$0xff]  ;;  %v1657_v59 = vld [vmem:[#allocation4_spill] sm:$0xff] }
  0x2b   :  { %v731_v4 = vmul.f32 %v487_v5, %v1653_v28  ;;  %v1654_v24 = vld [vmem:[#allocation23_spill] sm:$0xff]  ;;  %v499_v23 = vrot.slane %v179_v37, %v1652_v34  ;;  %v55_v19 = vunpack.c.h.bf16 %v19_v20  ;;  %v56_v49 = vunpack.c.l.bf16 %v20_v25  ;;  %v1659_v47 = vld [vmem:[#allocation22_spill] sm:$0xff] }
  0x2c   :  { %v187_v15 = vrot.slane %v1654_v24, %v1652_v34  ;;  %v1655_v17 = vld [vmem:[#allocation7_spill] sm:$0xff]  ;;  %v793_v48 = vadd.f32 %v792_v56, %v730_v61  ;;  %v191_v33 = vrot.slane %v1654_v24, %v1657_v59  ;;  %v503_v12 = vrot.slane %v183_v8, %v1652_v34  ;;  %v22_v56 = vld [vmem:[%s1587_s0 + $0x30] sm:$0xff] }
  0x2d   :  { %v1656_v18 = vunpack.c.l.bf16 %v1655_v17  ;;  %v1658_v5 = vunpack.c.h.bf16 %v1655_v17  ;;  %v123_v55 = vunpack.c.h.bf16 %v1659_v47  ;;  %v21_v37 = vld [vmem:[%s1587_s0 + $0x28] sm:$0xff]  ;;  %v195_v61 = vrot.slane %v1654_v24, %v1660_v38  ;;  %v114_v17 = vld [vmem:[%s1586_s1 + $0x10] sm:$0xff] }
  0x2e   :  { %v794_v21 = vadd.f32 %v793_v48, %v731_v4  ;;  %v734_v20 = vmul.f32 %v499_v23, %v54_v27  ;;  %v57_v51 = vunpack.c.h.bf16 %v20_v25  ;;  %v199_v26 = vrot.slane %v1654_v24, %v1651_v31 }
  0x2f   :  { %v732_v6 = vmul.f32 %v491_v43, %v1656_v18  ;;  %v733_v50 = vmul.f32 %v495_v46, %v1658_v5  ;;  %v507_v43 = vrot.slane %v187_v15, %v1652_v34  ;;  %v511_v8 = vrot.slane %v191_v33, %v1652_v34  ;;  %v23_v5 = vld [vmem:[%s1587_s0 + $0x38] sm:$0xff] }
  0x30   :  { %v735_v46 = vmul.f32 %v503_v12, %v55_v19  ;;  %v58_v4 = vunpack.c.l.bf16 %v21_v37  ;;  %v203_v27 = vrot.slane %v123_v55, %v1652_v34  ;;  %v515_v25 = vrot.slane %v195_v61, %v1652_v34 }
  0x31   :  { %v795_v36 = vadd.f32 %v794_v21, %v732_v6  ;;  %v736_v15 = vmul.f32 %v507_v43, %v56_v49  ;;  %v59_v24 = vunpack.c.h.bf16 %v21_v37  ;;  %v207_v18 = vrot.slane %v123_v55, %v1657_v59 }
  0x32   :  { %v519_v6 = vrot.slane %v199_v26, %v1652_v34  ;;  %v737_v48 = vmul.f32 %v511_v8, %v57_v51  ;;  %v60_v33 = vunpack.c.l.bf16 %v22_v56  ;;  %v124_v12 = vunpack.c.l.bf16 %v114_v17  ;;  %v24_v26 = vld [vmem:[%s1587_s0 + $0x40] sm:$0xff] }
  0x33   :  { %v796_v28 = vadd.f32 %v795_v36, %v733_v50  ;;  %v211_v50 = vrot.slane %v123_v55, %v1660_v38  ;;  %v523_v21 = vrot.slane %v203_v27, %v1652_v34  ;;  %v738_v47 = vmul.f32 %v515_v25, %v58_v4 }
  0x34   :  { %v61_v61 = vunpack.c.h.bf16 %v22_v56  ;;  %v215_v37 = vrot.slane %v123_v55, %v1651_v31  ;;  %v527_v43 = vrot.slane %v207_v18, %v1652_v34  ;;  %v62_v51 = vunpack.c.l.bf16 %v23_v5  ;;  %v25_v18 = vld [vmem:[%s1587_s0 + $0x48] sm:$0xff] }
  0x35   :  { %v797_v23 = vadd.f32 %v796_v28, %v734_v20  ;;  %v739_v20 = vmul.f32 %v519_v6, %v59_v24  ;;  %v219_v8 = vrot.slane %v124_v12, %v1652_v34  ;;  %v740_v28 = vmul.f32 %v523_v21, %v60_v33 }
  0x36   :  { %v63_v4 = vunpack.c.h.bf16 %v23_v5  ;;  %v223_v56 = vrot.slane %v124_v12, %v1657_v59  ;;  %v535_v55 = vrot.slane %v215_v37, %v1652_v34  ;;  %v741_v25 = vmul.f32 %v527_v43, %v61_v61  ;;  %v115_v37 = vld [vmem:[%s1586_s1 + $0x18] sm:$0xff] }
  0x37   :  { %v798_v19 = vadd.f32 %v797_v23, %v735_v46  ;;  %v531_v46 = vrot.slane %v211_v50, %v1652_v34  ;;  %v64_v23 = vunpack.c.l.bf16 %v24_v26  ;;  %v125_v24 = vunpack.c.h.bf16 %v114_v17  ;;  %v26_v17 = vld [vmem:[%s1587_s0 + $0x50] sm:$0xff] }
  0x38   :  { %v227_v6 = vrot.slane %v124_v12, %v1660_v38  ;;  %v65_v50 = vunpack.c.h.bf16 %v24_v26  ;;  %v231_v5 = vrot.slane %v124_v12, %v1651_v31  ;;  %v543_v21 = vrot.slane %v223_v56, %v1652_v34  ;;  %v27_v56 = vld [vmem:[%s1587_s0 + $0x58] sm:$0xff] }
  0x39   :  { %v799_v49 = vadd.f32 %v798_v19, %v736_v15  ;;  %v742_v19 = vmul.f32 %v531_v46, %v62_v51  ;;  %v66_v61 = vunpack.c.l.bf16 %v25_v18  ;;  %v235_v43 = vrot.slane %v125_v24, %v1652_v34 }
  0x3a   :  { %v67_v12 = vunpack.c.h.bf16 %v25_v18  ;;  %v239_v26 = vrot.slane %v125_v24, %v1657_v59  ;;  %v745_v46 = vmul.f32 %v543_v21, %v65_v50  ;;  %v247_v18 = vrot.slane %v125_v24, %v1651_v31 }
  0x3b   :  { %v800_v36 = vadd.f32 %v799_v49, %v737_v48  ;;  %v539_v48 = vrot.slane %v219_v8, %v1652_v34  ;;  %v551_v8 = vrot.slane %v231_v5, %v1652_v34  ;;  %v70_v50 = vunpack.c.l.bf16 %v27_v56  ;;  %v28_v5 = vld [vmem:[%s1587_s0 + $0x60] sm:$0xff] }
  0x3d   :  { %v801_v27 = vadd.f32 %v800_v36, %v738_v47  ;;  %v743_v47 = vmul.f32 %v535_v55, %v63_v4  ;;  %v744_v36 = vmul.f32 %v539_v48, %v64_v23  ;;  %v126_v4 = vunpack.c.l.bf16 %v115_v37 }
  0x3e   :  { %v243_v55 = vrot.slane %v125_v24, %v1660_v38  ;;  %v559_v48 = vrot.slane %v239_v26, %v1652_v34  ;;  %v567_v24 = vrot.slane %v247_v18, %v1652_v34  ;;  %v29_v26 = vld [vmem:[%s1587_s0 + $0x68] sm:$0xff] }
  0x3f   :  { %v802_v15 = vadd.f32 %v801_v27, %v739_v20  ;;  %v547_v20 = vrot.slane %v227_v6, %v1652_v34  ;;  %v68_v27 = vunpack.c.l.bf16 %v26_v17  ;;  %v69_v6 = vunpack.c.h.bf16 %v26_v17 }
  0x40   :  { %v251_v21 = vrot.slane %v126_v4, %v1652_v34  ;;  %v255_v17 = vrot.slane %v126_v4, %v1657_v59 }
  0x41   :  { %v803_v33 = vadd.f32 %v802_v15, %v740_v28  ;;  %v746_v15 = vmul.f32 %v547_v20, %v66_v61  ;;  %v71_v61 = vunpack.c.h.bf16 %v27_v56  ;;  %v749_v20 = vmul.f32 %v559_v48, %v69_v6 }
  0x42   :  { %v263_v56 = vrot.slane %v126_v4, %v1651_v31  ;;  %v74_v6 = vunpack.c.l.bf16 %v29_v26 }
  0x43   :  { %v804_v49 = vadd.f32 %v803_v33, %v741_v25  ;;  %v555_v25 = vrot.slane %v235_v43, %v1652_v34 }
  0x45   :  { %v805_v51 = vadd.f32 %v804_v49, %v742_v19  ;;  %v747_v19 = vmul.f32 %v551_v8, %v67_v12  ;;  %v748_v49 = vmul.f32 %v555_v25, %v68_v27  ;;  %v127_v12 = vunpack.c.h.bf16 %v115_v37  ;;  %v30_v37 = vld [vmem:[%s1587_s0 + $0x70] sm:$0xff] }
  0x46   :  { %v259_v8 = vrot.slane %v126_v4, %v1660_v38  ;;  %v575_v25 = vrot.slane %v255_v17, %v1652_v34  ;;  %v583_v4 = vrot.slane %v263_v56, %v1652_v34 }
  0x47   :  { %v806_v28 = vadd.f32 %v805_v51, %v743_v47  ;;  %v563_v47 = vrot.slane %v243_v55, %v1652_v34  ;;  %v72_v51 = vunpack.c.l.bf16 %v28_v5  ;;  %v73_v55 = vunpack.c.h.bf16 %v28_v5 }
  0x48   :  { %v267_v18 = vrot.slane %v127_v12, %v1652_v34  ;;  %v579_v48 = vrot.slane %v259_v8, %v1652_v34  ;;  %v271_v5 = vrot.slane %v127_v12, %v1657_v59 }
  0x49   :  { %v807_v23 = vadd.f32 %v806_v28, %v744_v36  ;;  %v750_v28 = vmul.f32 %v563_v47, %v70_v50  ;;  %v75_v50 = vunpack.c.h.bf16 %v29_v26 }
  0x4a   :  { %v587_v17 = vrot.slane %v267_v18, %v1652_v34  ;;  %v591_v59 = vrot.slane %v271_v5, %v1652_v34 }
  0x4b   :  { %v808_v33 = vadd.f32 %v807_v23, %v745_v46  ;;  %v571_v46 = vrot.slane %v251_v21, %v1652_v34  ;;  %v753_v21 = vmul.f32 %v575_v25, %v73_v55  ;;  %v755_v26 = vmul.f32 %v583_v4, %v75_v50 }
  0x4d   :  { %v809_v43 = vadd.f32 %v808_v33, %v746_v15  ;;  %v751_v15 = vmul.f32 %v567_v24, %v71_v61  ;;  %v275_v61 = vrot.slane %v127_v12, %v1660_v38  ;;  %v754_v24 = vmul.f32 %v579_v48, %v74_v6  ;;  %v32_v38 = vld [vmem:[%s1587_s0 + $0x80] sm:$0xff] }
  0x4e   :  { %v80_v6 = vunpack.c.l.bf16 %v32_v38 }
  0x4f   :  { %v810_v36 = vadd.f32 %v809_v43, %v747_v19  ;;  %v752_v19 = vmul.f32 %v571_v46, %v72_v51  ;;  %v31_v43 = vld [vmem:[%s1587_s0 + $0x78] sm:$0xff]  ;;  %v279_v51 = vrot.slane %v127_v12, %v1651_v31  ;;  %v595_v55 = vrot.slane %v275_v61, %v1652_v34 }
  0x50   :  { %v78_v46 = vunpack.c.l.bf16 %v31_v43 }
  0x51   :  { %v811_v27 = vadd.f32 %v810_v36, %v748_v49  ;;  %v76_v49 = vunpack.c.l.bf16 %v30_v37  ;;  %v77_v36 = vunpack.c.h.bf16 %v30_v37 }
  0x52   :  { %v758_v18 = vmul.f32 %v595_v55, %v78_v46 }
  0x53   :  { %v812_v23 = vadd.f32 %v811_v27, %v749_v20  ;;  %v756_v56 = vmul.f32 %v587_v17, %v76_v49  ;;  %v757_v31 = vmul.f32 %v591_v59, %v77_v36 }
  0x55   :  { %v813_v33 = vadd.f32 %v812_v23, %v750_v28  ;;  %v1661_v28 = vld [vmem:[#allocation8_spill] sm:$0xff]  ;;  %v599_v23 = vrot.slane %v279_v51, %v1652_v34 }
  0x56   :  { %v283_v27 = vrot.slane %v1661_v28, %v1652_v34 }
  0x57   :  { %v814_v47 = vadd.f32 %v813_v33, %v751_v15  ;;  %v79_v15 = vunpack.c.h.bf16 %v31_v43 }
  0x58   :  { %v603_v37 = vrot.slane %v283_v27, %v1652_v34 }
  0x59   :  { %v815_v20 = vadd.f32 %v814_v47, %v752_v19  ;;  %v81_v19 = vunpack.c.h.bf16 %v32_v38  ;;  %v759_v33 = vmul.f32 %v599_v23, %v79_v15 }
  0x5a   :  { %v760_v5 = vmul.f32 %v603_v37, %v80_v6 }
  0x5b   :  { %v816_v8 = vadd.f32 %v815_v20, %v753_v21  ;;  %v1662_v21 = vld [vmem:[#allocation9_spill] sm:$0xff] }
  0x5c   :  { %v761_v47 = vmul.f32 %v1662_v21, %v81_v19 }
  0x5d   :  { %v817_v25 = vadd.f32 %v816_v8, %v754_v24 }
  0x5f   :  { %v818_v12 = vadd.f32 %v817_v25, %v755_v26 }
  0x61   :  { %v819_v48 = vadd.f32 %v818_v12, %v756_v56 }
  0x63   :  { %v820_v50 = vadd.f32 %v819_v48, %v757_v31 }
  0x65   :  { %v821_v4 = vadd.f32 %v820_v50, %v758_v18 }
  0x67   :  { %v822_v49 = vadd.f32 %v821_v4, %v759_v33 }
  0x69   :  { %v823_v61 = vadd.f32 %v822_v49, %v760_v5 }
  0x6b   :  { %v824_v17 = vadd.f32 %v823_v61, %v761_v47 }
  0x6d   :  { %v825_v43 = vadd.f32 %v824_v17, %v1324_v10 }
  0x6f   :  { %v826_v24 = vadd.f32 %v825_v43, %v1329_v35 }
  0x71   :  { %v827_v20 = vadd.f32 %v826_v24, %v1333_v9 }
  0x73   :  { %v828_v34 = vadd.f32 %v827_v20, %v1338_v29 }
  0x75   :  { %v829_v36 = vadd.f32 %v828_v34, %v1343_v14 }
  0x77   :  { %v830_v51 = vadd.f32 %v829_v36, %v1348_v39 }
  0x79   :  { %v831_v59 = vadd.f32 %v830_v51, %v1353_v0 }
  0x7b   :  { %v832_v26 = vadd.f32 %v831_v59, %v1358_v58 }
  0x7d   :  { %v833_v8 = vadd.f32 %v832_v26, %v1363_v53 }
  0x7f   :  { %v834_v46 = vadd.f32 %v833_v8, %v1368_v54 }
  0x81   :  { %v835_v10 = vadd.f32 %v834_v46, %v1373_v1 }
  0x83   :  { %v836_v35 = vadd.f32 %v835_v10, %v1378_v2 }
  0x85   :  { %v837_v9 = vadd.f32 %v836_v35, %v1383_v3 }
  0x87   :  { %v838_v29 = vadd.f32 %v837_v9, %v1386_v57 }
  0x89   :  { %v839_v14 = vadd.f32 %v838_v29, %v1389_v52 }
  0x8b   :  { %v840_v39 = vadd.f32 %v839_v14, %v1392_v60 }
  0x8d   :  { %v841_v0 = vadd.f32 %v840_v39, %v1395_v16 }
  0x8f   :  { %v842_v58 = vadd.f32 %v841_v0, %v1398_v62 }
  0x91   :  { %v843_v53 = vadd.f32 %v842_v58, %v1401_v63 }
  0x93   :  { %v844_v54 = vadd.f32 %v843_v53, %v1404_v22 }
  0x95   :  { %v845_v1 = vadd.f32 %v844_v54, %v1407_v41  ;;  %v877_v41 = vld [vmem:[#allocation2] ss:$0 sm:$0xff] }
  0x97   :  { %v846_v2 = vadd.f32 %v845_v1, %v1410_v42 }
  0x99   :  { %v847_v3 = vadd.f32 %v846_v2, %v1416_v44 }
  0x9b   :  { %v848_v57 = vadd.f32 %v847_v3, %v1419_v7 }
  0x9d   :  { %v849_v52 = vadd.f32 %v848_v57, %v1422_v40 }
  0x9f   :  { %v850_v60 = vadd.f32 %v849_v52, %v1425_v30 }
  0xa1   :  { %v851_v16 = vadd.f32 %v850_v60, %v1428_v32 }
  0xa3   :  { %v852_v62 = vadd.f32 %v851_v16, %v1431_v13 }
  0xa5   :  { %v853_v63 = vadd.f32 %v852_v62, %v1434_v11 }
  0xa7   :  { %v854_v22 = vadd.f32 %v853_v63, %v1437_v45 }
  0xa9   :  { %855 = vadd.xlane.f32.xlu0 %v854_v22 }
 0x136   :  { %v856_v28 = vpop.xlane.xlu0 %855 }
 0x137   :  { %v864_v42 = vadd.f32 %v877_v41, %v856_v28 }
 0x139   :  { %v878_v27 = vmul.f32 -1.442695, %v864_v42 }
 0x13b   :  { %879 = vpow2.f32 %v878_v27 }
 0x145   :  { %v880_v44 = vpop.eup %879 }
 0x146   :  { %v868_v7 = vadd.f32 1.0, %v880_v44 }
 0x148   :  { %881 = vrcp.f32 %v868_v7 }
 0x152   :  { %v882_v40 = vpop.eup %881 }
 0x153   :  { %872 = vst.msk [vmem:[%s1588_s3] sm:$0xff] %vm871_vm0, %v882_v40 }

// kernel: discriminator_forward.8
= control target key start
LH: loop header
LB: loop body
LE: loop exit
PB: predicated region body
PF: predicated region fallthrough
CT: control target
= control target key end

     0   :  { %s10031_s12 = smov 0   ;;  %s10033_s13 = smov 0   ;;  %s11883_s0 = inlined_call_operand.vmem [shape: bf16[16,4096], index: 0, kind: input, shape index: {}]   ;;  %s11884_s1 = inlined_call_operand.vmem [shape: bf16[4096,512], index: 1, kind: input, shape index: {}]   ;;  %s11885_s2 = inlined_call_operand.vmem [shape: f32[1,512], index: 2, kind: input, shape index: {}]   ;;  %s11886_s3 = inlined_call_operand.vmem [shape: bf16[16,512], index: 3, kind: output, shape index: {}]  }
   0x1   :  { %s10035_s14 = smov 0   ;;  %s10037_s15 = smov 0  }
   0x2   :  { %s10039_s16 = smov 0  }
   0x3 LB: > { %s22_s17 = sadd.s32 1, %s10005_s15  ;;  %s8532_s18 = sadd.s32 4294967295, %s10009_s16   ;;  %s10009_s16 = sphi %s10039_s16, %s13_s16   ;;  %s10005_s15 = sphi %s10037_s15, %s11891_s15   ;;  %s10001_s14 = sphi %s10035_s14, %s11890_s14   ;;  %s9997_s13 = sphi %s10033_s13, %s11889_s13   ;;  %s9993_s12 = sphi %s10031_s12, %s11888_s12  }
   0x4   : > { %p23_p0 = scmp.ge.s32.totalorder %s22_s17, 2  ;;  %p65_p1 = scmp.ne.s32.totalorder %s9997_s13, %s9993_s12 }
   0x5   : > { %p66_p2 = scmp.eq.s32.totalorder %s10009_s16, 0  ;;  %p123_p4 = scmp.eq.s32.totalorder %s8532_s18, 1 }
   0x6   : > { %s11893_s17 = smov (%p23_p0, %s22_s17), 0  ;;  %s58_s20 = sadd.s32 1, %s9997_s13 }
   0x7   : > { %p67_p3 = por %p66_p2, %p65_p1  ;;  %s55_s19 = ssub.s32 %s10005_s15, %s11893_s17 }
   0x8   : > { %p56_p5 = scmp.eq.s32.totalorder %s55_s19, 0  ;;  %p10066_p6 = por %p123_p4, %p65_p1 }
   0x9   : > { %p8536_p7 = scmp.ge.s32.totalorder %s10009_s16, 2 }
   0xa   : > { %s10071_s22 = scalar_select %p56_p5, %s9997_s13, %s58_s20  }
   0xb   : > { %155 = sbr.rel (%p8536_p7) target bundleno = 278 (0x116), region = 20 }
  0x12   : > { %158 = sbr.rel (!%p67_p3) target bundleno = 278 (0x116), region = 24  ;;  %s160_s23 = sand.u32 (%p67_p3), 1, %s9997_s13  }
  0x13   : > { %s9095_s24 = sshll.u32 (%p67_p3), %s10005_s15, 3  ;;  %s8537_s25 = sshll.u32 (%p67_p3), %s160_s23, 12 }
  0x14   : > { %s10079_s28 = scalar_lea.vmem (%p67_p3), %s11884_s1, %s9095_s24  ;;  %s10084_s29 = scalar_lea.vmem (%p67_p3), [#allocation2], %s8537_s25 }
  0x15   : > { %v1218_v0 = vld [vmem:[%s10079_s28] sm:$0xff] (%p67_p3)  ;;  %v1220_v1 = vld [vmem:[%s10079_s28 + $0x10] sm:$0xff] (%p67_p3) }
  0x16   : > { %v1222_v2 = vld [vmem:[%s10079_s28 + $0x20] sm:$0xff] (%p67_p3)  ;;  %1219 = vst [vmem:[%s10084_s29] sm:$0xff] (%p67_p3), %v1218_v0  ;;  %1221 = vst [vmem:[%s10084_s29 + $0x8] sm:$0xff] (%p67_p3), %v1220_v1  ;;  %v1224_v3 = vld [vmem:[%s10079_s28 + $0x30] sm:$0xff] (%p67_p3) }
  0x17   : > { %1223 = vst [vmem:[%s10084_s29 + $0x10] sm:$0xff] (%p67_p3), %v1222_v2  ;;  %v1226_v4 = vld [vmem:[%s10079_s28 + $0x40] sm:$0xff] (%p67_p3)  ;;  %v1228_v5 = vld [vmem:[%s10079_s28 + $0x50] sm:$0xff] (%p67_p3)  ;;  %1225 = vst [vmem:[%s10084_s29 + $0x18] sm:$0xff] (%p67_p3), %v1224_v3 }
  0x18   : > { %1227 = vst [vmem:[%s10084_s29 + $0x20] sm:$0xff] (%p67_p3), %v1226_v4  ;;  %1229 = vst [vmem:[%s10084_s29 + $0x28] sm:$0xff] (%p67_p3), %v1228_v5  ;;  %v1230_v6 = vld [vmem:[%s10079_s28 + $0x60] sm:$0xff] (%p67_p3)  ;;  %v1232_v7 = vld [vmem:[%s10079_s28 + $0x70] sm:$0xff] (%p67_p3) }
  0x19   : > { %v1234_v8 = vld [vmem:[%s10079_s28 + $0x80] sm:$0xff]  ;;  %1231 = vst [vmem:[%s10084_s29 + $0x30] sm:$0xff] %v1230_v6  ;;  %1233 = vst [vmem:[%s10084_s29 + $0x38] sm:$0xff] %v1232_v7  ;;  %v1236_v9 = vld [vmem:[%s10079_s28 + $0x90] sm:$0xff] }
  0x1a   : > { %1235 = vst [vmem:[%s10084_s29 + $0x40] sm:$0xff] %v1234_v8  ;;  %v1238_v10 = vld [vmem:[%s10079_s28 + $0xa0] sm:$0xff]  ;;  %v1240_v11 = vld [vmem:[%s10079_s28 + $0xb0] sm:$0xff]  ;;  %1237 = vst [vmem:[%s10084_s29 + $0x48] sm:$0xff] %v1236_v9 }
  0x1b   : > { %1239 = vst [vmem:[%s10084_s29 + $0x50] sm:$0xff] %v1238_v10  ;;  %1241 = vst [vmem:[%s10084_s29 + $0x58] sm:$0xff] %v1240_v11  ;;  %v1242_v12 = vld [vmem:[%s10079_s28 + $0xc0] sm:$0xff]  ;;  %v1244_v13 = vld [vmem:[%s10079_s28 + $0xd0] sm:$0xff] }
  0x1c   : > { %v1246_v14 = vld [vmem:[%s10079_s28 + $0xe0] sm:$0xff]  ;;  %1243 = vst [vmem:[%s10084_s29 + $0x60] sm:$0xff] %v1242_v12  ;;  %1245 = vst [vmem:[%s10084_s29 + $0x68] sm:$0xff] %v1244_v13  ;;  %v1248_v15 = vld [vmem:[%s10079_s28 + $0xf0] sm:$0xff] }
  0x1d   : > { %1247 = vst [vmem:[%s10084_s29 + $0x70] sm:$0xff] %v1246_v14  ;;  %v1250_v16 = vld [vmem:[%s10079_s28 + $0x100] sm:$0xff]  ;;  %v1252_v17 = vld [vmem:[%s10079_s28 + $0x110] sm:$0xff]  ;;  %1249 = vst [vmem:[%s10084_s29 + $0x78] sm:$0xff] %v1248_v15 }
  0x1e   : > { %1251 = vst [vmem:[%s10084_s29 + $0x80] sm:$0xff] %v1250_v16  ;;  %1253 = vst [vmem:[%s10084_s29 + $0x88] sm:$0xff] %v1252_v17  ;;  %v1254_v18 = vld [vmem:[%s10079_s28 + $0x120] sm:$0xff]  ;;  %v1256_v19 = vld [vmem:[%s10079_s28 + $0x130] sm:$0xff] }
  0x1f   : > { %v1258_v20 = vld [vmem:[%s10079_s28 + $0x140] sm:$0xff]  ;;  %1255 = vst [vmem:[%s10084_s29 + $0x90] sm:$0xff] %v1254_v18  ;;  %1257 = vst [vmem:[%s10084_s29 + $0x98] sm:$0xff] %v1256_v19  ;;  %v1260_v21 = vld [vmem:[%s10079_s28 + $0x150] sm:$0xff] }
  0x20   : > { %1259 = vst [vmem:[%s10084_s29 + $0xa0] sm:$0xff] %v1258_v20  ;;  %v1262_v22 = vld [vmem:[%s10079_s28 + $0x160] sm:$0xff]  ;;  %v1264_v23 = vld [vmem:[%s10079_s28 + $0x170] sm:$0xff]  ;;  %1261 = vst [vmem:[%s10084_s29 + $0xa8] sm:$0xff] %v1260_v21 }
  0x21   : > { %1263 = vst [vmem:[%s10084_s29 + $0xb0] sm:$0xff] %v1262_v22  ;;  %1265 = vst [vmem:[%s10084_s29 + $0xb8] sm:$0xff] %v1264_v23  ;;  %v1266_v24 = vld [vmem:[%s10079_s28 + $0x180] sm:$0xff]  ;;  %v1268_v25 = vld [vmem:[%s10079_s28 + $0x190] sm:$0xff] }
  0x22   : > { %v1270_v26 = vld [vmem:[%s10079_s28 + $0x1a0] sm:$0xff]  ;;  %1267 = vst [vmem:[%s10084_s29 + $0xc0] sm:$0xff] %v1266_v24  ;;  %1269 = vst [vmem:[%s10084_s29 + $0xc8] sm:$0xff] %v1268_v25  ;;  %v1272_v27 = vld [vmem:[%s10079_s28 + $0x1b0] sm:$0xff] }
  0x23   : > { %1271 = vst [vmem:[%s10084_s29 + $0xd0] sm:$0xff] %v1270_v26  ;;  %v1274_v28 = vld [vmem:[%s10079_s28 + $0x1c0] sm:$0xff]  ;;  %v1276_v29 = vld [vmem:[%s10079_s28 + $0x1d0] sm:$0xff]  ;;  %1273 = vst [vmem:[%s10084_s29 + $0xd8] sm:$0xff] %v1272_v27 }
  0x24   : > { %1275 = vst [vmem:[%s10084_s29 + $0xe0] sm:$0xff] %v1274_v28  ;;  %1277 = vst [vmem:[%s10084_s29 + $0xe8] sm:$0xff] %v1276_v29  ;;  %v1278_v30 = vld [vmem:[%s10079_s28 + $0x1e0] sm:$0xff]  ;;  %v1280_v31 = vld [vmem:[%s10079_s28 + $0x1f0] sm:$0xff] }
  0x25   : > { %v1282_v32 = vld [vmem:[%s10079_s28 + $0x200] sm:$0xff]  ;;  %1279 = vst [vmem:[%s10084_s29 + $0xf0] sm:$0xff] %v1278_v30  ;;  %1281 = vst [vmem:[%s10084_s29 + $0xf8] sm:$0xff] %v1280_v31  ;;  %v1284_v33 = vld [vmem:[%s10079_s28 + $0x210] sm:$0xff] }
  0x26   : > { %1283 = vst [vmem:[%s10084_s29 + $0x100] sm:$0xff] %v1282_v32  ;;  %v1286_v34 = vld [vmem:[%s10079_s28 + $0x220] sm:$0xff]  ;;  %v1288_v35 = vld [vmem:[%s10079_s28 + $0x230] sm:$0xff]  ;;  %1285 = vst [vmem:[%s10084_s29 + $0x108] sm:$0xff] %v1284_v33 }
  0x27   : > { %1287 = vst [vmem:[%s10084_s29 + $0x110] sm:$0xff] %v1286_v34  ;;  %1289 = vst [vmem:[%s10084_s29 + $0x118] sm:$0xff] %v1288_v35  ;;  %v1290_v36 = vld [vmem:[%s10079_s28 + $0x240] sm:$0xff]  ;;  %v1292_v37 = vld [vmem:[%s10079_s28 + $0x250] sm:$0xff] }
  0x28   : > { %v1294_v38 = vld [vmem:[%s10079_s28 + $0x260] sm:$0xff]  ;;  %1291 = vst [vmem:[%s10084_s29 + $0x120] sm:$0xff] %v1290_v36  ;;  %1293 = vst [vmem:[%s10084_s29 + $0x128] sm:$0xff] %v1292_v37  ;;  %v1296_v39 = vld [vmem:[%s10079_s28 + $0x270] sm:$0xff] }
  0x29   : > { %1295 = vst [vmem:[%s10084_s29 + $0x130] sm:$0xff] %v1294_v38  ;;  %v1298_v40 = vld [vmem:[%s10079_s28 + $0x280] sm:$0xff]  ;;  %v1300_v41 = vld [vmem:[%s10079_s28 + $0x290] sm:$0xff]  ;;  %1297 = vst [vmem:[%s10084_s29 + $0x138] sm:$0xff] %v1296_v39 }
  0x2a   : > { %1299 = vst [vmem:[%s10084_s29 + $0x140] sm:$0xff] %v1298_v40  ;;  %1301 = vst [vmem:[%s10084_s29 + $0x148] sm:$0xff] %v1300_v41  ;;  %v1302_v42 = vld [vmem:[%s10079_s28 + $0x2a0] sm:$0xff]  ;;  %v1304_v43 = vld [vmem:[%s10079_s28 + $0x2b0] sm:$0xff] }
  0x2b   : > { %v1306_v44 = vld [vmem:[%s10079_s28 + $0x2c0] sm:$0xff]  ;;  %1303 = vst [vmem:[%s10084_s29 + $0x150] sm:$0xff] %v1302_v42  ;;  %1305 = vst [vmem:[%s10084_s29 + $0x158] sm:$0xff] %v1304_v43  ;;  %v1308_v45 = vld [vmem:[%s10079_s28 + $0x2d0] sm:$0xff] }
  0x2c   : > { %1307 = vst [vmem:[%s10084_s29 + $0x160] sm:$0xff] %v1306_v44  ;;  %v1310_v46 = vld [vmem:[%s10079_s28 + $0x2e0] sm:$0xff]  ;;  %v1312_v47 = vld [vmem:[%s10079_s28 + $0x2f0] sm:$0xff]  ;;  %1309 = vst [vmem:[%s10084_s29 + $0x168] sm:$0xff] %v1308_v45 }
  0x2d   : > { %1311 = vst [vmem:[%s10084_s29 + $0x170] sm:$0xff] %v1310_v46  ;;  %1313 = vst [vmem:[%s10084_s29 + $0x178] sm:$0xff] %v1312_v47  ;;  %v1314_v48 = vld [vmem:[%s10079_s28 + $0x300] sm:$0xff]  ;;  %v1316_v49 = vld [vmem:[%s10079_s28 + $0x310] sm:$0xff] }
  0x2e   : > { %v1318_v50 = vld [vmem:[%s10079_s28 + $0x320] sm:$0xff]  ;;  %1315 = vst [vmem:[%s10084_s29 + $0x180] sm:$0xff] %v1314_v48  ;;  %1317 = vst [vmem:[%s10084_s29 + $0x188] sm:$0xff] %v1316_v49  ;;  %v1320_v51 = vld [vmem:[%s10079_s28 + $0x330] sm:$0xff] }
  0x2f   : > { %1319 = vst [vmem:[%s10084_s29 + $0x190] sm:$0xff] %v1318_v50  ;;  %v1322_v52 = vld [vmem:[%s10079_s28 + $0x340] sm:$0xff]  ;;  %v1324_v53 = vld [vmem:[%s10079_s28 + $0x350] sm:$0xff]  ;;  %1321 = vst [vmem:[%s10084_s29 + $0x198] sm:$0xff] %v1320_v51 }
  0x30   : > { %1323 = vst [vmem:[%s10084_s29 + $0x1a0] sm:$0xff] %v1322_v52  ;;  %1325 = vst [vmem:[%s10084_s29 + $0x1a8] sm:$0xff] %v1324_v53  ;;  %v1326_v54 = vld [vmem:[%s10079_s28 + $0x360] sm:$0xff]  ;;  %v1328_v55 = vld [vmem:[%s10079_s28 + $0x370] sm:$0xff] }
  0x31   : > { %v1330_v56 = vld [vmem:[%s10079_s28 + $0x380] sm:$0xff]  ;;  %1327 = vst [vmem:[%s10084_s29 + $0x1b0] sm:$0xff] %v1326_v54  ;;  %1329 = vst [vmem:[%s10084_s29 + $0x1b8] sm:$0xff] %v1328_v55  ;;  %v1332_v57 = vld [vmem:[%s10079_s28 + $0x390] sm:$0xff] }
  0x32   : > { %1331 = vst [vmem:[%s10084_s29 + $0x1c0] sm:$0xff] %v1330_v56  ;;  %v1334_v58 = vld [vmem:[%s10079_s28 + $0x3a0] sm:$0xff]  ;;  %v1336_v59 = vld [vmem:[%s10079_s28 + $0x3b0] sm:$0xff]  ;;  %1333 = vst [vmem:[%s10084_s29 + $0x1c8] sm:$0xff] %v1332_v57 }
  0x33   : > { %1335 = vst [vmem:[%s10084_s29 + $0x1d0] sm:$0xff] %v1334_v58  ;;  %1337 = vst [vmem:[%s10084_s29 + $0x1d8] sm:$0xff] %v1336_v59  ;;  %v1338_v60 = vld [vmem:[%s10079_s28 + $0x3c0] sm:$0xff]  ;;  %v1340_v61 = vld [vmem:[%s10079_s28 + $0x3d0] sm:$0xff] }
  0x34   : > { %v1342_v62 = vld [vmem:[%s10079_s28 + $0x3e0] sm:$0xff]  ;;  %1339 = vst [vmem:[%s10084_s29 + $0x1e0] sm:$0xff] %v1338_v60  ;;  %1341 = vst [vmem:[%s10084_s29 + $0x1e8] sm:$0xff] %v1340_v61  ;;  %v1344_v63 = vld [vmem:[%s10079_s28 + $0x3f0] sm:$0xff] }
  0x35   : > { %1343 = vst [vmem:[%s10084_s29 + $0x1f0] sm:$0xff] %v1342_v62  ;;  %v1346_v0 = vld [vmem:[%s10079_s28 + $0x400] sm:$0xff]  ;;  %v1348_v1 = vld [vmem:[%s10079_s28 + $0x410] sm:$0xff]  ;;  %1345 = vst [vmem:[%s10084_s29 + $0x1f8] sm:$0xff] %v1344_v63 }
  0x36   : > { %1347 = vst [vmem:[%s10084_s29 + $0x200] sm:$0xff] %v1346_v0  ;;  %1349 = vst [vmem:[%s10084_s29 + $0x208] sm:$0xff] %v1348_v1  ;;  %v1350_v2 = vld [vmem:[%s10079_s28 + $0x420] sm:$0xff]  ;;  %v1352_v3 = vld [vmem:[%s10079_s28 + $0x430] sm:$0xff] }
  0x37   : > { %v1354_v4 = vld [vmem:[%s10079_s28 + $0x440] sm:$0xff]  ;;  %1351 = vst [vmem:[%s10084_s29 + $0x210] sm:$0xff] %v1350_v2  ;;  %1353 = vst [vmem:[%s10084_s29 + $0x218] sm:$0xff] %v1352_v3  ;;  %v1356_v5 = vld [vmem:[%s10079_s28 + $0x450] sm:$0xff] }
  0x38   : > { %1355 = vst [vmem:[%s10084_s29 + $0x220] sm:$0xff] %v1354_v4  ;;  %v1358_v6 = vld [vmem:[%s10079_s28 + $0x460] sm:$0xff]  ;;  %v1360_v7 = vld [vmem:[%s10079_s28 + $0x470] sm:$0xff]  ;;  %1357 = vst [vmem:[%s10084_s29 + $0x228] sm:$0xff] %v1356_v5 }
  0x39   : > { %1359 = vst [vmem:[%s10084_s29 + $0x230] sm:$0xff] %v1358_v6  ;;  %1361 = vst [vmem:[%s10084_s29 + $0x238] sm:$0xff] %v1360_v7  ;;  %v1362_v8 = vld [vmem:[%s10079_s28 + $0x480] sm:$0xff]  ;;  %v1364_v9 = vld [vmem:[%s10079_s28 + $0x490] sm:$0xff] }
  0x3a   : > { %v1366_v10 = vld [vmem:[%s10079_s28 + $0x4a0] sm:$0xff]  ;;  %1363 = vst [vmem:[%s10084_s29 + $0x240] sm:$0xff] %v1362_v8  ;;  %1365 = vst [vmem:[%s10084_s29 + $0x248] sm:$0xff] %v1364_v9  ;;  %v1368_v11 = vld [vmem:[%s10079_s28 + $0x4b0] sm:$0xff] }
  0x3b   : > { %1367 = vst [vmem:[%s10084_s29 + $0x250] sm:$0xff] %v1366_v10  ;;  %v1370_v12 = vld [vmem:[%s10079_s28 + $0x4c0] sm:$0xff]  ;;  %v1372_v13 = vld [vmem:[%s10079_s28 + $0x4d0] sm:$0xff]  ;;  %1369 = vst [vmem:[%s10084_s29 + $0x258] sm:$0xff] %v1368_v11 }
  0x3c   : > { %1371 = vst [vmem:[%s10084_s29 + $0x260] sm:$0xff] %v1370_v12  ;;  %1373 = vst [vmem:[%s10084_s29 + $0x268] sm:$0xff] %v1372_v13  ;;  %v1374_v14 = vld [vmem:[%s10079_s28 + $0x4e0] sm:$0xff]  ;;  %v1376_v15 = vld [vmem:[%s10079_s28 + $0x4f0] sm:$0xff] }
  0x3d   : > { %v1378_v16 = vld [vmem:[%s10079_s28 + $0x500] sm:$0xff]  ;;  %1375 = vst [vmem:[%s10084_s29 + $0x270] sm:$0xff] %v1374_v14  ;;  %1377 = vst [vmem:[%s10084_s29 + $0x278] sm:$0xff] %v1376_v15  ;;  %v1380_v17 = vld [vmem:[%s10079_s28 + $0x510] sm:$0xff] }
  0x3e   : > { %1379 = vst [vmem:[%s10084_s29 + $0x280] sm:$0xff] %v1378_v16  ;;  %v1382_v18 = vld [vmem:[%s10079_s28 + $0x520] sm:$0xff]  ;;  %v1384_v19 = vld [vmem:[%s10079_s28 + $0x530] sm:$0xff]  ;;  %1381 = vst [vmem:[%s10084_s29 + $0x288] sm:$0xff] %v1380_v17 }
  0x3f   : > { %1383 = vst [vmem:[%s10084_s29 + $0x290] sm:$0xff] %v1382_v18  ;;  %1385 = vst [vmem:[%s10084_s29 + $0x298] sm:$0xff] %v1384_v19  ;;  %v1386_v20 = vld [vmem:[%s10079_s28 + $0x540] sm:$0xff]  ;;  %v1388_v21 = vld [vmem:[%s10079_s28 + $0x550] sm:$0xff] }
  0x40   : > { %v1390_v22 = vld [vmem:[%s10079_s28 + $0x560] sm:$0xff]  ;;  %1387 = vst [vmem:[%s10084_s29 + $0x2a0] sm:$0xff] %v1386_v20  ;;  %1389 = vst [vmem:[%s10084_s29 + $0x2a8] sm:$0xff] %v1388_v21  ;;  %v1392_v23 = vld [vmem:[%s10079_s28 + $0x570] sm:$0xff] }
  0x41   : > { %1391 = vst [vmem:[%s10084_s29 + $0x2b0] sm:$0xff] %v1390_v22  ;;  %v1394_v24 = vld [vmem:[%s10079_s28 + $0x580] sm:$0xff]  ;;  %v1396_v25 = vld [vmem:[%s10079_s28 + $0x590] sm:$0xff]  ;;  %1393 = vst [vmem:[%s10084_s29 + $0x2b8] sm:$0xff] %v1392_v23 }
  0x42   : > { %1395 = vst [vmem:[%s10084_s29 + $0x2c0] sm:$0xff] %v1394_v24  ;;  %1397 = vst [vmem:[%s10084_s29 + $0x2c8] sm:$0xff] %v1396_v25  ;;  %v1398_v26 = vld [vmem:[%s10079_s28 + $0x5a0] sm:$0xff]  ;;  %v1400_v27 = vld [vmem:[%s10079_s28 + $0x5b0] sm:$0xff] }
  0x43   : > { %v1402_v28 = vld [vmem:[%s10079_s28 + $0x5c0] sm:$0xff]  ;;  %1399 = vst [vmem:[%s10084_s29 + $0x2d0] sm:$0xff] %v1398_v26  ;;  %1401 = vst [vmem:[%s10084_s29 + $0x2d8] sm:$0xff] %v1400_v27  ;;  %v1404_v29 = vld [vmem:[%s10079_s28 + $0x5d0] sm:$0xff] }
  0x44   : > { %1403 = vst [vmem:[%s10084_s29 + $0x2e0] sm:$0xff] %v1402_v28  ;;  %v1406_v30 = vld [vmem:[%s10079_s28 + $0x5e0] sm:$0xff]  ;;  %v1408_v31 = vld [vmem:[%s10079_s28 + $0x5f0] sm:$0xff]  ;;  %1405 = vst [vmem:[%s10084_s29 + $0x2e8] sm:$0xff] %v1404_v29 }
  0x45   : > { %1407 = vst [vmem:[%s10084_s29 + $0x2f0] sm:$0xff] %v1406_v30  ;;  %1409 = vst [vmem:[%s10084_s29 + $0x2f8] sm:$0xff] %v1408_v31  ;;  %v1410_v32 = vld [vmem:[%s10079_s28 + $0x600] sm:$0xff]  ;;  %v1412_v33 = vld [vmem:[%s10079_s28 + $0x610] sm:$0xff] }
  0x46   : > { %v1414_v34 = vld [vmem:[%s10079_s28 + $0x620] sm:$0xff]  ;;  %1411 = vst [vmem:[%s10084_s29 + $0x300] sm:$0xff] %v1410_v32  ;;  %1413 = vst [vmem:[%s10084_s29 + $0x308] sm:$0xff] %v1412_v33  ;;  %v1416_v35 = vld [vmem:[%s10079_s28 + $0x630] sm:$0xff] }
  0x47   : > { %1415 = vst [vmem:[%s10084_s29 + $0x310] sm:$0xff] %v1414_v34  ;;  %v1418_v36 = vld [vmem:[%s10079_s28 + $0x640] sm:$0xff]  ;;  %v1420_v37 = vld [vmem:[%s10079_s28 + $0x650] sm:$0xff]  ;;  %1417 = vst [vmem:[%s10084_s29 + $0x318] sm:$0xff] %v1416_v35 }
  0x48   : > { %1419 = vst [vmem:[%s10084_s29 + $0x320] sm:$0xff] %v1418_v36  ;;  %1421 = vst [vmem:[%s10084_s29 + $0x328] sm:$0xff] %v1420_v37  ;;  %v1422_v38 = vld [vmem:[%s10079_s28 + $0x660] sm:$0xff]  ;;  %v1424_v39 = vld [vmem:[%s10079_s28 + $0x670] sm:$0xff] }
  0x49   : > { %v1426_v40 = vld [vmem:[%s10079_s28 + $0x680] sm:$0xff]  ;;  %1423 = vst [vmem:[%s10084_s29 + $0x330] sm:$0xff] %v1422_v38  ;;  %1425 = vst [vmem:[%s10084_s29 + $0x338] sm:$0xff] %v1424_v39  ;;  %v1428_v41 = vld [vmem:[%s10079_s28 + $0x690] sm:$0xff] }
  0x4a   : > { %1427 = vst [vmem:[%s10084_s29 + $0x340] sm:$0xff] %v1426_v40  ;;  %v1430_v42 = vld [vmem:[%s10079_s28 + $0x6a0] sm:$0xff]  ;;  %v1432_v43 = vld [vmem:[%s10079_s28 + $0x6b0] sm:$0xff]  ;;  %1429 = vst [vmem:[%s10084_s29 + $0x348] sm:$0xff] %v1428_v41 }
  0x4b   : > { %1431 = vst [vmem:[%s10084_s29 + $0x350] sm:$0xff] %v1430_v42  ;;  %1433 = vst [vmem:[%s10084_s29 + $0x358] sm:$0xff] %v1432_v43  ;;  %v1434_v44 = vld [vmem:[%s10079_s28 + $0x6c0] sm:$0xff]  ;;  %v1436_v45 = vld [vmem:[%s10079_s28 + $0x6d0] sm:$0xff] }
  0x4c   : > { %v1438_v46 = vld [vmem:[%s10079_s28 + $0x6e0] sm:$0xff]  ;;  %1435 = vst [vmem:[%s10084_s29 + $0x360] sm:$0xff] %v1434_v44  ;;  %1437 = vst [vmem:[%s10084_s29 + $0x368] sm:$0xff] %v1436_v45  ;;  %v1440_v47 = vld [vmem:[%s10079_s28 + $0x6f0] sm:$0xff] }
  0x4d   : > { %1439 = vst [vmem:[%s10084_s29 + $0x370] sm:$0xff] %v1438_v46  ;;  %v1442_v48 = vld [vmem:[%s10079_s28 + $0x700] sm:$0xff]  ;;  %v1444_v49 = vld [vmem:[%s10079_s28 + $0x710] sm:$0xff]  ;;  %1441 = vst [vmem:[%s10084_s29 + $0x378] sm:$0xff] %v1440_v47 }
  0x4e   : > { %1443 = vst [vmem:[%s10084_s29 + $0x380] sm:$0xff] %v1442_v48  ;;  %1445 = vst [vmem:[%s10084_s29 + $0x388] sm:$0xff] %v1444_v49  ;;  %v1446_v50 = vld [vmem:[%s10079_s28 + $0x720] sm:$0xff]  ;;  %v1448_v51 = vld [vmem:[%s10079_s28 + $0x730] sm:$0xff] }
  0x4f   : > { %v1450_v52 = vld [vmem:[%s10079_s28 + $0x740] sm:$0xff]  ;;  %1447 = vst [vmem:[%s10084_s29 + $0x390] sm:$0xff] %v1446_v50  ;;  %1449 = vst [vmem:[%s10084_s29 + $0x398] sm:$0xff] %v1448_v51  ;;  %v1452_v53 = vld [vmem:[%s10079_s28 + $0x750] sm:$0xff] }
  0x50   : > { %1451 = vst [vmem:[%s10084_s29 + $0x3a0] sm:$0xff] %v1450_v52  ;;  %v1454_v54 = vld [vmem:[%s10079_s28 + $0x760] sm:$0xff]  ;;  %v1456_v55 = vld [vmem:[%s10079_s28 + $0x770] sm:$0xff]  ;;  %1453 = vst [vmem:[%s10084_s29 + $0x3a8] sm:$0xff] %v1452_v53 }
  0x51   : > { %1455 = vst [vmem:[%s10084_s29 + $0x3b0] sm:$0xff] %v1454_v54  ;;  %1457 = vst [vmem:[%s10084_s29 + $0x3b8] sm:$0xff] %v1456_v55  ;;  %v1458_v56 = vld [vmem:[%s10079_s28 + $0x780] sm:$0xff]  ;;  %v1460_v57 = vld [vmem:[%s10079_s28 + $0x790] sm:$0xff] }
  0x52   : > { %v1462_v58 = vld [vmem:[%s10079_s28 + $0x7a0] sm:$0xff]  ;;  %1459 = vst [vmem:[%s10084_s29 + $0x3c0] sm:$0xff] %v1458_v56  ;;  %1461 = vst [vmem:[%s10084_s29 + $0x3c8] sm:$0xff] %v1460_v57  ;;  %v1464_v59 = vld [vmem:[%s10079_s28 + $0x7b0] sm:$0xff] }
  0x53   : > { %1463 = vst [vmem:[%s10084_s29 + $0x3d0] sm:$0xff] %v1462_v58  ;;  %v1466_v60 = vld [vmem:[%s10079_s28 + $0x7c0] sm:$0xff]  ;;  %v1468_v61 = vld [vmem:[%s10079_s28 + $0x7d0] sm:$0xff]  ;;  %1465 = vst [vmem:[%s10084_s29 + $0x3d8] sm:$0xff] %v1464_v59 }
  0x54   : > { %1467 = vst [vmem:[%s10084_s29 + $0x3e0] sm:$0xff] %v1466_v60  ;;  %1469 = vst [vmem:[%s10084_s29 + $0x3e8] sm:$0xff] %v1468_v61  ;;  %v1470_v62 = vld [vmem:[%s10079_s28 + $0x7e0] sm:$0xff]  ;;  %v1472_v63 = vld [vmem:[%s10079_s28 + $0x7f0] sm:$0xff] }
  0x55   : > { %v1474_v0 = vld [vmem:[%s10079_s28 + $0x800] sm:$0xff]  ;;  %1471 = vst [vmem:[%s10084_s29 + $0x3f0] sm:$0xff] %v1470_v62  ;;  %1473 = vst [vmem:[%s10084_s29 + $0x3f8] sm:$0xff] %v1472_v63  ;;  %v1476_v1 = vld [vmem:[%s10079_s28 + $0x810] sm:$0xff] }
  0x56   : > { %1475 = vst [vmem:[%s10084_s29 + $0x400] sm:$0xff] %v1474_v0  ;;  %v1478_v2 = vld [vmem:[%s10079_s28 + $0x820] sm:$0xff]  ;;  %v1480_v3 = vld [vmem:[%s10079_s28 + $0x830] sm:$0xff]  ;;  %1477 = vst [vmem:[%s10084_s29 + $0x408] sm:$0xff] %v1476_v1 }
  0x57   : > { %1479 = vst [vmem:[%s10084_s29 + $0x410] sm:$0xff] %v1478_v2  ;;  %1481 = vst [vmem:[%s10084_s29 + $0x418] sm:$0xff] %v1480_v3  ;;  %v1482_v4 = vld [vmem:[%s10079_s28 + $0x840] sm:$0xff]  ;;  %v1484_v5 = vld [vmem:[%s10079_s28 + $0x850] sm:$0xff] }
  0x58   : > { %v1486_v6 = vld [vmem:[%s10079_s28 + $0x860] sm:$0xff]  ;;  %1483 = vst [vmem:[%s10084_s29 + $0x420] sm:$0xff] %v1482_v4  ;;  %1485 = vst [vmem:[%s10084_s29 + $0x428] sm:$0xff] %v1484_v5  ;;  %v1488_v7 = vld [vmem:[%s10079_s28 + $0x870] sm:$0xff] }
  0x59   : > { %1487 = vst [vmem:[%s10084_s29 + $0x430] sm:$0xff] %v1486_v6  ;;  %v1490_v8 = vld [vmem:[%s10079_s28 + $0x880] sm:$0xff]  ;;  %v1492_v9 = vld [vmem:[%s10079_s28 + $0x890] sm:$0xff]  ;;  %1489 = vst [vmem:[%s10084_s29 + $0x438] sm:$0xff] %v1488_v7 }
  0x5a   : > { %1491 = vst [vmem:[%s10084_s29 + $0x440] sm:$0xff] %v1490_v8  ;;  %1493 = vst [vmem:[%s10084_s29 + $0x448] sm:$0xff] %v1492_v9  ;;  %v1494_v10 = vld [vmem:[%s10079_s28 + $0x8a0] sm:$0xff]  ;;  %v1496_v11 = vld [vmem:[%s10079_s28 + $0x8b0] sm:$0xff] }
  0x5b   : > { %v1498_v12 = vld [vmem:[%s10079_s28 + $0x8c0] sm:$0xff]  ;;  %1495 = vst [vmem:[%s10084_s29 + $0x450] sm:$0xff] %v1494_v10  ;;  %1497 = vst [vmem:[%s10084_s29 + $0x458] sm:$0xff] %v1496_v11  ;;  %v1500_v13 = vld [vmem:[%s10079_s28 + $0x8d0] sm:$0xff] }
  0x5c   : > { %1499 = vst [vmem:[%s10084_s29 + $0x460] sm:$0xff] %v1498_v12  ;;  %v1502_v14 = vld [vmem:[%s10079_s28 + $0x8e0] sm:$0xff]  ;;  %v1504_v15 = vld [vmem:[%s10079_s28 + $0x8f0] sm:$0xff]  ;;  %1501 = vst [vmem:[%s10084_s29 + $0x468] sm:$0xff] %v1500_v13 }
  0x5d   : > { %1503 = vst [vmem:[%s10084_s29 + $0x470] sm:$0xff] %v1502_v14  ;;  %1505 = vst [vmem:[%s10084_s29 + $0x478] sm:$0xff] %v1504_v15  ;;  %v1506_v16 = vld [vmem:[%s10079_s28 + $0x900] sm:$0xff]  ;;  %v1508_v17 = vld [vmem:[%s10079_s28 + $0x910] sm:$0xff] }
  0x5e   : > { %v1510_v18 = vld [vmem:[%s10079_s28 + $0x920] sm:$0xff]  ;;  %1507 = vst [vmem:[%s10084_s29 + $0x480] sm:$0xff] %v1506_v16  ;;  %1509 = vst [vmem:[%s10084_s29 + $0x488] sm:$0xff] %v1508_v17  ;;  %v1512_v19 = vld [vmem:[%s10079_s28 + $0x930] sm:$0xff] }
  0x5f   : > { %1511 = vst [vmem:[%s10084_s29 + $0x490] sm:$0xff] %v1510_v18  ;;  %v1514_v20 = vld [vmem:[%s10079_s28 + $0x940] sm:$0xff]  ;;  %v1516_v21 = vld [vmem:[%s10079_s28 + $0x950] sm:$0xff]  ;;  %1513 = vst [vmem:[%s10084_s29 + $0x498] sm:$0xff] %v1512_v19 }
  0x60   : > { %1515 = vst [vmem:[%s10084_s29 + $0x4a0] sm:$0xff] %v1514_v20  ;;  %1517 = vst [vmem:[%s10084_s29 + $0x4a8] sm:$0xff] %v1516_v21  ;;  %v1518_v22 = vld [vmem:[%s10079_s28 + $0x960] sm:$0xff]  ;;  %v1520_v23 = vld [vmem:[%s10079_s28 + $0x970] sm:$0xff] }
  0x61   : > { %v1522_v24 = vld [vmem:[%s10079_s28 + $0x980] sm:$0xff]  ;;  %1519 = vst [vmem:[%s10084_s29 + $0x4b0] sm:$0xff] %v1518_v22  ;;  %1521 = vst [vmem:[%s10084_s29 + $0x4b8] sm:$0xff] %v1520_v23  ;;  %v1524_v25 = vld [vmem:[%s10079_s28 + $0x990] sm:$0xff] }
  0x62   : > { %1523 = vst [vmem:[%s10084_s29 + $0x4c0] sm:$0xff] %v1522_v24  ;;  %v1526_v26 = vld [vmem:[%s10079_s28 + $0x9a0] sm:$0xff]  ;;  %v1528_v27 = vld [vmem:[%s10079_s28 + $0x9b0] sm:$0xff]  ;;  %1525 = vst [vmem:[%s10084_s29 + $0x4c8] sm:$0xff] %v1524_v25 }
  0x63   : > { %1527 = vst [vmem:[%s10084_s29 + $0x4d0] sm:$0xff] %v1526_v26  ;;  %1529 = vst [vmem:[%s10084_s29 + $0x4d8] sm:$0xff] %v1528_v27  ;;  %v1530_v28 = vld [vmem:[%s10079_s28 + $0x9c0] sm:$0xff]  ;;  %v1532_v29 = vld [vmem:[%s10079_s28 + $0x9d0] sm:$0xff] }
  0x64   : > { %v1534_v30 = vld [vmem:[%s10079_s28 + $0x9e0] sm:$0xff]  ;;  %1531 = vst [vmem:[%s10084_s29 + $0x4e0] sm:$0xff] %v1530_v28  ;;  %1533 = vst [vmem:[%s10084_s29 + $0x4e8] sm:$0xff] %v1532_v29  ;;  %v1536_v31 = vld [vmem:[%s10079_s28 + $0x9f0] sm:$0xff] }
  0x65   : > { %1535 = vst [vmem:[%s10084_s29 + $0x4f0] sm:$0xff] %v1534_v30  ;;  %v1538_v32 = vld [vmem:[%s10079_s28 + $0xa00] sm:$0xff]  ;;  %v1540_v33 = vld [vmem:[%s10079_s28 + $0xa10] sm:$0xff]  ;;  %1537 = vst [vmem:[%s10084_s29 + $0x4f8] sm:$0xff] %v1536_v31 }
  0x66   : > { %1539 = vst [vmem:[%s10084_s29 + $0x500] sm:$0xff] %v1538_v32  ;;  %1541 = vst [vmem:[%s10084_s29 + $0x508] sm:$0xff] %v1540_v33  ;;  %v1542_v34 = vld [vmem:[%s10079_s28 + $0xa20] sm:$0xff]  ;;  %v1544_v35 = vld [vmem:[%s10079_s28 + $0xa30] sm:$0xff] }
  0x67   : > { %v1546_v36 = vld [vmem:[%s10079_s28 + $0xa40] sm:$0xff]  ;;  %1543 = vst [vmem:[%s10084_s29 + $0x510] sm:$0xff] %v1542_v34  ;;  %1545 = vst [vmem:[%s10084_s29 + $0x518] sm:$0xff] %v1544_v35  ;;  %v1548_v37 = vld [vmem:[%s10079_s28 + $0xa50] sm:$0xff] }
  0x68   : > { %1547 = vst [vmem:[%s10084_s29 + $0x520] sm:$0xff] %v1546_v36  ;;  %v1550_v38 = vld [vmem:[%s10079_s28 + $0xa60] sm:$0xff]  ;;  %v1552_v39 = vld [vmem:[%s10079_s28 + $0xa70] sm:$0xff]  ;;  %1549 = vst [vmem:[%s10084_s29 + $0x528] sm:$0xff] %v1548_v37 }
  0x69   : > { %1551 = vst [vmem:[%s10084_s29 + $0x530] sm:$0xff] %v1550_v38  ;;  %1553 = vst [vmem:[%s10084_s29 + $0x538] sm:$0xff] %v1552_v39  ;;  %v1554_v40 = vld [vmem:[%s10079_s28 + $0xa80] sm:$0xff]  ;;  %v1556_v41 = vld [vmem:[%s10079_s28 + $0xa90] sm:$0xff] }
  0x6a   : > { %v1558_v42 = vld [vmem:[%s10079_s28 + $0xaa0] sm:$0xff]  ;;  %1555 = vst [vmem:[%s10084_s29 + $0x540] sm:$0xff] %v1554_v40  ;;  %1557 = vst [vmem:[%s10084_s29 + $0x548] sm:$0xff] %v1556_v41  ;;  %v1560_v43 = vld [vmem:[%s10079_s28 + $0xab0] sm:$0xff] }
  0x6b   : > { %1559 = vst [vmem:[%s10084_s29 + $0x550] sm:$0xff] %v1558_v42  ;;  %v1562_v44 = vld [vmem:[%s10079_s28 + $0xac0] sm:$0xff]  ;;  %v1564_v45 = vld [vmem:[%s10079_s28 + $0xad0] sm:$0xff]  ;;  %1561 = vst [vmem:[%s10084_s29 + $0x558] sm:$0xff] %v1560_v43 }
  0x6c   : > { %1563 = vst [vmem:[%s10084_s29 + $0x560] sm:$0xff] %v1562_v44  ;;  %1565 = vst [vmem:[%s10084_s29 + $0x568] sm:$0xff] %v1564_v45  ;;  %v1566_v46 = vld [vmem:[%s10079_s28 + $0xae0] sm:$0xff]  ;;  %v1568_v47 = vld [vmem:[%s10079_s28 + $0xaf0] sm:$0xff] }
  0x6d   : > { %v1570_v48 = vld [vmem:[%s10079_s28 + $0xb00] sm:$0xff]  ;;  %1567 = vst [vmem:[%s10084_s29 + $0x570] sm:$0xff] %v1566_v46  ;;  %1569 = vst [vmem:[%s10084_s29 + $0x578] sm:$0xff] %v1568_v47  ;;  %v1572_v49 = vld [vmem:[%s10079_s28 + $0xb10] sm:$0xff] }
  0x6e   : > { %1571 = vst [vmem:[%s10084_s29 + $0x580] sm:$0xff] %v1570_v48  ;;  %v1574_v50 = vld [vmem:[%s10079_s28 + $0xb20] sm:$0xff]  ;;  %v1576_v51 = vld [vmem:[%s10079_s28 + $0xb30] sm:$0xff]  ;;  %1573 = vst [vmem:[%s10084_s29 + $0x588] sm:$0xff] %v1572_v49 }
  0x6f   : > { %1575 = vst [vmem:[%s10084_s29 + $0x590] sm:$0xff] %v1574_v50  ;;  %1577 = vst [vmem:[%s10084_s29 + $0x598] sm:$0xff] %v1576_v51  ;;  %v1578_v52 = vld [vmem:[%s10079_s28 + $0xb40] sm:$0xff]  ;;  %v1580_v53 = vld [vmem:[%s10079_s28 + $0xb50] sm:$0xff] }
  0x70   : > { %v1582_v54 = vld [vmem:[%s10079_s28 + $0xb60] sm:$0xff]  ;;  %1579 = vst [vmem:[%s10084_s29 + $0x5a0] sm:$0xff] %v1578_v52  ;;  %1581 = vst [vmem:[%s10084_s29 + $0x5a8] sm:$0xff] %v1580_v53  ;;  %v1584_v55 = vld [vmem:[%s10079_s28 + $0xb70] sm:$0xff] }
  0x71   : > { %1583 = vst [vmem:[%s10084_s29 + $0x5b0] sm:$0xff] %v1582_v54  ;;  %v1586_v56 = vld [vmem:[%s10079_s28 + $0xb80] sm:$0xff]  ;;  %v1588_v57 = vld [vmem:[%s10079_s28 + $0xb90] sm:$0xff]  ;;  %1585 = vst [vmem:[%s10084_s29 + $0x5b8] sm:$0xff] %v1584_v55 }
  0x72   : > { %1587 = vst [vmem:[%s10084_s29 + $0x5c0] sm:$0xff] %v1586_v56  ;;  %1589 = vst [vmem:[%s10084_s29 + $0x5c8] sm:$0xff] %v1588_v57  ;;  %v1590_v58 = vld [vmem:[%s10079_s28 + $0xba0] sm:$0xff]  ;;  %v1592_v59 = vld [vmem:[%s10079_s28 + $0xbb0] sm:$0xff] }
  0x73   : > { %v1594_v60 = vld [vmem:[%s10079_s28 + $0xbc0] sm:$0xff]  ;;  %1591 = vst [vmem:[%s10084_s29 + $0x5d0] sm:$0xff] %v1590_v58  ;;  %1593 = vst [vmem:[%s10084_s29 + $0x5d8] sm:$0xff] %v1592_v59  ;;  %v1596_v61 = vld [vmem:[%s10079_s28 + $0xbd0] sm:$0xff] }
  0x74   : > { %1595 = vst [vmem:[%s10084_s29 + $0x5e0] sm:$0xff] %v1594_v60  ;;  %v1598_v62 = vld [vmem:[%s10079_s28 + $0xbe0] sm:$0xff]  ;;  %v1600_v63 = vld [vmem:[%s10079_s28 + $0xbf0] sm:$0xff]  ;;  %1597 = vst [vmem:[%s10084_s29 + $0x5e8] sm:$0xff] %v1596_v61 }
  0x75   : > { %1599 = vst [vmem:[%s10084_s29 + $0x5f0] sm:$0xff] %v1598_v62  ;;  %1601 = vst [vmem:[%s10084_s29 + $0x5f8] sm:$0xff] %v1600_v63  ;;  %v1602_v0 = vld [vmem:[%s10079_s28 + $0xc00] sm:$0xff]  ;;  %v1604_v1 = vld [vmem:[%s10079_s28 + $0xc10] sm:$0xff] }
  0x76   : > { %v1606_v2 = vld [vmem:[%s10079_s28 + $0xc20] sm:$0xff]  ;;  %1603 = vst [vmem:[%s10084_s29 + $0x600] sm:$0xff] %v1602_v0  ;;  %1605 = vst [vmem:[%s10084_s29 + $0x608] sm:$0xff] %v1604_v1  ;;  %v1608_v3 = vld [vmem:[%s10079_s28 + $0xc30] sm:$0xff] }
  0x77   : > { %1607 = vst [vmem:[%s10084_s29 + $0x610] sm:$0xff] %v1606_v2  ;;  %v1610_v4 = vld [vmem:[%s10079_s28 + $0xc40] sm:$0xff]  ;;  %v1612_v5 = vld [vmem:[%s10079_s28 + $0xc50] sm:$0xff]  ;;  %1609 = vst [vmem:[%s10084_s29 + $0x618] sm:$0xff] %v1608_v3 }
  0x78   : > { %1611 = vst [vmem:[%s10084_s29 + $0x620] sm:$0xff] %v1610_v4  ;;  %1613 = vst [vmem:[%s10084_s29 + $0x628] sm:$0xff] %v1612_v5  ;;  %v1614_v6 = vld [vmem:[%s10079_s28 + $0xc60] sm:$0xff]  ;;  %v1616_v7 = vld [vmem:[%s10079_s28 + $0xc70] sm:$0xff] }
  0x79   : > { %v1618_v8 = vld [vmem:[%s10079_s28 + $0xc80] sm:$0xff]  ;;  %1615 = vst [vmem:[%s10084_s29 + $0x630] sm:$0xff] %v1614_v6  ;;  %1617 = vst [vmem:[%s10084_s29 + $0x638] sm:$0xff] %v1616_v7  ;;  %v1620_v9 = vld [vmem:[%s10079_s28 + $0xc90] sm:$0xff] }
  0x7a   : > { %1619 = vst [vmem:[%s10084_s29 + $0x640] sm:$0xff] %v1618_v8  ;;  %v1622_v10 = vld [vmem:[%s10079_s28 + $0xca0] sm:$0xff]  ;;  %v1624_v11 = vld [vmem:[%s10079_s28 + $0xcb0] sm:$0xff]  ;;  %1621 = vst [vmem:[%s10084_s29 + $0x648] sm:$0xff] %v1620_v9 }
  0x7b   : > { %1623 = vst [vmem:[%s10084_s29 + $0x650] sm:$0xff] %v1622_v10  ;;  %1625 = vst [vmem:[%s10084_s29 + $0x658] sm:$0xff] %v1624_v11  ;;  %v1626_v12 = vld [vmem:[%s10079_s28 + $0xcc0] sm:$0xff]  ;;  %v1628_v13 = vld [vmem:[%s10079_s28 + $0xcd0] sm:$0xff] }
  0x7c   : > { %v1630_v14 = vld [vmem:[%s10079_s28 + $0xce0] sm:$0xff]  ;;  %1627 = vst [vmem:[%s10084_s29 + $0x660] sm:$0xff] %v1626_v12  ;;  %1629 = vst [vmem:[%s10084_s29 + $0x668] sm:$0xff] %v1628_v13  ;;  %v1632_v15 = vld [vmem:[%s10079_s28 + $0xcf0] sm:$0xff] }
  0x7d   : > { %1631 = vst [vmem:[%s10084_s29 + $0x670] sm:$0xff] %v1630_v14  ;;  %v1634_v16 = vld [vmem:[%s10079_s28 + $0xd00] sm:$0xff]  ;;  %v1636_v17 = vld [vmem:[%s10079_s28 + $0xd10] sm:$0xff]  ;;  %1633 = vst [vmem:[%s10084_s29 + $0x678] sm:$0xff] %v1632_v15 }
  0x7e   : > { %1635 = vst [vmem:[%s10084_s29 + $0x680] sm:$0xff] %v1634_v16  ;;  %1637 = vst [vmem:[%s10084_s29 + $0x688] sm:$0xff] %v1636_v17  ;;  %v1638_v18 = vld [vmem:[%s10079_s28 + $0xd20] sm:$0xff]  ;;  %v1640_v19 = vld [vmem:[%s10079_s28 + $0xd30] sm:$0xff] }
  0x7f   : > { %v1642_v20 = vld [vmem:[%s10079_s28 + $0xd40] sm:$0xff]  ;;  %1639 = vst [vmem:[%s10084_s29 + $0x690] sm:$0xff] %v1638_v18  ;;  %1641 = vst [vmem:[%s10084_s29 + $0x698] sm:$0xff] %v1640_v19  ;;  %v1644_v21 = vld [vmem:[%s10079_s28 + $0xd50] sm:$0xff] }
  0x80   : > { %1643 = vst [vmem:[%s10084_s29 + $0x6a0] sm:$0xff] %v1642_v20  ;;  %v1646_v22 = vld [vmem:[%s10079_s28 + $0xd60] sm:$0xff]  ;;  %v1648_v23 = vld [vmem:[%s10079_s28 + $0xd70] sm:$0xff]  ;;  %1645 = vst [vmem:[%s10084_s29 + $0x6a8] sm:$0xff] %v1644_v21 }
  0x81   : > { %1647 = vst [vmem:[%s10084_s29 + $0x6b0] sm:$0xff] %v1646_v22  ;;  %1649 = vst [vmem:[%s10084_s29 + $0x6b8] sm:$0xff] %v1648_v23  ;;  %v1650_v24 = vld [vmem:[%s10079_s28 + $0xd80] sm:$0xff]  ;;  %v1652_v25 = vld [vmem:[%s10079_s28 + $0xd90] sm:$0xff] }
  0x82   : > { %v1654_v26 = vld [vmem:[%s10079_s28 + $0xda0] sm:$0xff]  ;;  %1651 = vst [vmem:[%s10084_s29 + $0x6c0] sm:$0xff] %v1650_v24  ;;  %1653 = vst [vmem:[%s10084_s29 + $0x6c8] sm:$0xff] %v1652_v25  ;;  %v1656_v27 = vld [vmem:[%s10079_s28 + $0xdb0] sm:$0xff] }
  0x83   : > { %1655 = vst [vmem:[%s10084_s29 + $0x6d0] sm:$0xff] %v1654_v26  ;;  %v1658_v28 = vld [vmem:[%s10079_s28 + $0xdc0] sm:$0xff]  ;;  %v1660_v29 = vld [vmem:[%s10079_s28 + $0xdd0] sm:$0xff]  ;;  %1657 = vst [vmem:[%s10084_s29 + $0x6d8] sm:$0xff] %v1656_v27 }
  0x84   : > { %1659 = vst [vmem:[%s10084_s29 + $0x6e0] sm:$0xff] %v1658_v28  ;;  %1661 = vst [vmem:[%s10084_s29 + $0x6e8] sm:$0xff] %v1660_v29  ;;  %v1662_v30 = vld [vmem:[%s10079_s28 + $0xde0] sm:$0xff]  ;;  %v1664_v31 = vld [vmem:[%s10079_s28 + $0xdf0] sm:$0xff] }
  0x85   : > { %v1666_v32 = vld [vmem:[%s10079_s28 + $0xe00] sm:$0xff]  ;;  %1663 = vst [vmem:[%s10084_s29 + $0x6f0] sm:$0xff] %v1662_v30  ;;  %1665 = vst [vmem:[%s10084_s29 + $0x6f8] sm:$0xff] %v1664_v31  ;;  %v1668_v33 = vld [vmem:[%s10079_s28 + $0xe10] sm:$0xff] }
  0x86   : > { %1667 = vst [vmem:[%s10084_s29 + $0x700] sm:$0xff] %v1666_v32  ;;  %v1670_v34 = vld [vmem:[%s10079_s28 + $0xe20] sm:$0xff]  ;;  %v1672_v35 = vld [vmem:[%s10079_s28 + $0xe30] sm:$0xff]  ;;  %1669 = vst [vmem:[%s10084_s29 + $0x708] sm:$0xff] %v1668_v33 }
  0x87   : > { %1671 = vst [vmem:[%s10084_s29 + $0x710] sm:$0xff] %v1670_v34  ;;  %1673 = vst [vmem:[%s10084_s29 + $0x718] sm:$0xff] %v1672_v35  ;;  %v1674_v36 = vld [vmem:[%s10079_s28 + $0xe40] sm:$0xff]  ;;  %v1676_v37 = vld [vmem:[%s10079_s28 + $0xe50] sm:$0xff] }
  0x88   : > { %v1678_v38 = vld [vmem:[%s10079_s28 + $0xe60] sm:$0xff]  ;;  %1675 = vst [vmem:[%s10084_s29 + $0x720] sm:$0xff] %v1674_v36  ;;  %1677 = vst [vmem:[%s10084_s29 + $0x728] sm:$0xff] %v1676_v37  ;;  %v1680_v39 = vld [vmem:[%s10079_s28 + $0xe70] sm:$0xff] }
  0x89   : > { %1679 = vst [vmem:[%s10084_s29 + $0x730] sm:$0xff] %v1678_v38  ;;  %v1682_v40 = vld [vmem:[%s10079_s28 + $0xe80] sm:$0xff]  ;;  %v1684_v41 = vld [vmem:[%s10079_s28 + $0xe90] sm:$0xff]  ;;  %1681 = vst [vmem:[%s10084_s29 + $0x738] sm:$0xff] %v1680_v39 }
  0x8a   : > { %1683 = vst [vmem:[%s10084_s29 + $0x740] sm:$0xff] %v1682_v40  ;;  %1685 = vst [vmem:[%s10084_s29 + $0x748] sm:$0xff] %v1684_v41  ;;  %v1686_v42 = vld [vmem:[%s10079_s28 + $0xea0] sm:$0xff]  ;;  %v1688_v43 = vld [vmem:[%s10079_s28 + $0xeb0] sm:$0xff] }
  0x8b   : > { %v1690_v44 = vld [vmem:[%s10079_s28 + $0xec0] sm:$0xff]  ;;  %1687 = vst [vmem:[%s10084_s29 + $0x750] sm:$0xff] %v1686_v42  ;;  %1689 = vst [vmem:[%s10084_s29 + $0x758] sm:$0xff] %v1688_v43  ;;  %v1692_v45 = vld [vmem:[%s10079_s28 + $0xed0] sm:$0xff] }
  0x8c   : > { %1691 = vst [vmem:[%s10084_s29 + $0x760] sm:$0xff] %v1690_v44  ;;  %v1694_v46 = vld [vmem:[%s10079_s28 + $0xee0] sm:$0xff]  ;;  %v1696_v47 = vld [vmem:[%s10079_s28 + $0xef0] sm:$0xff]  ;;  %1693 = vst [vmem:[%s10084_s29 + $0x768] sm:$0xff] %v1692_v45 }
  0x8d   : > { %1695 = vst [vmem:[%s10084_s29 + $0x770] sm:$0xff] %v1694_v46  ;;  %1697 = vst [vmem:[%s10084_s29 + $0x778] sm:$0xff] %v1696_v47  ;;  %v1698_v48 = vld [vmem:[%s10079_s28 + $0xf00] sm:$0xff]  ;;  %v1700_v49 = vld [vmem:[%s10079_s28 + $0xf10] sm:$0xff] }
  0x8e   : > { %v1702_v50 = vld [vmem:[%s10079_s28 + $0xf20] sm:$0xff]  ;;  %1699 = vst [vmem:[%s10084_s29 + $0x780] sm:$0xff] %v1698_v48  ;;  %1701 = vst [vmem:[%s10084_s29 + $0x788] sm:$0xff] %v1700_v49  ;;  %v1704_v51 = vld [vmem:[%s10079_s28 + $0xf30] sm:$0xff] }
  0x8f   : > { %1703 = vst [vmem:[%s10084_s29 + $0x790] sm:$0xff] %v1702_v50  ;;  %v1706_v52 = vld [vmem:[%s10079_s28 + $0xf40] sm:$0xff]  ;;  %v1708_v53 = vld [vmem:[%s10079_s28 + $0xf50] sm:$0xff]  ;;  %1705 = vst [vmem:[%s10084_s29 + $0x798] sm:$0xff] %v1704_v51 }
  0x90   : > { %1707 = vst [vmem:[%s10084_s29 + $0x7a0] sm:$0xff] %v1706_v52  ;;  %1709 = vst [vmem:[%s10084_s29 + $0x7a8] sm:$0xff] %v1708_v53  ;;  %v1710_v54 = vld [vmem:[%s10079_s28 + $0xf60] sm:$0xff]  ;;  %v1712_v55 = vld [vmem:[%s10079_s28 + $0xf70] sm:$0xff] }
  0x91   : > { %v1714_v56 = vld [vmem:[%s10079_s28 + $0xf80] sm:$0xff]  ;;  %1711 = vst [vmem:[%s10084_s29 + $0x7b0] sm:$0xff] %v1710_v54  ;;  %1713 = vst [vmem:[%s10084_s29 + $0x7b8] sm:$0xff] %v1712_v55  ;;  %v1716_v57 = vld [vmem:[%s10079_s28 + $0xf90] sm:$0xff] }
  0x92   : > { %1715 = vst [vmem:[%s10084_s29 + $0x7c0] sm:$0xff] %v1714_v56  ;;  %v1718_v58 = vld [vmem:[%s10079_s28 + $0xfa0] sm:$0xff]  ;;  %v1720_v59 = vld [vmem:[%s10079_s28 + $0xfb0] sm:$0xff]  ;;  %1717 = vst [vmem:[%s10084_s29 + $0x7c8] sm:$0xff] %v1716_v57 }
  0x93   : > { %1719 = vst [vmem:[%s10084_s29 + $0x7d0] sm:$0xff] %v1718_v58  ;;  %1721 = vst [vmem:[%s10084_s29 + $0x7d8] sm:$0xff] %v1720_v59  ;;  %v1722_v60 = vld [vmem:[%s10079_s28 + $0xfc0] sm:$0xff]  ;;  %v1724_v61 = vld [vmem:[%s10079_s28 + $0xfd0] sm:$0xff] }
  0x94   : > { %v1726_v62 = vld [vmem:[%s10079_s28 + $0xfe0] sm:$0xff]  ;;  %1723 = vst [vmem:[%s10084_s29 + $0x7e0] sm:$0xff] %v1722_v60  ;;  %1725 = vst [vmem:[%s10084_s29 + $0x7e8] sm:$0xff] %v1724_v61  ;;  %v1728_v63 = vld [vmem:[%s10079_s28 + $0xff0] sm:$0xff] }
  0x95   : > { %1727 = vst [vmem:[%s10084_s29 + $0x7f0] sm:$0xff] %v1726_v62  ;;  %v1730_v0 = vld [vmem:[%s10079_s28 + $0x1000] sm:$0xff]  ;;  %v1732_v1 = vld [vmem:[%s10079_s28 + $0x1010] sm:$0xff]  ;;  %1729 = vst [vmem:[%s10084_s29 + $0x7f8] sm:$0xff] %v1728_v63 }
  0x96   : > { %1731 = vst [vmem:[%s10084_s29 + $0x800] sm:$0xff] %v1730_v0  ;;  %1733 = vst [vmem:[%s10084_s29 + $0x808] sm:$0xff] %v1732_v1  ;;  %v1734_v2 = vld [vmem:[%s10079_s28 + $0x1020] sm:$0xff]  ;;  %v1736_v3 = vld [vmem:[%s10079_s28 + $0x1030] sm:$0xff] }
  0x97   : > { %v1738_v4 = vld [vmem:[%s10079_s28 + $0x1040] sm:$0xff]  ;;  %1735 = vst [vmem:[%s10084_s29 + $0x810] sm:$0xff] %v1734_v2  ;;  %1737 = vst [vmem:[%s10084_s29 + $0x818] sm:$0xff] %v1736_v3  ;;  %v1740_v5 = vld [vmem:[%s10079_s28 + $0x1050] sm:$0xff] }
  0x98   : > { %1739 = vst [vmem:[%s10084_s29 + $0x820] sm:$0xff] %v1738_v4  ;;  %v1742_v6 = vld [vmem:[%s10079_s28 + $0x1060] sm:$0xff]  ;;  %v1744_v7 = vld [vmem:[%s10079_s28 + $0x1070] sm:$0xff]  ;;  %1741 = vst [vmem:[%s10084_s29 + $0x828] sm:$0xff] %v1740_v5 }
  0x99   : > { %1743 = vst [vmem:[%s10084_s29 + $0x830] sm:$0xff] %v1742_v6  ;;  %1745 = vst [vmem:[%s10084_s29 + $0x838] sm:$0xff] %v1744_v7  ;;  %v1746_v8 = vld [vmem:[%s10079_s28 + $0x1080] sm:$0xff]  ;;  %v1748_v9 = vld [vmem:[%s10079_s28 + $0x1090] sm:$0xff] }
  0x9a   : > { %v1750_v10 = vld [vmem:[%s10079_s28 + $0x10a0] sm:$0xff]  ;;  %1747 = vst [vmem:[%s10084_s29 + $0x840] sm:$0xff] %v1746_v8  ;;  %1749 = vst [vmem:[%s10084_s29 + $0x848] sm:$0xff] %v1748_v9  ;;  %v1752_v11 = vld [vmem:[%s10079_s28 + $0x10b0] sm:$0xff] }
  0x9b   : > { %1751 = vst [vmem:[%s10084_s29 + $0x850] sm:$0xff] %v1750_v10  ;;  %v1754_v12 = vld [vmem:[%s10079_s28 + $0x10c0] sm:$0xff]  ;;  %v1756_v13 = vld [vmem:[%s10079_s28 + $0x10d0] sm:$0xff]  ;;  %1753 = vst [vmem:[%s10084_s29 + $0x858] sm:$0xff] %v1752_v11 }
  0x9c   : > { %1755 = vst [vmem:[%s10084_s29 + $0x860] sm:$0xff] %v1754_v12  ;;  %1757 = vst [vmem:[%s10084_s29 + $0x868] sm:$0xff] %v1756_v13  ;;  %v1758_v14 = vld [vmem:[%s10079_s28 + $0x10e0] sm:$0xff]  ;;  %v1760_v15 = vld [vmem:[%s10079_s28 + $0x10f0] sm:$0xff] }
  0x9d   : > { %v1762_v16 = vld [vmem:[%s10079_s28 + $0x1100] sm:$0xff]  ;;  %1759 = vst [vmem:[%s10084_s29 + $0x870] sm:$0xff] %v1758_v14  ;;  %1761 = vst [vmem:[%s10084_s29 + $0x878] sm:$0xff] %v1760_v15  ;;  %v1764_v17 = vld [vmem:[%s10079_s28 + $0x1110] sm:$0xff] }
  0x9e   : > { %1763 = vst [vmem:[%s10084_s29 + $0x880] sm:$0xff] %v1762_v16  ;;  %v1766_v18 = vld [vmem:[%s10079_s28 + $0x1120] sm:$0xff]  ;;  %v1768_v19 = vld [vmem:[%s10079_s28 + $0x1130] sm:$0xff]  ;;  %1765 = vst [vmem:[%s10084_s29 + $0x888] sm:$0xff] %v1764_v17 }
  0x9f   : > { %1767 = vst [vmem:[%s10084_s29 + $0x890] sm:$0xff] %v1766_v18  ;;  %1769 = vst [vmem:[%s10084_s29 + $0x898] sm:$0xff] %v1768_v19  ;;  %v1770_v20 = vld [vmem:[%s10079_s28 + $0x1140] sm:$0xff]  ;;  %v1772_v21 = vld [vmem:[%s10079_s28 + $0x1150] sm:$0xff] }
  0xa0   : > { %v1774_v22 = vld [vmem:[%s10079_s28 + $0x1160] sm:$0xff]  ;;  %1771 = vst [vmem:[%s10084_s29 + $0x8a0] sm:$0xff] %v1770_v20  ;;  %1773 = vst [vmem:[%s10084_s29 + $0x8a8] sm:$0xff] %v1772_v21  ;;  %v1776_v23 = vld [vmem:[%s10079_s28 + $0x1170] sm:$0xff] }
  0xa1   : > { %1775 = vst [vmem:[%s10084_s29 + $0x8b0] sm:$0xff] %v1774_v22  ;;  %v1778_v24 = vld [vmem:[%s10079_s28 + $0x1180] sm:$0xff]  ;;  %v1780_v25 = vld [vmem:[%s10079_s28 + $0x1190] sm:$0xff]  ;;  %1777 = vst [vmem:[%s10084_s29 + $0x8b8] sm:$0xff] %v1776_v23 }
  0xa2   : > { %1779 = vst [vmem:[%s10084_s29 + $0x8c0] sm:$0xff] %v1778_v24  ;;  %1781 = vst [vmem:[%s10084_s29 + $0x8c8] sm:$0xff] %v1780_v25  ;;  %v1782_v26 = vld [vmem:[%s10079_s28 + $0x11a0] sm:$0xff]  ;;  %v1784_v27 = vld [vmem:[%s10079_s28 + $0x11b0] sm:$0xff] }
  0xa3   : > { %v1786_v28 = vld [vmem:[%s10079_s28 + $0x11c0] sm:$0xff]  ;;  %1783 = vst [vmem:[%s10084_s29 + $0x8d0] sm:$0xff] %v1782_v26  ;;  %1785 = vst [vmem:[%s10084_s29 + $0x8d8] sm:$0xff] %v1784_v27  ;;  %v1788_v29 = vld [vmem:[%s10079_s28 + $0x11d0] sm:$0xff] }
  0xa4   : > { %1787 = vst [vmem:[%s10084_s29 + $0x8e0] sm:$0xff] %v1786_v28  ;;  %v1790_v30 = vld [vmem:[%s10079_s28 + $0x11e0] sm:$0xff]  ;;  %v1792_v31 = vld [vmem:[%s10079_s28 + $0x11f0] sm:$0xff]  ;;  %1789 = vst [vmem:[%s10084_s29 + $0x8e8] sm:$0xff] %v1788_v29 }
  0xa5   : > { %1791 = vst [vmem:[%s10084_s29 + $0x8f0] sm:$0xff] %v1790_v30  ;;  %1793 = vst [vmem:[%s10084_s29 + $0x8f8] sm:$0xff] %v1792_v31  ;;  %v1794_v32 = vld [vmem:[%s10079_s28 + $0x1200] sm:$0xff]  ;;  %v1796_v33 = vld [vmem:[%s10079_s28 + $0x1210] sm:$0xff] }
  0xa6   : > { %v1798_v34 = vld [vmem:[%s10079_s28 + $0x1220] sm:$0xff]  ;;  %1795 = vst [vmem:[%s10084_s29 + $0x900] sm:$0xff] %v1794_v32  ;;  %1797 = vst [vmem:[%s10084_s29 + $0x908] sm:$0xff] %v1796_v33  ;;  %v1800_v35 = vld [vmem:[%s10079_s28 + $0x1230] sm:$0xff] }
  0xa7   : > { %1799 = vst [vmem:[%s10084_s29 + $0x910] sm:$0xff] %v1798_v34  ;;  %v1802_v36 = vld [vmem:[%s10079_s28 + $0x1240] sm:$0xff]  ;;  %v1804_v37 = vld [vmem:[%s10079_s28 + $0x1250] sm:$0xff]  ;;  %1801 = vst [vmem:[%s10084_s29 + $0x918] sm:$0xff] %v1800_v35 }
  0xa8   : > { %1803 = vst [vmem:[%s10084_s29 + $0x920] sm:$0xff] %v1802_v36  ;;  %1805 = vst [vmem:[%s10084_s29 + $0x928] sm:$0xff] %v1804_v37  ;;  %v1806_v38 = vld [vmem:[%s10079_s28 + $0x1260] sm:$0xff]  ;;  %v1808_v39 = vld [vmem:[%s10079_s28 + $0x1270] sm:$0xff] }
  0xa9   : > { %v1810_v40 = vld [vmem:[%s10079_s28 + $0x1280] sm:$0xff]  ;;  %1807 = vst [vmem:[%s10084_s29 + $0x930] sm:$0xff] %v1806_v38  ;;  %1809 = vst [vmem:[%s10084_s29 + $0x938] sm:$0xff] %v1808_v39  ;;  %v1812_v41 = vld [vmem:[%s10079_s28 + $0x1290] sm:$0xff] }
  0xaa   : > { %1811 = vst [vmem:[%s10084_s29 + $0x940] sm:$0xff] %v1810_v40  ;;  %v1814_v42 = vld [vmem:[%s10079_s28 + $0x12a0] sm:$0xff]  ;;  %v1816_v43 = vld [vmem:[%s10079_s28 + $0x12b0] sm:$0xff]  ;;  %1813 = vst [vmem:[%s10084_s29 + $0x948] sm:$0xff] %v1812_v41 }
  0xab   : > { %1815 = vst [vmem:[%s10084_s29 + $0x950] sm:$0xff] %v1814_v42  ;;  %1817 = vst [vmem:[%s10084_s29 + $0x958] sm:$0xff] %v1816_v43  ;;  %v1818_v44 = vld [vmem:[%s10079_s28 + $0x12c0] sm:$0xff]  ;;  %v1820_v45 = vld [vmem:[%s10079_s28 + $0x12d0] sm:$0xff] }
  0xac   : > { %v1822_v46 = vld [vmem:[%s10079_s28 + $0x12e0] sm:$0xff]  ;;  %1819 = vst [vmem:[%s10084_s29 + $0x960] sm:$0xff] %v1818_v44  ;;  %1821 = vst [vmem:[%s10084_s29 + $0x968] sm:$0xff] %v1820_v45  ;;  %v1824_v47 = vld [vmem:[%s10079_s28 + $0x12f0] sm:$0xff] }
  0xad   : > { %1823 = vst [vmem:[%s10084_s29 + $0x970] sm:$0xff] %v1822_v46  ;;  %v1826_v48 = vld [vmem:[%s10079_s28 + $0x1300] sm:$0xff]  ;;  %v1828_v49 = vld [vmem:[%s10079_s28 + $0x1310] sm:$0xff]  ;;  %1825 = vst [vmem:[%s10084_s29 + $0x978] sm:$0xff] %v1824_v47 }
  0xae   : > { %1827 = vst [vmem:[%s10084_s29 + $0x980] sm:$0xff] %v1826_v48  ;;  %1829 = vst [vmem:[%s10084_s29 + $0x988] sm:$0xff] %v1828_v49  ;;  %v1830_v50 = vld [vmem:[%s10079_s28 + $0x1320] sm:$0xff]  ;;  %v1832_v51 = vld [vmem:[%s10079_s28 + $0x1330] sm:$0xff] }
  0xaf   : > { %v1834_v52 = vld [vmem:[%s10079_s28 + $0x1340] sm:$0xff]  ;;  %1831 = vst [vmem:[%s10084_s29 + $0x990] sm:$0xff] %v1830_v50  ;;  %1833 = vst [vmem:[%s10084_s29 + $0x998] sm:$0xff] %v1832_v51  ;;  %v1836_v53 = vld [vmem:[%s10079_s28 + $0x1350] sm:$0xff] }
  0xb0   : > { %1835 = vst [vmem:[%s10084_s29 + $0x9a0] sm:$0xff] %v1834_v52  ;;  %v1838_v54 = vld [vmem:[%s10079_s28 + $0x1360] sm:$0xff]  ;;  %v1840_v55 = vld [vmem:[%s10079_s28 + $0x1370] sm:$0xff]  ;;  %1837 = vst [vmem:[%s10084_s29 + $0x9a8] sm:$0xff] %v1836_v53 }
  0xb1   : > { %1839 = vst [vmem:[%s10084_s29 + $0x9b0] sm:$0xff] %v1838_v54  ;;  %1841 = vst [vmem:[%s10084_s29 + $0x9b8] sm:$0xff] %v1840_v55  ;;  %v1842_v56 = vld [vmem:[%s10079_s28 + $0x1380] sm:$0xff]  ;;  %v1844_v57 = vld [vmem:[%s10079_s28 + $0x1390] sm:$0xff] }
  0xb2   : > { %v1846_v58 = vld [vmem:[%s10079_s28 + $0x13a0] sm:$0xff]  ;;  %1843 = vst [vmem:[%s10084_s29 + $0x9c0] sm:$0xff] %v1842_v56  ;;  %1845 = vst [vmem:[%s10084_s29 + $0x9c8] sm:$0xff] %v1844_v57  ;;  %v1848_v59 = vld [vmem:[%s10079_s28 + $0x13b0] sm:$0xff] }
  0xb3   : > { %1847 = vst [vmem:[%s10084_s29 + $0x9d0] sm:$0xff] %v1846_v58  ;;  %v1850_v60 = vld [vmem:[%s10079_s28 + $0x13c0] sm:$0xff]  ;;  %v1852_v61 = vld [vmem:[%s10079_s28 + $0x13d0] sm:$0xff]  ;;  %1849 = vst [vmem:[%s10084_s29 + $0x9d8] sm:$0xff] %v1848_v59 }
  0xb4   : > { %1851 = vst [vmem:[%s10084_s29 + $0x9e0] sm:$0xff] %v1850_v60  ;;  %1853 = vst [vmem:[%s10084_s29 + $0x9e8] sm:$0xff] %v1852_v61  ;;  %v1854_v62 = vld [vmem:[%s10079_s28 + $0x13e0] sm:$0xff]  ;;  %v1856_v63 = vld [vmem:[%s10079_s28 + $0x13f0] sm:$0xff] }
  0xb5   : > { %v1858_v0 = vld [vmem:[%s10079_s28 + $0x1400] sm:$0xff]  ;;  %1855 = vst [vmem:[%s10084_s29 + $0x9f0] sm:$0xff] %v1854_v62  ;;  %1857 = vst [vmem:[%s10084_s29 + $0x9f8] sm:$0xff] %v1856_v63  ;;  %v1860_v1 = vld [vmem:[%s10079_s28 + $0x1410] sm:$0xff] }
  0xb6   : > { %1859 = vst [vmem:[%s10084_s29 + $0xa00] sm:$0xff] %v1858_v0  ;;  %v1862_v2 = vld [vmem:[%s10079_s28 + $0x1420] sm:$0xff]  ;;  %v1864_v3 = vld [vmem:[%s10079_s28 + $0x1430] sm:$0xff]  ;;  %1861 = vst [vmem:[%s10084_s29 + $0xa08] sm:$0xff] %v1860_v1 }
  0xb7   : > { %1863 = vst [vmem:[%s10084_s29 + $0xa10] sm:$0xff] %v1862_v2  ;;  %1865 = vst [vmem:[%s10084_s29 + $0xa18] sm:$0xff] %v1864_v3  ;;  %v1866_v4 = vld [vmem:[%s10079_s28 + $0x1440] sm:$0xff]  ;;  %v1868_v5 = vld [vmem:[%s10079_s28 + $0x1450] sm:$0xff] }
  0xb8   : > { %v1870_v6 = vld [vmem:[%s10079_s28 + $0x1460] sm:$0xff]  ;;  %1867 = vst [vmem:[%s10084_s29 + $0xa20] sm:$0xff] %v1866_v4  ;;  %1869 = vst [vmem:[%s10084_s29 + $0xa28] sm:$0xff] %v1868_v5  ;;  %v1872_v7 = vld [vmem:[%s10079_s28 + $0x1470] sm:$0xff] }
  0xb9   : > { %1871 = vst [vmem:[%s10084_s29 + $0xa30] sm:$0xff] %v1870_v6  ;;  %v1874_v8 = vld [vmem:[%s10079_s28 + $0x1480] sm:$0xff]  ;;  %v1876_v9 = vld [vmem:[%s10079_s28 + $0x1490] sm:$0xff]  ;;  %1873 = vst [vmem:[%s10084_s29 + $0xa38] sm:$0xff] %v1872_v7 }
  0xba   : > { %1875 = vst [vmem:[%s10084_s29 + $0xa40] sm:$0xff] %v1874_v8  ;;  %1877 = vst [vmem:[%s10084_s29 + $0xa48] sm:$0xff] %v1876_v9  ;;  %v1878_v10 = vld [vmem:[%s10079_s28 + $0x14a0] sm:$0xff]  ;;  %v1880_v11 = vld [vmem:[%s10079_s28 + $0x14b0] sm:$0xff] }
  0xbb   : > { %v1882_v12 = vld [vmem:[%s10079_s28 + $0x14c0] sm:$0xff]  ;;  %1879 = vst [vmem:[%s10084_s29 + $0xa50] sm:$0xff] %v1878_v10  ;;  %1881 = vst [vmem:[%s10084_s29 + $0xa58] sm:$0xff] %v1880_v11  ;;  %v1884_v13 = vld [vmem:[%s10079_s28 + $0x14d0] sm:$0xff] }
  0xbc   : > { %1883 = vst [vmem:[%s10084_s29 + $0xa60] sm:$0xff] %v1882_v12  ;;  %v1886_v14 = vld [vmem:[%s10079_s28 + $0x14e0] sm:$0xff]  ;;  %v1888_v15 = vld [vmem:[%s10079_s28 + $0x14f0] sm:$0xff]  ;;  %1885 = vst [vmem:[%s10084_s29 + $0xa68] sm:$0xff] %v1884_v13 }
  0xbd   : > { %1887 = vst [vmem:[%s10084_s29 + $0xa70] sm:$0xff] %v1886_v14  ;;  %1889 = vst [vmem:[%s10084_s29 + $0xa78] sm:$0xff] %v1888_v15  ;;  %v1890_v16 = vld [vmem:[%s10079_s28 + $0x1500] sm:$0xff]  ;;  %v1892_v17 = vld [vmem:[%s10079_s28 + $0x1510] sm:$0xff] }
  0xbe   : > { %v1894_v18 = vld [vmem:[%s10079_s28 + $0x1520] sm:$0xff]  ;;  %1891 = vst [vmem:[%s10084_s29 + $0xa80] sm:$0xff] %v1890_v16  ;;  %1893 = vst [vmem:[%s10084_s29 + $0xa88] sm:$0xff] %v1892_v17  ;;  %v1896_v19 = vld [vmem:[%s10079_s28 + $0x1530] sm:$0xff] }
  0xbf   : > { %1895 = vst [vmem:[%s10084_s29 + $0xa90] sm:$0xff] %v1894_v18  ;;  %v1898_v20 = vld [vmem:[%s10079_s28 + $0x1540] sm:$0xff]  ;;  %v1900_v21 = vld [vmem:[%s10079_s28 + $0x1550] sm:$0xff]  ;;  %1897 = vst [vmem:[%s10084_s29 + $0xa98] sm:$0xff] %v1896_v19 }
  0xc0   : > { %1899 = vst [vmem:[%s10084_s29 + $0xaa0] sm:$0xff] %v1898_v20  ;;  %1901 = vst [vmem:[%s10084_s29 + $0xaa8] sm:$0xff] %v1900_v21  ;;  %v1902_v22 = vld [vmem:[%s10079_s28 + $0x1560] sm:$0xff]  ;;  %v1904_v23 = vld [vmem:[%s10079_s28 + $0x1570] sm:$0xff] }
  0xc1   : > { %v1906_v24 = vld [vmem:[%s10079_s28 + $0x1580] sm:$0xff]  ;;  %1903 = vst [vmem:[%s10084_s29 + $0xab0] sm:$0xff] %v1902_v22  ;;  %1905 = vst [vmem:[%s10084_s29 + $0xab8] sm:$0xff] %v1904_v23  ;;  %v1908_v25 = vld [vmem:[%s10079_s28 + $0x1590] sm:$0xff] }
  0xc2   : > { %1907 = vst [vmem:[%s10084_s29 + $0xac0] sm:$0xff] %v1906_v24  ;;  %v1910_v26 = vld [vmem:[%s10079_s28 + $0x15a0] sm:$0xff]  ;;  %v1912_v27 = vld [vmem:[%s10079_s28 + $0x15b0] sm:$0xff]  ;;  %1909 = vst [vmem:[%s10084_s29 + $0xac8] sm:$0xff] %v1908_v25 }
  0xc3   : > { %1911 = vst [vmem:[%s10084_s29 + $0xad0] sm:$0xff] %v1910_v26  ;;  %1913 = vst [vmem:[%s10084_s29 + $0xad8] sm:$0xff] %v1912_v27  ;;  %v1914_v28 = vld [vmem:[%s10079_s28 + $0x15c0] sm:$0xff]  ;;  %v1916_v29 = vld [vmem:[%s10079_s28 + $0x15d0] sm:$0xff] }
  0xc4   : > { %v1918_v30 = vld [vmem:[%s10079_s28 + $0x15e0] sm:$0xff]  ;;  %1915 = vst [vmem:[%s10084_s29 + $0xae0] sm:$0xff] %v1914_v28  ;;  %1917 = vst [vmem:[%s10084_s29 + $0xae8] sm:$0xff] %v1916_v29  ;;  %v1920_v31 = vld [vmem:[%s10079_s28 + $0x15f0] sm:$0xff] }
  0xc5   : > { %1919 = vst [vmem:[%s10084_s29 + $0xaf0] sm:$0xff] %v1918_v30  ;;  %v1922_v32 = vld [vmem:[%s10079_s28 + $0x1600] sm:$0xff]  ;;  %v1924_v33 = vld [vmem:[%s10079_s28 + $0x1610] sm:$0xff]  ;;  %1921 = vst [vmem:[%s10084_s29 + $0xaf8] sm:$0xff] %v1920_v31 }
  0xc6   : > { %1923 = vst [vmem:[%s10084_s29 + $0xb00] sm:$0xff] %v1922_v32  ;;  %1925 = vst [vmem:[%s10084_s29 + $0xb08] sm:$0xff] %v1924_v33  ;;  %v1926_v34 = vld [vmem:[%s10079_s28 + $0x1620] sm:$0xff]  ;;  %v1928_v35 = vld [vmem:[%s10079_s28 + $0x1630] sm:$0xff] }
  0xc7   : > { %v1930_v36 = vld [vmem:[%s10079_s28 + $0x1640] sm:$0xff]  ;;  %1927 = vst [vmem:[%s10084_s29 + $0xb10] sm:$0xff] %v1926_v34  ;;  %1929 = vst [vmem:[%s10084_s29 + $0xb18] sm:$0xff] %v1928_v35  ;;  %v1932_v37 = vld [vmem:[%s10079_s28 + $0x1650] sm:$0xff] }
  0xc8   : > { %1931 = vst [vmem:[%s10084_s29 + $0xb20] sm:$0xff] %v1930_v36  ;;  %v1934_v38 = vld [vmem:[%s10079_s28 + $0x1660] sm:$0xff]  ;;  %v1936_v39 = vld [vmem:[%s10079_s28 + $0x1670] sm:$0xff]  ;;  %1933 = vst [vmem:[%s10084_s29 + $0xb28] sm:$0xff] %v1932_v37 }
  0xc9   : > { %1935 = vst [vmem:[%s10084_s29 + $0xb30] sm:$0xff] %v1934_v38  ;;  %1937 = vst [vmem:[%s10084_s29 + $0xb38] sm:$0xff] %v1936_v39  ;;  %v1938_v40 = vld [vmem:[%s10079_s28 + $0x1680] sm:$0xff]  ;;  %v1940_v41 = vld [vmem:[%s10079_s28 + $0x1690] sm:$0xff] }
  0xca   : > { %v1942_v42 = vld [vmem:[%s10079_s28 + $0x16a0] sm:$0xff]  ;;  %1939 = vst [vmem:[%s10084_s29 + $0xb40] sm:$0xff] %v1938_v40  ;;  %1941 = vst [vmem:[%s10084_s29 + $0xb48] sm:$0xff] %v1940_v41  ;;  %v1944_v43 = vld [vmem:[%s10079_s28 + $0x16b0] sm:$0xff] }
  0xcb   : > { %1943 = vst [vmem:[%s10084_s29 + $0xb50] sm:$0xff] %v1942_v42  ;;  %v1946_v44 = vld [vmem:[%s10079_s28 + $0x16c0] sm:$0xff]  ;;  %v1948_v45 = vld [vmem:[%s10079_s28 + $0x16d0] sm:$0xff]  ;;  %1945 = vst [vmem:[%s10084_s29 + $0xb58] sm:$0xff] %v1944_v43 }
  0xcc   : > { %1947 = vst [vmem:[%s10084_s29 + $0xb60] sm:$0xff] %v1946_v44  ;;  %1949 = vst [vmem:[%s10084_s29 + $0xb68] sm:$0xff] %v1948_v45  ;;  %v1950_v46 = vld [vmem:[%s10079_s28 + $0x16e0] sm:$0xff]  ;;  %v1952_v47 = vld [vmem:[%s10079_s28 + $0x16f0] sm:$0xff] }
  0xcd   : > { %v1954_v48 = vld [vmem:[%s10079_s28 + $0x1700] sm:$0xff]  ;;  %1951 = vst [vmem:[%s10084_s29 + $0xb70] sm:$0xff] %v1950_v46  ;;  %1953 = vst [vmem:[%s10084_s29 + $0xb78] sm:$0xff] %v1952_v47  ;;  %v1956_v49 = vld [vmem:[%s10079_s28 + $0x1710] sm:$0xff] }
  0xce   : > { %1955 = vst [vmem:[%s10084_s29 + $0xb80] sm:$0xff] %v1954_v48  ;;  %v1958_v50 = vld [vmem:[%s10079_s28 + $0x1720] sm:$0xff]  ;;  %v1960_v51 = vld [vmem:[%s10079_s28 + $0x1730] sm:$0xff]  ;;  %1957 = vst [vmem:[%s10084_s29 + $0xb88] sm:$0xff] %v1956_v49 }
  0xcf   : > { %1959 = vst [vmem:[%s10084_s29 + $0xb90] sm:$0xff] %v1958_v50  ;;  %1961 = vst [vmem:[%s10084_s29 + $0xb98] sm:$0xff] %v1960_v51  ;;  %v1962_v52 = vld [vmem:[%s10079_s28 + $0x1740] sm:$0xff]  ;;  %v1964_v53 = vld [vmem:[%s10079_s28 + $0x1750] sm:$0xff] }
  0xd0   : > { %v1966_v54 = vld [vmem:[%s10079_s28 + $0x1760] sm:$0xff]  ;;  %1963 = vst [vmem:[%s10084_s29 + $0xba0] sm:$0xff] %v1962_v52  ;;  %1965 = vst [vmem:[%s10084_s29 + $0xba8] sm:$0xff] %v1964_v53  ;;  %v1968_v55 = vld [vmem:[%s10079_s28 + $0x1770] sm:$0xff] }
  0xd1   : > { %1967 = vst [vmem:[%s10084_s29 + $0xbb0] sm:$0xff] %v1966_v54  ;;  %v1970_v56 = vld [vmem:[%s10079_s28 + $0x1780] sm:$0xff]  ;;  %v1972_v57 = vld [vmem:[%s10079_s28 + $0x1790] sm:$0xff]  ;;  %1969 = vst [vmem:[%s10084_s29 + $0xbb8] sm:$0xff] %v1968_v55 }
  0xd2   : > { %1971 = vst [vmem:[%s10084_s29 + $0xbc0] sm:$0xff] %v1970_v56  ;;  %1973 = vst [vmem:[%s10084_s29 + $0xbc8] sm:$0xff] %v1972_v57  ;;  %v1974_v58 = vld [vmem:[%s10079_s28 + $0x17a0] sm:$0xff]  ;;  %v1976_v59 = vld [vmem:[%s10079_s28 + $0x17b0] sm:$0xff] }
  0xd3   : > { %v1978_v60 = vld [vmem:[%s10079_s28 + $0x17c0] sm:$0xff]  ;;  %1975 = vst [vmem:[%s10084_s29 + $0xbd0] sm:$0xff] %v1974_v58  ;;  %1977 = vst [vmem:[%s10084_s29 + $0xbd8] sm:$0xff] %v1976_v59  ;;  %v1980_v61 = vld [vmem:[%s10079_s28 + $0x17d0] sm:$0xff] }
  0xd4   : > { %1979 = vst [vmem:[%s10084_s29 + $0xbe0] sm:$0xff] %v1978_v60  ;;  %v1982_v62 = vld [vmem:[%s10079_s28 + $0x17e0] sm:$0xff]  ;;  %v1984_v63 = vld [vmem:[%s10079_s28 + $0x17f0] sm:$0xff]  ;;  %1981 = vst [vmem:[%s10084_s29 + $0xbe8] sm:$0xff] %v1980_v61 }
  0xd5   : > { %1983 = vst [vmem:[%s10084_s29 + $0xbf0] sm:$0xff] %v1982_v62  ;;  %1985 = vst [vmem:[%s10084_s29 + $0xbf8] sm:$0xff] %v1984_v63  ;;  %v1986_v0 = vld [vmem:[%s10079_s28 + $0x1800] sm:$0xff]  ;;  %v1988_v1 = vld [vmem:[%s10079_s28 + $0x1810] sm:$0xff] }
  0xd6   : > { %v1990_v2 = vld [vmem:[%s10079_s28 + $0x1820] sm:$0xff]  ;;  %1987 = vst [vmem:[%s10084_s29 + $0xc00] sm:$0xff] %v1986_v0  ;;  %1989 = vst [vmem:[%s10084_s29 + $0xc08] sm:$0xff] %v1988_v1  ;;  %v1992_v3 = vld [vmem:[%s10079_s28 + $0x1830] sm:$0xff] }
  0xd7   : > { %1991 = vst [vmem:[%s10084_s29 + $0xc10] sm:$0xff] %v1990_v2  ;;  %v1994_v4 = vld [vmem:[%s10079_s28 + $0x1840] sm:$0xff]  ;;  %v1996_v5 = vld [vmem:[%s10079_s28 + $0x1850] sm:$0xff]  ;;  %1993 = vst [vmem:[%s10084_s29 + $0xc18] sm:$0xff] %v1992_v3 }
  0xd8   : > { %1995 = vst [vmem:[%s10084_s29 + $0xc20] sm:$0xff] %v1994_v4  ;;  %1997 = vst [vmem:[%s10084_s29 + $0xc28] sm:$0xff] %v1996_v5  ;;  %v1998_v6 = vld [vmem:[%s10079_s28 + $0x1860] sm:$0xff]  ;;  %v2000_v7 = vld [vmem:[%s10079_s28 + $0x1870] sm:$0xff] }
  0xd9   : > { %v2002_v8 = vld [vmem:[%s10079_s28 + $0x1880] sm:$0xff]  ;;  %1999 = vst [vmem:[%s10084_s29 + $0xc30] sm:$0xff] %v1998_v6  ;;  %2001 = vst [vmem:[%s10084_s29 + $0xc38] sm:$0xff] %v2000_v7  ;;  %v2004_v9 = vld [vmem:[%s10079_s28 + $0x1890] sm:$0xff] }
  0xda   : > { %2003 = vst [vmem:[%s10084_s29 + $0xc40] sm:$0xff] %v2002_v8  ;;  %v2006_v10 = vld [vmem:[%s10079_s28 + $0x18a0] sm:$0xff]  ;;  %v2008_v11 = vld [vmem:[%s10079_s28 + $0x18b0] sm:$0xff]  ;;  %2005 = vst [vmem:[%s10084_s29 + $0xc48] sm:$0xff] %v2004_v9 }
  0xdb   : > { %2007 = vst [vmem:[%s10084_s29 + $0xc50] sm:$0xff] %v2006_v10  ;;  %2009 = vst [vmem:[%s10084_s29 + $0xc58] sm:$0xff] %v2008_v11  ;;  %v2010_v12 = vld [vmem:[%s10079_s28 + $0x18c0] sm:$0xff]  ;;  %v2012_v13 = vld [vmem:[%s10079_s28 + $0x18d0] sm:$0xff] }
  0xdc   : > { %v2014_v14 = vld [vmem:[%s10079_s28 + $0x18e0] sm:$0xff]  ;;  %2011 = vst [vmem:[%s10084_s29 + $0xc60] sm:$0xff] %v2010_v12  ;;  %2013 = vst [vmem:[%s10084_s29 + $0xc68] sm:$0xff] %v2012_v13  ;;  %v2016_v15 = vld [vmem:[%s10079_s28 + $0x18f0] sm:$0xff] }
  0xdd   : > { %2015 = vst [vmem:[%s10084_s29 + $0xc70] sm:$0xff] %v2014_v14  ;;  %v2018_v16 = vld [vmem:[%s10079_s28 + $0x1900] sm:$0xff]  ;;  %v2020_v17 = vld [vmem:[%s10079_s28 + $0x1910] sm:$0xff]  ;;  %2017 = vst [vmem:[%s10084_s29 + $0xc78] sm:$0xff] %v2016_v15 }
  0xde   : > { %2019 = vst [vmem:[%s10084_s29 + $0xc80] sm:$0xff] %v2018_v16  ;;  %2021 = vst [vmem:[%s10084_s29 + $0xc88] sm:$0xff] %v2020_v17  ;;  %v2022_v18 = vld [vmem:[%s10079_s28 + $0x1920] sm:$0xff]  ;;  %v2024_v19 = vld [vmem:[%s10079_s28 + $0x1930] sm:$0xff] }
  0xdf   : > { %v2026_v20 = vld [vmem:[%s10079_s28 + $0x1940] sm:$0xff]  ;;  %2023 = vst [vmem:[%s10084_s29 + $0xc90] sm:$0xff] %v2022_v18  ;;  %2025 = vst [vmem:[%s10084_s29 + $0xc98] sm:$0xff] %v2024_v19  ;;  %v2028_v21 = vld [vmem:[%s10079_s28 + $0x1950] sm:$0xff] }
  0xe0   : > { %2027 = vst [vmem:[%s10084_s29 + $0xca0] sm:$0xff] %v2026_v20  ;;  %v2030_v22 = vld [vmem:[%s10079_s28 + $0x1960] sm:$0xff]  ;;  %v2032_v23 = vld [vmem:[%s10079_s28 + $0x1970] sm:$0xff]  ;;  %2029 = vst [vmem:[%s10084_s29 + $0xca8] sm:$0xff] %v2028_v21 }
  0xe1   : > { %2031 = vst [vmem:[%s10084_s29 + $0xcb0] sm:$0xff] %v2030_v22  ;;  %2033 = vst [vmem:[%s10084_s29 + $0xcb8] sm:$0xff] %v2032_v23  ;;  %v2034_v24 = vld [vmem:[%s10079_s28 + $0x1980] sm:$0xff]  ;;  %v2036_v25 = vld [vmem:[%s10079_s28 + $0x1990] sm:$0xff] }
  0xe2   : > { %v2038_v26 = vld [vmem:[%s10079_s28 + $0x19a0] sm:$0xff]  ;;  %2035 = vst [vmem:[%s10084_s29 + $0xcc0] sm:$0xff] %v2034_v24  ;;  %2037 = vst [vmem:[%s10084_s29 + $0xcc8] sm:$0xff] %v2036_v25  ;;  %v2040_v27 = vld [vmem:[%s10079_s28 + $0x19b0] sm:$0xff] }
  0xe3   : > { %2039 = vst [vmem:[%s10084_s29 + $0xcd0] sm:$0xff] %v2038_v26  ;;  %v2042_v28 = vld [vmem:[%s10079_s28 + $0x19c0] sm:$0xff]  ;;  %v2044_v29 = vld [vmem:[%s10079_s28 + $0x19d0] sm:$0xff]  ;;  %2041 = vst [vmem:[%s10084_s29 + $0xcd8] sm:$0xff] %v2040_v27 }
  0xe4   : > { %2043 = vst [vmem:[%s10084_s29 + $0xce0] sm:$0xff] %v2042_v28  ;;  %2045 = vst [vmem:[%s10084_s29 + $0xce8] sm:$0xff] %v2044_v29  ;;  %v2046_v30 = vld [vmem:[%s10079_s28 + $0x19e0] sm:$0xff]  ;;  %v2048_v31 = vld [vmem:[%s10079_s28 + $0x19f0] sm:$0xff] }
  0xe5   : > { %v2050_v32 = vld [vmem:[%s10079_s28 + $0x1a00] sm:$0xff]  ;;  %2047 = vst [vmem:[%s10084_s29 + $0xcf0] sm:$0xff] %v2046_v30  ;;  %2049 = vst [vmem:[%s10084_s29 + $0xcf8] sm:$0xff] %v2048_v31  ;;  %v2052_v33 = vld [vmem:[%s10079_s28 + $0x1a10] sm:$0xff] }
  0xe6   : > { %2051 = vst [vmem:[%s10084_s29 + $0xd00] sm:$0xff] %v2050_v32  ;;  %v2054_v34 = vld [vmem:[%s10079_s28 + $0x1a20] sm:$0xff]  ;;  %v2056_v35 = vld [vmem:[%s10079_s28 + $0x1a30] sm:$0xff]  ;;  %2053 = vst [vmem:[%s10084_s29 + $0xd08] sm:$0xff] %v2052_v33 }
  0xe7   : > { %2055 = vst [vmem:[%s10084_s29 + $0xd10] sm:$0xff] %v2054_v34  ;;  %2057 = vst [vmem:[%s10084_s29 + $0xd18] sm:$0xff] %v2056_v35  ;;  %v2058_v36 = vld [vmem:[%s10079_s28 + $0x1a40] sm:$0xff]  ;;  %v2060_v37 = vld [vmem:[%s10079_s28 + $0x1a50] sm:$0xff] }
  0xe8   : > { %v2062_v38 = vld [vmem:[%s10079_s28 + $0x1a60] sm:$0xff]  ;;  %2059 = vst [vmem:[%s10084_s29 + $0xd20] sm:$0xff] %v2058_v36  ;;  %2061 = vst [vmem:[%s10084_s29 + $0xd28] sm:$0xff] %v2060_v37  ;;  %v2064_v39 = vld [vmem:[%s10079_s28 + $0x1a70] sm:$0xff] }
  0xe9   : > { %2063 = vst [vmem:[%s10084_s29 + $0xd30] sm:$0xff] %v2062_v38  ;;  %v2066_v40 = vld [vmem:[%s10079_s28 + $0x1a80] sm:$0xff]  ;;  %v2068_v41 = vld [vmem:[%s10079_s28 + $0x1a90] sm:$0xff]  ;;  %2065 = vst [vmem:[%s10084_s29 + $0xd38] sm:$0xff] %v2064_v39 }
  0xea   : > { %2067 = vst [vmem:[%s10084_s29 + $0xd40] sm:$0xff] %v2066_v40  ;;  %2069 = vst [vmem:[%s10084_s29 + $0xd48] sm:$0xff] %v2068_v41  ;;  %v2070_v42 = vld [vmem:[%s10079_s28 + $0x1aa0] sm:$0xff]  ;;  %v2072_v43 = vld [vmem:[%s10079_s28 + $0x1ab0] sm:$0xff] }
  0xeb   : > { %v2074_v44 = vld [vmem:[%s10079_s28 + $0x1ac0] sm:$0xff]  ;;  %2071 = vst [vmem:[%s10084_s29 + $0xd50] sm:$0xff] %v2070_v42  ;;  %2073 = vst [vmem:[%s10084_s29 + $0xd58] sm:$0xff] %v2072_v43  ;;  %v2076_v45 = vld [vmem:[%s10079_s28 + $0x1ad0] sm:$0xff] }
  0xec   : > { %2075 = vst [vmem:[%s10084_s29 + $0xd60] sm:$0xff] %v2074_v44  ;;  %v2078_v46 = vld [vmem:[%s10079_s28 + $0x1ae0] sm:$0xff]  ;;  %v2080_v47 = vld [vmem:[%s10079_s28 + $0x1af0] sm:$0xff]  ;;  %2077 = vst [vmem:[%s10084_s29 + $0xd68] sm:$0xff] %v2076_v45 }
  0xed   : > { %2079 = vst [vmem:[%s10084_s29 + $0xd70] sm:$0xff] %v2078_v46  ;;  %2081 = vst [vmem:[%s10084_s29 + $0xd78] sm:$0xff] %v2080_v47  ;;  %v2082_v48 = vld [vmem:[%s10079_s28 + $0x1b00] sm:$0xff]  ;;  %v2084_v49 = vld [vmem:[%s10079_s28 + $0x1b10] sm:$0xff] }
  0xee   : > { %v2086_v50 = vld [vmem:[%s10079_s28 + $0x1b20] sm:$0xff]  ;;  %2083 = vst [vmem:[%s10084_s29 + $0xd80] sm:$0xff] %v2082_v48  ;;  %2085 = vst [vmem:[%s10084_s29 + $0xd88] sm:$0xff] %v2084_v49  ;;  %v2088_v51 = vld [vmem:[%s10079_s28 + $0x1b30] sm:$0xff] }
  0xef   : > { %2087 = vst [vmem:[%s10084_s29 + $0xd90] sm:$0xff] %v2086_v50  ;;  %v2090_v52 = vld [vmem:[%s10079_s28 + $0x1b40] sm:$0xff]  ;;  %v2092_v53 = vld [vmem:[%s10079_s28 + $0x1b50] sm:$0xff]  ;;  %2089 = vst [vmem:[%s10084_s29 + $0xd98] sm:$0xff] %v2088_v51 }
  0xf0   : > { %2091 = vst [vmem:[%s10084_s29 + $0xda0] sm:$0xff] %v2090_v52  ;;  %2093 = vst [vmem:[%s10084_s29 + $0xda8] sm:$0xff] %v2092_v53  ;;  %v2094_v54 = vld [vmem:[%s10079_s28 + $0x1b60] sm:$0xff]  ;;  %v2096_v55 = vld [vmem:[%s10079_s28 + $0x1b70] sm:$0xff] }
  0xf1   : > { %v2098_v56 = vld [vmem:[%s10079_s28 + $0x1b80] sm:$0xff]  ;;  %2095 = vst [vmem:[%s10084_s29 + $0xdb0] sm:$0xff] %v2094_v54  ;;  %2097 = vst [vmem:[%s10084_s29 + $0xdb8] sm:$0xff] %v2096_v55  ;;  %v2100_v57 = vld [vmem:[%s10079_s28 + $0x1b90] sm:$0xff] }
  0xf2   : > { %2099 = vst [vmem:[%s10084_s29 + $0xdc0] sm:$0xff] %v2098_v56  ;;  %v2102_v58 = vld [vmem:[%s10079_s28 + $0x1ba0] sm:$0xff]  ;;  %v2104_v59 = vld [vmem:[%s10079_s28 + $0x1bb0] sm:$0xff]  ;;  %2101 = vst [vmem:[%s10084_s29 + $0xdc8] sm:$0xff] %v2100_v57 }
  0xf3   : > { %2103 = vst [vmem:[%s10084_s29 + $0xdd0] sm:$0xff] %v2102_v58  ;;  %2105 = vst [vmem:[%s10084_s29 + $0xdd8] sm:$0xff] %v2104_v59  ;;  %v2106_v60 = vld [vmem:[%s10079_s28 + $0x1bc0] sm:$0xff]  ;;  %v2108_v61 = vld [vmem:[%s10079_s28 + $0x1bd0] sm:$0xff] }
  0xf4   : > { %v2110_v62 = vld [vmem:[%s10079_s28 + $0x1be0] sm:$0xff]  ;;  %2107 = vst [vmem:[%s10084_s29 + $0xde0] sm:$0xff] %v2106_v60  ;;  %2109 = vst [vmem:[%s10084_s29 + $0xde8] sm:$0xff] %v2108_v61  ;;  %v2112_v63 = vld [vmem:[%s10079_s28 + $0x1bf0] sm:$0xff] }
  0xf5   : > { %2111 = vst [vmem:[%s10084_s29 + $0xdf0] sm:$0xff] %v2110_v62  ;;  %v2114_v0 = vld [vmem:[%s10079_s28 + $0x1c00] sm:$0xff]  ;;  %v2116_v1 = vld [vmem:[%s10079_s28 + $0x1c10] sm:$0xff]  ;;  %2113 = vst [vmem:[%s10084_s29 + $0xdf8] sm:$0xff] %v2112_v63 }
  0xf6   : > { %2115 = vst [vmem:[%s10084_s29 + $0xe00] sm:$0xff] %v2114_v0  ;;  %2117 = vst [vmem:[%s10084_s29 + $0xe08] sm:$0xff] %v2116_v1  ;;  %v2118_v2 = vld [vmem:[%s10079_s28 + $0x1c20] sm:$0xff]  ;;  %v2120_v3 = vld [vmem:[%s10079_s28 + $0x1c30] sm:$0xff] }
  0xf7   : > { %v2122_v4 = vld [vmem:[%s10079_s28 + $0x1c40] sm:$0xff]  ;;  %2119 = vst [vmem:[%s10084_s29 + $0xe10] sm:$0xff] %v2118_v2  ;;  %2121 = vst [vmem:[%s10084_s29 + $0xe18] sm:$0xff] %v2120_v3  ;;  %v2124_v5 = vld [vmem:[%s10079_s28 + $0x1c50] sm:$0xff] }
  0xf8   : > { %2123 = vst [vmem:[%s10084_s29 + $0xe20] sm:$0xff] %v2122_v4  ;;  %v2126_v6 = vld [vmem:[%s10079_s28 + $0x1c60] sm:$0xff]  ;;  %v2128_v7 = vld [vmem:[%s10079_s28 + $0x1c70] sm:$0xff]  ;;  %2125 = vst [vmem:[%s10084_s29 + $0xe28] sm:$0xff] %v2124_v5 }
  0xf9   : > { %2127 = vst [vmem:[%s10084_s29 + $0xe30] sm:$0xff] %v2126_v6  ;;  %2129 = vst [vmem:[%s10084_s29 + $0xe38] sm:$0xff] %v2128_v7  ;;  %v2130_v8 = vld [vmem:[%s10079_s28 + $0x1c80] sm:$0xff]  ;;  %v2132_v9 = vld [vmem:[%s10079_s28 + $0x1c90] sm:$0xff] }
  0xfa   : > { %v2134_v10 = vld [vmem:[%s10079_s28 + $0x1ca0] sm:$0xff]  ;;  %2131 = vst [vmem:[%s10084_s29 + $0xe40] sm:$0xff] %v2130_v8  ;;  %2133 = vst [vmem:[%s10084_s29 + $0xe48] sm:$0xff] %v2132_v9  ;;  %v2136_v11 = vld [vmem:[%s10079_s28 + $0x1cb0] sm:$0xff] }
  0xfb   : > { %2135 = vst [vmem:[%s10084_s29 + $0xe50] sm:$0xff] %v2134_v10  ;;  %v2138_v12 = vld [vmem:[%s10079_s28 + $0x1cc0] sm:$0xff]  ;;  %v2140_v13 = vld [vmem:[%s10079_s28 + $0x1cd0] sm:$0xff]  ;;  %2137 = vst [vmem:[%s10084_s29 + $0xe58] sm:$0xff] %v2136_v11 }
  0xfc   : > { %2139 = vst [vmem:[%s10084_s29 + $0xe60] sm:$0xff] %v2138_v12  ;;  %2141 = vst [vmem:[%s10084_s29 + $0xe68] sm:$0xff] %v2140_v13  ;;  %v2142_v14 = vld [vmem:[%s10079_s28 + $0x1ce0] sm:$0xff]  ;;  %v2144_v15 = vld [vmem:[%s10079_s28 + $0x1cf0] sm:$0xff] }
  0xfd   : > { %v2146_v16 = vld [vmem:[%s10079_s28 + $0x1d00] sm:$0xff]  ;;  %2143 = vst [vmem:[%s10084_s29 + $0xe70] sm:$0xff] %v2142_v14  ;;  %2145 = vst [vmem:[%s10084_s29 + $0xe78] sm:$0xff] %v2144_v15  ;;  %v2148_v17 = vld [vmem:[%s10079_s28 + $0x1d10] sm:$0xff] }
  0xfe   : > { %2147 = vst [vmem:[%s10084_s29 + $0xe80] sm:$0xff] %v2146_v16  ;;  %v2150_v18 = vld [vmem:[%s10079_s28 + $0x1d20] sm:$0xff]  ;;  %v2152_v19 = vld [vmem:[%s10079_s28 + $0x1d30] sm:$0xff]  ;;  %2149 = vst [vmem:[%s10084_s29 + $0xe88] sm:$0xff] %v2148_v17 }
  0xff   : > { %2151 = vst [vmem:[%s10084_s29 + $0xe90] sm:$0xff] %v2150_v18  ;;  %2153 = vst [vmem:[%s10084_s29 + $0xe98] sm:$0xff] %v2152_v19  ;;  %v2154_v20 = vld [vmem:[%s10079_s28 + $0x1d40] sm:$0xff]  ;;  %v2156_v21 = vld [vmem:[%s10079_s28 + $0x1d50] sm:$0xff] }
 0x100   : > { %v2158_v22 = vld [vmem:[%s10079_s28 + $0x1d60] sm:$0xff]  ;;  %2155 = vst [vmem:[%s10084_s29 + $0xea0] sm:$0xff] %v2154_v20  ;;  %2157 = vst [vmem:[%s10084_s29 + $0xea8] sm:$0xff] %v2156_v21  ;;  %v2160_v23 = vld [vmem:[%s10079_s28 + $0x1d70] sm:$0xff] }
 0x101   : > { %2159 = vst [vmem:[%s10084_s29 + $0xeb0] sm:$0xff] %v2158_v22  ;;  %v2162_v24 = vld [vmem:[%s10079_s28 + $0x1d80] sm:$0xff]  ;;  %v2164_v25 = vld [vmem:[%s10079_s28 + $0x1d90] sm:$0xff]  ;;  %2161 = vst [vmem:[%s10084_s29 + $0xeb8] sm:$0xff] %v2160_v23 }
 0x102   : > { %2163 = vst [vmem:[%s10084_s29 + $0xec0] sm:$0xff] %v2162_v24  ;;  %2165 = vst [vmem:[%s10084_s29 + $0xec8] sm:$0xff] %v2164_v25  ;;  %v2166_v26 = vld [vmem:[%s10079_s28 + $0x1da0] sm:$0xff]  ;;  %v2168_v27 = vld [vmem:[%s10079_s28 + $0x1db0] sm:$0xff] }
 0x103   : > { %v2170_v28 = vld [vmem:[%s10079_s28 + $0x1dc0] sm:$0xff]  ;;  %2167 = vst [vmem:[%s10084_s29 + $0xed0] sm:$0xff] %v2166_v26  ;;  %2169 = vst [vmem:[%s10084_s29 + $0xed8] sm:$0xff] %v2168_v27  ;;  %v2172_v29 = vld [vmem:[%s10079_s28 + $0x1dd0] sm:$0xff] }
 0x104   : > { %2171 = vst [vmem:[%s10084_s29 + $0xee0] sm:$0xff] %v2170_v28  ;;  %v2174_v30 = vld [vmem:[%s10079_s28 + $0x1de0] sm:$0xff]  ;;  %v2176_v31 = vld [vmem:[%s10079_s28 + $0x1df0] sm:$0xff]  ;;  %2173 = vst [vmem:[%s10084_s29 + $0xee8] sm:$0xff] %v2172_v29 }
 0x105   : > { %2175 = vst [vmem:[%s10084_s29 + $0xef0] sm:$0xff] %v2174_v30  ;;  %2177 = vst [vmem:[%s10084_s29 + $0xef8] sm:$0xff] %v2176_v31  ;;  %v2178_v32 = vld [vmem:[%s10079_s28 + $0x1e00] sm:$0xff]  ;;  %v2180_v33 = vld [vmem:[%s10079_s28 + $0x1e10] sm:$0xff] }
 0x106   : > { %v2182_v34 = vld [vmem:[%s10079_s28 + $0x1e20] sm:$0xff]  ;;  %2179 = vst [vmem:[%s10084_s29 + $0xf00] sm:$0xff] %v2178_v32  ;;  %2181 = vst [vmem:[%s10084_s29 + $0xf08] sm:$0xff] %v2180_v33  ;;  %v2184_v35 = vld [vmem:[%s10079_s28 + $0x1e30] sm:$0xff] }
 0x107   : > { %2183 = vst [vmem:[%s10084_s29 + $0xf10] sm:$0xff] %v2182_v34  ;;  %v2186_v36 = vld [vmem:[%s10079_s28 + $0x1e40] sm:$0xff]  ;;  %v2188_v37 = vld [vmem:[%s10079_s28 + $0x1e50] sm:$0xff]  ;;  %2185 = vst [vmem:[%s10084_s29 + $0xf18] sm:$0xff] %v2184_v35 }
 0x108   : > { %2187 = vst [vmem:[%s10084_s29 + $0xf20] sm:$0xff] %v2186_v36  ;;  %2189 = vst [vmem:[%s10084_s29 + $0xf28] sm:$0xff] %v2188_v37  ;;  %v2190_v38 = vld [vmem:[%s10079_s28 + $0x1e60] sm:$0xff]  ;;  %v2192_v39 = vld [vmem:[%s10079_s28 + $0x1e70] sm:$0xff] }
 0x109   : > { %v2194_v40 = vld [vmem:[%s10079_s28 + $0x1e80] sm:$0xff]  ;;  %2191 = vst [vmem:[%s10084_s29 + $0xf30] sm:$0xff] %v2190_v38  ;;  %2193 = vst [vmem:[%s10084_s29 + $0xf38] sm:$0xff] %v2192_v39  ;;  %v2196_v41 = vld [vmem:[%s10079_s28 + $0x1e90] sm:$0xff] }
 0x10a   : > { %2195 = vst [vmem:[%s10084_s29 + $0xf40] sm:$0xff] %v2194_v40  ;;  %v2198_v42 = vld [vmem:[%s10079_s28 + $0x1ea0] sm:$0xff]  ;;  %v2200_v43 = vld [vmem:[%s10079_s28 + $0x1eb0] sm:$0xff]  ;;  %2197 = vst [vmem:[%s10084_s29 + $0xf48] sm:$0xff] %v2196_v41 }
 0x10b   : > { %2199 = vst [vmem:[%s10084_s29 + $0xf50] sm:$0xff] %v2198_v42  ;;  %2201 = vst [vmem:[%s10084_s29 + $0xf58] sm:$0xff] %v2200_v43  ;;  %v2202_v44 = vld [vmem:[%s10079_s28 + $0x1ec0] sm:$0xff]  ;;  %v2204_v45 = vld [vmem:[%s10079_s28 + $0x1ed0] sm:$0xff] }
 0x10c   : > { %v2206_v46 = vld [vmem:[%s10079_s28 + $0x1ee0] sm:$0xff]  ;;  %2203 = vst [vmem:[%s10084_s29 + $0xf60] sm:$0xff] %v2202_v44  ;;  %2205 = vst [vmem:[%s10084_s29 + $0xf68] sm:$0xff] %v2204_v45  ;;  %v2208_v47 = vld [vmem:[%s10079_s28 + $0x1ef0] sm:$0xff] }
 0x10d   : > { %2207 = vst [vmem:[%s10084_s29 + $0xf70] sm:$0xff] %v2206_v46  ;;  %v2210_v48 = vld [vmem:[%s10079_s28 + $0x1f00] sm:$0xff]  ;;  %v2212_v49 = vld [vmem:[%s10079_s28 + $0x1f10] sm:$0xff]  ;;  %2209 = vst [vmem:[%s10084_s29 + $0xf78] sm:$0xff] %v2208_v47 }
 0x10e   : > { %2211 = vst [vmem:[%s10084_s29 + $0xf80] sm:$0xff] %v2210_v48  ;;  %2213 = vst [vmem:[%s10084_s29 + $0xf88] sm:$0xff] %v2212_v49  ;;  %v2214_v50 = vld [vmem:[%s10079_s28 + $0x1f20] sm:$0xff]  ;;  %v2216_v51 = vld [vmem:[%s10079_s28 + $0x1f30] sm:$0xff] }
 0x10f   : > { %v2218_v52 = vld [vmem:[%s10079_s28 + $0x1f40] sm:$0xff]  ;;  %2215 = vst [vmem:[%s10084_s29 + $0xf90] sm:$0xff] %v2214_v50  ;;  %2217 = vst [vmem:[%s10084_s29 + $0xf98] sm:$0xff] %v2216_v51  ;;  %v2220_v53 = vld [vmem:[%s10079_s28 + $0x1f50] sm:$0xff] }
 0x110   : > { %2219 = vst [vmem:[%s10084_s29 + $0xfa0] sm:$0xff] %v2218_v52  ;;  %v2222_v54 = vld [vmem:[%s10079_s28 + $0x1f60] sm:$0xff]  ;;  %v2224_v55 = vld [vmem:[%s10079_s28 + $0x1f70] sm:$0xff]  ;;  %2221 = vst [vmem:[%s10084_s29 + $0xfa8] sm:$0xff] %v2220_v53 }
 0x111   : > { %2223 = vst [vmem:[%s10084_s29 + $0xfb0] sm:$0xff] %v2222_v54  ;;  %2225 = vst [vmem:[%s10084_s29 + $0xfb8] sm:$0xff] %v2224_v55  ;;  %v2226_v56 = vld [vmem:[%s10079_s28 + $0x1f80] sm:$0xff]  ;;  %v2228_v57 = vld [vmem:[%s10079_s28 + $0x1f90] sm:$0xff] }
 0x112   : > { %v2230_v58 = vld [vmem:[%s10079_s28 + $0x1fa0] sm:$0xff]  ;;  %2227 = vst [vmem:[%s10084_s29 + $0xfc0] sm:$0xff] %v2226_v56  ;;  %2229 = vst [vmem:[%s10084_s29 + $0xfc8] sm:$0xff] %v2228_v57  ;;  %v2232_v59 = vld [vmem:[%s10079_s28 + $0x1fb0] sm:$0xff] }
 0x113   : > { %2231 = vst [vmem:[%s10084_s29 + $0xfd0] sm:$0xff] %v2230_v58  ;;  %v2234_v60 = vld [vmem:[%s10079_s28 + $0x1fc0] sm:$0xff]  ;;  %v2236_v61 = vld [vmem:[%s10079_s28 + $0x1fd0] sm:$0xff]  ;;  %2233 = vst [vmem:[%s10084_s29 + $0xfd8] sm:$0xff] %v2232_v59 }
 0x114   : > { %2235 = vst [vmem:[%s10084_s29 + $0xfe0] sm:$0xff] %v2234_v60  ;;  %2237 = vst [vmem:[%s10084_s29 + $0xfe8] sm:$0xff] %v2236_v61  ;;  %v2238_v62 = vld [vmem:[%s10079_s28 + $0x1fe0] sm:$0xff]  ;;  %v2240_v63 = vld [vmem:[%s10079_s28 + $0x1ff0] sm:$0xff] }
 0x115   : > { %2239 = vst [vmem:[%s10084_s29 + $0xff0] sm:$0xff] %v2238_v62  ;;  %2241 = vst [vmem:[%s10084_s29 + $0xff8] sm:$0xff] %v2240_v63 }
 0x116 PF: > { %p8540_p8 = scmp.ge.s32.totalorder %s10009_s16, 1  ;;  %p4338_p9 = scmp.lt.s32.totalorder %s10009_s16, 3 }
 0x118   : > { %p4339_p10 = pnand %p8540_p8, %p4338_p9 }
 0x119   : > { %s4345_s30 = sand.u32 (!%p4339_p10), 1, %s9993_s12   ;;  %v11113_v0 = vld [vmem:[%s11883_s0] sm:$0xff] (!%p4339_p10)  ;;  %s8543_s27 = sshll.u32 (!%p4339_p10), %s10001_s14, 1 }
 0x11a   : > { %4342 = sbr.rel (%p4339_p10) target bundleno = 1032 (0x408), region = 80  ;;  %v11118_v1 = vld [vmem:[%s11883_s0 + $0x80] sm:$0xff] (!%p4339_p10)  ;;  %s8541_s10 = sshll.u32 (!%p4339_p10), %s4345_s30, 12 }
 0x11b   : > { %v11123_v2 = vld [vmem:[%s11883_s0 + $0x40] sm:$0xff] (!%p4339_p10)  ;;  %v8544_v3 = vcombine.low (!%p4339_p10), %v11113_v0, %v11118_v1  ;;  %v8545_v4 = vcombine.high (!%p4339_p10), %v11113_v0, %v11118_v1  ;;  %s11140_s19 = scalar_lea.vmem (!%p4339_p10), [#allocation2], %s8541_s10  ;;  %p4386_p11 = scmp.lt.s32.totalorder (!%p4339_p10), %s8543_s27, 3 }
 0x11c   : > { %v11134_v5 = vld [vmem:[%s11883_s0 + $0xc0] sm:$0xff] (!%p4339_p10)  ;;  %v9209_v12 = vld [vmem:[%s11140_s19 + $0x14] ss:$8 sps:$4 sm:$0xff] (!%p4339_p10)   ;;  %v9213_v14 = vld [vmem:[%s11140_s19 + $0x10] ss:$8 sps:$4 sm:$0xff] (!%p4339_p10)   ;;  %s8542_s4 = sshll.u32 (!%p4339_p10), %s4345_s30, 4 }
 0x11d   : > { %v8560_v6 = vcombine.low (!%p4339_p10), %v11123_v2, %v11134_v5  ;;  %v8561_v7 = vcombine.high (!%p4339_p10), %v11123_v2, %v11134_v5  ;;  %v9203_v8 = vld [vmem:[%s11140_s19 + $0x4] ss:$8 sps:$4 sm:$0xff] (!%p4339_p10)   ;;  %7700 = vmatprep.mubr.bf16.mxu1 (!%p4339_p10), %v8545_v4  ;;  %v9207_v10 = vld [vmem:[%s11140_s19] ss:$8 sps:$4 sm:$0xff] (!%p4339_p10)   ;;  %v9211_v13 = vld [vmem:[%s11140_s19 + $0x814] ss:$8 sps:$4 sm:$0xff] (!%p4339_p10)  }
 0x11e   : > { %v9205_v9 = vld [vmem:[%s11140_s19 + $0x804] ss:$8 sps:$4 sm:$0xff] (!%p4339_p10)   ;;  %7668 = vmatprep.subr.bf16.mxu1 (!%p4339_p10), %v9203_v8  ;;  %v9208_v11 = vld [vmem:[%s11140_s19 + $0x800] ss:$8 sps:$4 sm:$0xff] (!%p4339_p10)   ;;  %v9214_v15 = vld [vmem:[%s11140_s19 + $0x810] ss:$8 sps:$4 sm:$0xff] (!%p4339_p10)  }
 0x11f   : > { %8044 = vmatprep.mubr.bf16.mxu0 (!%p4339_p10), %v8561_v7  ;;  %8012 = vmatprep.subr.bf16.mxu0 (!%p4339_p10), %v9205_v9  ;;  %v9215_v16 = vld [vmem:[%s11140_s19 + $0x24] ss:$8 sps:$4 sm:$0xff] (!%p4339_p10)   ;;  %v9219_v18 = vld [vmem:[%s11140_s19 + $0x20] ss:$8 sps:$4 sm:$0xff] (!%p4339_p10)   ;;  %v9221_v20 = vld [vmem:[%s11140_s19 + $0x34] ss:$8 sps:$4 sm:$0xff] (!%p4339_p10)  }
 0x120   : > { %7669 = vmatpush1.bf16.msra.mxu1 (!%p4339_p10), %v9207_v10  ;;  %8013 = vmatpush1.bf16.msra.mxu0 (!%p4339_p10), %v9208_v11  ;;  %v9217_v17 = vld [vmem:[%s11140_s19 + $0x824] ss:$8 sps:$4 sm:$0xff] (!%p4339_p10)   ;;  %v9220_v19 = vld [vmem:[%s11140_s19 + $0x820] ss:$8 sps:$4 sm:$0xff] (!%p4339_p10)   ;;  %v9223_v21 = vld [vmem:[%s11140_s19 + $0x834] ss:$8 sps:$4 sm:$0xff] (!%p4339_p10)  }
 0x121   : > { %7670 = vmatprep.subr.bf16.mxu1 %v9209_v12  ;;  %8014 = vmatprep.subr.bf16.mxu0 %v9211_v13  ;;  %v9225_v22 = vld [vmem:[%s11140_s19 + $0x30] ss:$8 sps:$4 sm:$0xff]   ;;  %v9227_v24 = vld [vmem:[%s11140_s19 + $0x44] ss:$8 sps:$4 sm:$0xff]   ;;  %v9231_v26 = vld [vmem:[%s11140_s19 + $0x40] ss:$8 sps:$4 sm:$0xff]  }
 0x122   : > { %v9226_v23 = vld [vmem:[%s11140_s19 + $0x830] ss:$8 sps:$4 sm:$0xff]   ;;  %v9229_v25 = vld [vmem:[%s11140_s19 + $0x844] ss:$8 sps:$4 sm:$0xff]   ;;  %v9232_v27 = vld [vmem:[%s11140_s19 + $0x840] ss:$8 sps:$4 sm:$0xff]  }
 0x123   : > { %v9233_v28 = vld [vmem:[%s11140_s19 + $0x54] ss:$8 sps:$4 sm:$0xff]   ;;  %v9237_v30 = vld [vmem:[%s11140_s19 + $0x50] ss:$8 sps:$4 sm:$0xff]   ;;  %v9239_v32 = vld [vmem:[%s11140_s19 + $0x64] ss:$8 sps:$4 sm:$0xff]  }
 0x124   : > { %7671 = vmatpush1.bf16.msra.mxu1 %v9213_v14  ;;  %8015 = vmatpush1.bf16.msra.mxu0 %v9214_v15  ;;  %v9235_v29 = vld [vmem:[%s11140_s19 + $0x854] ss:$8 sps:$4 sm:$0xff]   ;;  %v9238_v31 = vld [vmem:[%s11140_s19 + $0x850] ss:$8 sps:$4 sm:$0xff]   ;;  %v9241_v33 = vld [vmem:[%s11140_s19 + $0x864] ss:$8 sps:$4 sm:$0xff]  }
 0x125   : > { %7672 = vmatprep.subr.bf16.mxu1 %v9215_v16  ;;  %8016 = vmatprep.subr.bf16.mxu0 %v9217_v17  ;;  %v9243_v34 = vld [vmem:[%s11140_s19 + $0x60] ss:$8 sps:$4 sm:$0xff]   ;;  %v9245_v36 = vld [vmem:[%s11140_s19 + $0x74] ss:$8 sps:$4 sm:$0xff]   ;;  %v9249_v38 = vld [vmem:[%s11140_s19 + $0x70] ss:$8 sps:$4 sm:$0xff]  }
 0x126   : > { %v9244_v35 = vld [vmem:[%s11140_s19 + $0x860] ss:$8 sps:$4 sm:$0xff]   ;;  %v9247_v37 = vld [vmem:[%s11140_s19 + $0x874] ss:$8 sps:$4 sm:$0xff]   ;;  %v9250_v39 = vld [vmem:[%s11140_s19 + $0x870] ss:$8 sps:$4 sm:$0xff]  }
 0x127   : > { %v9251_v40 = vld [vmem:[%s11140_s19 + $0x84] ss:$8 sps:$4 sm:$0xff]   ;;  %v9255_v42 = vld [vmem:[%s11140_s19 + $0x80] ss:$8 sps:$4 sm:$0xff]   ;;  %v9257_v44 = vld [vmem:[%s11140_s19 + $0x94] ss:$8 sps:$4 sm:$0xff]  }
 0x128   : > { %7673 = vmatpush1.bf16.msra.mxu1 %v9219_v18  ;;  %8017 = vmatpush1.bf16.msra.mxu0 %v9220_v19  ;;  %v9253_v41 = vld [vmem:[%s11140_s19 + $0x884] ss:$8 sps:$4 sm:$0xff]   ;;  %v9256_v43 = vld [vmem:[%s11140_s19 + $0x880] ss:$8 sps:$4 sm:$0xff]   ;;  %v9259_v45 = vld [vmem:[%s11140_s19 + $0x894] ss:$8 sps:$4 sm:$0xff]  }
 0x129   : > { %7674 = vmatprep.subr.bf16.mxu1 %v9221_v20  ;;  %8018 = vmatprep.subr.bf16.mxu0 %v9223_v21  ;;  %v9261_v46 = vld [vmem:[%s11140_s19 + $0x90] ss:$8 sps:$4 sm:$0xff]   ;;  %v9263_v48 = vld [vmem:[%s11140_s19 + $0xa4] ss:$8 sps:$4 sm:$0xff]   ;;  %v9267_v50 = vld [vmem:[%s11140_s19 + $0xa0] ss:$8 sps:$4 sm:$0xff]  }
 0x12a   : > { %v9262_v47 = vld [vmem:[%s11140_s19 + $0x890] ss:$8 sps:$4 sm:$0xff]   ;;  %v9265_v49 = vld [vmem:[%s11140_s19 + $0x8a4] ss:$8 sps:$4 sm:$0xff]   ;;  %v9268_v51 = vld [vmem:[%s11140_s19 + $0x8a0] ss:$8 sps:$4 sm:$0xff]  }
 0x12b   : > { %v9269_v52 = vld [vmem:[%s11140_s19 + $0xb4] ss:$8 sps:$4 sm:$0xff]   ;;  %v9273_v54 = vld [vmem:[%s11140_s19 + $0xb0] ss:$8 sps:$4 sm:$0xff]   ;;  %v9275_v56 = vld [vmem:[%s11140_s19 + $0xc4] ss:$8 sps:$4 sm:$0xff]  }
 0x12c   : > { %7675 = vmatpush1.bf16.msra.mxu1 %v9225_v22  ;;  %8019 = vmatpush1.bf16.msra.mxu0 %v9226_v23  ;;  %v9271_v53 = vld [vmem:[%s11140_s19 + $0x8b4] ss:$8 sps:$4 sm:$0xff]   ;;  %v9274_v55 = vld [vmem:[%s11140_s19 + $0x8b0] ss:$8 sps:$4 sm:$0xff]   ;;  %v9277_v57 = vld [vmem:[%s11140_s19 + $0x8c4] ss:$8 sps:$4 sm:$0xff]  }
 0x12d   : > { %7676 = vmatprep.subr.bf16.mxu1 %v9227_v24  ;;  %8020 = vmatprep.subr.bf16.mxu0 %v9229_v25  ;;  %v9279_v58 = vld [vmem:[%s11140_s19 + $0xc0] ss:$8 sps:$4 sm:$0xff]   ;;  %v9281_v60 = vld [vmem:[%s11140_s19 + $0xd4] ss:$8 sps:$4 sm:$0xff]   ;;  %v9285_v62 = vld [vmem:[%s11140_s19 + $0xd0] ss:$8 sps:$4 sm:$0xff]  }
 0x12e   : > { %v9280_v59 = vld [vmem:[%s11140_s19 + $0x8c0] ss:$8 sps:$4 sm:$0xff]   ;;  %v9283_v61 = vld [vmem:[%s11140_s19 + $0x8d4] ss:$8 sps:$4 sm:$0xff]   ;;  %v9286_v63 = vld [vmem:[%s11140_s19 + $0x8d0] ss:$8 sps:$4 sm:$0xff]  }
 0x12f   : > { %v9287_v4 = vld [vmem:[%s11140_s19 + $0xe4] ss:$8 sps:$4 sm:$0xff]   ;;  %v9291_v8 = vld [vmem:[%s11140_s19 + $0xe0] ss:$8 sps:$4 sm:$0xff]   ;;  %v9293_v10 = vld [vmem:[%s11140_s19 + $0xf4] ss:$8 sps:$4 sm:$0xff]  }
 0x130   : > { %7677 = vmatpush1.bf16.msra.mxu1 %v9231_v26  ;;  %8021 = vmatpush1.bf16.msra.mxu0 %v9232_v27  ;;  %v9289_v7 = vld [vmem:[%s11140_s19 + $0x8e4] ss:$8 sps:$4 sm:$0xff]   ;;  %v9292_v9 = vld [vmem:[%s11140_s19 + $0x8e0] ss:$8 sps:$4 sm:$0xff]   ;;  %v9295_v11 = vld [vmem:[%s11140_s19 + $0x8f4] ss:$8 sps:$4 sm:$0xff]  }
 0x131   : > { %7678 = vmatprep.subr.bf16.mxu1 %v9233_v28  ;;  %8022 = vmatprep.subr.bf16.mxu0 %v9235_v29  ;;  %v9297_v12 = vld [vmem:[%s11140_s19 + $0xf0] ss:$8 sps:$4 sm:$0xff]   ;;  %v9301_v14 = vld [vmem:[%s11140_s19 + $0x104] ss:$8 sps:$4 sm:$0xff]   ;;  %v9299_v16 = vld [vmem:[%s11140_s19 + $0x100] ss:$8 sps:$4 sm:$0xff]  }
 0x132   : > { %v9298_v13 = vld [vmem:[%s11140_s19 + $0x8f0] ss:$8 sps:$4 sm:$0xff]   ;;  %v9304_v15 = vld [vmem:[%s11140_s19 + $0x904] ss:$8 sps:$4 sm:$0xff]   ;;  %v9302_v17 = vld [vmem:[%s11140_s19 + $0x900] ss:$8 sps:$4 sm:$0xff]  }
 0x133   : > { %v9307_v18 = vld [vmem:[%s11140_s19 + $0x114] ss:$8 sps:$4 sm:$0xff]   ;;  %v9305_v20 = vld [vmem:[%s11140_s19 + $0x110] ss:$8 sps:$4 sm:$0xff]   ;;  %v9313_v22 = vld [vmem:[%s11140_s19 + $0x124] ss:$8 sps:$4 sm:$0xff]  }
 0x134   : > { %7679 = vmatpush1.bf16.msra.mxu1 %v9237_v30  ;;  %8023 = vmatpush1.bf16.msra.mxu0 %v9238_v31  ;;  %v9310_v19 = vld [vmem:[%s11140_s19 + $0x914] ss:$8 sps:$4 sm:$0xff]   ;;  %v9308_v21 = vld [vmem:[%s11140_s19 + $0x910] ss:$8 sps:$4 sm:$0xff]   ;;  %v9316_v23 = vld [vmem:[%s11140_s19 + $0x924] ss:$8 sps:$4 sm:$0xff]  }
 0x135   : > { %7680 = vmatprep.subr.bf16.mxu1 %v9239_v32  ;;  %8024 = vmatprep.subr.bf16.mxu0 %v9241_v33  ;;  %v9311_v24 = vld [vmem:[%s11140_s19 + $0x120] ss:$8 sps:$4 sm:$0xff]   ;;  %v9319_v1 = vld [vmem:[%s11140_s19 + $0x134] ss:$8 sps:$4 sm:$0xff]   ;;  %v9320_v5 = vld [vmem:[%s11140_s19 + $0x930] ss:$8 sps:$4 sm:$0xff]  }
 0x136   : > { %v9314_v0 = vld [vmem:[%s11140_s19 + $0x920] ss:$8 sps:$4 sm:$0xff]   ;;  %v9322_v2 = vld [vmem:[%s11140_s19 + $0x934] ss:$8 sps:$4 sm:$0xff]   ;;  %v9328_v25 = vld [vmem:[%s11140_s19 + $0x944] ss:$8 sps:$4 sm:$0xff]  }
 0x137   : > { %v9323_v26 = vld [vmem:[%s11140_s19 + $0x140] ss:$8 sps:$4 sm:$0xff]   ;;  %v9331_v28 = vld [vmem:[%s11140_s19 + $0x154] ss:$8 sps:$4 sm:$0xff]   ;;  %v9329_v30 = vld [vmem:[%s11140_s19 + $0x150] ss:$8 sps:$4 sm:$0xff]  }
 0x138   : > { %7681 = vmatpush1.bf16.msra.mxu1 %v9243_v34  ;;  %8025 = vmatpush1.bf16.msra.mxu0 %v9244_v35  ;;  %v9326_v27 = vld [vmem:[%s11140_s19 + $0x940] ss:$8 sps:$4 sm:$0xff]   ;;  %v9334_v29 = vld [vmem:[%s11140_s19 + $0x954] ss:$8 sps:$4 sm:$0xff]   ;;  %v9332_v31 = vld [vmem:[%s11140_s19 + $0x950] ss:$8 sps:$4 sm:$0xff]  }
 0x139   : > { %7682 = vmatprep.subr.bf16.mxu1 %v9245_v36  ;;  %8026 = vmatprep.subr.bf16.mxu0 %v9247_v37  ;;  %v9337_v32 = vld [vmem:[%s11140_s19 + $0x164] ss:$8 sps:$4 sm:$0xff]   ;;  %v9335_v36 = vld [vmem:[%s11140_s19 + $0x160] ss:$8 sps:$4 sm:$0xff]   ;;  %s11895_s27 = smov (!%p4386_p11, %s8543_s27), 3  ;;  %s4376_s5 = scalar_lea.vmem [#allocation3], %s8542_s4 }
 0x13a   : > { %v9340_v33 = vld [vmem:[%s11140_s19 + $0x964] ss:$8 sps:$4 sm:$0xff]   ;;  %s9098_s12 = sshll.u32 (%p10066_p6), %s10001_s14, 3 }
 0x13b   : > { %v11241_v34 = vld [vmem:[%s11883_s0 + $0x8] sm:$0xff]  ;;  %s8394_s7 = scalar_lea.vmem (%p10066_p6), %s11886_s3, %s9098_s12 }
 0x13c   : > { %7683 = vmatpush1.bf16.msra.mxu1 %v9249_v38  ;;  %8027 = vmatpush1.bf16.msra.mxu0 %v9250_v39  ;;  %v11246_v35 = vld [vmem:[%s11883_s0 + $0x88] sm:$0xff] }
 0x13d   : > { %7684 = vmatprep.subr.bf16.mxu1 %v9251_v40  ;;  %8028 = vmatprep.subr.bf16.mxu0 %v9253_v41  ;;  %v8547_v37 = vcombine.high %v11241_v34, %v11246_v35  ;;  %v9338_v38 = vld [vmem:[%s11140_s19 + $0x960] ss:$8 sps:$4 sm:$0xff]   ;;  %v9343_v41 = vld [vmem:[%s11140_s19 + $0x174] ss:$8 sps:$4 sm:$0xff]  }
 0x13e   : > { %v11255_v39 = vld [vmem:[%s11883_s0 + $0x48] sm:$0xff] }
 0x13f   : > { %v11260_v40 = vld [vmem:[%s11883_s0 + $0xc8] sm:$0xff] }
 0x140   : > { %7685 = vmatpush1.bf16.msra.mxu1 %v9255_v42  ;;  %8029 = vmatpush1.bf16.msra.mxu0 %v9256_v43  ;;  %v8563_v42 = vcombine.high %v11255_v39, %v11260_v40  ;;  %v9346_v43 = vld [vmem:[%s11140_s19 + $0x974] ss:$8 sps:$4 sm:$0xff]  }
 0x141   : > { %7686 = vmatprep.subr.bf16.mxu1 %v9257_v44  ;;  %8030 = vmatprep.subr.bf16.mxu0 %v9259_v45  ;;  %v9341_v44 = vld [vmem:[%s11140_s19 + $0x170] ss:$8 sps:$4 sm:$0xff]  }
 0x142   : > { %v9344_v45 = vld [vmem:[%s11140_s19 + $0x970] ss:$8 sps:$4 sm:$0xff]  }
 0x144   : > { %7687 = vmatpush1.bf16.msra.mxu1 %v9261_v46  ;;  %8031 = vmatpush1.bf16.msra.mxu0 %v9262_v47  ;;  %v9349_v46 = vld [vmem:[%s11140_s19 + $0x184] ss:$8 sps:$4 sm:$0xff]  }
 0x145   : > { %7688 = vmatprep.subr.bf16.mxu1 %v9263_v48  ;;  %8032 = vmatprep.subr.bf16.mxu0 %v9265_v49  ;;  %v9352_v47 = vld [vmem:[%s11140_s19 + $0x984] ss:$8 sps:$4 sm:$0xff]   ;;  %v9347_v48 = vld [vmem:[%s11140_s19 + $0x180] ss:$8 sps:$4 sm:$0xff]  }
 0x146   : > { %v9350_v49 = vld [vmem:[%s11140_s19 + $0x980] ss:$8 sps:$4 sm:$0xff]  }
 0x148   : > { %7689 = vmatpush1.bf16.msra.mxu1 %v9267_v50  ;;  %8033 = vmatpush1.bf16.msra.mxu0 %v9268_v51  ;;  %v9355_v50 = vld [vmem:[%s11140_s19 + $0x194] ss:$8 sps:$4 sm:$0xff]  }
 0x149   : > { %7690 = vmatprep.subr.bf16.mxu1 %v9269_v52  ;;  %8034 = vmatprep.subr.bf16.mxu0 %v9271_v53  ;;  %v9358_v51 = vld [vmem:[%s11140_s19 + $0x994] ss:$8 sps:$4 sm:$0xff]   ;;  %v9353_v52 = vld [vmem:[%s11140_s19 + $0x190] ss:$8 sps:$4 sm:$0xff]  }
 0x14a   : > { %v9356_v53 = vld [vmem:[%s11140_s19 + $0x990] ss:$8 sps:$4 sm:$0xff]  }
 0x14c   : > { %7691 = vmatpush1.bf16.msra.mxu1 %v9273_v54  ;;  %8035 = vmatpush1.bf16.msra.mxu0 %v9274_v55  ;;  %v9361_v54 = vld [vmem:[%s11140_s19 + $0x1a4] ss:$8 sps:$4 sm:$0xff]  }
 0x14d   : > { %7692 = vmatprep.subr.bf16.mxu1 %v9275_v56  ;;  %8036 = vmatprep.subr.bf16.mxu0 %v9277_v57  ;;  %v9364_v55 = vld [vmem:[%s11140_s19 + $0x9a4] ss:$8 sps:$4 sm:$0xff]   ;;  %v9359_v56 = vld [vmem:[%s11140_s19 + $0x1a0] ss:$8 sps:$4 sm:$0xff]  }
 0x14e   : > { %v9362_v57 = vld [vmem:[%s11140_s19 + $0x9a0] ss:$8 sps:$4 sm:$0xff]  }
 0x150   : > { %7693 = vmatpush1.bf16.msra.mxu1 %v9279_v58  ;;  %8037 = vmatpush1.bf16.msra.mxu0 %v9280_v59  ;;  %v9367_v58 = vld [vmem:[%s11140_s19 + $0x1b4] ss:$8 sps:$4 sm:$0xff]  }
 0x151   : > { %7694 = vmatprep.subr.bf16.mxu1 %v9281_v60  ;;  %8038 = vmatprep.subr.bf16.mxu0 %v9283_v61  ;;  %v9370_v59 = vld [vmem:[%s11140_s19 + $0x9b4] ss:$8 sps:$4 sm:$0xff]   ;;  %v9365_v60 = vld [vmem:[%s11140_s19 + $0x1b0] ss:$8 sps:$4 sm:$0xff]  }
 0x152   : > { %v9368_v61 = vld [vmem:[%s11140_s19 + $0x9b0] ss:$8 sps:$4 sm:$0xff]  }
 0x154   : > { %7695 = vmatpush1.bf16.msra.mxu1 %v9285_v62  ;;  %8039 = vmatpush1.bf16.msra.mxu0 %v9286_v63  ;;  %v9373_v62 = vld [vmem:[%s11140_s19 + $0x1c4] ss:$8 sps:$4 sm:$0xff]  }
 0x155   : > { %7696 = vmatprep.subr.bf16.mxu1 %v9287_v4  ;;  %8040 = vmatprep.subr.bf16.mxu0 %v9289_v7  ;;  %v9376_v63 = vld [vmem:[%s11140_s19 + $0x9c4] ss:$8 sps:$4 sm:$0xff]   ;;  %v9371_v4 = vld [vmem:[%s11140_s19 + $0x1c0] ss:$8 sps:$4 sm:$0xff]  }
 0x156   : > { %v9374_v7 = vld [vmem:[%s11140_s19 + $0x9c0] ss:$8 sps:$4 sm:$0xff]  }
 0x158   : > { %7697 = vmatpush1.bf16.msra.mxu1 %v9291_v8  ;;  %8041 = vmatpush1.bf16.msra.mxu0 %v9292_v9  ;;  %v9379_v8 = vld [vmem:[%s11140_s19 + $0x1d4] ss:$8 sps:$4 sm:$0xff]  }
 0x159   : > { %7698 = vmatprep.subr.bf16.mxu1 %v9293_v10  ;;  %8042 = vmatprep.subr.bf16.mxu0 %v9295_v11  ;;  %v9382_v9 = vld [vmem:[%s11140_s19 + $0x9d4] ss:$8 sps:$4 sm:$0xff]   ;;  %v9377_v10 = vld [vmem:[%s11140_s19 + $0x1d0] ss:$8 sps:$4 sm:$0xff]  }
 0x15a   : > { %v9380_v11 = vld [vmem:[%s11140_s19 + $0x9d0] ss:$8 sps:$4 sm:$0xff]  }
 0x15c   : > { %7699 = vmatpush1.bf16.msra.mxu1 %v9297_v12  ;;  %8043 = vmatpush1.bf16.msra.mxu0 %v9298_v13  ;;  %v9385_v12 = vld [vmem:[%s11140_s19 + $0x1e4] ss:$8 sps:$4 sm:$0xff]  }
 0x15d   : > { %7711 = vmatprep.subr.bf16.mxu1 %v9301_v14  ;;  %8055 = vmatprep.subr.bf16.mxu0 %v9304_v15  ;;  %v9388_v13 = vld [vmem:[%s11140_s19 + $0x9e4] ss:$8 sps:$4 sm:$0xff]   ;;  %v9383_v14 = vld [vmem:[%s11140_s19 + $0x1e0] ss:$8 sps:$4 sm:$0xff]  }
 0x15e   : > { %v9386_v15 = vld [vmem:[%s11140_s19 + $0x9e0] ss:$8 sps:$4 sm:$0xff]  }
 0x15f   : > { %7701 = vmatmul.mubr.bf16.vlgmr.msra.gmra.mrb[0].mxu1 %v8544_v3  ;;  %8045 = vmatmul.mubr.bf16.vlgmr.msra.gmra.mrb[0].mxu0 %v8560_v6  ;;  %v9317_v3 = vld [vmem:[%s11140_s19 + $0x130] ss:$8 sps:$4 sm:$0xff]   ;;  %v9325_v6 = vld [vmem:[%s11140_s19 + $0x144] ss:$8 sps:$4 sm:$0xff]  }
 0x160   : > { %7712 = vmatpush1.bf16.msra.mxu1 %v9299_v16  ;;  %8056 = vmatpush1.bf16.msra.mxu0 %v9302_v17  ;;  %v9391_v16 = vld [vmem:[%s11140_s19 + $0x1f4] ss:$8 sps:$4 sm:$0xff]  }
 0x161   : > { %7713 = vmatprep.subr.bf16.mxu1 %v9307_v18  ;;  %8057 = vmatprep.subr.bf16.mxu0 %v9310_v19  ;;  %v9394_v17 = vld [vmem:[%s11140_s19 + $0x9f4] ss:$8 sps:$4 sm:$0xff]   ;;  %v9389_v18 = vld [vmem:[%s11140_s19 + $0x1f0] ss:$8 sps:$4 sm:$0xff]  }
 0x162   : > { %7743 = vmatprep.mubr.bf16.mxu1 %v8547_v37  ;;  %8087 = vmatprep.mubr.bf16.mxu0 %v8563_v42  ;;  %v9392_v19 = vld [vmem:[%s11140_s19 + $0x9f0] ss:$8 sps:$4 sm:$0xff]   ;;  %v9427_v42 = vld [vmem:[%s11140_s19 + $0x254] ss:$8 sps:$4 sm:$0xff]  }
 0x163   : > { %v9416_v37 = vld [vmem:[%s11140_s19 + $0xa30] ss:$8 sps:$4 sm:$0xff]  }
 0x164   : > { %7714 = vmatpush1.bf16.msra.mxu1 %v9305_v20  ;;  %8058 = vmatpush1.bf16.msra.mxu0 %v9308_v21  ;;  %v9397_v20 = vld [vmem:[%s11140_s19 + $0x204] ss:$8 sps:$4 sm:$0xff]  }
 0x165   : > { %7715 = vmatprep.subr.bf16.mxu1 %v9313_v22  ;;  %8059 = vmatprep.subr.bf16.mxu0 %v9316_v23  ;;  %v9400_v21 = vld [vmem:[%s11140_s19 + $0xa04] ss:$8 sps:$4 sm:$0xff]   ;;  %v8546_v22 = vcombine.low %v11241_v34, %v11246_v35  ;;  %v9395_v23 = vld [vmem:[%s11140_s19 + $0x200] ss:$8 sps:$4 sm:$0xff]   ;;  %v9415_v34 = vld [vmem:[%s11140_s19 + $0x234] ss:$8 sps:$4 sm:$0xff]  }
 0x166   : > { %v9418_v35 = vld [vmem:[%s11140_s19 + $0xa34] ss:$8 sps:$4 sm:$0xff]  }
 0x168   : > { %7716 = vmatpush1.bf16.msra.mxu1 %v9311_v24  ;;  %8060 = vmatpush1.bf16.msra.mxu0 %v9314_v0  ;;  %v8562_v24 = vcombine.low %v11255_v39, %v11260_v40  ;;  %v9398_v0 = vld [vmem:[%s11140_s19 + $0xa00] ss:$8 sps:$4 sm:$0xff]   ;;  %v9424_v39 = vld [vmem:[%s11140_s19 + $0xa44] ss:$8 sps:$4 sm:$0xff]  }
 0x169   : > { %7717 = vmatprep.subr.bf16.mxu1 %v9319_v1  ;;  %8061 = vmatprep.subr.bf16.mxu0 %v9322_v2  ;;  %v9403_v1 = vld [vmem:[%s11140_s19 + $0x214] ss:$8 sps:$4 sm:$0xff]   ;;  %v9419_v40 = vld [vmem:[%s11140_s19 + $0x240] ss:$8 sps:$4 sm:$0xff]  }
 0x16a   : > { %v9406_v2 = vld [vmem:[%s11140_s19 + $0xa14] ss:$8 sps:$4 sm:$0xff]  }
 0x16c   : > { %7718 = vmatpush1.bf16.msra.mxu1 %v9317_v3  ;;  %8062 = vmatpush1.bf16.msra.mxu0 %v9320_v5  ;;  %v11313_v3 = vld [vmem:[%s11883_s0 + $0x10] sm:$0xff] }
 0x16d   : > { %7719 = vmatprep.subr.bf16.mxu1 %v9325_v6  ;;  %8063 = vmatprep.subr.bf16.mxu0 %v9328_v25  ;;  %v11318_v5 = vld [vmem:[%s11883_s0 + $0x90] sm:$0xff] }
 0x16e   : > { %v9401_v6 = vld [vmem:[%s11140_s19 + $0x210] ss:$8 sps:$4 sm:$0xff]   ;;  %v8549_v25 = vcombine.high %v11313_v3, %v11318_v5 }
 0x170   : > { %7720 = vmatpush1.bf16.msra.mxu1 %v9323_v26  ;;  %8064 = vmatpush1.bf16.msra.mxu0 %v9326_v27  ;;  %v9404_v26 = vld [vmem:[%s11140_s19 + $0xa10] ss:$8 sps:$4 sm:$0xff]  }
 0x171   : > { %7721 = vmatprep.subr.bf16.mxu1 %v9331_v28  ;;  %8065 = vmatprep.subr.bf16.mxu0 %v9334_v29  ;;  %v11327_v27 = vld [vmem:[%s11883_s0 + $0x50] sm:$0xff]  ;;  %v9409_v29 = vld [vmem:[%s11140_s19 + $0x224] ss:$8 sps:$4 sm:$0xff]  }
 0x172   : > { %v11332_v28 = vld [vmem:[%s11883_s0 + $0xd0] sm:$0xff] }
 0x174   : > { %7722 = vmatpush1.bf16.msra.mxu1 %v9329_v30  ;;  %8066 = vmatpush1.bf16.msra.mxu0 %v9332_v31  ;;  %v8565_v30 = vcombine.high %v11327_v27, %v11332_v28  ;;  %v9412_v31 = vld [vmem:[%s11140_s19 + $0xa24] ss:$8 sps:$4 sm:$0xff]  }
 0x175   : > { %7723 = vmatprep.subr.bf16.mxu1 %v9337_v32  ;;  %8067 = vmatprep.subr.bf16.mxu0 %v9340_v33  ;;  %v9407_v32 = vld [vmem:[%s11140_s19 + $0x220] ss:$8 sps:$4 sm:$0xff]  }
 0x176   : > { %v9410_v33 = vld [vmem:[%s11140_s19 + $0xa20] ss:$8 sps:$4 sm:$0xff]  }
 0x178   : > { %7724 = vmatpush1.bf16.msra.mxu1 %v9335_v36  ;;  %8068 = vmatpush1.bf16.msra.mxu0 %v9338_v38  ;;  %v9413_v36 = vld [vmem:[%s11140_s19 + $0x230] ss:$8 sps:$4 sm:$0xff]   ;;  %v9421_v38 = vld [vmem:[%s11140_s19 + $0x244] ss:$8 sps:$4 sm:$0xff]  }
 0x179   : > { %7725 = vmatprep.subr.bf16.mxu1 %v9343_v41  ;;  %8069 = vmatprep.subr.bf16.mxu0 %v9346_v43  ;;  %v9422_v41 = vld [vmem:[%s11140_s19 + $0xa40] ss:$8 sps:$4 sm:$0xff]   ;;  %v9430_v43 = vld [vmem:[%s11140_s19 + $0xa54] ss:$8 sps:$4 sm:$0xff]  }
 0x17c   : > { %7726 = vmatpush1.bf16.msra.mxu1 %v9341_v44  ;;  %8070 = vmatpush1.bf16.msra.mxu0 %v9344_v45  ;;  %v9425_v44 = vld [vmem:[%s11140_s19 + $0x250] ss:$8 sps:$4 sm:$0xff]  }
 0x17d   : > { %7727 = vmatprep.subr.bf16.mxu1 %v9349_v46  ;;  %8071 = vmatprep.subr.bf16.mxu0 %v9352_v47  ;;  %v9428_v45 = vld [vmem:[%s11140_s19 + $0xa50] ss:$8 sps:$4 sm:$0xff]   ;;  %v9433_v46 = vld [vmem:[%s11140_s19 + $0x264] ss:$8 sps:$4 sm:$0xff]  }
 0x17e   : > { %v9436_v47 = vld [vmem:[%s11140_s19 + $0xa64] ss:$8 sps:$4 sm:$0xff]  }
 0x180   : > { %7728 = vmatpush1.bf16.msra.mxu1 %v9347_v48  ;;  %8072 = vmatpush1.bf16.msra.mxu0 %v9350_v49  ;;  %v9431_v48 = vld [vmem:[%s11140_s19 + $0x260] ss:$8 sps:$4 sm:$0xff]  }
 0x181   : > { %7729 = vmatprep.subr.bf16.mxu1 %v9355_v50  ;;  %8073 = vmatprep.subr.bf16.mxu0 %v9358_v51  ;;  %v9434_v49 = vld [vmem:[%s11140_s19 + $0xa60] ss:$8 sps:$4 sm:$0xff]   ;;  %v9439_v50 = vld [vmem:[%s11140_s19 + $0x274] ss:$8 sps:$4 sm:$0xff]  }
 0x182   : > { %v9442_v51 = vld [vmem:[%s11140_s19 + $0xa74] ss:$8 sps:$4 sm:$0xff]  }
 0x184   : > { %7730 = vmatpush1.bf16.msra.mxu1 %v9353_v52  ;;  %8074 = vmatpush1.bf16.msra.mxu0 %v9356_v53  ;;  %v9437_v52 = vld [vmem:[%s11140_s19 + $0x270] ss:$8 sps:$4 sm:$0xff]  }
 0x185   : > { %7731 = vmatprep.subr.bf16.mxu1 %v9361_v54  ;;  %8075 = vmatprep.subr.bf16.mxu0 %v9364_v55  ;;  %v9440_v53 = vld [vmem:[%s11140_s19 + $0xa70] ss:$8 sps:$4 sm:$0xff]   ;;  %v9445_v54 = vld [vmem:[%s11140_s19 + $0x284] ss:$8 sps:$4 sm:$0xff]  }
 0x186   : > { %v9448_v55 = vld [vmem:[%s11140_s19 + $0xa84] ss:$8 sps:$4 sm:$0xff]  }
 0x188   : > { %7732 = vmatpush1.bf16.msra.mxu1 %v9359_v56  ;;  %8076 = vmatpush1.bf16.msra.mxu0 %v9362_v57  ;;  %v9443_v56 = vld [vmem:[%s11140_s19 + $0x280] ss:$8 sps:$4 sm:$0xff]  }
 0x189   : > { %7733 = vmatprep.subr.bf16.mxu1 %v9367_v58  ;;  %8077 = vmatprep.subr.bf16.mxu0 %v9370_v59  ;;  %v9446_v57 = vld [vmem:[%s11140_s19 + $0xa80] ss:$8 sps:$4 sm:$0xff]   ;;  %v9451_v58 = vld [vmem:[%s11140_s19 + $0x294] ss:$8 sps:$4 sm:$0xff]  }
 0x18a   : > { %v9454_v59 = vld [vmem:[%s11140_s19 + $0xa94] ss:$8 sps:$4 sm:$0xff]  }
 0x18c   : > { %7734 = vmatpush1.bf16.msra.mxu1 %v9365_v60  ;;  %8078 = vmatpush1.bf16.msra.mxu0 %v9368_v61  ;;  %v9449_v60 = vld [vmem:[%s11140_s19 + $0x290] ss:$8 sps:$4 sm:$0xff]  }
 0x18d   : > { %7735 = vmatprep.subr.bf16.mxu1 %v9373_v62  ;;  %8079 = vmatprep.subr.bf16.mxu0 %v9376_v63  ;;  %v9452_v61 = vld [vmem:[%s11140_s19 + $0xa90] ss:$8 sps:$4 sm:$0xff]   ;;  %v9457_v62 = vld [vmem:[%s11140_s19 + $0x2a4] ss:$8 sps:$4 sm:$0xff]  }
 0x18e   : > { %v9460_v63 = vld [vmem:[%s11140_s19 + $0xaa4] ss:$8 sps:$4 sm:$0xff]  }
 0x190   : > { %7736 = vmatpush1.bf16.msra.mxu1 %v9371_v4  ;;  %8080 = vmatpush1.bf16.msra.mxu0 %v9374_v7  ;;  %v9455_v4 = vld [vmem:[%s11140_s19 + $0x2a0] ss:$8 sps:$4 sm:$0xff]  }
 0x191   : > { %7737 = vmatprep.subr.bf16.mxu1 %v9379_v8  ;;  %8081 = vmatprep.subr.bf16.mxu0 %v9382_v9  ;;  %v9458_v7 = vld [vmem:[%s11140_s19 + $0xaa0] ss:$8 sps:$4 sm:$0xff]   ;;  %v9463_v8 = vld [vmem:[%s11140_s19 + $0x2b4] ss:$8 sps:$4 sm:$0xff]  }
 0x192   : > { %v9466_v9 = vld [vmem:[%s11140_s19 + $0xab4] ss:$8 sps:$4 sm:$0xff]  }
 0x194   : > { %7738 = vmatpush1.bf16.msra.mxu1 %v9377_v10  ;;  %8082 = vmatpush1.bf16.msra.mxu0 %v9380_v11  ;;  %v9461_v10 = vld [vmem:[%s11140_s19 + $0x2b0] ss:$8 sps:$4 sm:$0xff]  }
 0x195   : > { %7739 = vmatprep.subr.bf16.mxu1 %v9385_v12  ;;  %8083 = vmatprep.subr.bf16.mxu0 %v9388_v13  ;;  %v9464_v11 = vld [vmem:[%s11140_s19 + $0xab0] ss:$8 sps:$4 sm:$0xff]   ;;  %v9469_v12 = vld [vmem:[%s11140_s19 + $0x2c4] ss:$8 sps:$4 sm:$0xff]  }
 0x196   : > { %v9472_v13 = vld [vmem:[%s11140_s19 + $0xac4] ss:$8 sps:$4 sm:$0xff]  }
 0x198   : > { %7740 = vmatpush1.bf16.msra.mxu1 %v9383_v14  ;;  %8084 = vmatpush1.bf16.msra.mxu0 %v9386_v15  ;;  %v9467_v14 = vld [vmem:[%s11140_s19 + $0x2c0] ss:$8 sps:$4 sm:$0xff]  }
 0x199   : > { %7741 = vmatprep.subr.bf16.mxu1 %v9391_v16  ;;  %8085 = vmatprep.subr.bf16.mxu0 %v9394_v17  ;;  %v9470_v15 = vld [vmem:[%s11140_s19 + $0xac0] ss:$8 sps:$4 sm:$0xff]   ;;  %v9475_v16 = vld [vmem:[%s11140_s19 + $0x2d4] ss:$8 sps:$4 sm:$0xff]  }
 0x19a   : > { %v9478_v17 = vld [vmem:[%s11140_s19 + $0xad4] ss:$8 sps:$4 sm:$0xff]  }
 0x19c   : > { %7742 = vmatpush1.bf16.msra.mxu1 %v9389_v18  ;;  %8086 = vmatpush1.bf16.msra.mxu0 %v9392_v19  ;;  %v9473_v18 = vld [vmem:[%s11140_s19 + $0x2d0] ss:$8 sps:$4 sm:$0xff]  }
 0x19d   : > { %7754 = vmatprep.subr.bf16.mxu1 %v9397_v20  ;;  %8098 = vmatprep.subr.bf16.mxu0 %v9400_v21  ;;  %v9476_v19 = vld [vmem:[%s11140_s19 + $0xad0] ss:$8 sps:$4 sm:$0xff]   ;;  %v9481_v20 = vld [vmem:[%s11140_s19 + $0x2e4] ss:$8 sps:$4 sm:$0xff]  }
 0x19e   : > { %v9484_v21 = vld [vmem:[%s11140_s19 + $0xae4] ss:$8 sps:$4 sm:$0xff]  }
 0x19f   : > { %7744 = vmatmul.mubr.bf16.vlgmr.msra.gmra.mrb[0].mxu1 %v8546_v22  ;;  %8088 = vmatmul.mubr.bf16.vlgmr.msra.gmra.mrb[0].mxu0 %v8562_v24  ;;  %v9479_v22 = vld [vmem:[%s11140_s19 + $0x2e0] ss:$8 sps:$4 sm:$0xff]   ;;  %v9487_v24 = vld [vmem:[%s11140_s19 + $0x2f4] ss:$8 sps:$4 sm:$0xff]  }
 0x1a0   : > { %7755 = vmatpush1.bf16.msra.mxu1 %v9395_v23  ;;  %8099 = vmatpush1.bf16.msra.mxu0 %v9398_v0  ;;  %v9482_v23 = vld [vmem:[%s11140_s19 + $0xae0] ss:$8 sps:$4 sm:$0xff]   ;;  %v9490_v0 = vld [vmem:[%s11140_s19 + $0xaf4] ss:$8 sps:$4 sm:$0xff]  }
 0x1a1   : > { %7756 = vmatprep.subr.bf16.mxu1 %v9403_v1  ;;  %8100 = vmatprep.subr.bf16.mxu0 %v9406_v2  ;;  %v9485_v1 = vld [vmem:[%s11140_s19 + $0x2f0] ss:$8 sps:$4 sm:$0xff]  }
 0x1a2   : > { %7786 = vmatprep.mubr.bf16.mxu1 %v8549_v25  ;;  %8130 = vmatprep.mubr.bf16.mxu0 %v8565_v30  ;;  %v9488_v2 = vld [vmem:[%s11140_s19 + $0xaf0] ss:$8 sps:$4 sm:$0xff]   ;;  %v9496_v25 = vld [vmem:[%s11140_s19 + $0xb04] ss:$8 sps:$4 sm:$0xff]  }
 0x1a3   : > { %v11399_v30 = vld [vmem:[%s11883_s0 + $0x18] sm:$0xff] }
 0x1a4   : > { %7757 = vmatpush1.bf16.msra.mxu1 %v9401_v6  ;;  %8101 = vmatpush1.bf16.msra.mxu0 %v9404_v26  ;;  %v9493_v6 = vld [vmem:[%s11140_s19 + $0x304] ss:$8 sps:$4 sm:$0xff]   ;;  %v9491_v26 = vld [vmem:[%s11140_s19 + $0x300] ss:$8 sps:$4 sm:$0xff]  }
 0x1a5   : > { %7758 = vmatprep.subr.bf16.mxu1 %v9409_v29  ;;  %8102 = vmatprep.subr.bf16.mxu0 %v9412_v31  ;;  %v9494_v29 = vld [vmem:[%s11140_s19 + $0xb00] ss:$8 sps:$4 sm:$0xff]   ;;  %v11404_v31 = vld [vmem:[%s11883_s0 + $0x98] sm:$0xff] }
 0x1a8   : > { %7759 = vmatpush1.bf16.msra.mxu1 %v9407_v32  ;;  %8103 = vmatpush1.bf16.msra.mxu0 %v9410_v33  ;;  %v8548_v32 = vcombine.low %v11313_v3, %v11318_v5  ;;  %v8564_v33 = vcombine.low %v11327_v27, %v11332_v28  ;;  %v9502_v3 = vld [vmem:[%s11140_s19 + $0xb14] ss:$8 sps:$4 sm:$0xff]   ;;  %v8551_v5 = vcombine.high %v11399_v30, %v11404_v31  ;;  %v9497_v28 = vld [vmem:[%s11140_s19 + $0x310] ss:$8 sps:$4 sm:$0xff]  }
 0x1a9   : > { %7760 = vmatprep.subr.bf16.mxu1 %v9415_v34  ;;  %8104 = vmatprep.subr.bf16.mxu0 %v9418_v35  ;;  %v11413_v34 = vld [vmem:[%s11883_s0 + $0x58] sm:$0xff] }
 0x1aa   : > { %v11418_v35 = vld [vmem:[%s11883_s0 + $0xd8] sm:$0xff] }
 0x1ab   : > { %v8567_v27 = vcombine.high %v11413_v34, %v11418_v35 }
 0x1ac   : > { %7761 = vmatpush1.bf16.msra.mxu1 %v9413_v36  ;;  %8105 = vmatpush1.bf16.msra.mxu0 %v9416_v37  ;;  %v9499_v36 = vld [vmem:[%s11140_s19 + $0x314] ss:$8 sps:$4 sm:$0xff]   ;;  %v9500_v37 = vld [vmem:[%s11140_s19 + $0xb10] ss:$8 sps:$4 sm:$0xff]  }
 0x1ad   : > { %7762 = vmatprep.subr.bf16.mxu1 %v9421_v38  ;;  %8106 = vmatprep.subr.bf16.mxu0 %v9424_v39  ;;  %v9505_v38 = vld [vmem:[%s11140_s19 + $0x324] ss:$8 sps:$4 sm:$0xff]  }
 0x1ae   : > { %v9508_v39 = vld [vmem:[%s11140_s19 + $0xb24] ss:$8 sps:$4 sm:$0xff]  }
 0x1b0   : > { %7763 = vmatpush1.bf16.msra.mxu1 %v9419_v40  ;;  %8107 = vmatpush1.bf16.msra.mxu0 %v9422_v41  ;;  %v9503_v40 = vld [vmem:[%s11140_s19 + $0x320] ss:$8 sps:$4 sm:$0xff]  }
 0x1b1   : > { %7764 = vmatprep.subr.bf16.mxu1 %v9427_v42  ;;  %8108 = vmatprep.subr.bf16.mxu0 %v9430_v43  ;;  %v9506_v41 = vld [vmem:[%s11140_s19 + $0xb20] ss:$8 sps:$4 sm:$0xff]   ;;  %v9511_v42 = vld [vmem:[%s11140_s19 + $0x334] ss:$8 sps:$4 sm:$0xff]  }
 0x1b2   : > { %v9514_v43 = vld [vmem:[%s11140_s19 + $0xb34] ss:$8 sps:$4 sm:$0xff]  }
 0x1b4   : > { %7765 = vmatpush1.bf16.msra.mxu1 %v9425_v44  ;;  %8109 = vmatpush1.bf16.msra.mxu0 %v9428_v45  ;;  %v9509_v44 = vld [vmem:[%s11140_s19 + $0x330] ss:$8 sps:$4 sm:$0xff]  }
 0x1b5   : > { %7766 = vmatprep.subr.bf16.mxu1 %v9433_v46  ;;  %8110 = vmatprep.subr.bf16.mxu0 %v9436_v47  ;;  %v9512_v45 = vld [vmem:[%s11140_s19 + $0xb30] ss:$8 sps:$4 sm:$0xff]   ;;  %v9517_v46 = vld [vmem:[%s11140_s19 + $0x344] ss:$8 sps:$4 sm:$0xff]  }
 0x1b6   : > { %v9520_v47 = vld [vmem:[%s11140_s19 + $0xb44] ss:$8 sps:$4 sm:$0xff]  }
 0x1b8   : > { %7767 = vmatpush1.bf16.msra.mxu1 %v9431_v48  ;;  %8111 = vmatpush1.bf16.msra.mxu0 %v9434_v49  ;;  %v9515_v48 = vld [vmem:[%s11140_s19 + $0x340] ss:$8 sps:$4 sm:$0xff]  }
 0x1b9   : > { %7768 = vmatprep.subr.bf16.mxu1 %v9439_v50  ;;  %8112 = vmatprep.subr.bf16.mxu0 %v9442_v51  ;;  %v9518_v49 = vld [vmem:[%s11140_s19 + $0xb40] ss:$8 sps:$4 sm:$0xff]   ;;  %v9523_v50 = vld [vmem:[%s11140_s19 + $0x354] ss:$8 sps:$4 sm:$0xff]  }
 0x1ba   : > { %v9526_v51 = vld [vmem:[%s11140_s19 + $0xb54] ss:$8 sps:$4 sm:$0xff]  }
 0x1bc   : > { %7769 = vmatpush1.bf16.msra.mxu1 %v9437_v52  ;;  %8113 = vmatpush1.bf16.msra.mxu0 %v9440_v53  ;;  %v9521_v52 = vld [vmem:[%s11140_s19 + $0x350] ss:$8 sps:$4 sm:$0xff]  }
 0x1bd   : > { %7770 = vmatprep.subr.bf16.mxu1 %v9445_v54  ;;  %8114 = vmatprep.subr.bf16.mxu0 %v9448_v55  ;;  %v9524_v53 = vld [vmem:[%s11140_s19 + $0xb50] ss:$8 sps:$4 sm:$0xff]   ;;  %v9529_v54 = vld [vmem:[%s11140_s19 + $0x364] ss:$8 sps:$4 sm:$0xff]  }
 0x1be   : > { %v9532_v55 = vld [vmem:[%s11140_s19 + $0xb64] ss:$8 sps:$4 sm:$0xff]  }
 0x1c0   : > { %7771 = vmatpush1.bf16.msra.mxu1 %v9443_v56  ;;  %8115 = vmatpush1.bf16.msra.mxu0 %v9446_v57  ;;  %v9527_v56 = vld [vmem:[%s11140_s19 + $0x360] ss:$8 sps:$4 sm:$0xff]  }
 0x1c1   : > { %7772 = vmatprep.subr.bf16.mxu1 %v9451_v58  ;;  %8116 = vmatprep.subr.bf16.mxu0 %v9454_v59  ;;  %v9530_v57 = vld [vmem:[%s11140_s19 + $0xb60] ss:$8 sps:$4 sm:$0xff]   ;;  %v9535_v58 = vld [vmem:[%s11140_s19 + $0x374] ss:$8 sps:$4 sm:$0xff]  }
 0x1c2   : > { %v9538_v59 = vld [vmem:[%s11140_s19 + $0xb74] ss:$8 sps:$4 sm:$0xff]  }
 0x1c4   : > { %7773 = vmatpush1.bf16.msra.mxu1 %v9449_v60  ;;  %8117 = vmatpush1.bf16.msra.mxu0 %v9452_v61  ;;  %v9533_v60 = vld [vmem:[%s11140_s19 + $0x370] ss:$8 sps:$4 sm:$0xff]  }
 0x1c5   : > { %7774 = vmatprep.subr.bf16.mxu1 %v9457_v62  ;;  %8118 = vmatprep.subr.bf16.mxu0 %v9460_v63  ;;  %v9536_v61 = vld [vmem:[%s11140_s19 + $0xb70] ss:$8 sps:$4 sm:$0xff]   ;;  %v9541_v62 = vld [vmem:[%s11140_s19 + $0x384] ss:$8 sps:$4 sm:$0xff]  }
 0x1c6   : > { %v9544_v63 = vld [vmem:[%s11140_s19 + $0xb84] ss:$8 sps:$4 sm:$0xff]  }
 0x1c8   : > { %7775 = vmatpush1.bf16.msra.mxu1 %v9455_v4  ;;  %8119 = vmatpush1.bf16.msra.mxu0 %v9458_v7  ;;  %v9539_v4 = vld [vmem:[%s11140_s19 + $0x380] ss:$8 sps:$4 sm:$0xff]  }
 0x1c9   : > { %7776 = vmatprep.subr.bf16.mxu1 %v9463_v8  ;;  %8120 = vmatprep.subr.bf16.mxu0 %v9466_v9  ;;  %v9542_v7 = vld [vmem:[%s11140_s19 + $0xb80] ss:$8 sps:$4 sm:$0xff]   ;;  %v9547_v8 = vld [vmem:[%s11140_s19 + $0x394] ss:$8 sps:$4 sm:$0xff]  }
 0x1ca   : > { %v9550_v9 = vld [vmem:[%s11140_s19 + $0xb94] ss:$8 sps:$4 sm:$0xff]  }
 0x1cc   : > { %7777 = vmatpush1.bf16.msra.mxu1 %v9461_v10  ;;  %8121 = vmatpush1.bf16.msra.mxu0 %v9464_v11  ;;  %v9545_v10 = vld [vmem:[%s11140_s19 + $0x390] ss:$8 sps:$4 sm:$0xff]  }
 0x1cd   : > { %7778 = vmatprep.subr.bf16.mxu1 %v9469_v12  ;;  %8122 = vmatprep.subr.bf16.mxu0 %v9472_v13  ;;  %v9548_v11 = vld [vmem:[%s11140_s19 + $0xb90] ss:$8 sps:$4 sm:$0xff]   ;;  %v9553_v12 = vld [vmem:[%s11140_s19 + $0x3a4] ss:$8 sps:$4 sm:$0xff]  }
 0x1ce   : > { %v9556_v13 = vld [vmem:[%s11140_s19 + $0xba4] ss:$8 sps:$4 sm:$0xff]  }
 0x1d0   : > { %7779 = vmatpush1.bf16.msra.mxu1 %v9467_v14  ;;  %8123 = vmatpush1.bf16.msra.mxu0 %v9470_v15  ;;  %v9551_v14 = vld [vmem:[%s11140_s19 + $0x3a0] ss:$8 sps:$4 sm:$0xff]  }
 0x1d1   : > { %7780 = vmatprep.subr.bf16.mxu1 %v9475_v16  ;;  %8124 = vmatprep.subr.bf16.mxu0 %v9478_v17  ;;  %v9554_v15 = vld [vmem:[%s11140_s19 + $0xba0] ss:$8 sps:$4 sm:$0xff]   ;;  %v9559_v16 = vld [vmem:[%s11140_s19 + $0x3b4] ss:$8 sps:$4 sm:$0xff]  }
 0x1d2   : > { %v9562_v17 = vld [vmem:[%s11140_s19 + $0xbb4] ss:$8 sps:$4 sm:$0xff]  }
 0x1d4   : > { %7781 = vmatpush1.bf16.msra.mxu1 %v9473_v18  ;;  %8125 = vmatpush1.bf16.msra.mxu0 %v9476_v19  ;;  %v9557_v18 = vld [vmem:[%s11140_s19 + $0x3b0] ss:$8 sps:$4 sm:$0xff]  }
 0x1d5   : > { %7782 = vmatprep.subr.bf16.mxu1 %v9481_v20  ;;  %8126 = vmatprep.subr.bf16.mxu0 %v9484_v21  ;;  %v9560_v19 = vld [vmem:[%s11140_s19 + $0xbb0] ss:$8 sps:$4 sm:$0xff]   ;;  %v9565_v20 = vld [vmem:[%s11140_s19 + $0x3c4] ss:$8 sps:$4 sm:$0xff]  }
 0x1d6   : > { %v9568_v21 = vld [vmem:[%s11140_s19 + $0xbc4] ss:$8 sps:$4 sm:$0xff]  }
 0x1d8   : > { %7783 = vmatpush1.bf16.msra.mxu1 %v9479_v22  ;;  %8127 = vmatpush1.bf16.msra.mxu0 %v9482_v23  ;;  %v9563_v22 = vld [vmem:[%s11140_s19 + $0x3c0] ss:$8 sps:$4 sm:$0xff]  }
 0x1d9   : > { %7784 = vmatprep.subr.bf16.mxu1 %v9487_v24  ;;  %8128 = vmatprep.subr.bf16.mxu0 %v9490_v0  ;;  %v9566_v23 = vld [vmem:[%s11140_s19 + $0xbc0] ss:$8 sps:$4 sm:$0xff]   ;;  %v9571_v24 = vld [vmem:[%s11140_s19 + $0x3d4] ss:$8 sps:$4 sm:$0xff]  }
 0x1da   : > { %v9574_v0 = vld [vmem:[%s11140_s19 + $0xbd4] ss:$8 sps:$4 sm:$0xff]  }
 0x1dc   : > { %7785 = vmatpush1.bf16.msra.mxu1 %v9485_v1  ;;  %8129 = vmatpush1.bf16.msra.mxu0 %v9488_v2  ;;  %v9569_v1 = vld [vmem:[%s11140_s19 + $0x3d0] ss:$8 sps:$4 sm:$0xff]  }
 0x1dd   : > { %7797 = vmatprep.subr.bf16.mxu1 %v9493_v6  ;;  %8141 = vmatprep.subr.bf16.mxu0 %v9496_v25  ;;  %v9572_v2 = vld [vmem:[%s11140_s19 + $0xbd0] ss:$8 sps:$4 sm:$0xff]   ;;  %v9577_v6 = vld [vmem:[%s11140_s19 + $0x3e4] ss:$8 sps:$4 sm:$0xff]  }
 0x1de   : > { %v9580_v25 = vld [vmem:[%s11140_s19 + $0xbe4] ss:$8 sps:$4 sm:$0xff]  }
 0x1df   : > { %7787 = vmatmul.mubr.bf16.vlgmr.msra.gmra.mrb[0].mxu1 %v8548_v32  ;;  %8131 = vmatmul.mubr.bf16.vlgmr.msra.gmra.mrb[0].mxu0 %v8564_v33  ;;  %v9583_v32 = vld [vmem:[%s11140_s19 + $0x3f4] ss:$8 sps:$4 sm:$0xff]  }
 0x1e0   : > { %7798 = vmatpush1.bf16.msra.mxu1 %v9491_v26  ;;  %8142 = vmatpush1.bf16.msra.mxu0 %v9494_v29  ;;  %v9575_v26 = vld [vmem:[%s11140_s19 + $0x3e0] ss:$8 sps:$4 sm:$0xff]   ;;  %v9586_v33 = vld [vmem:[%s11140_s19 + $0xbf4] ss:$8 sps:$4 sm:$0xff]  }
 0x1e1   : > { %7799 = vmatprep.subr.bf16.mxu1 %v9499_v36  ;;  %8143 = vmatprep.subr.bf16.mxu0 %v9502_v3  ;;  %v9578_v29 = vld [vmem:[%s11140_s19 + $0xbe0] ss:$8 sps:$4 sm:$0xff]   ;;  %v9581_v36 = vld [vmem:[%s11140_s19 + $0x3f0] ss:$8 sps:$4 sm:$0xff]  }
 0x1e2   : > { %7829 = vmatprep.mubr.bf16.mxu1 %v8551_v5  ;;  %8173 = vmatprep.mubr.bf16.mxu0 %v8567_v27  ;;  %v9584_v3 = vld [vmem:[%s11140_s19 + $0xbf0] ss:$8 sps:$4 sm:$0xff]   ;;  %v9589_v5 = vld [vmem:[%s11140_s19 + $0x404] ss:$8 sps:$4 sm:$0xff]  }
 0x1e3   : > { %v9592_v27 = vld [vmem:[%s11140_s19 + $0xc04] ss:$8 sps:$4 sm:$0xff]  }
 0x1e4   : > { %7800 = vmatpush1.bf16.msra.mxu1 %v9497_v28  ;;  %8144 = vmatpush1.bf16.msra.mxu0 %v9500_v37  ;;  %v9587_v28 = vld [vmem:[%s11140_s19 + $0x400] ss:$8 sps:$4 sm:$0xff]  }
 0x1e5   : > { %7801 = vmatprep.subr.bf16.mxu1 %v9505_v38  ;;  %8145 = vmatprep.subr.bf16.mxu0 %v9508_v39  ;;  %v9590_v37 = vld [vmem:[%s11140_s19 + $0xc00] ss:$8 sps:$4 sm:$0xff]  }
 0x1e6   : > { %v11491_v38 = vld [vmem:[%s11883_s0 + $0x20] sm:$0xff] }
 0x1e7   : > { %v11496_v39 = vld [vmem:[%s11883_s0 + $0xa0] sm:$0xff] }
 0x1e8   : > { %7802 = vmatpush1.bf16.msra.mxu1 %v9503_v40  ;;  %8146 = vmatpush1.bf16.msra.mxu0 %v9506_v41  ;;  %v8550_v40 = vcombine.low %v11399_v30, %v11404_v31  ;;  %v8566_v41 = vcombine.low %v11413_v34, %v11418_v35  ;;  %v9598_v30 = vld [vmem:[%s11140_s19 + $0xc14] ss:$8 sps:$4 sm:$0xff]   ;;  %v8553_v31 = vcombine.high %v11491_v38, %v11496_v39  ;;  %v9593_v35 = vld [vmem:[%s11140_s19 + $0x410] ss:$8 sps:$4 sm:$0xff]  }
 0x1e9   : > { %7803 = vmatprep.subr.bf16.mxu1 %v9511_v42  ;;  %8147 = vmatprep.subr.bf16.mxu0 %v9514_v43  ;;  %v11505_v42 = vld [vmem:[%s11883_s0 + $0x60] sm:$0xff] }
 0x1ea   : > { %v11510_v43 = vld [vmem:[%s11883_s0 + $0xe0] sm:$0xff] }
 0x1eb   : > { %v8569_v34 = vcombine.high %v11505_v42, %v11510_v43 }
 0x1ec   : > { %7804 = vmatpush1.bf16.msra.mxu1 %v9509_v44  ;;  %8148 = vmatpush1.bf16.msra.mxu0 %v9512_v45  ;;  %v9595_v44 = vld [vmem:[%s11140_s19 + $0x414] ss:$8 sps:$4 sm:$0xff]   ;;  %v9596_v45 = vld [vmem:[%s11140_s19 + $0xc10] ss:$8 sps:$4 sm:$0xff]  }
 0x1ed   : > { %7805 = vmatprep.subr.bf16.mxu1 %v9517_v46  ;;  %8149 = vmatprep.subr.bf16.mxu0 %v9520_v47  ;;  %v9601_v46 = vld [vmem:[%s11140_s19 + $0x424] ss:$8 sps:$4 sm:$0xff]  }
 0x1ee   : > { %v9604_v47 = vld [vmem:[%s11140_s19 + $0xc24] ss:$8 sps:$4 sm:$0xff]  }
 0x1f0   : > { %7806 = vmatpush1.bf16.msra.mxu1 %v9515_v48  ;;  %8150 = vmatpush1.bf16.msra.mxu0 %v9518_v49  ;;  %v9599_v48 = vld [vmem:[%s11140_s19 + $0x420] ss:$8 sps:$4 sm:$0xff]  }
 0x1f1   : > { %7807 = vmatprep.subr.bf16.mxu1 %v9523_v50  ;;  %8151 = vmatprep.subr.bf16.mxu0 %v9526_v51  ;;  %v9602_v49 = vld [vmem:[%s11140_s19 + $0xc20] ss:$8 sps:$4 sm:$0xff]   ;;  %v9607_v50 = vld [vmem:[%s11140_s19 + $0x434] ss:$8 sps:$4 sm:$0xff]  }
 0x1f2   : > { %v9610_v51 = vld [vmem:[%s11140_s19 + $0xc34] ss:$8 sps:$4 sm:$0xff]  }
 0x1f4   : > { %7808 = vmatpush1.bf16.msra.mxu1 %v9521_v52  ;;  %8152 = vmatpush1.bf16.msra.mxu0 %v9524_v53  ;;  %v9605_v52 = vld [vmem:[%s11140_s19 + $0x430] ss:$8 sps:$4 sm:$0xff]  }
 0x1f5   : > { %7809 = vmatprep.subr.bf16.mxu1 %v9529_v54  ;;  %8153 = vmatprep.subr.bf16.mxu0 %v9532_v55  ;;  %v9608_v53 = vld [vmem:[%s11140_s19 + $0xc30] ss:$8 sps:$4 sm:$0xff]   ;;  %v9613_v54 = vld [vmem:[%s11140_s19 + $0x444] ss:$8 sps:$4 sm:$0xff]  }
 0x1f6   : > { %v9616_v55 = vld [vmem:[%s11140_s19 + $0xc44] ss:$8 sps:$4 sm:$0xff]  }
 0x1f8   : > { %7810 = vmatpush1.bf16.msra.mxu1 %v9527_v56  ;;  %8154 = vmatpush1.bf16.msra.mxu0 %v9530_v57  ;;  %v9611_v56 = vld [vmem:[%s11140_s19 + $0x440] ss:$8 sps:$4 sm:$0xff]  }
 0x1f9   : > { %7811 = vmatprep.subr.bf16.mxu1 %v9535_v58  ;;  %8155 = vmatprep.subr.bf16.mxu0 %v9538_v59  ;;  %v9614_v57 = vld [vmem:[%s11140_s19 + $0xc40] ss:$8 sps:$4 sm:$0xff]   ;;  %v9619_v58 = vld [vmem:[%s11140_s19 + $0x454] ss:$8 sps:$4 sm:$0xff]  }
 0x1fa   : > { %v9622_v59 = vld [vmem:[%s11140_s19 + $0xc54] ss:$8 sps:$4 sm:$0xff]  }
 0x1fc   : > { %7812 = vmatpush1.bf16.msra.mxu1 %v9533_v60  ;;  %8156 = vmatpush1.bf16.msra.mxu0 %v9536_v61  ;;  %v9617_v60 = vld [vmem:[%s11140_s19 + $0x450] ss:$8 sps:$4 sm:$0xff]  }
 0x1fd   : > { %7813 = vmatprep.subr.bf16.mxu1 %v9541_v62  ;;  %8157 = vmatprep.subr.bf16.mxu0 %v9544_v63  ;;  %v9620_v61 = vld [vmem:[%s11140_s19 + $0xc50] ss:$8 sps:$4 sm:$0xff]   ;;  %v9625_v62 = vld [vmem:[%s11140_s19 + $0x464] ss:$8 sps:$4 sm:$0xff]  }
 0x1fe   : > { %v9628_v63 = vld [vmem:[%s11140_s19 + $0xc64] ss:$8 sps:$4 sm:$0xff]  }
 0x200   : > { %7814 = vmatpush1.bf16.msra.mxu1 %v9539_v4  ;;  %8158 = vmatpush1.bf16.msra.mxu0 %v9542_v7  ;;  %v9623_v4 = vld [vmem:[%s11140_s19 + $0x460] ss:$8 sps:$4 sm:$0xff]  }
 0x201   : > { %7815 = vmatprep.subr.bf16.mxu1 %v9547_v8  ;;  %8159 = vmatprep.subr.bf16.mxu0 %v9550_v9  ;;  %v9626_v7 = vld [vmem:[%s11140_s19 + $0xc60] ss:$8 sps:$4 sm:$0xff]   ;;  %v9631_v8 = vld [vmem:[%s11140_s19 + $0x474] ss:$8 sps:$4 sm:$0xff]  }
 0x202   : > { %v9634_v9 = vld [vmem:[%s11140_s19 + $0xc74] ss:$8 sps:$4 sm:$0xff]  }
 0x204   : > { %7816 = vmatpush1.bf16.msra.mxu1 %v9545_v10  ;;  %8160 = vmatpush1.bf16.msra.mxu0 %v9548_v11  ;;  %v9629_v10 = vld [vmem:[%s11140_s19 + $0x470] ss:$8 sps:$4 sm:$0xff]  }
 0x205   : > { %7817 = vmatprep.subr.bf16.mxu1 %v9553_v12  ;;  %8161 = vmatprep.subr.bf16.mxu0 %v9556_v13  ;;  %v9632_v11 = vld [vmem:[%s11140_s19 + $0xc70] ss:$8 sps:$4 sm:$0xff]   ;;  %v9637_v12 = vld [vmem:[%s11140_s19 + $0x484] ss:$8 sps:$4 sm:$0xff]  }
 0x206   : > { %v9640_v13 = vld [vmem:[%s11140_s19 + $0xc84] ss:$8 sps:$4 sm:$0xff]  }
 0x208   : > { %7818 = vmatpush1.bf16.msra.mxu1 %v9551_v14  ;;  %8162 = vmatpush1.bf16.msra.mxu0 %v9554_v15  ;;  %v9635_v14 = vld [vmem:[%s11140_s19 + $0x480] ss:$8 sps:$4 sm:$0xff]  }
 0x209   : > { %7819 = vmatprep.subr.bf16.mxu1 %v9559_v16  ;;  %8163 = vmatprep.subr.bf16.mxu0 %v9562_v17  ;;  %v9638_v15 = vld [vmem:[%s11140_s19 + $0xc80] ss:$8 sps:$4 sm:$0xff]   ;;  %v9643_v16 = vld [vmem:[%s11140_s19 + $0x494] ss:$8 sps:$4 sm:$0xff]  }
 0x20a   : > { %v9646_v17 = vld [vmem:[%s11140_s19 + $0xc94] ss:$8 sps:$4 sm:$0xff]  }
 0x20c   : > { %7820 = vmatpush1.bf16.msra.mxu1 %v9557_v18  ;;  %8164 = vmatpush1.bf16.msra.mxu0 %v9560_v19  ;;  %v9641_v18 = vld [vmem:[%s11140_s19 + $0x490] ss:$8 sps:$4 sm:$0xff]  }
 0x20d   : > { %7821 = vmatprep.subr.bf16.mxu1 %v9565_v20  ;;  %8165 = vmatprep.subr.bf16.mxu0 %v9568_v21  ;;  %v9644_v19 = vld [vmem:[%s11140_s19 + $0xc90] ss:$8 sps:$4 sm:$0xff]   ;;  %v9649_v20 = vld [vmem:[%s11140_s19 + $0x4a4] ss:$8 sps:$4 sm:$0xff]  }
 0x20e   : > { %v9652_v21 = vld [vmem:[%s11140_s19 + $0xca4] ss:$8 sps:$4 sm:$0xff]  }
 0x210   : > { %7822 = vmatpush1.bf16.msra.mxu1 %v9563_v22  ;;  %8166 = vmatpush1.bf16.msra.mxu0 %v9566_v23  ;;  %v9647_v22 = vld [vmem:[%s11140_s19 + $0x4a0] ss:$8 sps:$4 sm:$0xff]  }
 0x211   : > { %7823 = vmatprep.subr.bf16.mxu1 %v9571_v24  ;;  %8167 = vmatprep.subr.bf16.mxu0 %v9574_v0  ;;  %v9650_v23 = vld [vmem:[%s11140_s19 + $0xca0] ss:$8 sps:$4 sm:$0xff]   ;;  %v9655_v24 = vld [vmem:[%s11140_s19 + $0x4b4] ss:$8 sps:$4 sm:$0xff]  }
 0x212   : > { %v9658_v0 = vld [vmem:[%s11140_s19 + $0xcb4] ss:$8 sps:$4 sm:$0xff]  }
 0x214   : > { %7824 = vmatpush1.bf16.msra.mxu1 %v9569_v1  ;;  %8168 = vmatpush1.bf16.msra.mxu0 %v9572_v2  ;;  %v9653_v1 = vld [vmem:[%s11140_s19 + $0x4b0] ss:$8 sps:$4 sm:$0xff]  }
 0x215   : > { %7825 = vmatprep.subr.bf16.mxu1 %v9577_v6  ;;  %8169 = vmatprep.subr.bf16.mxu0 %v9580_v25  ;;  %v9656_v2 = vld [vmem:[%s11140_s19 + $0xcb0] ss:$8 sps:$4 sm:$0xff]   ;;  %v9661_v6 = vld [vmem:[%s11140_s19 + $0x4c4] ss:$8 sps:$4 sm:$0xff]  }
 0x216   : > { %v9664_v25 = vld [vmem:[%s11140_s19 + $0xcc4] ss:$8 sps:$4 sm:$0xff]  }
 0x218   : > { %7826 = vmatpush1.bf16.msra.mxu1 %v9575_v26  ;;  %8170 = vmatpush1.bf16.msra.mxu0 %v9578_v29  ;;  %v9659_v26 = vld [vmem:[%s11140_s19 + $0x4c0] ss:$8 sps:$4 sm:$0xff]  }
 0x219   : > { %7827 = vmatprep.subr.bf16.mxu1 %v9583_v32  ;;  %8171 = vmatprep.subr.bf16.mxu0 %v9586_v33  ;;  %v9662_v29 = vld [vmem:[%s11140_s19 + $0xcc0] ss:$8 sps:$4 sm:$0xff]   ;;  %v9667_v32 = vld [vmem:[%s11140_s19 + $0x4d4] ss:$8 sps:$4 sm:$0xff]  }
 0x21a   : > { %v9670_v33 = vld [vmem:[%s11140_s19 + $0xcd4] ss:$8 sps:$4 sm:$0xff]  }
 0x21c   : > { %7828 = vmatpush1.bf16.msra.mxu1 %v9581_v36  ;;  %8172 = vmatpush1.bf16.msra.mxu0 %v9584_v3  ;;  %v9665_v36 = vld [vmem:[%s11140_s19 + $0x4d0] ss:$8 sps:$4 sm:$0xff]  }
 0x21d   : > { %7840 = vmatprep.subr.bf16.mxu1 %v9589_v5  ;;  %8184 = vmatprep.subr.bf16.mxu0 %v9592_v27  ;;  %v9668_v3 = vld [vmem:[%s11140_s19 + $0xcd0] ss:$8 sps:$4 sm:$0xff]   ;;  %v9673_v5 = vld [vmem:[%s11140_s19 + $0x4e4] ss:$8 sps:$4 sm:$0xff]  }
 0x21e   : > { %v9676_v27 = vld [vmem:[%s11140_s19 + $0xce4] ss:$8 sps:$4 sm:$0xff]  }
 0x21f   : > { %7830 = vmatmul.mubr.bf16.vlgmr.msra.gmra.mrb[0].mxu1 %v8550_v40  ;;  %8174 = vmatmul.mubr.bf16.vlgmr.msra.gmra.mrb[0].mxu0 %v8566_v41  ;;  %v9679_v40 = vld [vmem:[%s11140_s19 + $0x4f4] ss:$8 sps:$4 sm:$0xff]  }
 0x220   : > { %7841 = vmatpush1.bf16.msra.mxu1 %v9587_v28  ;;  %8185 = vmatpush1.bf16.msra.mxu0 %v9590_v37  ;;  %v9671_v28 = vld [vmem:[%s11140_s19 + $0x4e0] ss:$8 sps:$4 sm:$0xff]   ;;  %v9682_v41 = vld [vmem:[%s11140_s19 + $0xcf4] ss:$8 sps:$4 sm:$0xff]  }
 0x221   : > { %7842 = vmatprep.subr.bf16.mxu1 %v9595_v44  ;;  %8186 = vmatprep.subr.bf16.mxu0 %v9598_v30  ;;  %v9674_v37 = vld [vmem:[%s11140_s19 + $0xce0] ss:$8 sps:$4 sm:$0xff]   ;;  %v9677_v44 = vld [vmem:[%s11140_s19 + $0x4f0] ss:$8 sps:$4 sm:$0xff]  }
 0x222   : > { %7872 = vmatprep.mubr.bf16.mxu1 %v8553_v31  ;;  %8216 = vmatprep.mubr.bf16.mxu0 %v8569_v34  ;;  %v9680_v30 = vld [vmem:[%s11140_s19 + $0xcf0] ss:$8 sps:$4 sm:$0xff]   ;;  %v9685_v31 = vld [vmem:[%s11140_s19 + $0x504] ss:$8 sps:$4 sm:$0xff]  }
 0x223   : > { %v9688_v34 = vld [vmem:[%s11140_s19 + $0xd04] ss:$8 sps:$4 sm:$0xff]  }
 0x224   : > { %7843 = vmatpush1.bf16.msra.mxu1 %v9593_v35  ;;  %8187 = vmatpush1.bf16.msra.mxu0 %v9596_v45  ;;  %v11581_v35 = vld [vmem:[%s11883_s0 + $0x28] sm:$0xff] }
 0x225   : > { %7844 = vmatprep.subr.bf16.mxu1 %v9601_v46  ;;  %8188 = vmatprep.subr.bf16.mxu0 %v9604_v47  ;;  %v11586_v45 = vld [vmem:[%s11883_s0 + $0xa8] sm:$0xff] }
 0x226   : > { %v11591_v46 = vld [vmem:[%s11883_s0 + $0x68] sm:$0xff] }
 0x227   : > { %v11596_v47 = vld [vmem:[%s11883_s0 + $0xe8] sm:$0xff] }
 0x228   : > { %7845 = vmatpush1.bf16.msra.mxu1 %v9599_v48  ;;  %8189 = vmatpush1.bf16.msra.mxu0 %v9602_v49  ;;  %v8552_v48 = vcombine.low %v11491_v38, %v11496_v39  ;;  %v8568_v49 = vcombine.low %v11505_v42, %v11510_v43  ;;  %v8571_v38 = vcombine.high %v11591_v46, %v11596_v47  ;;  %v9689_v39 = vld [vmem:[%s11140_s19 + $0x510] ss:$8 sps:$4 sm:$0xff]   ;;  %v9697_v43 = vld [vmem:[%s11140_s19 + $0x524] ss:$8 sps:$4 sm:$0xff]  }
 0x229   : > { %7846 = vmatprep.subr.bf16.mxu1 %v9607_v50  ;;  %8190 = vmatprep.subr.bf16.mxu0 %v9610_v51  ;;  %v9683_v50 = vld [vmem:[%s11140_s19 + $0x500] ss:$8 sps:$4 sm:$0xff]   ;;  %v9692_v42 = vld [vmem:[%s11140_s19 + $0xd10] ss:$8 sps:$4 sm:$0xff]  }
 0x22a   : > { %v9686_v51 = vld [vmem:[%s11140_s19 + $0xd00] ss:$8 sps:$4 sm:$0xff]  }
 0x22c   : > { %7847 = vmatpush1.bf16.msra.mxu1 %v9605_v52  ;;  %8191 = vmatpush1.bf16.msra.mxu0 %v9608_v53  ;;  %v9691_v52 = vld [vmem:[%s11140_s19 + $0x514] ss:$8 sps:$4 sm:$0xff]  }
 0x22d   : > { %7848 = vmatprep.subr.bf16.mxu1 %v9613_v54  ;;  %8192 = vmatprep.subr.bf16.mxu0 %v9616_v55  ;;  %v9694_v53 = vld [vmem:[%s11140_s19 + $0xd14] ss:$8 sps:$4 sm:$0xff]   ;;  %v8555_v54 = vcombine.high %v11581_v35, %v11586_v45  ;;  %v9700_v55 = vld [vmem:[%s11140_s19 + $0xd24] ss:$8 sps:$4 sm:$0xff]  }
 0x230   : > { %7849 = vmatpush1.bf16.msra.mxu1 %v9611_v56  ;;  %8193 = vmatpush1.bf16.msra.mxu0 %v9614_v57  ;;  %v9695_v56 = vld [vmem:[%s11140_s19 + $0x520] ss:$8 sps:$4 sm:$0xff]  }
 0x231   : > { %7850 = vmatprep.subr.bf16.mxu1 %v9619_v58  ;;  %8194 = vmatprep.subr.bf16.mxu0 %v9622_v59  ;;  %v9698_v57 = vld [vmem:[%s11140_s19 + $0xd20] ss:$8 sps:$4 sm:$0xff]   ;;  %v9703_v58 = vld [vmem:[%s11140_s19 + $0x534] ss:$8 sps:$4 sm:$0xff]  }
 0x232   : > { %v9706_v59 = vld [vmem:[%s11140_s19 + $0xd34] ss:$8 sps:$4 sm:$0xff]  }
 0x234   : > { %7851 = vmatpush1.bf16.msra.mxu1 %v9617_v60  ;;  %8195 = vmatpush1.bf16.msra.mxu0 %v9620_v61  ;;  %v9701_v60 = vld [vmem:[%s11140_s19 + $0x530] ss:$8 sps:$4 sm:$0xff]  }
 0x235   : > { %7852 = vmatprep.subr.bf16.mxu1 %v9625_v62  ;;  %8196 = vmatprep.subr.bf16.mxu0 %v9628_v63  ;;  %v9704_v61 = vld [vmem:[%s11140_s19 + $0xd30] ss:$8 sps:$4 sm:$0xff]   ;;  %v9709_v62 = vld [vmem:[%s11140_s19 + $0x544] ss:$8 sps:$4 sm:$0xff]  }
 0x236   : > { %v9712_v63 = vld [vmem:[%s11140_s19 + $0xd44] ss:$8 sps:$4 sm:$0xff]  }
 0x238   : > { %7853 = vmatpush1.bf16.msra.mxu1 %v9623_v4  ;;  %8197 = vmatpush1.bf16.msra.mxu0 %v9626_v7  ;;  %v9707_v4 = vld [vmem:[%s11140_s19 + $0x540] ss:$8 sps:$4 sm:$0xff]  }
 0x239   : > { %7854 = vmatprep.subr.bf16.mxu1 %v9631_v8  ;;  %8198 = vmatprep.subr.bf16.mxu0 %v9634_v9  ;;  %v9710_v7 = vld [vmem:[%s11140_s19 + $0xd40] ss:$8 sps:$4 sm:$0xff]   ;;  %v9715_v8 = vld [vmem:[%s11140_s19 + $0x554] ss:$8 sps:$4 sm:$0xff]  }
 0x23a   : > { %v9718_v9 = vld [vmem:[%s11140_s19 + $0xd54] ss:$8 sps:$4 sm:$0xff]  }
 0x23c   : > { %7855 = vmatpush1.bf16.msra.mxu1 %v9629_v10  ;;  %8199 = vmatpush1.bf16.msra.mxu0 %v9632_v11  ;;  %v9713_v10 = vld [vmem:[%s11140_s19 + $0x550] ss:$8 sps:$4 sm:$0xff]  }
 0x23d   : > { %7856 = vmatprep.subr.bf16.mxu1 %v9637_v12  ;;  %8200 = vmatprep.subr.bf16.mxu0 %v9640_v13  ;;  %v9716_v11 = vld [vmem:[%s11140_s19 + $0xd50] ss:$8 sps:$4 sm:$0xff]   ;;  %v9721_v12 = vld [vmem:[%s11140_s19 + $0x564] ss:$8 sps:$4 sm:$0xff]  }
 0x23e   : > { %v9724_v13 = vld [vmem:[%s11140_s19 + $0xd64] ss:$8 sps:$4 sm:$0xff]  }
 0x240   : > { %7857 = vmatpush1.bf16.msra.mxu1 %v9635_v14  ;;  %8201 = vmatpush1.bf16.msra.mxu0 %v9638_v15  ;;  %v9719_v14 = vld [vmem:[%s11140_s19 + $0x560] ss:$8 sps:$4 sm:$0xff]  }
 0x241   : > { %7858 = vmatprep.subr.bf16.mxu1 %v9643_v16  ;;  %8202 = vmatprep.subr.bf16.mxu0 %v9646_v17  ;;  %v9722_v15 = vld [vmem:[%s11140_s19 + $0xd60] ss:$8 sps:$4 sm:$0xff]   ;;  %v9727_v16 = vld [vmem:[%s11140_s19 + $0x574] ss:$8 sps:$4 sm:$0xff]  }
 0x242   : > { %v9730_v17 = vld [vmem:[%s11140_s19 + $0xd74] ss:$8 sps:$4 sm:$0xff]  }
 0x244   : > { %7859 = vmatpush1.bf16.msra.mxu1 %v9641_v18  ;;  %8203 = vmatpush1.bf16.msra.mxu0 %v9644_v19  ;;  %v9725_v18 = vld [vmem:[%s11140_s19 + $0x570] ss:$8 sps:$4 sm:$0xff]  }
 0x245   : > { %7860 = vmatprep.subr.bf16.mxu1 %v9649_v20  ;;  %8204 = vmatprep.subr.bf16.mxu0 %v9652_v21  ;;  %v9728_v19 = vld [vmem:[%s11140_s19 + $0xd70] ss:$8 sps:$4 sm:$0xff]   ;;  %v9733_v20 = vld [vmem:[%s11140_s19 + $0x584] ss:$8 sps:$4 sm:$0xff]  }
 0x246   : > { %v9736_v21 = vld [vmem:[%s11140_s19 + $0xd84] ss:$8 sps:$4 sm:$0xff]  }
 0x248   : > { %7861 = vmatpush1.bf16.msra.mxu1 %v9647_v22  ;;  %8205 = vmatpush1.bf16.msra.mxu0 %v9650_v23  ;;  %v9731_v22 = vld [vmem:[%s11140_s19 + $0x580] ss:$8 sps:$4 sm:$0xff]  }
 0x249   : > { %7862 = vmatprep.subr.bf16.mxu1 %v9655_v24  ;;  %8206 = vmatprep.subr.bf16.mxu0 %v9658_v0  ;;  %v9734_v23 = vld [vmem:[%s11140_s19 + $0xd80] ss:$8 sps:$4 sm:$0xff]   ;;  %v9739_v24 = vld [vmem:[%s11140_s19 + $0x594] ss:$8 sps:$4 sm:$0xff]  }
 0x24a   : > { %v9742_v0 = vld [vmem:[%s11140_s19 + $0xd94] ss:$8 sps:$4 sm:$0xff]  }
 0x24c   : > { %7863 = vmatpush1.bf16.msra.mxu1 %v9653_v1  ;;  %8207 = vmatpush1.bf16.msra.mxu0 %v9656_v2  ;;  %v9737_v1 = vld [vmem:[%s11140_s19 + $0x590] ss:$8 sps:$4 sm:$0xff]  }
 0x24d   : > { %7864 = vmatprep.subr.bf16.mxu1 %v9661_v6  ;;  %8208 = vmatprep.subr.bf16.mxu0 %v9664_v25  ;;  %v9740_v2 = vld [vmem:[%s11140_s19 + $0xd90] ss:$8 sps:$4 sm:$0xff]   ;;  %v9745_v6 = vld [vmem:[%s11140_s19 + $0x5a4] ss:$8 sps:$4 sm:$0xff]  }
 0x24e   : > { %v9748_v25 = vld [vmem:[%s11140_s19 + $0xda4] ss:$8 sps:$4 sm:$0xff]  }
 0x250   : > { %7865 = vmatpush1.bf16.msra.mxu1 %v9659_v26  ;;  %8209 = vmatpush1.bf16.msra.mxu0 %v9662_v29  ;;  %v9743_v26 = vld [vmem:[%s11140_s19 + $0x5a0] ss:$8 sps:$4 sm:$0xff]  }
 0x251   : > { %7866 = vmatprep.subr.bf16.mxu1 %v9667_v32  ;;  %8210 = vmatprep.subr.bf16.mxu0 %v9670_v33  ;;  %v9746_v29 = vld [vmem:[%s11140_s19 + $0xda0] ss:$8 sps:$4 sm:$0xff]   ;;  %v9751_v32 = vld [vmem:[%s11140_s19 + $0x5b4] ss:$8 sps:$4 sm:$0xff]  }
 0x252   : > { %v9754_v33 = vld [vmem:[%s11140_s19 + $0xdb4] ss:$8 sps:$4 sm:$0xff]  }
 0x254   : > { %7867 = vmatpush1.bf16.msra.mxu1 %v9665_v36  ;;  %8211 = vmatpush1.bf16.msra.mxu0 %v9668_v3  ;;  %v9749_v36 = vld [vmem:[%s11140_s19 + $0x5b0] ss:$8 sps:$4 sm:$0xff]  }
 0x255   : > { %7868 = vmatprep.subr.bf16.mxu1 %v9673_v5  ;;  %8212 = vmatprep.subr.bf16.mxu0 %v9676_v27  ;;  %v9752_v3 = vld [vmem:[%s11140_s19 + $0xdb0] ss:$8 sps:$4 sm:$0xff]   ;;  %v9757_v5 = vld [vmem:[%s11140_s19 + $0x5c4] ss:$8 sps:$4 sm:$0xff]  }
 0x256   : > { %v9760_v27 = vld [vmem:[%s11140_s19 + $0xdc4] ss:$8 sps:$4 sm:$0xff]  }
 0x258   : > { %7869 = vmatpush1.bf16.msra.mxu1 %v9671_v28  ;;  %8213 = vmatpush1.bf16.msra.mxu0 %v9674_v37  ;;  %v9755_v28 = vld [vmem:[%s11140_s19 + $0x5c0] ss:$8 sps:$4 sm:$0xff]  }
 0x259   : > { %7870 = vmatprep.subr.bf16.mxu1 %v9679_v40  ;;  %8214 = vmatprep.subr.bf16.mxu0 %v9682_v41  ;;  %v9758_v37 = vld [vmem:[%s11140_s19 + $0xdc0] ss:$8 sps:$4 sm:$0xff]   ;;  %v9763_v40 = vld [vmem:[%s11140_s19 + $0x5d4] ss:$8 sps:$4 sm:$0xff]  }
 0x25a   : > { %v9766_v41 = vld [vmem:[%s11140_s19 + $0xdd4] ss:$8 sps:$4 sm:$0xff]  }
 0x25c   : > { %7871 = vmatpush1.bf16.msra.mxu1 %v9677_v44  ;;  %8215 = vmatpush1.bf16.msra.mxu0 %v9680_v30  ;;  %v9761_v44 = vld [vmem:[%s11140_s19 + $0x5d0] ss:$8 sps:$4 sm:$0xff]  }
 0x25d   : > { %7883 = vmatprep.subr.bf16.mxu1 %v9685_v31  ;;  %8227 = vmatprep.subr.bf16.mxu0 %v9688_v34  ;;  %v9764_v30 = vld [vmem:[%s11140_s19 + $0xdd0] ss:$8 sps:$4 sm:$0xff]   ;;  %v9769_v31 = vld [vmem:[%s11140_s19 + $0x5e4] ss:$8 sps:$4 sm:$0xff]  }
 0x25e   : > { %v9772_v34 = vld [vmem:[%s11140_s19 + $0xde4] ss:$8 sps:$4 sm:$0xff]  }
 0x25f   : > { %7873 = vmatmul.mubr.bf16.vlgmr.msra.gmra.mrb[0].mxu1 %v8552_v48  ;;  %8217 = vmatmul.mubr.bf16.vlgmr.msra.gmra.mrb[0].mxu0 %v8568_v49  ;;  %v9767_v48 = vld [vmem:[%s11140_s19 + $0x5e0] ss:$8 sps:$4 sm:$0xff]  }
 0x260   : > { %7884 = vmatpush1.bf16.msra.mxu1 %v9683_v50  ;;  %8228 = vmatpush1.bf16.msra.mxu0 %v9686_v51  ;;  %v9770_v49 = vld [vmem:[%s11140_s19 + $0xde0] ss:$8 sps:$4 sm:$0xff]   ;;  %v9775_v50 = vld [vmem:[%s11140_s19 + $0x5f4] ss:$8 sps:$4 sm:$0xff]  }
 0x261   : > { %7885 = vmatprep.subr.bf16.mxu1 %v9691_v52  ;;  %8229 = vmatprep.subr.bf16.mxu0 %v9694_v53  ;;  %v9778_v51 = vld [vmem:[%s11140_s19 + $0xdf4] ss:$8 sps:$4 sm:$0xff]   ;;  %v9773_v52 = vld [vmem:[%s11140_s19 + $0x5f0] ss:$8 sps:$4 sm:$0xff]  }
 0x262   : > { %7915 = vmatprep.mubr.bf16.mxu1 %v8555_v54  ;;  %8259 = vmatprep.mubr.bf16.mxu0 %v8571_v38  ;;  %v9776_v53 = vld [vmem:[%s11140_s19 + $0xdf0] ss:$8 sps:$4 sm:$0xff]   ;;  %v9781_v54 = vld [vmem:[%s11140_s19 + $0x604] ss:$8 sps:$4 sm:$0xff]  }
 0x263   : > { %v9784_v38 = vld [vmem:[%s11140_s19 + $0xe04] ss:$8 sps:$4 sm:$0xff]  }
 0x264   : > { %7886 = vmatpush1.bf16.msra.mxu1 %v9689_v39  ;;  %8230 = vmatpush1.bf16.msra.mxu0 %v9692_v42  ;;  %v11673_v39 = vld [vmem:[%s11883_s0 + $0x30] sm:$0xff]  ;;  %v8554_v42 = vcombine.low %v11581_v35, %v11586_v45  ;;  %v9779_v35 = vld [vmem:[%s11140_s19 + $0x600] ss:$8 sps:$4 sm:$0xff]  }
 0x265   : > { %7887 = vmatprep.subr.bf16.mxu1 %v9697_v43  ;;  %8231 = vmatprep.subr.bf16.mxu0 %v9700_v55  ;;  %v8570_v43 = vcombine.low %v11591_v46, %v11596_v47  ;;  %v11682_v55 = vld [vmem:[%s11883_s0 + $0xb0] sm:$0xff]  ;;  %v9782_v45 = vld [vmem:[%s11140_s19 + $0xe00] ss:$8 sps:$4 sm:$0xff]  }
 0x266   : > { %v9787_v46 = vld [vmem:[%s11140_s19 + $0x614] ss:$8 sps:$4 sm:$0xff]  }
 0x267   : > { %v9790_v47 = vld [vmem:[%s11140_s19 + $0xe14] ss:$8 sps:$4 sm:$0xff]  }
 0x268   : > { %7888 = vmatpush1.bf16.msra.mxu1 %v9695_v56  ;;  %8232 = vmatpush1.bf16.msra.mxu0 %v9698_v57  ;;  %v11687_v56 = vld [vmem:[%s11883_s0 + $0x70] sm:$0xff] }
 0x269   : > { %7889 = vmatprep.subr.bf16.mxu1 %v9703_v58  ;;  %8233 = vmatprep.subr.bf16.mxu0 %v9706_v59  ;;  %v11692_v57 = vld [vmem:[%s11883_s0 + $0xf0] sm:$0xff]  ;;  %v8557_v58 = vcombine.high %v11673_v39, %v11682_v55 }
 0x26a   : > { %v8573_v59 = vcombine.high %v11687_v56, %v11692_v57 }
 0x26c   : > { %7890 = vmatpush1.bf16.msra.mxu1 %v9701_v60  ;;  %8234 = vmatpush1.bf16.msra.mxu0 %v9704_v61  ;;  %v9785_v60 = vld [vmem:[%s11140_s19 + $0x610] ss:$8 sps:$4 sm:$0xff]  }
 0x26d   : > { %7891 = vmatprep.subr.bf16.mxu1 %v9709_v62  ;;  %8235 = vmatprep.subr.bf16.mxu0 %v9712_v63  ;;  %v9788_v61 = vld [vmem:[%s11140_s19 + $0xe10] ss:$8 sps:$4 sm:$0xff]   ;;  %v9793_v62 = vld [vmem:[%s11140_s19 + $0x624] ss:$8 sps:$4 sm:$0xff]  }
 0x26e   : > { %v9796_v63 = vld [vmem:[%s11140_s19 + $0xe24] ss:$8 sps:$4 sm:$0xff]  }
 0x270   : > { %7892 = vmatpush1.bf16.msra.mxu1 %v9707_v4  ;;  %8236 = vmatpush1.bf16.msra.mxu0 %v9710_v7  ;;  %v9791_v4 = vld [vmem:[%s11140_s19 + $0x620] ss:$8 sps:$4 sm:$0xff]  }
 0x271   : > { %7893 = vmatprep.subr.bf16.mxu1 %v9715_v8  ;;  %8237 = vmatprep.subr.bf16.mxu0 %v9718_v9  ;;  %v9794_v7 = vld [vmem:[%s11140_s19 + $0xe20] ss:$8 sps:$4 sm:$0xff]   ;;  %v9799_v8 = vld [vmem:[%s11140_s19 + $0x634] ss:$8 sps:$4 sm:$0xff]  }
 0x272   : > { %v9802_v9 = vld [vmem:[%s11140_s19 + $0xe34] ss:$8 sps:$4 sm:$0xff]  }
 0x274   : > { %7894 = vmatpush1.bf16.msra.mxu1 %v9713_v10  ;;  %8238 = vmatpush1.bf16.msra.mxu0 %v9716_v11  ;;  %v9797_v10 = vld [vmem:[%s11140_s19 + $0x630] ss:$8 sps:$4 sm:$0xff]  }
 0x275   : > { %7895 = vmatprep.subr.bf16.mxu1 %v9721_v12  ;;  %8239 = vmatprep.subr.bf16.mxu0 %v9724_v13  ;;  %v9800_v11 = vld [vmem:[%s11140_s19 + $0xe30] ss:$8 sps:$4 sm:$0xff]   ;;  %v9805_v12 = vld [vmem:[%s11140_s19 + $0x644] ss:$8 sps:$4 sm:$0xff]  }
 0x276   : > { %v9808_v13 = vld [vmem:[%s11140_s19 + $0xe44] ss:$8 sps:$4 sm:$0xff]  }
 0x278   : > { %7896 = vmatpush1.bf16.msra.mxu1 %v9719_v14  ;;  %8240 = vmatpush1.bf16.msra.mxu0 %v9722_v15  ;;  %v9803_v14 = vld [vmem:[%s11140_s19 + $0x640] ss:$8 sps:$4 sm:$0xff]  }
 0x279   : > { %7897 = vmatprep.subr.bf16.mxu1 %v9727_v16  ;;  %8241 = vmatprep.subr.bf16.mxu0 %v9730_v17  ;;  %v9806_v15 = vld [vmem:[%s11140_s19 + $0xe40] ss:$8 sps:$4 sm:$0xff]   ;;  %v9811_v16 = vld [vmem:[%s11140_s19 + $0x654] ss:$8 sps:$4 sm:$0xff]  }
 0x27a   : > { %v9814_v17 = vld [vmem:[%s11140_s19 + $0xe54] ss:$8 sps:$4 sm:$0xff]  }
 0x27c   : > { %7898 = vmatpush1.bf16.msra.mxu1 %v9725_v18  ;;  %8242 = vmatpush1.bf16.msra.mxu0 %v9728_v19  ;;  %v9809_v18 = vld [vmem:[%s11140_s19 + $0x650] ss:$8 sps:$4 sm:$0xff]  }
 0x27d   : > { %7899 = vmatprep.subr.bf16.mxu1 %v9733_v20  ;;  %8243 = vmatprep.subr.bf16.mxu0 %v9736_v21  ;;  %v9812_v19 = vld [vmem:[%s11140_s19 + $0xe50] ss:$8 sps:$4 sm:$0xff]   ;;  %v9817_v20 = vld [vmem:[%s11140_s19 + $0x664] ss:$8 sps:$4 sm:$0xff]  }
 0x27e   : > { %v9820_v21 = vld [vmem:[%s11140_s19 + $0xe64] ss:$8 sps:$4 sm:$0xff]  }
 0x280   : > { %7900 = vmatpush1.bf16.msra.mxu1 %v9731_v22  ;;  %8244 = vmatpush1.bf16.msra.mxu0 %v9734_v23  ;;  %v9815_v22 = vld [vmem:[%s11140_s19 + $0x660] ss:$8 sps:$4 sm:$0xff]  }
 0x281   : > { %7901 = vmatprep.subr.bf16.mxu1 %v9739_v24  ;;  %8245 = vmatprep.subr.bf16.mxu0 %v9742_v0  ;;  %v9818_v23 = vld [vmem:[%s11140_s19 + $0xe60] ss:$8 sps:$4 sm:$0xff]   ;;  %v9823_v24 = vld [vmem:[%s11140_s19 + $0x674] ss:$8 sps:$4 sm:$0xff]  }
 0x282   : > { %v9826_v0 = vld [vmem:[%s11140_s19 + $0xe74] ss:$8 sps:$4 sm:$0xff]  }
 0x284   : > { %7902 = vmatpush1.bf16.msra.mxu1 %v9737_v1  ;;  %8246 = vmatpush1.bf16.msra.mxu0 %v9740_v2  ;;  %v9821_v1 = vld [vmem:[%s11140_s19 + $0x670] ss:$8 sps:$4 sm:$0xff]  }
 0x285   : > { %7903 = vmatprep.subr.bf16.mxu1 %v9745_v6  ;;  %8247 = vmatprep.subr.bf16.mxu0 %v9748_v25  ;;  %v9824_v2 = vld [vmem:[%s11140_s19 + $0xe70] ss:$8 sps:$4 sm:$0xff]   ;;  %v9829_v6 = vld [vmem:[%s11140_s19 + $0x684] ss:$8 sps:$4 sm:$0xff]  }
 0x286   : > { %v9832_v25 = vld [vmem:[%s11140_s19 + $0xe84] ss:$8 sps:$4 sm:$0xff]  }
 0x288   : > { %7904 = vmatpush1.bf16.msra.mxu1 %v9743_v26  ;;  %8248 = vmatpush1.bf16.msra.mxu0 %v9746_v29  ;;  %v9827_v26 = vld [vmem:[%s11140_s19 + $0x680] ss:$8 sps:$4 sm:$0xff]  }
 0x289   : > { %7905 = vmatprep.subr.bf16.mxu1 %v9751_v32  ;;  %8249 = vmatprep.subr.bf16.mxu0 %v9754_v33  ;;  %v9830_v29 = vld [vmem:[%s11140_s19 + $0xe80] ss:$8 sps:$4 sm:$0xff]   ;;  %v9835_v32 = vld [vmem:[%s11140_s19 + $0x694] ss:$8 sps:$4 sm:$0xff]  }
 0x28a   : > { %v9838_v33 = vld [vmem:[%s11140_s19 + $0xe94] ss:$8 sps:$4 sm:$0xff]  }
 0x28c   : > { %7906 = vmatpush1.bf16.msra.mxu1 %v9749_v36  ;;  %8250 = vmatpush1.bf16.msra.mxu0 %v9752_v3  ;;  %v9833_v36 = vld [vmem:[%s11140_s19 + $0x690] ss:$8 sps:$4 sm:$0xff]  }
 0x28d   : > { %7907 = vmatprep.subr.bf16.mxu1 %v9757_v5  ;;  %8251 = vmatprep.subr.bf16.mxu0 %v9760_v27  ;;  %v9836_v3 = vld [vmem:[%s11140_s19 + $0xe90] ss:$8 sps:$4 sm:$0xff]   ;;  %v9841_v5 = vld [vmem:[%s11140_s19 + $0x6a4] ss:$8 sps:$4 sm:$0xff]  }
 0x28e   : > { %v9844_v27 = vld [vmem:[%s11140_s19 + $0xea4] ss:$8 sps:$4 sm:$0xff]  }
 0x290   : > { %7908 = vmatpush1.bf16.msra.mxu1 %v9755_v28  ;;  %8252 = vmatpush1.bf16.msra.mxu0 %v9758_v37  ;;  %v9839_v28 = vld [vmem:[%s11140_s19 + $0x6a0] ss:$8 sps:$4 sm:$0xff]  }
 0x291   : > { %7909 = vmatprep.subr.bf16.mxu1 %v9763_v40  ;;  %8253 = vmatprep.subr.bf16.mxu0 %v9766_v41  ;;  %v9842_v37 = vld [vmem:[%s11140_s19 + $0xea0] ss:$8 sps:$4 sm:$0xff]   ;;  %v9847_v40 = vld [vmem:[%s11140_s19 + $0x6b4] ss:$8 sps:$4 sm:$0xff]  }
 0x292   : > { %v9850_v41 = vld [vmem:[%s11140_s19 + $0xeb4] ss:$8 sps:$4 sm:$0xff]  }
 0x294   : > { %7910 = vmatpush1.bf16.msra.mxu1 %v9761_v44  ;;  %8254 = vmatpush1.bf16.msra.mxu0 %v9764_v30  ;;  %v9845_v44 = vld [vmem:[%s11140_s19 + $0x6b0] ss:$8 sps:$4 sm:$0xff]  }
 0x295   : > { %7911 = vmatprep.subr.bf16.mxu1 %v9769_v31  ;;  %8255 = vmatprep.subr.bf16.mxu0 %v9772_v34  ;;  %v9848_v30 = vld [vmem:[%s11140_s19 + $0xeb0] ss:$8 sps:$4 sm:$0xff]   ;;  %v9853_v31 = vld [vmem:[%s11140_s19 + $0x6c4] ss:$8 sps:$4 sm:$0xff]  }
 0x296   : > { %v9856_v34 = vld [vmem:[%s11140_s19 + $0xec4] ss:$8 sps:$4 sm:$0xff]  }
 0x298   : > { %7912 = vmatpush1.bf16.msra.mxu1 %v9767_v48  ;;  %8256 = vmatpush1.bf16.msra.mxu0 %v9770_v49  ;;  %v9851_v48 = vld [vmem:[%s11140_s19 + $0x6c0] ss:$8 sps:$4 sm:$0xff]  }
 0x299   : > { %7913 = vmatprep.subr.bf16.mxu1 %v9775_v50  ;;  %8257 = vmatprep.subr.bf16.mxu0 %v9778_v51  ;;  %v9854_v49 = vld [vmem:[%s11140_s19 + $0xec0] ss:$8 sps:$4 sm:$0xff]   ;;  %v9859_v50 = vld [vmem:[%s11140_s19 + $0x6d4] ss:$8 sps:$4 sm:$0xff]  }
 0x29a   : > { %v9862_v51 = vld [vmem:[%s11140_s19 + $0xed4] ss:$8 sps:$4 sm:$0xff]  }
 0x29c   : > { %7914 = vmatpush1.bf16.msra.mxu1 %v9773_v52  ;;  %8258 = vmatpush1.bf16.msra.mxu0 %v9776_v53  ;;  %v9857_v52 = vld [vmem:[%s11140_s19 + $0x6d0] ss:$8 sps:$4 sm:$0xff]  }
 0x29d   : > { %7926 = vmatprep.subr.bf16.mxu1 %v9781_v54  ;;  %8270 = vmatprep.subr.bf16.mxu0 %v9784_v38  ;;  %v9860_v53 = vld [vmem:[%s11140_s19 + $0xed0] ss:$8 sps:$4 sm:$0xff]   ;;  %v9865_v54 = vld [vmem:[%s11140_s19 + $0x6e4] ss:$8 sps:$4 sm:$0xff]  }
 0x29e   : > { %v9868_v38 = vld [vmem:[%s11140_s19 + $0xee4] ss:$8 sps:$4 sm:$0xff]  }
 0x29f   : > { %7916 = vmatmul.mubr.bf16.vlgmr.msra.gmra.mrb[0].mxu1 %v8554_v42  ;;  %8260 = vmatmul.mubr.bf16.vlgmr.msra.gmra.mrb[0].mxu0 %v8570_v43  ;;  %v9863_v42 = vld [vmem:[%s11140_s19 + $0x6e0] ss:$8 sps:$4 sm:$0xff]  }
 0x2a0   : > { %7927 = vmatpush1.bf16.msra.mxu1 %v9779_v35  ;;  %8271 = vmatpush1.bf16.msra.mxu0 %v9782_v45  ;;  %v9866_v43 = vld [vmem:[%s11140_s19 + $0xee0] ss:$8 sps:$4 sm:$0xff]   ;;  %v9871_v35 = vld [vmem:[%s11140_s19 + $0x6f4] ss:$8 sps:$4 sm:$0xff]  }
 0x2a1   : > { %7928 = vmatprep.subr.bf16.mxu1 %v9787_v46  ;;  %8272 = vmatprep.subr.bf16.mxu0 %v9790_v47  ;;  %v9874_v45 = vld [vmem:[%s11140_s19 + $0xef4] ss:$8 sps:$4 sm:$0xff]   ;;  %v9869_v46 = vld [vmem:[%s11140_s19 + $0x6f0] ss:$8 sps:$4 sm:$0xff]  }
 0x2a2   : > { %7958 = vmatprep.mubr.bf16.mxu1 %v8557_v58  ;;  %8302 = vmatprep.mubr.bf16.mxu0 %v8573_v59  ;;  %v9872_v47 = vld [vmem:[%s11140_s19 + $0xef0] ss:$8 sps:$4 sm:$0xff]   ;;  %v9877_v58 = vld [vmem:[%s11140_s19 + $0x704] ss:$8 sps:$4 sm:$0xff]  }
 0x2a3   : > { %v9880_v59 = vld [vmem:[%s11140_s19 + $0xf04] ss:$8 sps:$4 sm:$0xff]  }
 0x2a4   : > { %7929 = vmatpush1.bf16.msra.mxu1 %v9785_v60  ;;  %8273 = vmatpush1.bf16.msra.mxu0 %v9788_v61  ;;  %v11765_v60 = vld [vmem:[%s11883_s0 + $0x38] sm:$0xff]  ;;  %v8556_v61 = vcombine.low %v11673_v39, %v11682_v55  ;;  %v9875_v39 = vld [vmem:[%s11140_s19 + $0x700] ss:$8 sps:$4 sm:$0xff]  }
 0x2a5   : > { %7930 = vmatprep.subr.bf16.mxu1 %v9793_v62  ;;  %8274 = vmatprep.subr.bf16.mxu0 %v9796_v63  ;;  %v8572_v62 = vcombine.low %v11687_v56, %v11692_v57  ;;  %v11774_v63 = vld [vmem:[%s11883_s0 + $0xb8] sm:$0xff]  ;;  %v9878_v55 = vld [vmem:[%s11140_s19 + $0xf00] ss:$8 sps:$4 sm:$0xff]  }
 0x2a6   : > { %v9883_v56 = vld [vmem:[%s11140_s19 + $0x714] ss:$8 sps:$4 sm:$0xff]  }
 0x2a7   : > { %v9886_v57 = vld [vmem:[%s11140_s19 + $0xf14] ss:$8 sps:$4 sm:$0xff]  }
 0x2a8   : > { %7931 = vmatpush1.bf16.msra.mxu1 %v9791_v4  ;;  %8275 = vmatpush1.bf16.msra.mxu0 %v9794_v7  ;;  %v11779_v4 = vld [vmem:[%s11883_s0 + $0x78] sm:$0xff] }
 0x2a9   : > { %7932 = vmatprep.subr.bf16.mxu1 %v9799_v8  ;;  %8276 = vmatprep.subr.bf16.mxu0 %v9802_v9  ;;  %v11784_v7 = vld [vmem:[%s11883_s0 + $0xf8] sm:$0xff]  ;;  %v8559_v8 = vcombine.high %v11765_v60, %v11774_v63 }
 0x2aa   : > { %v8575_v9 = vcombine.high %v11779_v4, %v11784_v7 }
 0x2ac   : > { %7933 = vmatpush1.bf16.msra.mxu1 %v9797_v10  ;;  %8277 = vmatpush1.bf16.msra.mxu0 %v9800_v11  ;;  %v9881_v10 = vld [vmem:[%s11140_s19 + $0x710] ss:$8 sps:$4 sm:$0xff]  }
 0x2ad   : > { %7934 = vmatprep.subr.bf16.mxu1 %v9805_v12  ;;  %8278 = vmatprep.subr.bf16.mxu0 %v9808_v13  ;;  %v9884_v11 = vld [vmem:[%s11140_s19 + $0xf10] ss:$8 sps:$4 sm:$0xff]   ;;  %v9889_v12 = vld [vmem:[%s11140_s19 + $0x724] ss:$8 sps:$4 sm:$0xff]  }
 0x2ae   : > { %v9892_v13 = vld [vmem:[%s11140_s19 + $0xf24] ss:$8 sps:$4 sm:$0xff]  }
 0x2b0   : > { %7935 = vmatpush1.bf16.msra.mxu1 %v9803_v14  ;;  %8279 = vmatpush1.bf16.msra.mxu0 %v9806_v15  ;;  %v9887_v14 = vld [vmem:[%s11140_s19 + $0x720] ss:$8 sps:$4 sm:$0xff]  }
 0x2b1   : > { %7936 = vmatprep.subr.bf16.mxu1 %v9811_v16  ;;  %8280 = vmatprep.subr.bf16.mxu0 %v9814_v17  ;;  %v9890_v15 = vld [vmem:[%s11140_s19 + $0xf20] ss:$8 sps:$4 sm:$0xff]   ;;  %v9895_v16 = vld [vmem:[%s11140_s19 + $0x734] ss:$8 sps:$4 sm:$0xff]  }
 0x2b2   : > { %v9898_v17 = vld [vmem:[%s11140_s19 + $0xf34] ss:$8 sps:$4 sm:$0xff]  }
 0x2b4   : > { %7937 = vmatpush1.bf16.msra.mxu1 %v9809_v18  ;;  %8281 = vmatpush1.bf16.msra.mxu0 %v9812_v19  ;;  %v9893_v18 = vld [vmem:[%s11140_s19 + $0x730] ss:$8 sps:$4 sm:$0xff]  }
 0x2b5   : > { %7938 = vmatprep.subr.bf16.mxu1 %v9817_v20  ;;  %8282 = vmatprep.subr.bf16.mxu0 %v9820_v21  ;;  %v9896_v19 = vld [vmem:[%s11140_s19 + $0xf30] ss:$8 sps:$4 sm:$0xff]   ;;  %v9901_v20 = vld [vmem:[%s11140_s19 + $0x744] ss:$8 sps:$4 sm:$0xff]  }
 0x2b6   : > { %v9904_v21 = vld [vmem:[%s11140_s19 + $0xf44] ss:$8 sps:$4 sm:$0xff]  }
 0x2b8   : > { %7939 = vmatpush1.bf16.msra.mxu1 %v9815_v22  ;;  %8283 = vmatpush1.bf16.msra.mxu0 %v9818_v23  ;;  %v9899_v22 = vld [vmem:[%s11140_s19 + $0x740] ss:$8 sps:$4 sm:$0xff]  }
 0x2b9   : > { %7940 = vmatprep.subr.bf16.mxu1 %v9823_v24  ;;  %8284 = vmatprep.subr.bf16.mxu0 %v9826_v0  ;;  %v9902_v23 = vld [vmem:[%s11140_s19 + $0xf40] ss:$8 sps:$4 sm:$0xff]   ;;  %v9907_v24 = vld [vmem:[%s11140_s19 + $0x754] ss:$8 sps:$4 sm:$0xff]  }
 0x2ba   : > { %v9910_v0 = vld [vmem:[%s11140_s19 + $0xf54] ss:$8 sps:$4 sm:$0xff]  }
 0x2bc   : > { %7941 = vmatpush1.bf16.msra.mxu1 %v9821_v1  ;;  %8285 = vmatpush1.bf16.msra.mxu0 %v9824_v2  ;;  %v9905_v1 = vld [vmem:[%s11140_s19 + $0x750] ss:$8 sps:$4 sm:$0xff]  }
 0x2bd   : > { %7942 = vmatprep.subr.bf16.mxu1 %v9829_v6  ;;  %8286 = vmatprep.subr.bf16.mxu0 %v9832_v25  ;;  %v9908_v2 = vld [vmem:[%s11140_s19 + $0xf50] ss:$8 sps:$4 sm:$0xff]   ;;  %v9913_v6 = vld [vmem:[%s11140_s19 + $0x764] ss:$8 sps:$4 sm:$0xff]  }
 0x2be   : > { %v9916_v25 = vld [vmem:[%s11140_s19 + $0xf64] ss:$8 sps:$4 sm:$0xff]  }
 0x2c0   : > { %7943 = vmatpush1.bf16.msra.mxu1 %v9827_v26  ;;  %8287 = vmatpush1.bf16.msra.mxu0 %v9830_v29  ;;  %v9911_v26 = vld [vmem:[%s11140_s19 + $0x760] ss:$8 sps:$4 sm:$0xff]  }
 0x2c1   : > { %7944 = vmatprep.subr.bf16.mxu1 %v9835_v32  ;;  %8288 = vmatprep.subr.bf16.mxu0 %v9838_v33  ;;  %v9914_v29 = vld [vmem:[%s11140_s19 + $0xf60] ss:$8 sps:$4 sm:$0xff]   ;;  %v9919_v32 = vld [vmem:[%s11140_s19 + $0x774] ss:$8 sps:$4 sm:$0xff]  }
 0x2c2   : > { %v9922_v33 = vld [vmem:[%s11140_s19 + $0xf74] ss:$8 sps:$4 sm:$0xff]  }
 0x2c4   : > { %7945 = vmatpush1.bf16.msra.mxu1 %v9833_v36  ;;  %8289 = vmatpush1.bf16.msra.mxu0 %v9836_v3  ;;  %v9917_v36 = vld [vmem:[%s11140_s19 + $0x770] ss:$8 sps:$4 sm:$0xff]  }
 0x2c5   : > { %7946 = vmatprep.subr.bf16.mxu1 %v9841_v5  ;;  %8290 = vmatprep.subr.bf16.mxu0 %v9844_v27  ;;  %v9920_v3 = vld [vmem:[%s11140_s19 + $0xf70] ss:$8 sps:$4 sm:$0xff]   ;;  %v9925_v5 = vld [vmem:[%s11140_s19 + $0x784] ss:$8 sps:$4 sm:$0xff]  }
 0x2c6   : > { %v9928_v27 = vld [vmem:[%s11140_s19 + $0xf84] ss:$8 sps:$4 sm:$0xff]  }
 0x2c8   : > { %7947 = vmatpush1.bf16.msra.mxu1 %v9839_v28  ;;  %8291 = vmatpush1.bf16.msra.mxu0 %v9842_v37  ;;  %v9923_v28 = vld [vmem:[%s11140_s19 + $0x780] ss:$8 sps:$4 sm:$0xff]  }
 0x2c9   : > { %7948 = vmatprep.subr.bf16.mxu1 %v9847_v40  ;;  %8292 = vmatprep.subr.bf16.mxu0 %v9850_v41  ;;  %v9926_v37 = vld [vmem:[%s11140_s19 + $0xf80] ss:$8 sps:$4 sm:$0xff]   ;;  %v9931_v40 = vld [vmem:[%s11140_s19 + $0x794] ss:$8 sps:$4 sm:$0xff]  }
 0x2ca   : > { %v9934_v41 = vld [vmem:[%s11140_s19 + $0xf94] ss:$8 sps:$4 sm:$0xff]  }
 0x2cc   : > { %7949 = vmatpush1.bf16.msra.mxu1 %v9845_v44  ;;  %8293 = vmatpush1.bf16.msra.mxu0 %v9848_v30  ;;  %v9929_v44 = vld [vmem:[%s11140_s19 + $0x790] ss:$8 sps:$4 sm:$0xff]  }
 0x2cd   : > { %7950 = vmatprep.subr.bf16.mxu1 %v9853_v31  ;;  %8294 = vmatprep.subr.bf16.mxu0 %v9856_v34  ;;  %v9932_v30 = vld [vmem:[%s11140_s19 + $0xf90] ss:$8 sps:$4 sm:$0xff]   ;;  %v9937_v31 = vld [vmem:[%s11140_s19 + $0x7a4] ss:$8 sps:$4 sm:$0xff]  }
 0x2ce   : > { %v9940_v34 = vld [vmem:[%s11140_s19 + $0xfa4] ss:$8 sps:$4 sm:$0xff]  }
 0x2d0   : > { %7951 = vmatpush1.bf16.msra.mxu1 %v9851_v48  ;;  %8295 = vmatpush1.bf16.msra.mxu0 %v9854_v49  ;;  %v9935_v48 = vld [vmem:[%s11140_s19 + $0x7a0] ss:$8 sps:$4 sm:$0xff]  }
 0x2d1   : > { %7952 = vmatprep.subr.bf16.mxu1 %v9859_v50  ;;  %8296 = vmatprep.subr.bf16.mxu0 %v9862_v51  ;;  %v9938_v49 = vld [vmem:[%s11140_s19 + $0xfa0] ss:$8 sps:$4 sm:$0xff]   ;;  %v9943_v50 = vld [vmem:[%s11140_s19 + $0x7b4] ss:$8 sps:$4 sm:$0xff]  }
 0x2d2   : > { %v9946_v51 = vld [vmem:[%s11140_s19 + $0xfb4] ss:$8 sps:$4 sm:$0xff]  }
 0x2d4   : > { %7953 = vmatpush1.bf16.msra.mxu1 %v9857_v52  ;;  %8297 = vmatpush1.bf16.msra.mxu0 %v9860_v53  ;;  %v9941_v52 = vld [vmem:[%s11140_s19 + $0x7b0] ss:$8 sps:$4 sm:$0xff]  }
 0x2d5   : > { %7954 = vmatprep.subr.bf16.mxu1 %v9865_v54  ;;  %8298 = vmatprep.subr.bf16.mxu0 %v9868_v38  ;;  %v9944_v53 = vld [vmem:[%s11140_s19 + $0xfb0] ss:$8 sps:$4 sm:$0xff]   ;;  %v9949_v54 = vld [vmem:[%s11140_s19 + $0x7c4] ss:$8 sps:$4 sm:$0xff]  }
 0x2d6   : > { %v9952_v38 = vld [vmem:[%s11140_s19 + $0xfc4] ss:$8 sps:$4 sm:$0xff]  }
 0x2d8   : > { %7955 = vmatpush1.bf16.msra.mxu1 %v9863_v42  ;;  %8299 = vmatpush1.bf16.msra.mxu0 %v9866_v43  ;;  %v9947_v42 = vld [vmem:[%s11140_s19 + $0x7c0] ss:$8 sps:$4 sm:$0xff]  }
 0x2d9   : > { %7956 = vmatprep.subr.bf16.mxu1 %v9871_v35  ;;  %8300 = vmatprep.subr.bf16.mxu0 %v9874_v45  ;;  %v9950_v43 = vld [vmem:[%s11140_s19 + $0xfc0] ss:$8 sps:$4 sm:$0xff]   ;;  %v9955_v35 = vld [vmem:[%s11140_s19 + $0x7d4] ss:$8 sps:$4 sm:$0xff]  }
 0x2da   : > { %v9958_v45 = vld [vmem:[%s11140_s19 + $0xfd4] ss:$8 sps:$4 sm:$0xff]  }
 0x2dc   : > { %7957 = vmatpush1.bf16.msra.mxu1 %v9869_v46  ;;  %8301 = vmatpush1.bf16.msra.mxu0 %v9872_v47  ;;  %v9953_v46 = vld [vmem:[%s11140_s19 + $0x7d0] ss:$8 sps:$4 sm:$0xff]  }
 0x2dd   : > { %7969 = vmatprep.subr.bf16.mxu1 %v9877_v58  ;;  %8313 = vmatprep.subr.bf16.mxu0 %v9880_v59  ;;  %v9956_v47 = vld [vmem:[%s11140_s19 + $0xfd0] ss:$8 sps:$4 sm:$0xff]   ;;  %v9961_v58 = vld [vmem:[%s11140_s19 + $0x7e4] ss:$8 sps:$4 sm:$0xff]  }
 0x2de   : > { %v9964_v59 = vld [vmem:[%s11140_s19 + $0xfe4] ss:$8 sps:$4 sm:$0xff]  }
 0x2df   : > { %7959 = vmatmul.mubr.bf16.vlgmr.msra.gmra.mrb[0].mxu1 %v8556_v61  ;;  %8303 = vmatmul.mubr.bf16.vlgmr.msra.gmra.mrb[0].mxu0 %v8572_v62  ;;  %v9959_v61 = vld [vmem:[%s11140_s19 + $0x7e0] ss:$8 sps:$4 sm:$0xff]  }
 0x2e0   : > { %7970 = vmatpush1.bf16.msra.mxu1 %v9875_v39  ;;  %8314 = vmatpush1.bf16.msra.mxu0 %v9878_v55  ;;  %v9962_v62 = vld [vmem:[%s11140_s19 + $0xfe0] ss:$8 sps:$4 sm:$0xff]   ;;  %v9967_v39 = vld [vmem:[%s11140_s19 + $0x7f4] ss:$8 sps:$4 sm:$0xff]  }
 0x2e1   : > { %7971 = vmatprep.subr.bf16.mxu1 %v9883_v56  ;;  %8315 = vmatprep.subr.bf16.mxu0 %v9886_v57  ;;  %v9970_v55 = vld [vmem:[%s11140_s19 + $0xff4] ss:$8 sps:$4 sm:$0xff]   ;;  %v9965_v56 = vld [vmem:[%s11140_s19 + $0x7f0] ss:$8 sps:$4 sm:$0xff]  }
 0x2e2   : > { %8001 = vmatprep.mubr.bf16.mxu1 %v8559_v8  ;;  %8345 = vmatprep.mubr.bf16.mxu0 %v8575_v9  ;;  %v9968_v57 = vld [vmem:[%s11140_s19 + $0xff0] ss:$8 sps:$4 sm:$0xff]   ;;  %v8558_v8 = vcombine.low %v11765_v60, %v11774_v63  ;;  %v8574_v9 = vcombine.low %v11779_v4, %v11784_v7  ;;  %s4388_s19 = scalar_lea.vmem %s11885_s2, %s11895_s27 }
 0x2e4   : > { %7972 = vmatpush1.bf16.msra.mxu1 %v9881_v10  ;;  %8316 = vmatpush1.bf16.msra.mxu0 %v9884_v11  ;;  %v4938_v10 = vlaneseq }
 0x2e5   : > { %7973 = vmatprep.subr.bf16.mxu1 %v9889_v12  ;;  %8317 = vmatprep.subr.bf16.mxu0 %v9892_v13  ;;  %v4936_v13 = vld [vmem:[%s4388_s19] sm:$0x3] }
 0x2e6   : > { %v4939_v11 = vshrl.u32 %v4938_v10, 7 }
 0x2e8   : > { %7974 = vmatpush1.bf16.msra.mxu1 %v9887_v14  ;;  %8318 = vmatpush1.bf16.msra.mxu0 %v9890_v15  ;;  %v4940_v12 = vsub.s32 0, %v4939_v11  ;;  %v4944_v14 = vsub.s32 1, %v4939_v11 }
 0x2e9   : > { %7975 = vmatprep.subr.bf16.mxu1 %v9895_v16  ;;  %8319 = vmatprep.subr.bf16.mxu0 %v9898_v17 }
 0x2ea   : > { %v4941_v60 = vrot.slane %v4936_v13, %v4940_v12  ;;  %v4945_v63 = vrot.slane %v4936_v13, %v4944_v14 }
 0x2ec   : > { %7976 = vmatpush1.bf16.msra.mxu1 %v9893_v18  ;;  %8320 = vmatpush1.bf16.msra.mxu0 %v9896_v19 }
 0x2ed   : > { %7977 = vmatprep.subr.bf16.mxu1 %v9901_v20  ;;  %8321 = vmatprep.subr.bf16.mxu0 %v9904_v21 }
 0x2f0   : > { %7978 = vmatpush1.bf16.msra.mxu1 %v9899_v22  ;;  %8322 = vmatpush1.bf16.msra.mxu0 %v9902_v23 }
 0x2f1   : > { %7979 = vmatprep.subr.bf16.mxu1 %v9907_v24  ;;  %8323 = vmatprep.subr.bf16.mxu0 %v9910_v0 }
 0x2f4   : > { %7980 = vmatpush1.bf16.msra.mxu1 %v9905_v1  ;;  %8324 = vmatpush1.bf16.msra.mxu0 %v9908_v2 }
 0x2f5   : > { %7981 = vmatprep.subr.bf16.mxu1 %v9913_v6  ;;  %8325 = vmatprep.subr.bf16.mxu0 %v9916_v25 }
 0x2f8   : > { %7982 = vmatpush1.bf16.msra.mxu1 %v9911_v26  ;;  %8326 = vmatpush1.bf16.msra.mxu0 %v9914_v29 }
 0x2f9   : > { %7983 = vmatprep.subr.bf16.mxu1 %v9919_v32  ;;  %8327 = vmatprep.subr.bf16.mxu0 %v9922_v33 }
 0x2fc   : > { %7984 = vmatpush1.bf16.msra.mxu1 %v9917_v36  ;;  %8328 = vmatpush1.bf16.msra.mxu0 %v9920_v3 }
 0x2fd   : > { %7985 = vmatprep.subr.bf16.mxu1 %v9925_v5  ;;  %8329 = vmatprep.subr.bf16.mxu0 %v9928_v27 }
 0x300   : > { %7986 = vmatpush1.bf16.msra.mxu1 %v9923_v28  ;;  %8330 = vmatpush1.bf16.msra.mxu0 %v9926_v37 }
 0x301   : > { %7987 = vmatprep.subr.bf16.mxu1 %v9931_v40  ;;  %8331 = vmatprep.subr.bf16.mxu0 %v9934_v41 }
 0x304   : > { %7988 = vmatpush1.bf16.msra.mxu1 %v9929_v44  ;;  %8332 = vmatpush1.bf16.msra.mxu0 %v9932_v30 }
 0x305   : > { %7989 = vmatprep.subr.bf16.mxu1 %v9937_v31  ;;  %8333 = vmatprep.subr.bf16.mxu0 %v9940_v34 }
 0x308   : > { %7990 = vmatpush1.bf16.msra.mxu1 %v9935_v48  ;;  %8334 = vmatpush1.bf16.msra.mxu0 %v9938_v49 }
 0x309   : > { %7991 = vmatprep.subr.bf16.mxu1 %v9943_v50  ;;  %8335 = vmatprep.subr.bf16.mxu0 %v9946_v51 }
 0x30c   : > { %7992 = vmatpush1.bf16.msra.mxu1 %v9941_v52  ;;  %8336 = vmatpush1.bf16.msra.mxu0 %v9944_v53 }
 0x30d   : > { %7993 = vmatprep.subr.bf16.mxu1 %v9949_v54  ;;  %8337 = vmatprep.subr.bf16.mxu0 %v9952_v38 }
 0x310   : > { %7994 = vmatpush1.bf16.msra.mxu1 %v9947_v42  ;;  %8338 = vmatpush1.bf16.msra.mxu0 %v9950_v43 }
 0x311   : > { %7995 = vmatprep.subr.bf16.mxu1 %v9955_v35  ;;  %8339 = vmatprep.subr.bf16.mxu0 %v9958_v45 }
 0x314   : > { %7996 = vmatpush1.bf16.msra.mxu1 %v9953_v46  ;;  %8340 = vmatpush1.bf16.msra.mxu0 %v9956_v47 }
 0x315   : > { %7997 = vmatprep.subr.bf16.mxu1 %v9961_v58  ;;  %8341 = vmatprep.subr.bf16.mxu0 %v9964_v59 }
 0x318   : > { %7998 = vmatpush1.bf16.msra.mxu1 %v9959_v61  ;;  %8342 = vmatpush1.bf16.msra.mxu0 %v9962_v62 }
 0x319   : > { %7999 = vmatprep.subr.bf16.mxu1 %v9967_v39  ;;  %8343 = vmatprep.subr.bf16.mxu0 %v9970_v55 }
 0x31c   : > { %8000 = vmatpush1.bf16.msra.mxu1 %v9965_v56  ;;  %8344 = vmatpush1.bf16.msra.mxu0 %v9968_v57 }
 0x31f   : > { %8002 = vmatmul.mubr.bf16.vlgmr.msra.gmra.mrb[0].mxu1 %v8558_v8  ;;  %8346 = vmatmul.mubr.bf16.vlgmr.msra.gmra.mrb[0].mxu0 %v8574_v9 }
 0x3f2   : > { %v8003_v15 = vpop.f32.mrb[0].mxu1  ;;  %v8347_v4 = vpop.f32.mrb[0].mxu0 }
 0x3f3   : > { %v9099_v7 = vadd.f32 %v8003_v15, %v4941_v60  ;;  %v8005_v16 = vpop.f32.mrb[1].mxu1  ;;  %v8349_v17 = vpop.f32.mrb[1].mxu0 }
 0x3f4   : > { %v9101_v18 = vadd.f32 %v8005_v16, %v4945_v63  ;;  %v8007_v19 = vpop.f32.mrb[2].mxu1  ;;  %v8351_v20 = vpop.f32.mrb[2].mxu0 }
 0x3f5   : > { %v9100_v21 = vadd.f32 %v9099_v7, %v8347_v4  ;;  %v9103_v22 = vadd.f32 %v8007_v19, %v4941_v60  ;;  %v8009_v23 = vpop.f32.mrb[3].mxu1  ;;  %v8353_v24 = vpop.f32.mrb[3].mxu0 }
 0x3f6   : > { %v9102_v0 = vadd.f32 %v9101_v18, %v8349_v17  ;;  %v9105_v1 = vadd.f32 %v8009_v23, %v4945_v63 }
 0x3f7   : > { %vm8356_vm0 = vcmp.gt.f32.partialorder %v9100_v21, 0.0  ;;  %v8360_v2 = vmul.f32 0.2, %v9100_v21  ;;  %v9104_v6 = vadd.f32 %v9103_v22, %v8351_v20 }
 0x3f8   : > { %vm8357_vm1 = vcmp.gt.f32.partialorder %v9102_v0, 0.0  ;;  %v8361_v25 = vmul.f32 0.2, %v9102_v0  ;;  %v9106_v26 = vadd.f32 %v9105_v1, %v8353_v24 }
 0x3f9   : > { %v8364_v29 = vsel %vm8356_vm0, %v9100_v21, %v8360_v2  ;;  %vm8358_vm2 = vcmp.gt.f32.partialorder %v9104_v6, 0.0  ;;  %v8362_v32 = vmul.f32 0.2, %v9104_v6  ;;  %8388 = sbr.rel (!%p10066_p6) target bundleno = 1032 (0x408), region = 88 }
 0x3fa   : > { %v8365_v33 = vsel %vm8357_vm1, %v9102_v0, %v8361_v25  ;;  %vm8359_vm3 = vcmp.gt.f32.partialorder %v9106_v26, 0.0  ;;  %v8363_v36 = vmul.f32 0.2, %v9106_v26 }
 0x3fb   : > { %v9096_v3 = vpack.c.bf16 %v8365_v33, %v8364_v29  ;;  %v8366_v5 = vsel %vm8358_vm2, %v9104_v6, %v8362_v32 }
 0x3fc   : > { %v8367_v27 = vsel %vm8359_vm3, %v9106_v26, %v8363_v36 }
 0x3fd   : > { %8380 = vst [vmem:[%s4376_s5] sm:$0xff] %v9096_v3  ;;  %v9097_v28 = vpack.c.bf16 %v8367_v27, %v8366_v5 }
 0x3ff   : > { %8381 = vst [vmem:[%s4376_s5 + $0x8] sm:$0xff] %v9097_v28 }
 0x404   : > { %v8424_v37 = vld [vmem:[%s4376_s5] sm:$0xff] }
 0x405   : > { %8425 = vst [vmem:[%s8394_s7] sm:$0xff] %v8424_v37 }
 0x406   : > { %v8426_v40 = vld [vmem:[%s4376_s5 + $0x8] sm:$0xff] }
 0x407   : > { %8427 = vst [vmem:[%s8394_s7 + $0x10] sm:$0xff] %v8426_v40 }
 0x408 PF: > { %s13_s16 = sadd.s32 1, %s10009_s16   ;;  %s11888_s12 = smov %s9997_s13 }
 0x409   : > { %p10_p12 = scmp.ge.s32.totalorder %s13_s16, 4   ;;  %s11889_s13 = smov %s10071_s22 }
 0x40a   : > { %s11890_s14 = smov %s10005_s15  ;;  %s11891_s15 = smov %s11893_s17 }
 0x40b   :  { %12 = sbr.rel (!%p10_p12) target bundleno = 3 (0x3), region = 169 }

</bundles_post_ra>
